<compile_context>
chip_gen: v6e
topology: v6e:2x2x1
jax: 0.10.0
libtpu: 0.0.40
codegen_flags: <defaults>
</compile_context>

<pallas_src>
import numpy as np
import jax
import jax.numpy as jnp
from jax.experimental import pallas as pl
from jax.experimental.pallas import tpu as pltpu

BN_EPS = 1e-5  # PyTorch BatchNorm2d default


# ---------------------------------------------------------------------------
# Pallas kernels
# ---------------------------------------------------------------------------
def _make_strided_conv_kernel(kh, s, Ho, G, Cin, Kw, bWo, Cout, ws_list):
    """down conv: stride-s conv of the phase-split, H-reflect-padded input.
    Per W band j and H tap dy: one (Ho*G, Kw*Cin) @ (Kw*Cin, bWo*Cout) MXU matmul.
    Also emits per-step BN partial sum / sum-of-squares of the raw conv output."""
    bc = bWo * Cout

    def kernel(x_ref, w_ref, y_ref, st_ref):
        x = x_ref[...]                                      # (s, L, G, W*Cin) bf16
        for j, ws in enumerate(ws_list):                    # static W bands
            xb = x[:, :, :, ws * Cin:(ws + Kw) * Cin]
            acc = jnp.zeros((Ho * G, bc), jnp.float32)
            for dy in range(kh):                            # static H taps
                r, st = dy % s, dy // s
                rows = xb[r, st:st + Ho]                    # leading-axis slice
                acc = acc + jnp.dot(rows.reshape(Ho * G, Kw * Cin), w_ref[dy, j],
                                    preferred_element_type=jnp.float32)
            c0 = j * bc
            y_ref[:, :, c0:c0 + bc] = acc.reshape(Ho, G, bc).astype(y_ref.dtype)
            st_ref[0, 0:1, c0:c0 + bc] = jnp.sum(acc, axis=0, keepdims=True)
            st_ref[0, 1:2, c0:c0 + bc] = jnp.sum(acc * acc, axis=0, keepdims=True)

    return kernel


def _reflect_rows(xb, dy, p, Hin, Ho):
    """Rows ho + dy - p (reflected at the H borders) for a stride-1 tap, built from
    leading-axis slices of the VMEM-resident block (no HBM pre-padding pass)."""
    lo = dy - p
    parts = []
    for r in range(lo, 0):                      # top reflect rows: row r < 0 -> row -r
        parts.append(xb[-r:(-r) + 1])
    a, b = max(lo, 0), min(lo + Ho, Hin)
    if b > a:
        parts.append(xb[a:b])
    for r in range(max(lo, Hin), lo + Ho):      # bottom reflect rows: r >= Hin -> 2*Hin-2-r
        rr = 2 * Hin - 2 - r
        parts.append(xb[rr:rr + 1])
    return parts[0] if len(parts) == 1 else jnp.concatenate(parts, axis=0)


def _make_conv_s1_kernel(kh, p, Hin, Ho, G, Cin, Kw, bWo, Cout, ws_list):
    """conv1/conv2: the *previous* layer's BN scale/shift + ReLU applied to the raw input
    on the fly, H reflect-padding handled in-kernel, W-banded folded weights, plus
    per-step BN partial statistics of the raw conv output."""
    bc = bWo * Cout

    def kernel(x_ref, w_ref, n_ref, y_ref, st_ref):
        xv = jnp.maximum(
            x_ref[...].astype(jnp.float32) * n_ref[0][None, None, :]
            + n_ref[1][None, None, :], 0.0).astype(jnp.bfloat16)   # (Hin, G, W*Cin)
        for j, ws in enumerate(ws_list):
            xb = xv[:, :, ws * Cin:(ws + Kw) * Cin]
            acc = jnp.zeros((Ho * G, bc), jnp.float32)
            for dy in range(kh):
                rows = _reflect_rows(xb, dy, p, Hin, Ho)            # (Ho, G, Kw*Cin)
                acc = acc + jnp.dot(rows.reshape(Ho * G, Kw * Cin), w_ref[dy, j],
                                    preferred_element_type=jnp.float32)
            c0 = j * bc
            y_ref[:, :, c0:c0 + bc] = acc.reshape(Ho, G, bc).astype(y_ref.dtype)
            st_ref[0, 0:1, c0:c0 + bc] = jnp.sum(acc, axis=0, keepdims=True)
            st_ref[0, 1:2, c0:c0 + bc] = jnp.sum(acc * acc, axis=0, keepdims=True)

    return kernel


def _bn_relu_residual_kernel(y1_ref, y2_ref, p1_ref, p2_ref, o_ref):
    """out = ReLU(BN1(y1_raw)) + ReLU(BN2(y2_raw)); f32 epilogue, bf16 store."""
    a1 = jnp.maximum(y1_ref[...].astype(jnp.float32) * p1_ref[0][None, None, :]
                     + p1_ref[1][None, None, :], 0.0)
    a2 = jnp.maximum(y2_ref[...].astype(jnp.float32) * p2_ref[0][None, None, :]
                     + p2_ref[1][None, None, :], 0.0)
    o_ref[...] = (a1 + a2).astype(o_ref.dtype)


# ---------------------------------------------------------------------------
# Glue helpers (weight-sized or layout-only work)
# ---------------------------------------------------------------------------
def _reflect_idx(j, n):
    if j < 0:
        return -j
    if j >= n:
        return 2 * n - 2 - j
    return j


def _pick_bwo(Wo, W, k, s):
    """Largest band width (<= 8 output cols, dividing Wo) whose input window fits in W."""
    for b in range(min(Wo, 8), 0, -1):
        if Wo % b == 0 and k + s * (b - 1) <= W:
            return b
    return Wo                                   # fall back to a single whole-width band


def _band_windows(W, Wo, k, s, p, bWo):
    Kw = min(W, k + s * (bWo - 1))
    ws = [int(np.clip(s * j * bWo - p, 0, W - Kw)) for j in range(Wo // bWo)]
    return ws, Kw


def _fold_band_weight(w, W, s, p, ws, Kw, wo0, bWo):
    """PyTorch conv weight (Cout,Cin,kh,kw) -> one W-band matrix (kh, Kw*Cin, bWo*Cout).
    The kw taps, the W stride and the reflect W-padding are folded into the matrix; the
    band only covers the Kw input columns its bWo output columns actually touch."""
    Cout, Cin, kh, kw = w.shape
    M = np.zeros((Kw, kw, bWo), np.float32)
    for v in range(bWo):
        for dx in range(kw):
            u = _reflect_idx(s * (wo0 + v) + dx - p, W) - ws
            assert 0 <= u < Kw, "band window does not cover a reflected tap"
            M[u, dx, v] += 1.0
    B = jnp.einsum("uxv,oiyx->yuivo", jnp.asarray(M), w)     # (kh, Kw, Cin, bWo, Cout)
    return B.reshape(kh, Kw * Cin, bWo * Cout)


def _fold_conv_weight(w, W, s, p, bWo, ws_list, Kw):
    bands = [_fold_band_weight(w, W, s, p, ws, Kw, j * bWo, bWo)
             for j, ws in enumerate(ws_list)]
    return jnp.stack(bands, axis=1).astype(jnp.bfloat16)     # (kh, nb, Kw*Cin, bWo*Cout)


def _reflect_pad_rows(x, p):
    """Reflect-pad along the leading H axis (W reflect padding lives in the weights)."""
    if p == 0:
        return x
    return jnp.concatenate([x[p:0:-1], x, x[-2:-(p + 2):-1]], axis=0)


def _bn_affine(stats, gamma, beta, count):
    """Training-mode BatchNorm (batch statistics, biased variance) -> scale/shift."""
    mean = stats[0] / count
    var = jnp.maximum(stats[1] / count - mean * mean, 0.0)
    scale = gamma * jax.lax.rsqrt(var + BN_EPS)
    return scale, beta - mean * scale


def _pick_batch_block(N, Ho):
    """Batch rows per grid step.  Default: whole batch in one step (keeps the matmul
    M = N*Ho full on single-TC v5e/v6e).  Two 'parallel' steps (v7x megacore) only when
    halving the batch keeps M >= 256 and the block stays sublane-tile aligned.
    TODO(synk): on v7x prefer splitting the W-band (output-column) axis across the two
    TensorCores instead of the batch."""
    if N % 2 == 0 and (N // 2) % 16 == 0 and (N // 2) * Ho >= 256:
        return N // 2, 2
    return N, 1


def _const_spec(shape, index_map, steps):
    """BlockSpec for a grid-constant operand: single-buffered when the grid pipelines."""
    if steps > 1:
        try:
            return pl.BlockSpec(shape, index_map, pipeline_mode=pl.Buffered(1))
        except (TypeError, AttributeError):
            pass
    return pl.BlockSpec(shape, index_map)


def _mosaic_params(block_bytes, semantics):
    """Scoped-VMEM limit sized from the per-step buffer set (x2 double buffering plus
    temporaries), capped so realistic shapes still fit v7x's 64 MiB physical VMEM while
    v5e/v6e (128 MiB) can take larger blocks."""
    limit = int(min(max(3 * block_bytes + (8 << 20), 32 << 20), 100 << 20))
    return pltpu.CompilerParams(dimension_semantics=semantics, vmem_limit_bytes=limit)


# ---------------------------------------------------------------------------
# Layer wrappers
# ---------------------------------------------------------------------------
def strided_conv_pallas(x_hm, w, k, s, p):
    """down layer conv: Conv2d(k, s, p, reflect) on H-major lane-dense input
    (H, N, W*Cin).  Returns raw conv output (Ho, N, Wo*Cout) bf16 + BN partial stats."""
    H, N, WC = x_hm.shape
    Cout, Cin, kh, kw = w.shape
    W = WC // Cin
    assert p < H and p < W, "reflect padding must be smaller than the spatial size"
    Ho = (H + 2 * p - k) // s + 1
    Wo = (W + 2 * p - k) // s + 1

    bWo = _pick_bwo(Wo, W, k, s)
    ws_list, Kw = _band_windows(W, Wo, k, s, p, bWo)
    B = _fold_conv_weight(w, W, s, p, bWo, ws_list, Kw)
    nb = len(ws_list)

    # H reflect-pad + stride-phase split, fused with the (already required) input layout
    # transform; the kernel then only needs contiguous leading-axis row slices.
    xp = _reflect_pad_rows(x_hm.astype(jnp.bfloat16), p)
    L = Ho + (k - 1) // s
    phases = []
    for r in range(s):
        ph = xp[r::s]
        if ph.shape[0] < L:
            raise ValueError("stride phase shorter than the required tap window")
        phases.append(ph[:L])
    xph = jnp.stack(phases, axis=0)                           # (s, L, N, W*Cin)

    G, steps = _pick_batch_block(N, Ho)
    buf = (s * L * G * WC + B.size + Ho * G * Wo * Cout) * 2 + 2 * Wo * Cout * 4

    y, stats = pl.pallas_call(
        _make_strided_conv_kernel(kh, s, Ho, G, Cin, Kw, bWo, Cout, tuple(ws_list)),
        out_shape=(jax.ShapeDtypeStruct((Ho, N, Wo * Cout), jnp.bfloat16),
                   jax.ShapeDtypeStruct((steps, 2, Wo * Cout), jnp.float32)),
        grid=(steps,),
        in_specs=[pl.BlockSpec((s, L, G, WC), lambda g: (0, 0, g, 0)),
                  _const_spec((kh, nb, Kw * Cin, bWo * Cout),
                              lambda g: (0, 0, 0, 0), steps)],
        out_specs=(pl.BlockSpec((Ho, G, Wo * Cout), lambda g: (0, g, 0)),
                   pl.BlockSpec((1, 2, Wo * Cout), lambda g: (g, 0, 0))),
        compiler_params=_mosaic_params(buf, ("parallel",)),
    )(xph, B)

    stats = stats.sum(axis=0).reshape(2, Wo, Cout).sum(axis=1)   # (2, Cout): [sum; sum_sq]
    return y, stats, (Ho, Wo, Cout)


def conv_s1_pallas(y_prev, in_norm, w, p=1):
    """conv1/conv2: [BN+ReLU of the previous raw conv output, fused in-kernel] ->
    Conv2d(3, 1, p, reflect).  y_prev: (Hin, N, Win*Cin) raw conv output, bf16."""
    Hin, N, WC = y_prev.shape
    Cout, Cin, kh, kw = w.shape
    Win = WC // Cin
    assert p < Hin and p < Win
    Ho = Hin + 2 * p - kh + 1
    Wo = Win + 2 * p - kw + 1

    bWo = _pick_bwo(Wo, Win, kw, 1)
    ws_list, Kw = _band_windows(Win, Wo, kw, 1, p, bWo)
    B = _fold_conv_weight(w, Win, 1, p, bWo, ws_list, Kw)
    nb = len(ws_list)

    # previous layer's BN scale/shift, tiled to the lane-dense (w, ci) layout
    nrm = jnp.stack([jnp.tile(in_norm[0], Win), jnp.tile(in_norm[1], Win)],
                    axis=0).astype(jnp.float32)                # (2, Win*Cin)

    G, steps = _pick_batch_block(N, Ho)
    buf = (Hin * G * WC + B.size + Ho * G * Wo * Cout) * 2 + (2 * WC + 2 * Wo * Cout) * 4

    y, stats = pl.pallas_call(
        _make_conv_s1_kernel(kh, p, Hin, Ho, G, Cin, Kw, bWo, Cout, tuple(ws_list)),
        out_shape=(jax.ShapeDtypeStruct((Ho, N, Wo * Cout), jnp.bfloat16),
                   jax.ShapeDtypeStruct((steps, 2, Wo * Cout), jnp.float32)),
        grid=(steps,),
        in_specs=[pl.BlockSpec((Hin, G, WC), lambda g: (0, g, 0)),
                  _const_spec((kh, nb, Kw * Cin, bWo * Cout),
                              lambda g: (0, 0, 0, 0), steps),
                  _const_spec((2, WC), lambda g: (0, 0), steps)],
        out_specs=(pl.BlockSpec((Ho, G, Wo * Cout), lambda g: (0, g, 0)),
                   pl.BlockSpec((1, 2, Wo * Cout), lambda g: (g, 0, 0))),
        compiler_params=_mosaic_params(buf, ("parallel",)),
    )(y_prev, B, nrm)

    stats = stats.sum(axis=0).reshape(2, Wo, Cout).sum(axis=1)
    return y, stats, (Ho, Wo, Cout)


def bn_relu_residual(y1, y2, sc1, sh1, sc2, sh2):
    """out = ReLU(BN1(y1_raw)) + ReLU(BN2(y2_raw)) in one fused pass (bf16 output)."""
    Ho, N, WC = y1.shape
    C = sc1.shape[0]
    Wo = WC // C
    p1 = jnp.stack([jnp.tile(sc1, Wo), jnp.tile(sh1, Wo)], 0).astype(jnp.float32)
    p2 = jnp.stack([jnp.tile(sc2, Wo), jnp.tile(sh2, Wo)], 0).astype(jnp.float32)

    hb, steps = Ho, 1
    if Ho % 2 == 0 and 3 * Ho * N * WC * 2 > (24 << 20):       # split along H only if big
        hb, steps = Ho // 2, 2
    buf = 3 * hb * N * WC * 2 + 2 * 2 * WC * 4

    return pl.pallas_call(
        _bn_relu_residual_kernel,
        out_shape=jax.ShapeDtypeStruct((Ho, N, WC), jnp.bfloat16),
        grid=(steps,),
        in_specs=[pl.BlockSpec((hb, N, WC), lambda g: (g, 0, 0)),
                  pl.BlockSpec((hb, N, WC), lambda g: (g, 0, 0)),
                  _const_spec((2, WC), lambda g: (0, 0), steps),
                  _const_spec((2, WC), lambda g: (0, 0), steps)],
        out_specs=pl.BlockSpec((hb, N, WC), lambda g: (g, 0, 0)),
        compiler_params=_mosaic_params(buf, ("parallel",)),
    )(y1, y2, p1, p2)


# ---------------------------------------------------------------------------
# DownConvBlock forward (smart_forward 5-D path, pad_value=None)
# ---------------------------------------------------------------------------
def down_conv_block_forward(params, x, k, s, p):
    bs, seq, c, h, w = x.shape
    N = bs * seq
    # fold (b, t) -> batch; H-major lane-dense layout (H, N, W*C)
    # TODO(synk): pad C so W*C is a multiple of 128 for non-power-of-two channel counts.
    x_hm = jnp.transpose(x.reshape(N, c, h, w), (2, 0, 3, 1)).reshape(h, N, w * c)

    # Conv biases are omitted: training-mode BN subtracts the batch mean, which cancels a
    # per-channel bias exactly, so the block output is unchanged.

    # down: Conv(k, s, p) -> BN -> ReLU (the BN+ReLU is fused into conv1's kernel)
    y0, st0, (h0, w0, c0) = strided_conv_pallas(x_hm, params["down_w"], k, s, p)
    sc0, sh0 = _bn_affine(st0, params["down_gamma"], params["down_beta"], N * h0 * w0)

    # conv1: Conv3x3(reflect) -> BN -> ReLU
    y1, st1, (h1, w1, c1) = conv_s1_pallas(y0, (sc0, sh0), params["c1_w"])
    sc1, sh1 = _bn_affine(st1, params["c1_gamma"], params["c1_beta"], N * h1 * w1)

    # conv2: Conv3x3(reflect) -> BN -> ReLU (input = BN1+ReLU of y1, fused in-kernel)
    y2, st2, (h2, w2, c2) = conv_s1_pallas(y1, (sc1, sh1), params["c2_w"])
    sc2, sh2 = _bn_affine(st2, params["c2_gamma"], params["c2_beta"], N * h2 * w2)

    # out = conv1_out + conv2_out, fully fused epilogue (bf16)
    out = bn_relu_residual(y1, y2, sc1, sh1, sc2, sh2)            # (h1, N, w1*c1)

    out = out.reshape(h1, N, w1, c1)
    out = jnp.transpose(out, (1, 3, 0, 2)).astype(jnp.float32)    # (N, C, H, W)
    return out.reshape(bs, seq, c1, h1, w1)


# ---------------------------------------------------------------------------
# Pure-JAX f32 reference of the PyTorch forward (for a tolerance check)
# ---------------------------------------------------------------------------
def _ref_conv_bn_relu(x, w, b, gamma, beta, k, s, p):
    xp = jnp.pad(x, ((0, 0), (0, 0), (p, p), (p, p)), mode="reflect")
    y = jax.lax.conv_general_dilated(xp, w, (s, s), "VALID",
                                     dimension_numbers=("NCHW", "OIHW", "NCHW"),
                                     precision=jax.lax.Precision.HIGHEST)
    y = y + b[None, :, None, None]
    mean = y.mean(axis=(0, 2, 3), keepdims=True)
    var = y.var(axis=(0, 2, 3), keepdims=True)
    y = (y - mean) * (gamma[None, :, None, None] * jax.lax.rsqrt(var + BN_EPS)) \
        + beta[None, :, None, None]
    return jnp.maximum(y, 0.0)


def _ref_forward(params, x, k, s, p):
    bs, seq, c, h, w = x.shape
    xi = x.reshape(bs * seq, c, h, w)
    a0 = _ref_conv_bn_relu(xi, params["down_w"], params["down_b"],
                           params["down_gamma"], params["down_beta"], k, s, p)
    a1 = _ref_conv_bn_relu(a0, params["c1_w"], params["c1_b"],
                           params["c1_gamma"], params["c1_beta"], 3, 1, 1)
    a2 = _ref_conv_bn_relu(a1, params["c2_w"], params["c2_b"],
                           params["c2_gamma"], params["c2_beta"], 3, 1, 1)
    out = a1 + a2
    return out.reshape(bs, seq, *out.shape[1:])


# ---------------------------------------------------------------------------
# Deterministic synthetic parameters (shapes follow the module __init__)
# ---------------------------------------------------------------------------
def init_params(key, d_in, d_out, k):
    ks = jax.random.split(key, 6)
    f = lambda kk, shape: jax.random.normal(kk, shape, jnp.float32) * 0.1
    return {
        "down_w": f(ks[0], (d_in, d_in, k, k)),
        "down_b": f(ks[1], (d_in,)),          # used only by the reference (BN cancels it)
        "down_gamma": jnp.ones((d_in,), jnp.float32),
        "down_beta": jnp.zeros((d_in,), jnp.float32),
        "c1_w": f(ks[2], (d_out, d_in, 3, 3)),
        "c1_b": f(ks[3], (d_out,)),
        "c1_gamma": jnp.ones((d_out,), jnp.float32),
        "c1_beta": jnp.zeros((d_out,), jnp.float32),
        "c2_w": f(ks[4], (d_out, d_out, 3, 3)),
        "c2_b": f(ks[5], (d_out,)),
        "c2_gamma": jnp.ones((d_out,), jnp.float32),
        "c2_beta": jnp.zeros((d_out,), jnp.float32),
    }


if __name__ == "__main__":
    bs, seq = 2, 4
    d_in, d_out = 32, 64
    h = w = 16
    k, s, p = 4, 2, 1          # UTAE-style strided down conv (halves spatial resolution)

    key = jax.random.PRNGKey(0)
    kp, kx = jax.random.split(key)
    params = init_params(kp, d_in, d_out, k)
    x = jax.random.normal(kx, (bs, seq, d_in, h, w), jnp.float32)

    fwd = jax.jit(lambda pr, xx: down_conv_block_forward(pr, xx, k, s, p))
    out = jax.block_until_ready(fwd(params, x))

    assert out.shape == (bs, seq, d_out, h // s, w // s), out.shape
    assert bool(jnp.all(jnp.isfinite(out)))

    # bf16-tolerance check against a pure-JAX f32 reference of the PyTorch forward
    ref = jax.jit(lambda pr, xx: _ref_forward(pr, xx, k, s, p))(params, x)
    max_err = float(jnp.max(jnp.abs(out - ref)))
    mean_err = float(jnp.mean(jnp.abs(out - ref)))
    assert max_err < 0.35 and mean_err < 0.05, (max_err, mean_err)
    print("KERNEL_OK")
</pallas_src>

<mosaic_0001>
module attributes {stable_mosaic.version = 11 : i64} {
  func.func @kernel(%arg0: i32, %arg1: memref<2x9x8x512xbf16, #tpu.memory_space<vmem>>, %arg2: memref<4x2x320x128xbf16, #tpu.memory_space<vmem>>, %arg3: memref<8x8x256xbf16, #tpu.memory_space<vmem>>, %arg4: memref<1x2x256xf32, #tpu.memory_space<vmem>>) attributes {dimension_semantics = [#tpu.dimension_semantics<parallel>], iteration_bounds = array<i64: 1>, scalar_prefetch = 0 : i64, scratch_operands = 0 : i64, tpu.core_type = #tpu.core_type<tc>, window_params = [{transform_indices = @transform_0, window_bounds = array<i64: 2, 9, 8, 512>}, {pipeline_mode = #tpu.pipeline_mode<synchronous>, transform_indices = @transform_1, window_bounds = array<i64: 4, 2, 320, 128>}, {transform_indices = @transform_2, window_bounds = array<i64: 8, 8, 256>}, {transform_indices = @transform_3, window_bounds = array<i64: 1, 2, 256>}]} {
    %c0 = arith.constant 0 : index
    %c0_0 = arith.constant 0 : index
    %c0_1 = arith.constant 0 : index
    %c0_2 = arith.constant 0 : index
    %0 = vector.load %arg1[%c0, %c0_0, %c0_1, %c0_2] : memref<2x9x8x512xbf16, #tpu.memory_space<vmem>>, vector<2x9x8x512xbf16>
    %1 = vector.extract_strided_slice %0 {offsets = [0, 0, 0, 0], sizes = [2, 9, 8, 320], strides = [1, 1, 1, 1]} : vector<2x9x8x512xbf16> to vector<2x9x8x320xbf16>
    %cst = arith.constant 0.000000e+00 : f32
    %2 = vector.broadcast %cst : f32 to vector<64x128xf32>
    %3 = vector.extract_strided_slice %1 {offsets = [0, 0, 0, 0], sizes = [1, 8, 8, 320], strides = [1, 1, 1, 1]} : vector<2x9x8x320xbf16> to vector<1x8x8x320xbf16>
    %4 = vector.shape_cast %3 : vector<1x8x8x320xbf16> to vector<8x8x320xbf16>
    %5 = vector.shape_cast %4 : vector<8x8x320xbf16> to vector<64x320xbf16>
    %c0_3 = arith.constant 0 : index
    %c0_4 = arith.constant 0 : index
    %c0_5 = arith.constant 0 : index
    %c0_6 = arith.constant 0 : index
    %6 = vector.load %arg2[%c0_3, %c0_4, %c0_5, %c0_6] : memref<4x2x320x128xbf16, #tpu.memory_space<vmem>>, vector<1x1x320x128xbf16>
    %7 = vector.shape_cast %6 : vector<1x1x320x128xbf16> to vector<320x128xbf16>
    %cst_7 = arith.constant dense<0.000000e+00> : vector<64x128xf32>
    %8 = tpu.matmul %5, %7, %cst_7 {dimension_numbers = #tpu.dot_dimension_numbers<[1], [0], [0], [1], [0, 0, 1, 1], [], []>} : vector<64x320xbf16>, vector<320x128xbf16>, vector<64x128xf32> -> vector<64x128xf32>
    %9 = arith.addf %2, %8 : vector<64x128xf32>
    %10 = vector.extract_strided_slice %1 {offsets = [1, 0, 0, 0], sizes = [1, 8, 8, 320], strides = [1, 1, 1, 1]} : vector<2x9x8x320xbf16> to vector<1x8x8x320xbf16>
    %11 = vector.shape_cast %10 : vector<1x8x8x320xbf16> to vector<8x8x320xbf16>
    %12 = vector.shape_cast %11 : vector<8x8x320xbf16> to vector<64x320xbf16>
    %c1 = arith.constant 1 : index
    %c0_8 = arith.constant 0 : index
    %c0_9 = arith.constant 0 : index
    %c0_10 = arith.constant 0 : index
    %13 = vector.load %arg2[%c1, %c0_8, %c0_9, %c0_10] : memref<4x2x320x128xbf16, #tpu.memory_space<vmem>>, vector<1x1x320x128xbf16>
    %14 = vector.shape_cast %13 : vector<1x1x320x128xbf16> to vector<320x128xbf16>
    %cst_11 = arith.constant dense<0.000000e+00> : vector<64x128xf32>
    %15 = tpu.matmul %12, %14, %cst_11 {dimension_numbers = #tpu.dot_dimension_numbers<[1], [0], [0], [1], [0, 0, 1, 1], [], []>} : vector<64x320xbf16>, vector<320x128xbf16>, vector<64x128xf32> -> vector<64x128xf32>
    %16 = arith.addf %9, %15 : vector<64x128xf32>
    %17 = vector.extract_strided_slice %1 {offsets = [0, 1, 0, 0], sizes = [1, 8, 8, 320], strides = [1, 1, 1, 1]} : vector<2x9x8x320xbf16> to vector<1x8x8x320xbf16>
    %18 = vector.shape_cast %17 : vector<1x8x8x320xbf16> to vector<8x8x320xbf16>
    %19 = vector.shape_cast %18 : vector<8x8x320xbf16> to vector<64x320xbf16>
    %c2 = arith.constant 2 : index
    %c0_12 = arith.constant 0 : index
    %c0_13 = arith.constant 0 : index
    %c0_14 = arith.constant 0 : index
    %20 = vector.load %arg2[%c2, %c0_12, %c0_13, %c0_14] : memref<4x2x320x128xbf16, #tpu.memory_space<vmem>>, vector<1x1x320x128xbf16>
    %21 = vector.shape_cast %20 : vector<1x1x320x128xbf16> to vector<320x128xbf16>
    %cst_15 = arith.constant dense<0.000000e+00> : vector<64x128xf32>
    %22 = tpu.matmul %19, %21, %cst_15 {dimension_numbers = #tpu.dot_dimension_numbers<[1], [0], [0], [1], [0, 0, 1, 1], [], []>} : vector<64x320xbf16>, vector<320x128xbf16>, vector<64x128xf32> -> vector<64x128xf32>
    %23 = arith.addf %16, %22 : vector<64x128xf32>
    %24 = vector.extract_strided_slice %1 {offsets = [1, 1, 0, 0], sizes = [1, 8, 8, 320], strides = [1, 1, 1, 1]} : vector<2x9x8x320xbf16> to vector<1x8x8x320xbf16>
    %25 = vector.shape_cast %24 : vector<1x8x8x320xbf16> to vector<8x8x320xbf16>
    %26 = vector.shape_cast %25 : vector<8x8x320xbf16> to vector<64x320xbf16>
    %c3 = arith.constant 3 : index
    %c0_16 = arith.constant 0 : index
    %c0_17 = arith.constant 0 : index
    %c0_18 = arith.constant 0 : index
    %27 = vector.load %arg2[%c3, %c0_16, %c0_17, %c0_18] : memref<4x2x320x128xbf16, #tpu.memory_space<vmem>>, vector<1x1x320x128xbf16>
    %28 = vector.shape_cast %27 : vector<1x1x320x128xbf16> to vector<320x128xbf16>
    %cst_19 = arith.constant dense<0.000000e+00> : vector<64x128xf32>
    %29 = tpu.matmul %26, %28, %cst_19 {dimension_numbers = #tpu.dot_dimension_numbers<[1], [0], [0], [1], [0, 0, 1, 1], [], []>} : vector<64x320xbf16>, vector<320x128xbf16>, vector<64x128xf32> -> vector<64x128xf32>
    %30 = arith.addf %23, %29 : vector<64x128xf32>
    %31 = vector.shape_cast %30 : vector<64x128xf32> to vector<8x8x128xf32>
    %32 = arith.truncf %31 : vector<8x8x128xf32> to vector<8x8x128xbf16>
    %c0_20 = arith.constant 0 : index
    %c0_21 = arith.constant 0 : index
    %c0_22 = arith.constant 0 : index
    %33 = vector.load %arg3[%c0_20, %c0_21, %c0_22] : memref<8x8x256xbf16, #tpu.memory_space<vmem>>, vector<8x8x128xbf16>
    tpu.vector_store %arg3[%c0_20, %c0_21, %c0_22], %32 {strides = array<i32>} : memref<8x8x256xbf16, #tpu.memory_space<vmem>>, vector<8x8x128xbf16>,
    %cst_23 = arith.constant dense<0.000000e+00> : vector<128xf32>
    %34 = vector.multi_reduction <add>, %30, %cst_23 [0] : vector<64x128xf32> to vector<128xf32>
    %35 = vector.shape_cast %34 : vector<128xf32> to vector<1x128xf32>
    %c0_24 = arith.constant 0 : index
    %c0_25 = arith.constant 0 : index
    %c0_26 = arith.constant 0 : index
    %36 = vector.load %arg4[%c0_24, %c0_25, %c0_26] : memref<1x2x256xf32, #tpu.memory_space<vmem>>, vector<1x1x128xf32>
    %37 = vector.shape_cast %36 : vector<1x1x128xf32> to vector<1x128xf32>
    %38 = vector.shape_cast %35 : vector<1x128xf32> to vector<1x1x128xf32>
    tpu.vector_store %arg4[%c0_24, %c0_25, %c0_26], %38 {strides = array<i32>} : memref<1x2x256xf32, #tpu.memory_space<vmem>>, vector<1x1x128xf32>,
    %39 = arith.mulf %30, %30 : vector<64x128xf32>
    %cst_27 = arith.constant dense<0.000000e+00> : vector<128xf32>
    %40 = vector.multi_reduction <add>, %39, %cst_27 [0] : vector<64x128xf32> to vector<128xf32>
    %41 = vector.shape_cast %40 : vector<128xf32> to vector<1x128xf32>
    %c0_28 = arith.constant 0 : index
    %c1_29 = arith.constant 1 : index
    %c0_30 = arith.constant 0 : index
    %42 = vector.load %arg4[%c0_28, %c1_29, %c0_30] : memref<1x2x256xf32, #tpu.memory_space<vmem>>, vector<1x1x128xf32>
    %43 = vector.shape_cast %42 : vector<1x1x128xf32> to vector<1x128xf32>
    %44 = vector.shape_cast %41 : vector<1x128xf32> to vector<1x1x128xf32>
    tpu.vector_store %arg4[%c0_28, %c1_29, %c0_30], %44 {strides = array<i32>} : memref<1x2x256xf32, #tpu.memory_space<vmem>>, vector<1x1x128xf32>,
    %45 = vector.extract_strided_slice %0 {offsets = [0, 0, 0, 192], sizes = [2, 9, 8, 320], strides = [1, 1, 1, 1]} : vector<2x9x8x512xbf16> to vector<2x9x8x320xbf16>
    %cst_31 = arith.constant 0.000000e+00 : f32
    %46 = vector.broadcast %cst_31 : f32 to vector<64x128xf32>
    %47 = vector.extract_strided_slice %45 {offsets = [0, 0, 0, 0], sizes = [1, 8, 8, 320], strides = [1, 1, 1, 1]} : vector<2x9x8x320xbf16> to vector<1x8x8x320xbf16>
    %48 = vector.shape_cast %47 : vector<1x8x8x320xbf16> to vector<8x8x320xbf16>
    %49 = vector.shape_cast %48 : vector<8x8x320xbf16> to vector<64x320xbf16>
    %c0_32 = arith.constant 0 : index
    %c1_33 = arith.constant 1 : index
    %c0_34 = arith.constant 0 : index
    %c0_35 = arith.constant 0 : index
    %50 = vector.load %arg2[%c0_32, %c1_33, %c0_34, %c0_35] : memref<4x2x320x128xbf16, #tpu.memory_space<vmem>>, vector<1x1x320x128xbf16>
    %51 = vector.shape_cast %50 : vector<1x1x320x128xbf16> to vector<320x128xbf16>
    %cst_36 = arith.constant dense<0.000000e+00> : vector<64x128xf32>
    %52 = tpu.matmul %49, %51, %cst_36 {dimension_numbers = #tpu.dot_dimension_numbers<[1], [0], [0], [1], [0, 0, 1, 1], [], []>} : vector<64x320xbf16>, vector<320x128xbf16>, vector<64x128xf32> -> vector<64x128xf32>
    %53 = arith.addf %46, %52 : vector<64x128xf32>
    %54 = vector.extract_strided_slice %45 {offsets = [1, 0, 0, 0], sizes = [1, 8, 8, 320], strides = [1, 1, 1, 1]} : vector<2x9x8x320xbf16> to vector<1x8x8x320xbf16>
    %55 = vector.shape_cast %54 : vector<1x8x8x320xbf16> to vector<8x8x320xbf16>
    %56 = vector.shape_cast %55 : vector<8x8x320xbf16> to vector<64x320xbf16>
    %c1_37 = arith.constant 1 : index
    %c1_38 = arith.constant 1 : index
    %c0_39 = arith.constant 0 : index
    %c0_40 = arith.constant 0 : index
    %57 = vector.load %arg2[%c1_37, %c1_38, %c0_39, %c0_40] : memref<4x2x320x128xbf16, #tpu.memory_space<vmem>>, vector<1x1x320x128xbf16>
    %58 = vector.shape_cast %57 : vector<1x1x320x128xbf16> to vector<320x128xbf16>
    %cst_41 = arith.constant dense<0.000000e+00> : vector<64x128xf32>
    %59 = tpu.matmul %56, %58, %cst_41 {dimension_numbers = #tpu.dot_dimension_numbers<[1], [0], [0], [1], [0, 0, 1, 1], [], []>} : vector<64x320xbf16>, vector<320x128xbf16>, vector<64x128xf32> -> vector<64x128xf32>
    %60 = arith.addf %53, %59 : vector<64x128xf32>
    %61 = vector.extract_strided_slice %45 {offsets = [0, 1, 0, 0], sizes = [1, 8, 8, 320], strides = [1, 1, 1, 1]} : vector<2x9x8x320xbf16> to vector<1x8x8x320xbf16>
    %62 = vector.shape_cast %61 : vector<1x8x8x320xbf16> to vector<8x8x320xbf16>
    %63 = vector.shape_cast %62 : vector<8x8x320xbf16> to vector<64x320xbf16>
    %c2_42 = arith.constant 2 : index
    %c1_43 = arith.constant 1 : index
    %c0_44 = arith.constant 0 : index
    %c0_45 = arith.constant 0 : index
    %64 = vector.load %arg2[%c2_42, %c1_43, %c0_44, %c0_45] : memref<4x2x320x128xbf16, #tpu.memory_space<vmem>>, vector<1x1x320x128xbf16>
    %65 = vector.shape_cast %64 : vector<1x1x320x128xbf16> to vector<320x128xbf16>
    %cst_46 = arith.constant dense<0.000000e+00> : vector<64x128xf32>
    %66 = tpu.matmul %63, %65, %cst_46 {dimension_numbers = #tpu.dot_dimension_numbers<[1], [0], [0], [1], [0, 0, 1, 1], [], []>} : vector<64x320xbf16>, vector<320x128xbf16>, vector<64x128xf32> -> vector<64x128xf32>
    %67 = arith.addf %60, %66 : vector<64x128xf32>
    %68 = vector.extract_strided_slice %45 {offsets = [1, 1, 0, 0], sizes = [1, 8, 8, 320], strides = [1, 1, 1, 1]} : vector<2x9x8x320xbf16> to vector<1x8x8x320xbf16>
    %69 = vector.shape_cast %68 : vector<1x8x8x320xbf16> to vector<8x8x320xbf16>
    %70 = vector.shape_cast %69 : vector<8x8x320xbf16> to vector<64x320xbf16>
    %c3_47 = arith.constant 3 : index
    %c1_48 = arith.constant 1 : index
    %c0_49 = arith.constant 0 : index
    %c0_50 = arith.constant 0 : index
    %71 = vector.load %arg2[%c3_47, %c1_48, %c0_49, %c0_50] : memref<4x2x320x128xbf16, #tpu.memory_space<vmem>>, vector<1x1x320x128xbf16>
    %72 = vector.shape_cast %71 : vector<1x1x320x128xbf16> to vector<320x128xbf16>
    %cst_51 = arith.constant dense<0.000000e+00> : vector<64x128xf32>
    %73 = tpu.matmul %70, %72, %cst_51 {dimension_numbers = #tpu.dot_dimension_numbers<[1], [0], [0], [1], [0, 0, 1, 1], [], []>} : vector<64x320xbf16>, vector<320x128xbf16>, vector<64x128xf32> -> vector<64x128xf32>
    %74 = arith.addf %67, %73 : vector<64x128xf32>
    %75 = vector.shape_cast %74 : vector<64x128xf32> to vector<8x8x128xf32>
    %76 = arith.truncf %75 : vector<8x8x128xf32> to vector<8x8x128xbf16>
    %c0_52 = arith.constant 0 : index
    %c0_53 = arith.constant 0 : index
    %c128 = arith.constant 128 : index
    %77 = vector.load %arg3[%c0_52, %c0_53, %c128] : memref<8x8x256xbf16, #tpu.memory_space<vmem>>, vector<8x8x128xbf16>
    tpu.vector_store %arg3[%c0_52, %c0_53, %c128], %76 {strides = array<i32>} : memref<8x8x256xbf16, #tpu.memory_space<vmem>>, vector<8x8x128xbf16>,
    %cst_54 = arith.constant dense<0.000000e+00> : vector<128xf32>
    %78 = vector.multi_reduction <add>, %74, %cst_54 [0] : vector<64x128xf32> to vector<128xf32>
    %79 = vector.shape_cast %78 : vector<128xf32> to vector<1x128xf32>
    %c0_55 = arith.constant 0 : index
    %c0_56 = arith.constant 0 : index
    %c128_57 = arith.constant 128 : index
    %80 = vector.load %arg4[%c0_55, %c0_56, %c128_57] : memref<1x2x256xf32, #tpu.memory_space<vmem>>, vector<1x1x128xf32>
    %81 = vector.shape_cast %80 : vector<1x1x128xf32> to vector<1x128xf32>
    %82 = vector.shape_cast %79 : vector<1x128xf32> to vector<1x1x128xf32>
    tpu.vector_store %arg4[%c0_55, %c0_56, %c128_57], %82 {strides = array<i32>} : memref<1x2x256xf32, #tpu.memory_space<vmem>>, vector<1x1x128xf32>,
    %83 = arith.mulf %74, %74 : vector<64x128xf32>
    %cst_58 = arith.constant dense<0.000000e+00> : vector<128xf32>
    %84 = vector.multi_reduction <add>, %83, %cst_58 [0] : vector<64x128xf32> to vector<128xf32>
    %85 = vector.shape_cast %84 : vector<128xf32> to vector<1x128xf32>
    %c0_59 = arith.constant 0 : index
    %c1_60 = arith.constant 1 : index
    %c128_61 = arith.constant 128 : index
    %86 = vector.load %arg4[%c0_59, %c1_60, %c128_61] : memref<1x2x256xf32, #tpu.memory_space<vmem>>, vector<1x1x128xf32>
    %87 = vector.shape_cast %86 : vector<1x1x128xf32> to vector<1x128xf32>
    %88 = vector.shape_cast %85 : vector<1x128xf32> to vector<1x1x128xf32>
    tpu.vector_store %arg4[%c0_59, %c1_60, %c128_61], %88 {strides = array<i32>} : memref<1x2x256xf32, #tpu.memory_space<vmem>>, vector<1x1x128xf32>,
    return
  }
  func.func @transform_0(%arg0: i32) -> (i32, i32, i32, i32) {
    %c0_i32 = arith.constant 0 : i32
    %c0_i32_0 = arith.constant 0 : i32
    %c0_i32_1 = arith.constant 0 : i32
    %c0_i32_2 = arith.constant 0 : i32
    return %c0_i32, %c0_i32_0, %arg0, %c0_i32_1 : i32, i32, i32, i32
  }
  func.func @transform_1(%arg0: i32) -> (i32, i32, i32, i32) {
    %c0_i32 = arith.constant 0 : i32
    %c0_i32_0 = arith.constant 0 : i32
    %c0_i32_1 = arith.constant 0 : i32
    %c0_i32_2 = arith.constant 0 : i32
    %c0_i32_3 = arith.constant 0 : i32
    return %c0_i32, %c0_i32_0, %c0_i32_1, %c0_i32_2 : i32, i32, i32, i32
  }
  func.func @transform_2(%arg0: i32) -> (i32, i32, i32) {
    %c0_i32 = arith.constant 0 : i32
    %c0_i32_0 = arith.constant 0 : i32
    %c0_i32_1 = arith.constant 0 : i32
    return %c0_i32, %arg0, %c0_i32_0 : i32, i32, i32
  }
  func.func @transform_3(%arg0: i32) -> (i32, i32, i32) {
    %c0_i32 = arith.constant 0 : i32
    %c0_i32_0 = arith.constant 0 : i32
    %c0_i32_1 = arith.constant 0 : i32
    return %arg0, %c0_i32, %c0_i32_0 : i32, i32, i32
  }
}

module attributes {stable_mosaic.version = 11 : i64} {
  func.func @kernel(%arg0: i32, %arg1: memref<8x8x256xbf16, #tpu.memory_space<vmem>>, %arg2: memref<3x2x192x256xbf16, #tpu.memory_space<vmem>>, %arg3: memref<2x256xf32, #tpu.memory_space<vmem>>, %arg4: memref<8x8x512xbf16, #tpu.memory_space<vmem>>, %arg5: memref<1x2x512xf32, #tpu.memory_space<vmem>>) attributes {dimension_semantics = [#tpu.dimension_semantics<parallel>], iteration_bounds = array<i64: 1>, scalar_prefetch = 0 : i64, scratch_operands = 0 : i64, tpu.core_type = #tpu.core_type<tc>, window_params = [{transform_indices = @transform_0, window_bounds = array<i64: 8, 8, 256>}, {pipeline_mode = #tpu.pipeline_mode<synchronous>, transform_indices = @transform_1, window_bounds = array<i64: 3, 2, 192, 256>}, {pipeline_mode = #tpu.pipeline_mode<synchronous>, transform_indices = @transform_2, window_bounds = array<i64: 2, 256>}, {transform_indices = @transform_3, window_bounds = array<i64: 8, 8, 512>}, {transform_indices = @transform_4, window_bounds = array<i64: 1, 2, 512>}]} {
    %c0 = arith.constant 0 : index
    %c0_0 = arith.constant 0 : index
    %c0_1 = arith.constant 0 : index
    %0 = vector.load %arg1[%c0, %c0_0, %c0_1] : memref<8x8x256xbf16, #tpu.memory_space<vmem>>, vector<8x8x256xbf16>
    %1 = arith.extf %0 : vector<8x8x256xbf16> to vector<8x8x256xf32>
    %c0_2 = arith.constant 0 : index
    %c0_3 = arith.constant 0 : index
    %2 = vector.load %arg3[%c0_2, %c0_3] : memref<2x256xf32, #tpu.memory_space<vmem>>, vector<1x256xf32>
    %3 = vector.shape_cast %2 : vector<1x256xf32> to vector<256xf32>
    %4 = vector.shape_cast %3 : vector<256xf32> to vector<1x1x256xf32>
    %5 = vector.broadcast %4 : vector<1x1x256xf32> to vector<8x8x256xf32>
    %6 = arith.mulf %1, %5 : vector<8x8x256xf32>
    %c1 = arith.constant 1 : index
    %c0_4 = arith.constant 0 : index
    %7 = vector.load %arg3[%c1, %c0_4] : memref<2x256xf32, #tpu.memory_space<vmem>>, vector<1x256xf32>
    %8 = vector.shape_cast %7 : vector<1x256xf32> to vector<256xf32>
    %9 = vector.shape_cast %8 : vector<256xf32> to vector<1x1x256xf32>
    %10 = vector.broadcast %9 : vector<1x1x256xf32> to vector<8x8x256xf32>
    %11 = arith.addf %6, %10 : vector<8x8x256xf32>
    %cst = arith.constant 0.000000e+00 : f32
    %12 = vector.broadcast %cst : f32 to vector<8x8x256xf32>
    %13 = arith.maximumf %11, %12 : vector<8x8x256xf32>
    %14 = arith.truncf %13 : vector<8x8x256xf32> to vector<8x8x256xbf16>
    %15 = vector.extract_strided_slice %14 {offsets = [0, 0, 0], sizes = [8, 8, 192], strides = [1, 1, 1]} : vector<8x8x256xbf16> to vector<8x8x192xbf16>
    %cst_5 = arith.constant 0.000000e+00 : f32
    %16 = vector.broadcast %cst_5 : f32 to vector<64x256xf32>
    %17 = vector.extract_strided_slice %15 {offsets = [1, 0, 0], sizes = [1, 8, 192], strides = [1, 1, 1]} : vector<8x8x192xbf16> to vector<1x8x192xbf16>
    %18 = vector.extract_strided_slice %15 {offsets = [0, 0, 0], sizes = [7, 8, 192], strides = [1, 1, 1]} : vector<8x8x192xbf16> to vector<7x8x192xbf16>
    %19 = tpu.concatenate %17, %18 in 0 : vector<1x8x192xbf16>, vector<7x8x192xbf16> -> vector<8x8x192xbf16>
    %20 = vector.shape_cast %19 : vector<8x8x192xbf16> to vector<64x192xbf16>
    %c0_6 = arith.constant 0 : index
    %c0_7 = arith.constant 0 : index
    %c0_8 = arith.constant 0 : index
    %c0_9 = arith.constant 0 : index
    %21 = vector.load %arg2[%c0_6, %c0_7, %c0_8, %c0_9] : memref<3x2x192x256xbf16, #tpu.memory_space<vmem>>, vector<1x1x192x256xbf16>
    %22 = vector.shape_cast %21 : vector<1x1x192x256xbf16> to vector<192x256xbf16>
    %cst_10 = arith.constant dense<0.000000e+00> : vector<64x256xf32>
    %23 = tpu.matmul %20, %22, %cst_10 {dimension_numbers = #tpu.dot_dimension_numbers<[1], [0], [0], [1], [0, 0, 1, 1], [], []>} : vector<64x192xbf16>, vector<192x256xbf16>, vector<64x256xf32> -> vector<64x256xf32>
    %24 = arith.addf %16, %23 : vector<64x256xf32>
    %25 = vector.shape_cast %15 : vector<8x8x192xbf16> to vector<64x192xbf16>
    %c1_11 = arith.constant 1 : index
    %c0_12 = arith.constant 0 : index
    %c0_13 = arith.constant 0 : index
    %c0_14 = arith.constant 0 : index
    %26 = vector.load %arg2[%c1_11, %c0_12, %c0_13, %c0_14] : memref<3x2x192x256xbf16, #tpu.memory_space<vmem>>, vector<1x1x192x256xbf16>
    %27 = vector.shape_cast %26 : vector<1x1x192x256xbf16> to vector<192x256xbf16>
    %cst_15 = arith.constant dense<0.000000e+00> : vector<64x256xf32>
    %28 = tpu.matmul %25, %27, %cst_15 {dimension_numbers = #tpu.dot_dimension_numbers<[1], [0], [0], [1], [0, 0, 1, 1], [], []>} : vector<64x192xbf16>, vector<192x256xbf16>, vector<64x256xf32> -> vector<64x256xf32>
    %29 = arith.addf %24, %28 : vector<64x256xf32>
    %30 = vector.extract_strided_slice %15 {offsets = [1, 0, 0], sizes = [7, 8, 192], strides = [1, 1, 1]} : vector<8x8x192xbf16> to vector<7x8x192xbf16>
    %31 = vector.extract_strided_slice %15 {offsets = [6, 0, 0], sizes = [1, 8, 192], strides = [1, 1, 1]} : vector<8x8x192xbf16> to vector<1x8x192xbf16>
    %32 = tpu.concatenate %30, %31 in 0 : vector<7x8x192xbf16>, vector<1x8x192xbf16> -> vector<8x8x192xbf16>
    %33 = vector.shape_cast %32 : vector<8x8x192xbf16> to vector<64x192xbf16>
    %c2 = arith.constant 2 : index
    %c0_16 = arith.constant 0 : index
    %c0_17 = arith.constant 0 : index
    %c0_18 = arith.constant 0 : index
    %34 = vector.load %arg2[%c2, %c0_16, %c0_17, %c0_18] : memref<3x2x192x256xbf16, #tpu.memory_space<vmem>>, vector<1x1x192x256xbf16>
    %35 = vector.shape_cast %34 : vector<1x1x192x256xbf16> to vector<192x256xbf16>
    %cst_19 = arith.constant dense<0.000000e+00> : vector<64x256xf32>
    %36 = tpu.matmul %33, %35, %cst_19 {dimension_numbers = #tpu.dot_dimension_numbers<[1], [0], [0], [1], [0, 0, 1, 1], [], []>} : vector<64x192xbf16>, vector<192x256xbf16>, vector<64x256xf32> -> vector<64x256xf32>
    %37 = arith.addf %29, %36 : vector<64x256xf32>
    %38 = vector.shape_cast %37 : vector<64x256xf32> to vector<8x8x256xf32>
    %39 = arith.truncf %38 : vector<8x8x256xf32> to vector<8x8x256xbf16>
    %c0_20 = arith.constant 0 : index
    %c0_21 = arith.constant 0 : index
    %c0_22 = arith.constant 0 : index
    %40 = vector.load %arg4[%c0_20, %c0_21, %c0_22] : memref<8x8x512xbf16, #tpu.memory_space<vmem>>, vector<8x8x256xbf16>
    tpu.vector_store %arg4[%c0_20, %c0_21, %c0_22], %39 {strides = array<i32>} : memref<8x8x512xbf16, #tpu.memory_space<vmem>>, vector<8x8x256xbf16>,
    %cst_23 = arith.constant dense<0.000000e+00> : vector<256xf32>
    %41 = vector.multi_reduction <add>, %37, %cst_23 [0] : vector<64x256xf32> to vector<256xf32>
    %42 = vector.shape_cast %41 : vector<256xf32> to vector<1x256xf32>
    %c0_24 = arith.constant 0 : index
    %c0_25 = arith.constant 0 : index
    %c0_26 = arith.constant 0 : index
    %43 = vector.load %arg5[%c0_24, %c0_25, %c0_26] : memref<1x2x512xf32, #tpu.memory_space<vmem>>, vector<1x1x256xf32>
    %44 = vector.shape_cast %43 : vector<1x1x256xf32> to vector<1x256xf32>
    %45 = vector.shape_cast %42 : vector<1x256xf32> to vector<1x1x256xf32>
    tpu.vector_store %arg5[%c0_24, %c0_25, %c0_26], %45 {strides = array<i32>} : memref<1x2x512xf32, #tpu.memory_space<vmem>>, vector<1x1x256xf32>,
    %46 = arith.mulf %37, %37 : vector<64x256xf32>
    %cst_27 = arith.constant dense<0.000000e+00> : vector<256xf32>
    %47 = vector.multi_reduction <add>, %46, %cst_27 [0] : vector<64x256xf32> to vector<256xf32>
    %48 = vector.shape_cast %47 : vector<256xf32> to vector<1x256xf32>
    %c0_28 = arith.constant 0 : index
    %c1_29 = arith.constant 1 : index
    %c0_30 = arith.constant 0 : index
    %49 = vector.load %arg5[%c0_28, %c1_29, %c0_30] : memref<1x2x512xf32, #tpu.memory_space<vmem>>, vector<1x1x256xf32>
    %50 = vector.shape_cast %49 : vector<1x1x256xf32> to vector<1x256xf32>
    %51 = vector.shape_cast %48 : vector<1x256xf32> to vector<1x1x256xf32>
    tpu.vector_store %arg5[%c0_28, %c1_29, %c0_30], %51 {strides = array<i32>} : memref<1x2x512xf32, #tpu.memory_space<vmem>>, vector<1x1x256xf32>,
    %52 = vector.extract_strided_slice %14 {offsets = [0, 0, 64], sizes = [8, 8, 192], strides = [1, 1, 1]} : vector<8x8x256xbf16> to vector<8x8x192xbf16>
    %cst_31 = arith.constant 0.000000e+00 : f32
    %53 = vector.broadcast %cst_31 : f32 to vector<64x256xf32>
    %54 = vector.extract_strided_slice %52 {offsets = [1, 0, 0], sizes = [1, 8, 192], strides = [1, 1, 1]} : vector<8x8x192xbf16> to vector<1x8x192xbf16>
    %55 = vector.extract_strided_slice %52 {offsets = [0, 0, 0], sizes = [7, 8, 192], strides = [1, 1, 1]} : vector<8x8x192xbf16> to vector<7x8x192xbf16>
    %56 = tpu.concatenate %54, %55 in 0 : vector<1x8x192xbf16>, vector<7x8x192xbf16> -> vector<8x8x192xbf16>
    %57 = vector.shape_cast %56 : vector<8x8x192xbf16> to vector<64x192xbf16>
    %c0_32 = arith.constant 0 : index
    %c1_33 = arith.constant 1 : index
    %c0_34 = arith.constant 0 : index
    %c0_35 = arith.constant 0 : index
    %58 = vector.load %arg2[%c0_32, %c1_33, %c0_34, %c0_35] : memref<3x2x192x256xbf16, #tpu.memory_space<vmem>>, vector<1x1x192x256xbf16>
    %59 = vector.shape_cast %58 : vector<1x1x192x256xbf16> to vector<192x256xbf16>
    %cst_36 = arith.constant dense<0.000000e+00> : vector<64x256xf32>
    %60 = tpu.matmul %57, %59, %cst_36 {dimension_numbers = #tpu.dot_dimension_numbers<[1], [0], [0], [1], [0, 0, 1, 1], [], []>} : vector<64x192xbf16>, vector<192x256xbf16>, vector<64x256xf32> -> vector<64x256xf32>
    %61 = arith.addf %53, %60 : vector<64x256xf32>
    %62 = vector.shape_cast %52 : vector<8x8x192xbf16> to vector<64x192xbf16>
    %c1_37 = arith.constant 1 : index
    %c1_38 = arith.constant 1 : index
    %c0_39 = arith.constant 0 : index
    %c0_40 = arith.constant 0 : index
    %63 = vector.load %arg2[%c1_37, %c1_38, %c0_39, %c0_40] : memref<3x2x192x256xbf16, #tpu.memory_space<vmem>>, vector<1x1x192x256xbf16>
    %64 = vector.shape_cast %63 : vector<1x1x192x256xbf16> to vector<192x256xbf16>
    %cst_41 = arith.constant dense<0.000000e+00> : vector<64x256xf32>
    %65 = tpu.matmul %62, %64, %cst_41 {dimension_numbers = #tpu.dot_dimension_numbers<[1], [0], [0], [1], [0, 0, 1, 1], [], []>} : vector<64x192xbf16>, vector<192x256xbf16>, vector<64x256xf32> -> vector<64x256xf32>
    %66 = arith.addf %61, %65 : vector<64x256xf32>
    %67 = vector.extract_strided_slice %52 {offsets = [1, 0, 0], sizes = [7, 8, 192], strides = [1, 1, 1]} : vector<8x8x192xbf16> to vector<7x8x192xbf16>
    %68 = vector.extract_strided_slice %52 {offsets = [6, 0, 0], sizes = [1, 8, 192], strides = [1, 1, 1]} : vector<8x8x192xbf16> to vector<1x8x192xbf16>
    %69 = tpu.concatenate %67, %68 in 0 : vector<7x8x192xbf16>, vector<1x8x192xbf16> -> vector<8x8x192xbf16>
    %70 = vector.shape_cast %69 : vector<8x8x192xbf16> to vector<64x192xbf16>
    %c2_42 = arith.constant 2 : index
    %c1_43 = arith.constant 1 : index
    %c0_44 = arith.constant 0 : index
    %c0_45 = arith.constant 0 : index
    %71 = vector.load %arg2[%c2_42, %c1_43, %c0_44, %c0_45] : memref<3x2x192x256xbf16, #tpu.memory_space<vmem>>, vector<1x1x192x256xbf16>
    %72 = vector.shape_cast %71 : vector<1x1x192x256xbf16> to vector<192x256xbf16>
    %cst_46 = arith.constant dense<0.000000e+00> : vector<64x256xf32>
    %73 = tpu.matmul %70, %72, %cst_46 {dimension_numbers = #tpu.dot_dimension_numbers<[1], [0], [0], [1], [0, 0, 1, 1], [], []>} : vector<64x192xbf16>, vector<192x256xbf16>, vector<64x256xf32> -> vector<64x256xf32>
    %74 = arith.addf %66, %73 : vector<64x256xf32>
    %75 = vector.shape_cast %74 : vector<64x256xf32> to vector<8x8x256xf32>
    %76 = arith.truncf %75 : vector<8x8x256xf32> to vector<8x8x256xbf16>
    %c0_47 = arith.constant 0 : index
    %c0_48 = arith.constant 0 : index
    %c256 = arith.constant 256 : index
    %77 = vector.load %arg4[%c0_47, %c0_48, %c256] : memref<8x8x512xbf16, #tpu.memory_space<vmem>>, vector<8x8x256xbf16>
    tpu.vector_store %arg4[%c0_47, %c0_48, %c256], %76 {strides = array<i32>} : memref<8x8x512xbf16, #tpu.memory_space<vmem>>, vector<8x8x256xbf16>,
    %cst_49 = arith.constant dense<0.000000e+00> : vector<256xf32>
    %78 = vector.multi_reduction <add>, %74, %cst_49 [0] : vector<64x256xf32> to vector<256xf32>
    %79 = vector.shape_cast %78 : vector<256xf32> to vector<1x256xf32>
    %c0_50 = arith.constant 0 : index
    %c0_51 = arith.constant 0 : index
    %c256_52 = arith.constant 256 : index
    %80 = vector.load %arg5[%c0_50, %c0_51, %c256_52] : memref<1x2x512xf32, #tpu.memory_space<vmem>>, vector<1x1x256xf32>
    %81 = vector.shape_cast %80 : vector<1x1x256xf32> to vector<1x256xf32>
    %82 = vector.shape_cast %79 : vector<1x256xf32> to vector<1x1x256xf32>
    tpu.vector_store %arg5[%c0_50, %c0_51, %c256_52], %82 {strides = array<i32>} : memref<1x2x512xf32, #tpu.memory_space<vmem>>, vector<1x1x256xf32>,
    %83 = arith.mulf %74, %74 : vector<64x256xf32>
    %cst_53 = arith.constant dense<0.000000e+00> : vector<256xf32>
    %84 = vector.multi_reduction <add>, %83, %cst_53 [0] : vector<64x256xf32> to vector<256xf32>
    %85 = vector.shape_cast %84 : vector<256xf32> to vector<1x256xf32>
    %c0_54 = arith.constant 0 : index
    %c1_55 = arith.constant 1 : index
    %c256_56 = arith.constant 256 : index
    %86 = vector.load %arg5[%c0_54, %c1_55, %c256_56] : memref<1x2x512xf32, #tpu.memory_space<vmem>>, vector<1x1x256xf32>
    %87 = vector.shape_cast %86 : vector<1x1x256xf32> to vector<1x256xf32>
    %88 = vector.shape_cast %85 : vector<1x256xf32> to vector<1x1x256xf32>
    tpu.vector_store %arg5[%c0_54, %c1_55, %c256_56], %88 {strides = array<i32>} : memref<1x2x512xf32, #tpu.memory_space<vmem>>, vector<1x1x256xf32>,
    return
  }
  func.func @transform_0(%arg0: i32) -> (i32, i32, i32) {
    %c0_i32 = arith.constant 0 : i32
    %c0_i32_0 = arith.constant 0 : i32
    %c0_i32_1 = arith.constant 0 : i32
    return %c0_i32, %arg0, %c0_i32_0 : i32, i32, i32
  }
  func.func @transform_1(%arg0: i32) -> (i32, i32, i32, i32) {
    %c0_i32 = arith.constant 0 : i32
    %c0_i32_0 = arith.constant 0 : i32
    %c0_i32_1 = arith.constant 0 : i32
    %c0_i32_2 = arith.constant 0 : i32
    %c0_i32_3 = arith.constant 0 : i32
    return %c0_i32, %c0_i32_0, %c0_i32_1, %c0_i32_2 : i32, i32, i32, i32
  }
  func.func @transform_2(%arg0: i32) -> (i32, i32) {
    %c0_i32 = arith.constant 0 : i32
    %c0_i32_0 = arith.constant 0 : i32
    %c0_i32_1 = arith.constant 0 : i32
    return %c0_i32, %c0_i32_0 : i32, i32
  }
  func.func @transform_3(%arg0: i32) -> (i32, i32, i32) {
    %c0_i32 = arith.constant 0 : i32
    %c0_i32_0 = arith.constant 0 : i32
    %c0_i32_1 = arith.constant 0 : i32
    return %c0_i32, %arg0, %c0_i32_0 : i32, i32, i32
  }
  func.func @transform_4(%arg0: i32) -> (i32, i32, i32) {
    %c0_i32 = arith.constant 0 : i32
    %c0_i32_0 = arith.constant 0 : i32
    %c0_i32_1 = arith.constant 0 : i32
    return %arg0, %c0_i32, %c0_i32_0 : i32, i32, i32
  }
}

module attributes {stable_mosaic.version = 11 : i64} {
  func.func @kernel(%arg0: i32, %arg1: memref<8x8x512xbf16, #tpu.memory_space<vmem>>, %arg2: memref<3x2x384x256xbf16, #tpu.memory_space<vmem>>, %arg3: memref<2x512xf32, #tpu.memory_space<vmem>>, %arg4: memref<8x8x512xbf16, #tpu.memory_space<vmem>>, %arg5: memref<1x2x512xf32, #tpu.memory_space<vmem>>) attributes {dimension_semantics = [#tpu.dimension_semantics<parallel>], iteration_bounds = array<i64: 1>, scalar_prefetch = 0 : i64, scratch_operands = 0 : i64, tpu.core_type = #tpu.core_type<tc>, window_params = [{transform_indices = @transform_0, window_bounds = array<i64: 8, 8, 512>}, {pipeline_mode = #tpu.pipeline_mode<synchronous>, transform_indices = @transform_1, window_bounds = array<i64: 3, 2, 384, 256>}, {pipeline_mode = #tpu.pipeline_mode<synchronous>, transform_indices = @transform_2, window_bounds = array<i64: 2, 512>}, {transform_indices = @transform_3, window_bounds = array<i64: 8, 8, 512>}, {transform_indices = @transform_4, window_bounds = array<i64: 1, 2, 512>}]} {
    %c0 = arith.constant 0 : index
    %c0_0 = arith.constant 0 : index
    %c0_1 = arith.constant 0 : index
    %0 = vector.load %arg1[%c0, %c0_0, %c0_1] : memref<8x8x512xbf16, #tpu.memory_space<vmem>>, vector<8x8x512xbf16>
    %1 = arith.extf %0 : vector<8x8x512xbf16> to vector<8x8x512xf32>
    %c0_2 = arith.constant 0 : index
    %c0_3 = arith.constant 0 : index
    %2 = vector.load %arg3[%c0_2, %c0_3] : memref<2x512xf32, #tpu.memory_space<vmem>>, vector<1x512xf32>
    %3 = vector.shape_cast %2 : vector<1x512xf32> to vector<512xf32>
    %4 = vector.shape_cast %3 : vector<512xf32> to vector<1x1x512xf32>
    %5 = vector.broadcast %4 : vector<1x1x512xf32> to vector<8x8x512xf32>
    %6 = arith.mulf %1, %5 : vector<8x8x512xf32>
    %c1 = arith.constant 1 : index
    %c0_4 = arith.constant 0 : index
    %7 = vector.load %arg3[%c1, %c0_4] : memref<2x512xf32, #tpu.memory_space<vmem>>, vector<1x512xf32>
    %8 = vector.shape_cast %7 : vector<1x512xf32> to vector<512xf32>
    %9 = vector.shape_cast %8 : vector<512xf32> to vector<1x1x512xf32>
    %10 = vector.broadcast %9 : vector<1x1x512xf32> to vector<8x8x512xf32>
    %11 = arith.addf %6, %10 : vector<8x8x512xf32>
    %cst = arith.constant 0.000000e+00 : f32
    %12 = vector.broadcast %cst : f32 to vector<8x8x512xf32>
    %13 = arith.maximumf %11, %12 : vector<8x8x512xf32>
    %14 = arith.truncf %13 : vector<8x8x512xf32> to vector<8x8x512xbf16>
    %15 = vector.extract_strided_slice %14 {offsets = [0, 0, 0], sizes = [8, 8, 384], strides = [1, 1, 1]} : vector<8x8x512xbf16> to vector<8x8x384xbf16>
    %cst_5 = arith.constant 0.000000e+00 : f32
    %16 = vector.broadcast %cst_5 : f32 to vector<64x256xf32>
    %17 = vector.extract_strided_slice %15 {offsets = [1, 0, 0], sizes = [1, 8, 384], strides = [1, 1, 1]} : vector<8x8x384xbf16> to vector<1x8x384xbf16>
    %18 = vector.extract_strided_slice %15 {offsets = [0, 0, 0], sizes = [7, 8, 384], strides = [1, 1, 1]} : vector<8x8x384xbf16> to vector<7x8x384xbf16>
    %19 = tpu.concatenate %17, %18 in 0 : vector<1x8x384xbf16>, vector<7x8x384xbf16> -> vector<8x8x384xbf16>
    %20 = vector.shape_cast %19 : vector<8x8x384xbf16> to vector<64x384xbf16>
    %c0_6 = arith.constant 0 : index
    %c0_7 = arith.constant 0 : index
    %c0_8 = arith.constant 0 : index
    %c0_9 = arith.constant 0 : index
    %21 = vector.load %arg2[%c0_6, %c0_7, %c0_8, %c0_9] : memref<3x2x384x256xbf16, #tpu.memory_space<vmem>>, vector<1x1x384x256xbf16>
    %22 = vector.shape_cast %21 : vector<1x1x384x256xbf16> to vector<384x256xbf16>
    %cst_10 = arith.constant dense<0.000000e+00> : vector<64x256xf32>
    %23 = tpu.matmul %20, %22, %cst_10 {dimension_numbers = #tpu.dot_dimension_numbers<[1], [0], [0], [1], [0, 0, 1, 1], [], []>} : vector<64x384xbf16>, vector<384x256xbf16>, vector<64x256xf32> -> vector<64x256xf32>
    %24 = arith.addf %16, %23 : vector<64x256xf32>
    %25 = vector.shape_cast %15 : vector<8x8x384xbf16> to vector<64x384xbf16>
    %c1_11 = arith.constant 1 : index
    %c0_12 = arith.constant 0 : index
    %c0_13 = arith.constant 0 : index
    %c0_14 = arith.constant 0 : index
    %26 = vector.load %arg2[%c1_11, %c0_12, %c0_13, %c0_14] : memref<3x2x384x256xbf16, #tpu.memory_space<vmem>>, vector<1x1x384x256xbf16>
    %27 = vector.shape_cast %26 : vector<1x1x384x256xbf16> to vector<384x256xbf16>
    %cst_15 = arith.constant dense<0.000000e+00> : vector<64x256xf32>
    %28 = tpu.matmul %25, %27, %cst_15 {dimension_numbers = #tpu.dot_dimension_numbers<[1], [0], [0], [1], [0, 0, 1, 1], [], []>} : vector<64x384xbf16>, vector<384x256xbf16>, vector<64x256xf32> -> vector<64x256xf32>
    %29 = arith.addf %24, %28 : vector<64x256xf32>
    %30 = vector.extract_strided_slice %15 {offsets = [1, 0, 0], sizes = [7, 8, 384], strides = [1, 1, 1]} : vector<8x8x384xbf16> to vector<7x8x384xbf16>
    %31 = vector.extract_strided_slice %15 {offsets = [6, 0, 0], sizes = [1, 8, 384], strides = [1, 1, 1]} : vector<8x8x384xbf16> to vector<1x8x384xbf16>
    %32 = tpu.concatenate %30, %31 in 0 : vector<7x8x384xbf16>, vector<1x8x384xbf16> -> vector<8x8x384xbf16>
    %33 = vector.shape_cast %32 : vector<8x8x384xbf16> to vector<64x384xbf16>
    %c2 = arith.constant 2 : index
    %c0_16 = arith.constant 0 : index
    %c0_17 = arith.constant 0 : index
    %c0_18 = arith.constant 0 : index
    %34 = vector.load %arg2[%c2, %c0_16, %c0_17, %c0_18] : memref<3x2x384x256xbf16, #tpu.memory_space<vmem>>, vector<1x1x384x256xbf16>
    %35 = vector.shape_cast %34 : vector<1x1x384x256xbf16> to vector<384x256xbf16>
    %cst_19 = arith.constant dense<0.000000e+00> : vector<64x256xf32>
    %36 = tpu.matmul %33, %35, %cst_19 {dimension_numbers = #tpu.dot_dimension_numbers<[1], [0], [0], [1], [0, 0, 1, 1], [], []>} : vector<64x384xbf16>, vector<384x256xbf16>, vector<64x256xf32> -> vector<64x256xf32>
    %37 = arith.addf %29, %36 : vector<64x256xf32>
    %38 = vector.shape_cast %37 : vector<64x256xf32> to vector<8x8x256xf32>
    %39 = arith.truncf %38 : vector<8x8x256xf32> to vector<8x8x256xbf16>
    %c0_20 = arith.constant 0 : index
    %c0_21 = arith.constant 0 : index
    %c0_22 = arith.constant 0 : index
    %40 = vector.load %arg4[%c0_20, %c0_21, %c0_22] : memref<8x8x512xbf16, #tpu.memory_space<vmem>>, vector<8x8x256xbf16>
    tpu.vector_store %arg4[%c0_20, %c0_21, %c0_22], %39 {strides = array<i32>} : memref<8x8x512xbf16, #tpu.memory_space<vmem>>, vector<8x8x256xbf16>,
    %cst_23 = arith.constant dense<0.000000e+00> : vector<256xf32>
    %41 = vector.multi_reduction <add>, %37, %cst_23 [0] : vector<64x256xf32> to vector<256xf32>
    %42 = vector.shape_cast %41 : vector<256xf32> to vector<1x256xf32>
    %c0_24 = arith.constant 0 : index
    %c0_25 = arith.constant 0 : index
    %c0_26 = arith.constant 0 : index
    %43 = vector.load %arg5[%c0_24, %c0_25, %c0_26] : memref<1x2x512xf32, #tpu.memory_space<vmem>>, vector<1x1x256xf32>
    %44 = vector.shape_cast %43 : vector<1x1x256xf32> to vector<1x256xf32>
    %45 = vector.shape_cast %42 : vector<1x256xf32> to vector<1x1x256xf32>
    tpu.vector_store %arg5[%c0_24, %c0_25, %c0_26], %45 {strides = array<i32>} : memref<1x2x512xf32, #tpu.memory_space<vmem>>, vector<1x1x256xf32>,
    %46 = arith.mulf %37, %37 : vector<64x256xf32>
    %cst_27 = arith.constant dense<0.000000e+00> : vector<256xf32>
    %47 = vector.multi_reduction <add>, %46, %cst_27 [0] : vector<64x256xf32> to vector<256xf32>
    %48 = vector.shape_cast %47 : vector<256xf32> to vector<1x256xf32>
    %c0_28 = arith.constant 0 : index
    %c1_29 = arith.constant 1 : index
    %c0_30 = arith.constant 0 : index
    %49 = vector.load %arg5[%c0_28, %c1_29, %c0_30] : memref<1x2x512xf32, #tpu.memory_space<vmem>>, vector<1x1x256xf32>
    %50 = vector.shape_cast %49 : vector<1x1x256xf32> to vector<1x256xf32>
    %51 = vector.shape_cast %48 : vector<1x256xf32> to vector<1x1x256xf32>
    tpu.vector_store %arg5[%c0_28, %c1_29, %c0_30], %51 {strides = array<i32>} : memref<1x2x512xf32, #tpu.memory_space<vmem>>, vector<1x1x256xf32>,
    %52 = vector.extract_strided_slice %14 {offsets = [0, 0, 128], sizes = [8, 8, 384], strides = [1, 1, 1]} : vector<8x8x512xbf16> to vector<8x8x384xbf16>
    %cst_31 = arith.constant 0.000000e+00 : f32
    %53 = vector.broadcast %cst_31 : f32 to vector<64x256xf32>
    %54 = vector.extract_strided_slice %52 {offsets = [1, 0, 0], sizes = [1, 8, 384], strides = [1, 1, 1]} : vector<8x8x384xbf16> to vector<1x8x384xbf16>
    %55 = vector.extract_strided_slice %52 {offsets = [0, 0, 0], sizes = [7, 8, 384], strides = [1, 1, 1]} : vector<8x8x384xbf16> to vector<7x8x384xbf16>
    %56 = tpu.concatenate %54, %55 in 0 : vector<1x8x384xbf16>, vector<7x8x384xbf16> -> vector<8x8x384xbf16>
    %57 = vector.shape_cast %56 : vector<8x8x384xbf16> to vector<64x384xbf16>
    %c0_32 = arith.constant 0 : index
    %c1_33 = arith.constant 1 : index
    %c0_34 = arith.constant 0 : index
    %c0_35 = arith.constant 0 : index
    %58 = vector.load %arg2[%c0_32, %c1_33, %c0_34, %c0_35] : memref<3x2x384x256xbf16, #tpu.memory_space<vmem>>, vector<1x1x384x256xbf16>
    %59 = vector.shape_cast %58 : vector<1x1x384x256xbf16> to vector<384x256xbf16>
    %cst_36 = arith.constant dense<0.000000e+00> : vector<64x256xf32>
    %60 = tpu.matmul %57, %59, %cst_36 {dimension_numbers = #tpu.dot_dimension_numbers<[1], [0], [0], [1], [0, 0, 1, 1], [], []>} : vector<64x384xbf16>, vector<384x256xbf16>, vector<64x256xf32> -> vector<64x256xf32>
    %61 = arith.addf %53, %60 : vector<64x256xf32>
    %62 = vector.shape_cast %52 : vector<8x8x384xbf16> to vector<64x384xbf16>
    %c1_37 = arith.constant 1 : index
    %c1_38 = arith.constant 1 : index
    %c0_39 = arith.constant 0 : index
    %c0_40 = arith.constant 0 : index
    %63 = vector.load %arg2[%c1_37, %c1_38, %c0_39, %c0_40] : memref<3x2x384x256xbf16, #tpu.memory_space<vmem>>, vector<1x1x384x256xbf16>
    %64 = vector.shape_cast %63 : vector<1x1x384x256xbf16> to vector<384x256xbf16>
    %cst_41 = arith.constant dense<0.000000e+00> : vector<64x256xf32>
    %65 = tpu.matmul %62, %64, %cst_41 {dimension_numbers = #tpu.dot_dimension_numbers<[1], [0], [0], [1], [0, 0, 1, 1], [], []>} : vector<64x384xbf16>, vector<384x256xbf16>, vector<64x256xf32> -> vector<64x256xf32>
    %66 = arith.addf %61, %65 : vector<64x256xf32>
    %67 = vector.extract_strided_slice %52 {offsets = [1, 0, 0], sizes = [7, 8, 384], strides = [1, 1, 1]} : vector<8x8x384xbf16> to vector<7x8x384xbf16>
    %68 = vector.extract_strided_slice %52 {offsets = [6, 0, 0], sizes = [1, 8, 384], strides = [1, 1, 1]} : vector<8x8x384xbf16> to vector<1x8x384xbf16>
    %69 = tpu.concatenate %67, %68 in 0 : vector<7x8x384xbf16>, vector<1x8x384xbf16> -> vector<8x8x384xbf16>
    %70 = vector.shape_cast %69 : vector<8x8x384xbf16> to vector<64x384xbf16>
    %c2_42 = arith.constant 2 : index
    %c1_43 = arith.constant 1 : index
    %c0_44 = arith.constant 0 : index
    %c0_45 = arith.constant 0 : index
    %71 = vector.load %arg2[%c2_42, %c1_43, %c0_44, %c0_45] : memref<3x2x384x256xbf16, #tpu.memory_space<vmem>>, vector<1x1x384x256xbf16>
    %72 = vector.shape_cast %71 : vector<1x1x384x256xbf16> to vector<384x256xbf16>
    %cst_46 = arith.constant dense<0.000000e+00> : vector<64x256xf32>
    %73 = tpu.matmul %70, %72, %cst_46 {dimension_numbers = #tpu.dot_dimension_numbers<[1], [0], [0], [1], [0, 0, 1, 1], [], []>} : vector<64x384xbf16>, vector<384x256xbf16>, vector<64x256xf32> -> vector<64x256xf32>
    %74 = arith.addf %66, %73 : vector<64x256xf32>
    %75 = vector.shape_cast %74 : vector<64x256xf32> to vector<8x8x256xf32>
    %76 = arith.truncf %75 : vector<8x8x256xf32> to vector<8x8x256xbf16>
    %c0_47 = arith.constant 0 : index
    %c0_48 = arith.constant 0 : index
    %c256 = arith.constant 256 : index
    %77 = vector.load %arg4[%c0_47, %c0_48, %c256] : memref<8x8x512xbf16, #tpu.memory_space<vmem>>, vector<8x8x256xbf16>
    tpu.vector_store %arg4[%c0_47, %c0_48, %c256], %76 {strides = array<i32>} : memref<8x8x512xbf16, #tpu.memory_space<vmem>>, vector<8x8x256xbf16>,
    %cst_49 = arith.constant dense<0.000000e+00> : vector<256xf32>
    %78 = vector.multi_reduction <add>, %74, %cst_49 [0] : vector<64x256xf32> to vector<256xf32>
    %79 = vector.shape_cast %78 : vector<256xf32> to vector<1x256xf32>
    %c0_50 = arith.constant 0 : index
    %c0_51 = arith.constant 0 : index
    %c256_52 = arith.constant 256 : index
    %80 = vector.load %arg5[%c0_50, %c0_51, %c256_52] : memref<1x2x512xf32, #tpu.memory_space<vmem>>, vector<1x1x256xf32>
    %81 = vector.shape_cast %80 : vector<1x1x256xf32> to vector<1x256xf32>
    %82 = vector.shape_cast %79 : vector<1x256xf32> to vector<1x1x256xf32>
    tpu.vector_store %arg5[%c0_50, %c0_51, %c256_52], %82 {strides = array<i32>} : memref<1x2x512xf32, #tpu.memory_space<vmem>>, vector<1x1x256xf32>,
    %83 = arith.mulf %74, %74 : vector<64x256xf32>
    %cst_53 = arith.constant dense<0.000000e+00> : vector<256xf32>
    %84 = vector.multi_reduction <add>, %83, %cst_53 [0] : vector<64x256xf32> to vector<256xf32>
    %85 = vector.shape_cast %84 : vector<256xf32> to vector<1x256xf32>
    %c0_54 = arith.constant 0 : index
    %c1_55 = arith.constant 1 : index
    %c256_56 = arith.constant 256 : index
    %86 = vector.load %arg5[%c0_54, %c1_55, %c256_56] : memref<1x2x512xf32, #tpu.memory_space<vmem>>, vector<1x1x256xf32>
    %87 = vector.shape_cast %86 : vector<1x1x256xf32> to vector<1x256xf32>
    %88 = vector.shape_cast %85 : vector<1x256xf32> to vector<1x1x256xf32>
    tpu.vector_store %arg5[%c0_54, %c1_55, %c256_56], %88 {strides = array<i32>} : memref<1x2x512xf32, #tpu.memory_space<vmem>>, vector<1x1x256xf32>,
    return
  }
  func.func @transform_0(%arg0: i32) -> (i32, i32, i32) {
    %c0_i32 = arith.constant 0 : i32
    %c0_i32_0 = arith.constant 0 : i32
    %c0_i32_1 = arith.constant 0 : i32
    return %c0_i32, %arg0, %c0_i32_0 : i32, i32, i32
  }
  func.func @transform_1(%arg0: i32) -> (i32, i32, i32, i32) {
    %c0_i32 = arith.constant 0 : i32
    %c0_i32_0 = arith.constant 0 : i32
    %c0_i32_1 = arith.constant 0 : i32
    %c0_i32_2 = arith.constant 0 : i32
    %c0_i32_3 = arith.constant 0 : i32
    return %c0_i32, %c0_i32_0, %c0_i32_1, %c0_i32_2 : i32, i32, i32, i32
  }
  func.func @transform_2(%arg0: i32) -> (i32, i32) {
    %c0_i32 = arith.constant 0 : i32
    %c0_i32_0 = arith.constant 0 : i32
    %c0_i32_1 = arith.constant 0 : i32
    return %c0_i32, %c0_i32_0 : i32, i32
  }
  func.func @transform_3(%arg0: i32) -> (i32, i32, i32) {
    %c0_i32 = arith.constant 0 : i32
    %c0_i32_0 = arith.constant 0 : i32
    %c0_i32_1 = arith.constant 0 : i32
    return %c0_i32, %arg0, %c0_i32_0 : i32, i32, i32
  }
  func.func @transform_4(%arg0: i32) -> (i32, i32, i32) {
    %c0_i32 = arith.constant 0 : i32
    %c0_i32_0 = arith.constant 0 : i32
    %c0_i32_1 = arith.constant 0 : i32
    return %arg0, %c0_i32, %c0_i32_0 : i32, i32, i32
  }
}

module attributes {stable_mosaic.version = 11 : i64} {
  func.func @_bn_relu_residual_kernel(%arg0: i32, %arg1: memref<8x8x512xbf16, #tpu.memory_space<vmem>>, %arg2: memref<8x8x512xbf16, #tpu.memory_space<vmem>>, %arg3: memref<2x512xf32, #tpu.memory_space<vmem>>, %arg4: memref<2x512xf32, #tpu.memory_space<vmem>>, %arg5: memref<8x8x512xbf16, #tpu.memory_space<vmem>>) attributes {dimension_semantics = [#tpu.dimension_semantics<parallel>], iteration_bounds = array<i64: 1>, scalar_prefetch = 0 : i64, scratch_operands = 0 : i64, tpu.core_type = #tpu.core_type<tc>, window_params = [{transform_indices = @transform_0, window_bounds = array<i64: 8, 8, 512>}, {transform_indices = @transform_1, window_bounds = array<i64: 8, 8, 512>}, {pipeline_mode = #tpu.pipeline_mode<synchronous>, transform_indices = @transform_2, window_bounds = array<i64: 2, 512>}, {pipeline_mode = #tpu.pipeline_mode<synchronous>, transform_indices = @transform_3, window_bounds = array<i64: 2, 512>}, {transform_indices = @transform_4, window_bounds = array<i64: 8, 8, 512>}]} {
    %c0 = arith.constant 0 : index
    %c0_0 = arith.constant 0 : index
    %c0_1 = arith.constant 0 : index
    %0 = vector.load %arg1[%c0, %c0_0, %c0_1] : memref<8x8x512xbf16, #tpu.memory_space<vmem>>, vector<8x8x512xbf16>
    %1 = arith.extf %0 : vector<8x8x512xbf16> to vector<8x8x512xf32>
    %c0_2 = arith.constant 0 : index
    %c0_3 = arith.constant 0 : index
    %2 = vector.load %arg3[%c0_2, %c0_3] : memref<2x512xf32, #tpu.memory_space<vmem>>, vector<1x512xf32>
    %3 = vector.shape_cast %2 : vector<1x512xf32> to vector<512xf32>
    %4 = vector.shape_cast %3 : vector<512xf32> to vector<1x1x512xf32>
    %5 = vector.broadcast %4 : vector<1x1x512xf32> to vector<8x8x512xf32>
    %6 = arith.mulf %1, %5 : vector<8x8x512xf32>
    %c1 = arith.constant 1 : index
    %c0_4 = arith.constant 0 : index
    %7 = vector.load %arg3[%c1, %c0_4] : memref<2x512xf32, #tpu.memory_space<vmem>>, vector<1x512xf32>
    %8 = vector.shape_cast %7 : vector<1x512xf32> to vector<512xf32>
    %9 = vector.shape_cast %8 : vector<512xf32> to vector<1x1x512xf32>
    %10 = vector.broadcast %9 : vector<1x1x512xf32> to vector<8x8x512xf32>
    %11 = arith.addf %6, %10 : vector<8x8x512xf32>
    %cst = arith.constant 0.000000e+00 : f32
    %12 = vector.broadcast %cst : f32 to vector<8x8x512xf32>
    %13 = arith.maximumf %11, %12 : vector<8x8x512xf32>
    %c0_5 = arith.constant 0 : index
    %c0_6 = arith.constant 0 : index
    %c0_7 = arith.constant 0 : index
    %14 = vector.load %arg2[%c0_5, %c0_6, %c0_7] : memref<8x8x512xbf16, #tpu.memory_space<vmem>>, vector<8x8x512xbf16>
    %15 = arith.extf %14 : vector<8x8x512xbf16> to vector<8x8x512xf32>
    %c0_8 = arith.constant 0 : index
    %c0_9 = arith.constant 0 : index
    %16 = vector.load %arg4[%c0_8, %c0_9] : memref<2x512xf32, #tpu.memory_space<vmem>>, vector<1x512xf32>
    %17 = vector.shape_cast %16 : vector<1x512xf32> to vector<512xf32>
    %18 = vector.shape_cast %17 : vector<512xf32> to vector<1x1x512xf32>
    %19 = vector.broadcast %18 : vector<1x1x512xf32> to vector<8x8x512xf32>
    %20 = arith.mulf %15, %19 : vector<8x8x512xf32>
    %c1_10 = arith.constant 1 : index
    %c0_11 = arith.constant 0 : index
    %21 = vector.load %arg4[%c1_10, %c0_11] : memref<2x512xf32, #tpu.memory_space<vmem>>, vector<1x512xf32>
    %22 = vector.shape_cast %21 : vector<1x512xf32> to vector<512xf32>
    %23 = vector.shape_cast %22 : vector<512xf32> to vector<1x1x512xf32>
    %24 = vector.broadcast %23 : vector<1x1x512xf32> to vector<8x8x512xf32>
    %25 = arith.addf %20, %24 : vector<8x8x512xf32>
    %cst_12 = arith.constant 0.000000e+00 : f32
    %26 = vector.broadcast %cst_12 : f32 to vector<8x8x512xf32>
    %27 = arith.maximumf %25, %26 : vector<8x8x512xf32>
    %28 = arith.addf %13, %27 : vector<8x8x512xf32>
    %29 = arith.truncf %28 : vector<8x8x512xf32> to vector<8x8x512xbf16>
    %c0_13 = arith.constant 0 : index
    %c0_14 = arith.constant 0 : index
    %c0_15 = arith.constant 0 : index
    %30 = vector.load %arg5[%c0_13, %c0_14, %c0_15] : memref<8x8x512xbf16, #tpu.memory_space<vmem>>, vector<8x8x512xbf16>
    tpu.vector_store %arg5[%c0_13, %c0_14, %c0_15], %29 {strides = array<i32>} : memref<8x8x512xbf16, #tpu.memory_space<vmem>>, vector<8x8x512xbf16>,
    return
  }
  func.func @transform_0(%arg0: i32) -> (i32, i32, i32) {
    %c0_i32 = arith.constant 0 : i32
    %c0_i32_0 = arith.constant 0 : i32
    %c0_i32_1 = arith.constant 0 : i32
    return %arg0, %c0_i32, %c0_i32_0 : i32, i32, i32
  }
  func.func @transform_1(%arg0: i32) -> (i32, i32, i32) {
    %c0_i32 = arith.constant 0 : i32
    %c0_i32_0 = arith.constant 0 : i32
    %c0_i32_1 = arith.constant 0 : i32
    return %arg0, %c0_i32, %c0_i32_0 : i32, i32, i32
  }
  func.func @transform_2(%arg0: i32) -> (i32, i32) {
    %c0_i32 = arith.constant 0 : i32
    %c0_i32_0 = arith.constant 0 : i32
    %c0_i32_1 = arith.constant 0 : i32
    return %c0_i32, %c0_i32_0 : i32, i32
  }
  func.func @transform_3(%arg0: i32) -> (i32, i32) {
    %c0_i32 = arith.constant 0 : i32
    %c0_i32_0 = arith.constant 0 : i32
    %c0_i32_1 = arith.constant 0 : i32
    return %c0_i32, %c0_i32_0 : i32, i32
  }
  func.func @transform_4(%arg0: i32) -> (i32, i32, i32) {
    %c0_i32 = arith.constant 0 : i32
    %c0_i32_0 = arith.constant 0 : i32
    %c0_i32_1 = arith.constant 0 : i32
    return %arg0, %c0_i32, %c0_i32_0 : i32, i32, i32
  }
}

</mosaic_0001>

<bundles_post_ra>
// kernel: tile.43
= control target key start
LH: loop header
LB: loop body
LE: loop exit
PB: predicated region body
PF: predicated region fallthrough
CT: control target
= control target key end

     0   :  { %s22_s0 = inlined_call_operand.vmem [shape: f32[32], index: 0, kind: input, shape index: {}]   ;;  %s23_s1 = inlined_call_operand.vmem [shape: f32[8,32], index: 1, kind: output, shape index: {}]  }
   0x1   :  { %v4_v0 = vld [vmem:[%s22_s0] ss:$0 sm:$0xff] }
   0x2   :  { %5 = vst [vmem:[%s23_s1] sm:$0xff] %v4_v0 }

// kernel: tile.48
= control target key start
LH: loop header
LB: loop body
LE: loop exit
PB: predicated region body
PF: predicated region fallthrough
CT: control target
= control target key end

     0   :  { %s7_s6 = smov 3  ;;  %s14_s9 = smov 3  ;;  %vm4_vm0 = vcmask 261120   ;;  %vm11_vm1 = vcmask 1048320   ;;  %vm18_vm2 = vcmask 785920   ;;  %vm25_vm3 = vcmask 523520   ;;  %s79_s0 = inlined_call_operand.vmem [shape: f32[8,32], index: 0, kind: input, shape index: {}]   ;;  %s80_s1 = inlined_call_operand.vmem [shape: f32[1,256], index: 1, kind: output, shape index: {}]  }
   0x1   :  { %v41_v0 = vld [vmem:[%s79_s0 + $0x3] ss:$4 sm:%s7_s6]   ;;  %s48_s10 = smov 96   ;;  %s21_s11 = smov 3  ;;  %v42_v1 = vld [vmem:[%s79_s0 + $0x2] ss:$4 sm:%s14_s9]  }
   0x2   :  { %9 = vrot.lane.b32.xlu0 %v41_v0, %s48_s10  ;;  %v43_v2 = vld [vmem:[%s79_s0 + $0x1] ss:$4 sm:%s21_s11]   ;;  %s2_s16 = smov 3  ;;  %s49_s17 = smov 32  }
   0x3   :  { %23 = vrot.lane.b32.xlu1 %v43_v2, %s49_s17  ;;  %v3_v3 = vld [vmem:[%s79_s0] ss:$4 sm:%s2_s16]   ;;  %s50_s0 = smov 64  }
   0x4   :  { %5 = vst.msk [vmem:[#allocation0] ss:$8 sm:$0x3] %vm4_vm0, %v3_v3  }
   0x6   :  { %16 = vrot.lane.b32.xlu0 %v42_v1, %s50_s0 }
  0x74   :  { %v10_v4 = vpop.permute.xlu0 %9  }
  0x75   :  { %12 = vst.msk [vmem:[#allocation0] ss:$8 sm:$0x3] %vm11_vm1, %v10_v4   ;;  %v24_v5 = vpop.permute.xlu1 %23  }
  0x78   :  { %v17_v6 = vpop.permute.xlu0 %16  }
  0x79   :  { %19 = vst.msk [vmem:[#allocation0] ss:$8 sm:$0x3] %vm18_vm2, %v17_v6  }
  0x7a   :  { %26 = vst.msk [vmem:[#allocation0] ss:$8 sm:$0x3] %vm25_vm3, %v24_v5  }
  0x81   :  { %v31_v7 = vld [vmem:[#allocation0] sm:$0x1]  ;;  %v36_v8 = vld [vmem:[#allocation0 + $0x8] sm:$0x1] }
  0x82   :  { %34 = vst [vmem:[%s80_s1] sm:$0x1] %v31_v7  ;;  %44 = vst [vmem:[%s80_s1 + $0x1] sm:$0x1] %v36_v8 }

// kernel: _lambda_.4
= control target key start
LH: loop header
LB: loop body
LE: loop exit
PB: predicated region body
PF: predicated region fallthrough
CT: control target
= control target key end

     0   :  { %s4357_s16 = smov 64   ;;  %vm311_vm0 = vcmask 523264   ;;  %vm1548_vm1 = vcmask 1043456   ;;  %s5899_s0 = inlined_call_operand.vmem [shape: bf16[2,9,8,512], index: 0, kind: input, shape index: {}]   ;;  %s5900_s1 = inlined_call_operand.vmem [shape: bf16[4,2,320,128], index: 1, kind: input, shape index: {}]   ;;  %s5901_s2 = inlined_call_operand.vmem [shape: bf16[8,8,256], index: 2, kind: output, shape index: {0}]   ;;  %s5902_s3 = inlined_call_operand.vmem [shape: f32[1,2,256], index: 3, kind: output, shape index: {1}]  }
   0x1   :  { %v4381_v0 = vld [vmem:[%s5899_s0 + $0xa0] sm:$0xff]  ;;  %v4386_v1 = vld [vmem:[%s5899_s0 + $0x90] sm:$0xff]  ;;  %v4149_v2 = vld [vmem:[%s5900_s1 + $0x1b8] sm:$0xff]  }
   0x2   :  { %1611 = vrot.lane.b32.xlu1 %v4381_v0, %s4357_s16  ;;  %1607 = vrot.lane.b32.xlu0 %v4386_v1, %s4357_s16  ;;  %v3109_v3 = vcombine.high %v4386_v1, %v4381_v0  ;;  %v4150_v4 = vld [vmem:[%s5900_s1 + $0x1d8] sm:$0xff]   ;;  %v4406_v6 = vld [vmem:[%s5899_s0 + $0xa8] sm:$0xff]  ;;  %v3108_v58 = vcombine.low %v4386_v1, %v4381_v0 }
   0x3   :  { %3636 = vmatprep.subr.bf16.mxu0 %v4149_v2  ;;  %v4151_v5 = vld [vmem:[%s5900_s1 + $0x178] sm:$0xff]   ;;  %4020 = vmatprep.subr.bf16.mxu1 %v4150_v4  ;;  %v4152_v8 = vld [vmem:[%s5900_s1 + $0x1b0] sm:$0xff]   ;;  %v4428_v12 = vld [vmem:[%s5899_s0 + $0xc8] sm:$0xff] }
   0x4   :  { %356 = vmatprep.mubr.bf16.mxu0 %v3109_v3  ;;  %v33_v7 = vld [vmem:[%s5899_s0 + $0x98] sm:$0xff]  ;;  %3637 = vmatpush3.bf16.msra.mxu0 %v4151_v5  ;;  %v4153_v10 = vld [vmem:[%s5900_s1 + $0x1d0] sm:$0xff]   ;;  %v4157_v15 = vld [vmem:[%s5900_s1 + $0x1a8] sm:$0xff]  }
   0x5   :  { %4021 = vmatpush3.bf16.msra.mxu1 %v4150_v4  ;;  %v3110_v9 = vcombine.low %v33_v7, %v4406_v6  ;;  %3638 = vmatprep.subr.bf16.mxu0 %v4152_v8  ;;  %v4154_v11 = vld [vmem:[%s5900_s1 + $0x170] sm:$0xff]   ;;  %v4433_v13 = vld [vmem:[%s5899_s0 + $0xb8] sm:$0xff]  ;;  %v4158_v16 = vld [vmem:[%s5900_s1 + $0x1c8] sm:$0xff]  }
   0x6   :  { %1613 = vrot.lane.b32.xlu1 %v4406_v6, %s4357_s16  ;;  %1609 = vrot.lane.b32.xlu0 %v33_v7, %s4357_s16  ;;  %v3298_v14 = vcombine.low %v4406_v6, %v4433_v13  ;;  %v4159_v17 = vld [vmem:[%s5900_s1 + $0x168] sm:$0xff]   ;;  %v4453_v18 = vld [vmem:[%s5899_s0 + $0xc0] sm:$0xff]  ;;  %v3113_v25 = vcombine.low %v4433_v13, %v4428_v12 }
   0x7   :  { %4028 = vmatprep.mubr.msk.bf16.mxu1 %vm311_vm0, %v3110_v9  ;;  %4022 = vmatprep.subr.bf16.mxu1 %v4153_v10  ;;  %v4458_v19 = vld [vmem:[%s5899_s0 + $0xb0] sm:$0xff]  ;;  %v4160_v20 = vld [vmem:[%s5900_s1 + $0x1a0] sm:$0xff]   ;;  %v4482_v26 = vld [vmem:[%s5899_s0 + $0xd8] sm:$0xff] }
   0x8   :  { %3639 = vmatpush3.bf16.msra.mxu0 %v4154_v11  ;;  %v3297_v21 = vcombine.high %v4381_v0, %v4458_v19  ;;  %v4161_v22 = vld [vmem:[%s5900_s1 + $0x1c0] sm:$0xff]   ;;  %v3296_v23 = vcombine.low %v4381_v0, %v4458_v19  ;;  %v4487_v27 = vld [vmem:[%s5899_s0 + $0xd0] sm:$0xff]  ;;  %v3301_v28 = vcombine.low %v4428_v12, %v4482_v26  ;;  %v4164_v29 = vld [vmem:[%s5900_s1 + $0x198] sm:$0xff]   ;;  %v3112_v62 = vcombine.high %v4458_v19, %v4453_v18 }
   0x9   :  { %4023 = vmatpush3.bf16.msra.mxu1 %v4153_v10  ;;  %3640 = vmatprep.subr.bf16.mxu0 %v4157_v15  ;;  %v4162_v24 = vld [vmem:[%s5900_s1 + $0x160] sm:$0xff]   ;;  %v3300_v30 = vcombine.high %v4453_v18, %v4487_v27  ;;  %v3299_v31 = vcombine.low %v4453_v18, %v4487_v27  ;;  %v4166_v32 = vld [vmem:[%s5900_s1 + $0x78] sm:$0xff]   ;;  %v4515_v35 = vld [vmem:[%s5899_s0 + $0xe8] sm:$0xff]  ;;  %v3111_v10 = vcombine.low %v4458_v19, %v4453_v18 }
   0xa   :  { %1621 = vrot.lane.b32.xlu1 %v4428_v12, %s4357_s16  ;;  %1617 = vrot.lane.b32.xlu0 %v4433_v13, %s4357_s16  ;;  %v4167_v33 = vld [vmem:[%s5900_s1 + $0x158] sm:$0xff]   ;;  %v4520_v36 = vld [vmem:[%s5899_s0 + $0xe0] sm:$0xff]  ;;  %v3116_v37 = vcombine.low %v4482_v26, %v4515_v35 }
   0xb   :  { %4024 = vmatprep.subr.bf16.mxu1 %v4158_v16  ;;  %v4168_v34 = vld [vmem:[%s5900_s1 + $0x38] sm:$0xff]   ;;  %v4170_v38 = vld [vmem:[%s5900_s1 + $0x190] sm:$0xff]   ;;  %v4175_v45 = vld [vmem:[%s5900_s1 + $0x188] sm:$0xff]   ;;  %v3115_v15 = vcombine.high %v4487_v27, %v4520_v36 }
   0xc   :  { %3641 = vmatpush3.bf16.msra.mxu0 %v4159_v17  ;;  %v4171_v39 = vld [vmem:[%s5900_s1 + $0x70] sm:$0xff]   ;;  %v4544_v42 = vld [vmem:[%s5899_s0 + $0xf8] sm:$0xff]  ;;  %v4176_v48 = vld [vmem:[%s5900_s1 + $0x68] sm:$0xff]  }
   0xd   :  { %4025 = vmatpush3.bf16.msra.mxu1 %v4158_v16  ;;  %3642 = vmatprep.subr.bf16.mxu0 %v4160_v20  ;;  %v4172_v40 = vld [vmem:[%s5900_s1 + $0x150] sm:$0xff]   ;;  %v3304_v43 = vcombine.low %v4515_v35, %v4544_v42  ;;  %v4177_v49 = vld [vmem:[%s5900_s1 + $0x148] sm:$0xff]   ;;  %v4581_v52 = vld [vmem:[%s5899_s0 + $0x100] sm:$0xff] }
   0xe   :  { %1619 = vrot.lane.b32.xlu1 %v4453_v18, %s4357_s16  ;;  %1615 = vrot.lane.b32.xlu0 %v4458_v19, %s4357_s16  ;;  %v4173_v41 = vld [vmem:[%s5900_s1 + $0x30] sm:$0xff]   ;;  %v4178_v50 = vld [vmem:[%s5900_s1 + $0x28] sm:$0xff]  }
   0xf   :  { %4026 = vmatprep.subr.bf16.mxu1 %v4161_v22  ;;  %v4553_v44 = vld [vmem:[%s5899_s0 + $0xf0] sm:$0xff]  ;;  %v4576_v51 = vld [vmem:[%s5899_s0 + $0x108] sm:$0xff]  ;;  %v4180_v54 = vld [vmem:[%s5900_s1 + $0x180] sm:$0xff]  }
  0x10   :  { %3643 = vmatpush3.bf16.msra.mxu0 %v4162_v24  ;;  %v3303_v46 = vcombine.high %v4520_v36, %v4553_v44  ;;  %v3302_v47 = vcombine.low %v4520_v36, %v4553_v44  ;;  %v3119_v53 = vcombine.low %v4544_v42, %v4576_v51  ;;  %v4181_v55 = vld [vmem:[%s5900_s1 + $0x60] sm:$0xff]   ;;  %v4607_v59 = vld [vmem:[%s5899_s0 + $0x8] sm:$0xff]  ;;  %v4617_v61 = vld [vmem:[%s5899_s0 + $0x10] sm:$0xff] }
  0x11   :  { %4027 = vmatpush3.bf16.msra.mxu1 %v4161_v22  ;;  %3644 = vmatprep.subr.bf16.mxu0 %v4164_v29  ;;  %v4182_v56 = vld [vmem:[%s5900_s1 + $0x140] sm:$0xff]   ;;  %v4187_v63 = vld [vmem:[%s5900_s1 + $0x58] sm:$0xff]   ;;  %v4191_v5 = vld [vmem:[%s5900_s1 + $0x50] sm:$0xff]  }
  0x12   :  { %1625 = vrot.lane.b32.xlu1 %v4482_v26, %s4357_s16  ;;  %1623 = vrot.lane.b32.xlu0 %v4487_v27, %s4357_s16  ;;  %v4183_v57 = vld [vmem:[%s5900_s1 + $0x20] sm:$0xff]   ;;  %v4188_v1 = vld [vmem:[%s5900_s1 + $0x98] sm:$0xff]  }
  0x13   :  { %3684 = vmatprep.subr.bf16.mxu1 %v4166_v32  ;;  %v4612_v60 = vld [vmem:[%s5899_s0] sm:$0xff]  ;;  %v4189_v2 = vld [vmem:[%s5900_s1 + $0x18] sm:$0xff]   ;;  %v4192_v7 = vld [vmem:[%s5900_s1 + $0x10] sm:$0xff]  }
  0x14   :  { %4029 = vmatmul.mubr.msk.bf16.vlgmr.msra.gmra.mxu1 %vm311_vm0, %v3113_v25  ;;  %3645 = vmatpush3.bf16.msra.mxu0 %v4167_v33  ;;  %v3145_v3 = vcombine.high %v4612_v60, %v4617_v61  ;;  %v4639_v4 = vld [vmem:[%s5899_s0 + $0x18] sm:$0xff]  ;;  %v4659_v9 = vld [vmem:[%s5899_s0 + $0x28] sm:$0xff]  ;;  %v4198_v16 = vld [vmem:[%s5900_s1 + $0x90] sm:$0xff]   ;;  %v3114_v33 = vcombine.low %v4487_v27, %v4520_v36 }
  0x15   :  { %3685 = vmatpush3.bf16.msra.mxu1 %v4168_v34  ;;  %3646 = vmatprep.subr.bf16.mxu0 %v4170_v38  ;;  %v4654_v8 = vld [vmem:[%s5899_s0 + $0x38] sm:$0xff]  ;;  %v4197_v11 = vld [vmem:[%s5900_s1 + $0x48] sm:$0xff]   ;;  %v4681_v20 = vld [vmem:[%s5899_s0 + $0x30] sm:$0xff] }
  0x16   :  { %1629 = vrot.lane.b32.xlu1 %v4515_v35, %s4357_s16  ;;  %1627 = vrot.lane.b32.xlu0 %v4520_v36, %s4357_s16  ;;  %v4199_v17 = vld [vmem:[%s5900_s1 + $0x8] sm:$0xff]   ;;  %v4686_v22 = vld [vmem:[%s5899_s0 + $0x20] sm:$0xff] }
  0x17   :  { %4032 = vmatprep.mubr.msk.bf16.mxu1 %vm311_vm0, %v3116_v37  ;;  %3686 = vmatprep.subr.bf16.mxu1 %v4171_v39  ;;  %v4200_v24 = vld [vmem:[%s5900_s1 + $0x40] sm:$0xff]   ;;  %v4697_v29 = vld [vmem:[%s5899_s0 + $0x58] sm:$0xff]  ;;  %v4702_v32 = vld [vmem:[%s5899_s0 + $0x48] sm:$0xff]  ;;  %v3144_v37 = vcombine.low %v4612_v60, %v4617_v61 }
  0x18   :  { %3647 = vmatpush3.bf16.msra.mxu0 %v4172_v40  ;;  %v4201_v25 = vld [vmem:[%s5900_s1] sm:$0xff]   ;;  %v4207_v34 = vld [vmem:[%s5900_s1 + $0x88] sm:$0xff]   ;;  %v4208_v38 = vld [vmem:[%s5900_s1 + $0x2f8] sm:$0xff]  }
  0x19   :  { %3687 = vmatpush3.bf16.msra.mxu1 %v4173_v41  ;;  %3648 = vmatprep.subr.bf16.mxu0 %v4175_v45  ;;  %v4209_v39 = vld [vmem:[%s5900_s1 + $0x2b8] sm:$0xff]   ;;  %v4729_v41 = vld [vmem:[%s5899_s0 + $0x68] sm:$0xff]  ;;  %v3118_v45 = vcombine.high %v4553_v44, %v4581_v52  ;;  %v4275_v6 = vld [vmem:[%s5900_s1 + $0x270] sm:$0xff]  }
  0x1a   :  { %1633 = vrot.lane.b32.xlu1 %v4544_v42, %s4357_s16  ;;  %1631 = vrot.lane.b32.xlu0 %v4553_v44, %s4357_s16  ;;  %v4724_v40 = vld [vmem:[%s5899_s0 + $0x78] sm:$0xff]  ;;  %v4276_v13 = vld [vmem:[%s5900_s1 + $0x210] sm:$0xff]  }
  0x1b   :  { %3688 = vmatprep.subr.bf16.mxu1 %v4176_v48  ;;  %v4212_v48 = vld [vmem:[%s5900_s1 + $0x2f0] sm:$0xff]   ;;  %v4279_v0 = vld [vmem:[%s5900_s1 + $0x248] sm:$0xff]   ;;  %v4282_v35 = vld [vmem:[%s5900_s1 + $0x240] sm:$0xff]  }
  0x1c   :  { %3649 = vmatpush3.bf16.msra.mxu0 %v4177_v49  ;;  %4033 = vmatmul.mubr.msk.bf16.gmra.mxu1 %vm311_vm0, %v3119_v53  ;;  %v3148_v49 = vcombine.high %v4686_v22, %v4681_v20  ;;  %v4748_v53 = vld [vmem:[%s5899_s0 + $0x50] sm:$0xff]  ;;  %v4287_v27 = vld [vmem:[%s5900_s1 + $0x238] sm:$0xff]  }
  0x1d   :  { %3689 = vmatpush3.bf16.msra.mxu1 %v4178_v50  ;;  %3650 = vmatprep.subr.bf16.mxu0 %v4180_v54  ;;  %v4213_v50 = vld [vmem:[%s5900_s1 + $0x2b0] sm:$0xff]   ;;  %v4753_v54 = vld [vmem:[%s5899_s0 + $0x40] sm:$0xff] }
  0x1e   :  { %1637 = vrot.lane.b32.xlu1 %v4576_v51, %s4357_s16  ;;  %1635 = vrot.lane.b32.xlu0 %v4581_v52, %s4357_s16 }
  0x1f   :  { %3690 = vmatprep.subr.bf16.mxu1 %v4181_v55  ;;  %678 = vmatprep.mubr.bf16.mxu1 %v3145_v3  ;;  %v4218_v55 = vld [vmem:[%s5900_s1 + $0x80] sm:$0xff]  }
  0x20   :  { %3651 = vmatpush3.bf16.msra.mxu0 %v4182_v56  ;;  %v3117_v56 = vcombine.low %v4553_v44, %v4581_v52  ;;  %v4222_v3 = vld [vmem:[%s5900_s1 + $0x2a0] sm:$0xff]   ;;  %v4297_v44 = vld [vmem:[%s5900_s1 + $0x228] sm:$0xff]  }
  0x21   :  { %3691 = vmatpush3.bf16.msra.mxu1 %v4183_v57  ;;  %4036 = vmatprep.subr.bf16.mxu0 %v4188_v1  ;;  %v4219_v57 = vld [vmem:[%s5900_s1 + $0x2e8] sm:$0xff]  }
  0x22   :  { %1502 = vrot.lane.b32.xlu1 %v4607_v59, %s4357_s16  ;;  %1500 = vrot.lane.b32.xlu0 %v4612_v60, %s4357_s16  ;;  %v3147_v60 = vcombine.low %v4686_v22, %v4681_v20 }
  0x23   :  { %357 = vmatmul.mubr.bf16.vlgmr.msra.gmra.mxu0 %v3108_v58  ;;  %3692 = vmatprep.subr.bf16.mxu1 %v4187_v63  ;;  %v3146_v58 = vcombine.low %v4607_v59, %v4639_v4  ;;  %v4777_v63 = vld [vmem:[%s5899_s0 + $0x70] sm:$0xff]  ;;  %v4788_v59 = vld [vmem:[%s5899_s0 + $0x60] sm:$0xff] }
  0x24   :  { %364 = vmatprep.mubr.bf16.mxu0 %v3112_v62  ;;  %4037 = vmatpush3.bf16.msra.mxu0 %v4188_v1  ;;  %v4220_v62 = vld [vmem:[%s5900_s1 + $0x2a8] sm:$0xff]   ;;  %v3151_v1 = vcombine.high %v4753_v54, %v4748_v53 }
  0x25   :  { %3693 = vmatpush3.bf16.msra.mxu1 %v4189_v2  ;;  %4038 = vmatprep.subr.bf16.mxu0 %v4198_v16  ;;  %v4221_v2 = vld [vmem:[%s5900_s1 + $0x2e0] sm:$0xff]  }
  0x26   :  { %1506 = vrot.lane.b32.xlu1 %v4639_v4, %s4357_s16  ;;  %1504 = vrot.lane.b32.xlu0 %v4617_v61, %s4357_s16 }
  0x27   :  { %3694 = vmatprep.subr.bf16.mxu1 %v4191_v5  ;;  %v4225_v5 = vld [vmem:[%s5900_s1 + $0x318] sm:$0xff]  }
  0x28   :  { %4039 = vmatpush3.bf16.msra.mxu0 %v4198_v16  ;;  %v4822_v16 = vld [vmem:[%s5899_s0 + $0x110] sm:$0xff] }
  0x29   :  { %3695 = vmatpush3.bf16.msra.mxu1 %v4192_v7  ;;  %4040 = vmatprep.subr.bf16.mxu0 %v4207_v34  ;;  %v4803_v7 = vld [vmem:[%s5899_s0 + $0x80] sm:$0xff] }
  0x2a   :  { %1514 = vrot.lane.b32.xlu1 %v4654_v8, %s4357_s16  ;;  %1510 = vrot.lane.b32.xlu0 %v4659_v9, %s4357_s16 }
  0x2b   :  { %365 = vmatmul.mubr.bf16.gmra.mxu0 %v3111_v10  ;;  %3696 = vmatprep.subr.bf16.mxu1 %v4197_v11  ;;  %v3149_v10 = vcombine.low %v4659_v9, %v4654_v8  ;;  %v4814_v11 = vld [vmem:[%s5899_s0 + $0x88] sm:$0xff] }
  0x2c   :  { %372 = vmatprep.mubr.bf16.mxu0 %v3115_v15  ;;  %4041 = vmatpush3.bf16.msra.mxu0 %v4207_v34  ;;  %v4227_v15 = vld [vmem:[%s5900_s1 + $0x2d8] sm:$0xff]   ;;  %v4230_v34 = vld [vmem:[%s5900_s1 + $0x310] sm:$0xff]  }
  0x2d   :  { %3697 = vmatpush3.bf16.msra.mxu1 %v4199_v17  ;;  %4042 = vmatprep.subr.bf16.mxu0 %v4218_v55  ;;  %v3150_v17 = vcombine.low %v4753_v54, %v4748_v53 }
  0x2e   :  { %1512 = vrot.lane.b32.xlu1 %v4681_v20, %s4357_s16  ;;  %1508 = vrot.lane.b32.xlu0 %v4686_v22, %s4357_s16 }
  0x2f   :  { %3698 = vmatprep.subr.bf16.mxu1 %v4200_v24  ;;  %v4228_v24 = vld [vmem:[%s5900_s1 + $0x298] sm:$0xff]  }
  0x30   :  { %4043 = vmatpush3.bf16.msra.mxu0 %v4218_v55  ;;  %v3153_v55 = vcombine.low %v4788_v59, %v4777_v63 }
  0x31   :  { %3699 = vmatpush3.bf16.msra.mxu1 %v4201_v25  ;;  %4052 = vmatprep.subr.bf16.mxu0 %v4225_v5  ;;  %v3305_v25 = vcombine.low %v4581_v52, %v4822_v16 }
  0x32   :  { %1522 = vrot.lane.b32.xlu1 %v4697_v29, %s4357_s16  ;;  %1518 = vrot.lane.b32.xlu0 %v4702_v32, %s4357_s16 }
  0x33   :  { %373 = vmatmul.mubr.bf16.gmra.mxu0 %v3114_v33  ;;  %3732 = vmatprep.subr.bf16.mxu1 %v4208_v38  ;;  %v4834_v33 = vld [vmem:[%s5899_s0 + $0x118] sm:$0xff]  ;;  %v3154_v38 = vcombine.high %v4788_v59, %v4777_v63 }
  0x34   :  { %679 = vmatmul.mubr.bf16.vlgmr.msra.gmra.mxu1 %v3144_v37  ;;  %380 = vmatprep.mubr.bf16.mxu0 %v3118_v45  ;;  %v4231_v37 = vld [vmem:[%s5900_s1 + $0x2d0] sm:$0xff]   ;;  %v3307_v26 = vcombine.low %v4576_v51, %v4834_v33 }
  0x35   :  { %3733 = vmatpush3.bf16.msra.mxu1 %v4209_v39  ;;  %686 = vmatprep.mubr.bf16.mxu1 %v3148_v49  ;;  %v3152_v39 = vcombine.low %v4702_v32, %v4697_v29  ;;  %v4232_v45 = vld [vmem:[%s5900_s1 + $0x290] sm:$0xff]   ;;  %v4236_v49 = vld [vmem:[%s5900_s1 + $0x2c8] sm:$0xff]  }
  0x36   :  { %1530 = vrot.lane.b32.xlu1 %v4724_v40, %s4357_s16  ;;  %1526 = vrot.lane.b32.xlu0 %v4729_v41, %s4357_s16 }
  0x37   :  { %3734 = vmatprep.subr.bf16.mxu1 %v4212_v48  ;;  %v4234_v48 = vld [vmem:[%s5900_s1 + $0x308] sm:$0xff]  }
  0x39   :  { %3735 = vmatpush3.bf16.msra.mxu1 %v4213_v50  ;;  %v3155_v50 = vcombine.low %v4729_v41, %v4724_v40 }
  0x3a   :  { %1520 = vrot.lane.b32.xlu1 %v4748_v53, %s4357_s16  ;;  %1516 = vrot.lane.b32.xlu0 %v4753_v54, %s4357_s16 }
  0x3b   :  { %381 = vmatmul.mubr.bf16.gmra.mxu0 %v3117_v56  ;;  %3736 = vmatprep.subr.bf16.mxu1 %v4219_v57  ;;  %v4237_v56 = vld [vmem:[%s5900_s1 + $0x288] sm:$0xff]   ;;  %v4238_v57 = vld [vmem:[%s5900_s1 + $0x300] sm:$0xff]  }
  0x3c   :  { %687 = vmatmul.mubr.bf16.gmra.mxu1 %v3147_v60  ;;  %4044 = vmatprep.mubr.msk.bf16.mxu0 %vm311_vm0, %v3146_v58  ;;  %v4239_v58 = vld [vmem:[%s5900_s1 + $0x2c0] sm:$0xff]   ;;  %v3221_v60 = vcombine.high %v4617_v61, %v4686_v22 }
  0x3d   :  { %3737 = vmatpush3.bf16.msra.mxu1 %v4220_v62  ;;  %694 = vmatprep.mubr.bf16.mxu1 %v3151_v1  ;;  %v3222_v62 = vcombine.low %v4639_v4, %v4659_v9  ;;  %v4240_v1 = vld [vmem:[%s5900_s1 + $0x280] sm:$0xff]   ;;  %v3220_v4 = vcombine.low %v4617_v61, %v4686_v22  ;;  %v4244_v9 = vld [vmem:[%s5900_s1 + $0x3f8] sm:$0xff]   ;;  %v4246_v22 = vld [vmem:[%s5900_s1 + $0x3f0] sm:$0xff]  }
  0x3e   :  { %1528 = vrot.lane.b32.xlu1 %v4777_v63, %s4357_s16  ;;  %1524 = vrot.lane.b32.xlu0 %v4788_v59, %s4357_s16  ;;  %v4253_v61 = vld [vmem:[%s5900_s1 + $0x458] sm:$0xff]  }
  0x3f   :  { %3738 = vmatprep.subr.bf16.mxu1 %v4221_v2  ;;  %v4242_v2 = vld [vmem:[%s5900_s1 + $0x438] sm:$0xff]  }
  0x41   :  { %3739 = vmatpush3.bf16.msra.mxu1 %v4222_v3  ;;  %v3225_v3 = vcombine.low %v4654_v8, %v4702_v32  ;;  %v3228_v8 = vcombine.low %v4697_v29, %v4729_v41  ;;  %v4248_v32 = vld [vmem:[%s5900_s1 + $0x428] sm:$0xff]   ;;  %v4259_v29 = vld [vmem:[%s5900_s1 + $0x450] sm:$0xff]   ;;  %v3231_v41 = vcombine.low %v4724_v40, %v4814_v11 }
  0x42   :  { %2324 = vrot.lane.b32.xlu1 %v4803_v7, %s4357_s16  ;;  %2326 = vrot.lane.b32.xlu0 %v4814_v11, %s4357_s16  ;;  %v4263_v40 = vld [vmem:[%s5900_s1 + $0x448] sm:$0xff]   ;;  %v4255_v11 = vld [vmem:[%s5900_s1 + $0x418] sm:$0xff]  }
  0x43   :  { %4045 = vmatmul.mubr.msk.bf16.vlgmr.msra.gmra.mxu0 %vm311_vm0, %v3149_v10  ;;  %3740 = vmatprep.subr.bf16.mxu1 %v4227_v15  ;;  %v3224_v10 = vcombine.high %v4681_v20, %v4753_v54  ;;  %v3223_v15 = vcombine.low %v4681_v20, %v4753_v54  ;;  %v4252_v20 = vld [vmem:[%s5900_s1 + $0x3e0] sm:$0xff]  }
  0x44   :  { %695 = vmatmul.mubr.bf16.gmra.mxu1 %v3150_v17  ;;  %4053 = vmatpush3.bf16.msra.mxu0 %v4225_v5  ;;  %v4245_v5 = vld [vmem:[%s5900_s1 + $0x430] sm:$0xff]   ;;  %v4250_v17 = vld [vmem:[%s5900_s1 + $0x3e8] sm:$0xff]   ;;  %v4267_v54 = vld [vmem:[%s5900_s1 + $0x440] sm:$0xff]  }
  0x45   :  { %3741 = vmatpush3.bf16.msra.mxu1 %v4228_v24  ;;  %4054 = vmatprep.subr.bf16.mxu0 %v4230_v34  ;;  %v4251_v24 = vld [vmem:[%s5900_s1 + $0x420] sm:$0xff]  }
  0x46   :  { %2668 = vrot.lane.b32.xlu1 %v4834_v33, %s4357_s16  ;;  %2666 = vrot.lane.b32.xlu0 %v4822_v16, %s4357_s16 }
  0x47   :  { %3742 = vmatprep.subr.bf16.mxu1 %v4231_v37  ;;  %702 = vmatprep.mubr.bf16.mxu1 %v3154_v38  ;;  %v3226_v37 = vcombine.low %v4748_v53, %v4788_v59  ;;  %v4257_v38 = vld [vmem:[%s5900_s1 + $0x3d8] sm:$0xff]  }
  0x48   :  { %4055 = vmatpush3.bf16.msra.mxu0 %v4230_v34  ;;  %4048 = vmatprep.mubr.msk.bf16.mxu0 %vm311_vm0, %v3152_v39  ;;  %v3227_v34 = vcombine.high %v4748_v53, %v4788_v59  ;;  %v4258_v39 = vld [vmem:[%s5900_s1 + $0x410] sm:$0xff]   ;;  %v4262_v59 = vld [vmem:[%s5900_s1 + $0x408] sm:$0xff]  }
  0x49   :  { %3743 = vmatpush3.bf16.msra.mxu1 %v4232_v45  ;;  %4056 = vmatprep.subr.bf16.mxu0 %v4234_v48  ;;  %v3230_v45 = vcombine.high %v4777_v63, %v4803_v7  ;;  %v4260_v53 = vld [vmem:[%s5900_s1 + $0x3d0] sm:$0xff]  }
  0x4a   :  { %3744 = vmatprep.subr.bf16.mxu1 %v4236_v49  ;;  %v4265_v49 = vld [vmem:[%s5900_s1 + $0x3c8] sm:$0xff]  }
  0x4b   :  { %4049 = vmatmul.mubr.msk.bf16.gmra.mxu0 %vm311_vm0, %v3155_v50  ;;  %v4266_v50 = vld [vmem:[%s5900_s1 + $0x400] sm:$0xff]  }
  0x4c   :  { %703 = vmatmul.mubr.bf16.gmra.mxu1 %v3153_v55  ;;  %4057 = vmatpush3.bf16.msra.mxu0 %v4234_v48  ;;  %v3229_v48 = vcombine.low %v4777_v63, %v4803_v7  ;;  %v4268_v55 = vld [vmem:[%s5900_s1 + $0x3c0] sm:$0xff]   ;;  %v4271_v63 = vld [vmem:[%s5900_s1 + $0x258] sm:$0xff]  }
  0x4d   :  { %3745 = vmatpush3.bf16.msra.mxu1 %v4237_v56  ;;  %4058 = vmatprep.subr.bf16.mxu0 %v4238_v57 }
  0x4e   :  { %3746 = vmatprep.subr.bf16.mxu1 %v4239_v58  ;;  %1006 = vmatprep.mubr.bf16.mxu1 %v3221_v60  ;;  %v4274_v58 = vld [vmem:[%s5900_s1 + $0x250] sm:$0xff]  }
  0x4f   :  { %4060 = vmatprep.mubr.msk.bf16.mxu0 %vm311_vm0, %v3222_v62  ;;  %v4281_v62 = vld [vmem:[%s5900_s1 + $0x208] sm:$0xff]  }
  0x50   :  { %4059 = vmatpush3.bf16.msra.mxu0 %v4238_v57  ;;  %v4273_v57 = vld [vmem:[%s5900_s1 + $0x218] sm:$0xff]  }
  0x51   :  { %3747 = vmatpush3.bf16.msra.mxu1 %v4240_v1  ;;  %3780 = vmatprep.subr.bf16.mxu0 %v4242_v2 }
  0x52   :  { %4068 = vmatprep.subr.bf16.mxu1 %v4253_v61 }
  0x53   :  { %4061 = vmatmul.mubr.msk.bf16.vlgmr.msra.gmra.mxu0 %vm311_vm0, %v3225_v3 }
  0x54   :  { %1007 = vmatmul.mubr.bf16.vlgmr.msra.gmra.mxu1 %v3220_v4  ;;  %3781 = vmatpush3.bf16.msra.mxu0 %v4244_v9  ;;  %v4284_v4 = vld [vmem:[%s5900_s1 + $0x200] sm:$0xff]  }
  0x55   :  { %3782 = vmatprep.subr.bf16.mxu0 %v4245_v5  ;;  %1014 = vmatprep.mubr.bf16.mxu1 %v3224_v10  ;;  %v4288_v10 = vld [vmem:[%s5900_s1 + $0x118] sm:$0xff]  }
  0x56   :  { %4064 = vmatprep.mubr.msk.bf16.mxu0 %vm311_vm0, %v3228_v8  ;;  %4069 = vmatpush3.bf16.msra.mxu1 %v4253_v61  ;;  %v4289_v8 = vld [vmem:[%s5900_s1 + $0x1f8] sm:$0xff]  }
  0x57   :  { %4070 = vmatprep.subr.bf16.mxu1 %v4259_v29 }
  0x58   :  { %3783 = vmatpush3.bf16.msra.mxu0 %v4246_v22 }
  0x59   :  { %3784 = vmatprep.subr.bf16.mxu0 %v4248_v32 }
  0x5a   :  { %4071 = vmatpush3.bf16.msra.mxu1 %v4259_v29 }
  0x5b   :  { %4065 = vmatmul.mubr.msk.bf16.gmra.mxu0 %vm311_vm0, %v3231_v41  ;;  %4072 = vmatprep.subr.bf16.mxu1 %v4263_v40  ;;  %v4290_v41 = vld [vmem:[%s5900_s1 + $0xd8] sm:$0xff]  }
  0x5c   :  { %1015 = vmatmul.mubr.bf16.gmra.mxu1 %v3223_v15  ;;  %3785 = vmatpush3.bf16.msra.mxu0 %v4250_v17 }
  0x5d   :  { %3786 = vmatprep.subr.bf16.mxu0 %v4251_v24  ;;  %1022 = vmatprep.mubr.bf16.mxu1 %v3227_v34  ;;  %v4291_v34 = vld [vmem:[%s5900_s1 + $0x230] sm:$0xff]  }
  0x5e   :  { %1342 = vmatprep.mubr.bf16.mxu0 %v3297_v21  ;;  %4073 = vmatpush3.bf16.msra.mxu1 %v4263_v40  ;;  %v4272_v21 = vld [vmem:[%s5900_s1 + $0x278] sm:$0xff]  }
  0x5f   :  { %4074 = vmatprep.subr.bf16.mxu1 %v4267_v54 }
  0x60   :  { %3787 = vmatpush3.bf16.msra.mxu0 %v4252_v20 }
  0x61   :  { %3788 = vmatprep.subr.bf16.mxu0 %v4255_v11  ;;  %v4292_v11 = vld [vmem:[%s5900_s1 + $0x110] sm:$0xff]  }
  0x62   :  { %4075 = vmatpush3.bf16.msra.mxu1 %v4267_v54 }
  0x63   :  { %4084 = vmatprep.subr.bf16.mxu1 %v4272_v21 }
  0x64   :  { %1023 = vmatmul.mubr.bf16.gmra.mxu1 %v3226_v37  ;;  %3789 = vmatpush3.bf16.msra.mxu0 %v4257_v38  ;;  %v4293_v37 = vld [vmem:[%s5900_s1 + $0x1f0] sm:$0xff]   ;;  %v3306_v38 = vcombine.high %v4581_v52, %v4822_v16  ;;  %v4306_v52 = vld [vmem:[%s5900_s1 + $0x138] sm:$0xff]  }
  0x65   :  { %3790 = vmatprep.subr.bf16.mxu0 %v4258_v39  ;;  %1030 = vmatprep.mubr.bf16.mxu1 %v3230_v45 }
  0x68   :  { %3791 = vmatpush3.bf16.msra.mxu0 %v4260_v53 }
  0x69   :  { %3792 = vmatprep.subr.bf16.mxu0 %v4262_v59  ;;  %v4294_v59 = vld [vmem:[%s5900_s1 + $0xd0] sm:$0xff]  }
  0x6c   :  { %1031 = vmatmul.mubr.bf16.gmra.mxu1 %v3229_v48  ;;  %3793 = vmatpush3.bf16.msra.mxu0 %v4265_v49 }
  0x6d   :  { %3794 = vmatprep.subr.bf16.mxu0 %v4266_v50  ;;  %4076 = vmatprep.mubr.msk.bf16.mxu1 %vm311_vm0, %v3298_v14  ;;  %v4298_v50 = vld [vmem:[%s5900_s1 + $0x108] sm:$0xff]  }
  0x70   :  { %3795 = vmatpush3.bf16.msra.mxu0 %v4268_v55 }
  0x71   :  { %3828 = vmatprep.subr.bf16.mxu0 %v4271_v63 }
  0x73   :  { %1343 = vmatmul.mubr.bf16.vlgmr.msra.gmra.mxu0 %v3296_v23  ;;  %v4280_v23 = vld [vmem:[%s5900_s1 + $0x268] sm:$0xff]  }
  0x74   :  { %v1612_v7 = vpop.permute.xlu1 %1611  ;;  %v4983_v56 = vpop.permute.xlu0 %1607  ;;  %4077 = vmatmul.mubr.msk.bf16.vlgmr.msra.gmra.mxu1 %vm311_vm0, %v3301_v28  ;;  %3829 = vmatpush3.bf16.msra.mxu0 %v4273_v57  ;;  %v4299_v57 = vld [vmem:[%s5900_s1 + $0x1e8] sm:$0xff]  }
  0x75   :  { %4085 = vmatpush3.bf16.msra.mxu1 %v4272_v21  ;;  %3830 = vmatprep.subr.bf16.mxu0 %v4274_v58  ;;  %v1641_v28 = vrot.slane %v1612_v7, 4  ;;  %v1639_v22 = vrot.slane %v4983_v56, 4 }
  0x76   :  { %4086 = vmatprep.subr.bf16.mxu1 %v4275_v6  ;;  %1350 = vmatprep.mubr.bf16.mxu0 %v3300_v30 }
  0x77   :  { %4080 = vmatprep.mubr.msk.bf16.mxu1 %vm311_vm0, %v3304_v43  ;;  %v4283_v43 = vld [vmem:[%s5900_s1 + $0x260] sm:$0xff]  }
  0x78   :  { %v1614_v14 = vpop.permute.xlu1 %1613  ;;  %v5004_v60 = vpop.permute.xlu0 %1609  ;;  %3831 = vmatpush3.bf16.msra.mxu0 %v4276_v13 }
  0x79   :  { %v5009_v19 = vrot.slane %v1614_v14, 4  ;;  %v1640_v12 = vrot.slane %v5004_v60, 4  ;;  %4087 = vmatpush3.bf16.msra.mxu1 %v4275_v6  ;;  %3832 = vmatprep.subr.bf16.mxu0 %v4279_v0  ;;  %v4300_v6 = vld [vmem:[%s5900_s1 + $0xc8] sm:$0xff]  }
  0x7a   :  { %4088 = vmatprep.subr.bf16.mxu1 %v4280_v23 }
  0x7b   :  { %v3414_v51 = vcombine.low %v1640_v12, %v5009_v19  ;;  %1351 = vmatmul.mubr.bf16.gmra.mxu0 %v3299_v31  ;;  %v1657_v33 = vsel %vm1548_vm1, %v1641_v28, %v5009_v19  ;;  %v1655_v45 = vsel %vm1548_vm1, %v1639_v22, %v1640_v12  ;;  %v4308_v22 = vld [vmem:[%s5900_s1 + $0xf0] sm:$0xff]  }
  0x7c   :  { %v1622_v30 = vpop.permute.xlu1 %1621  ;;  %v1618_v1 = vpop.permute.xlu0 %1617  ;;  %4081 = vmatmul.mubr.msk.bf16.gmra.mxu1 %vm311_vm0, %v3307_v26  ;;  %3833 = vmatpush3.bf16.msra.mxu0 %v4281_v62  ;;  %v5062_v61 = vsel %vm311_vm0, %v1657_v33, %v1614_v14  ;;  %v1656_v7 = vsel %vm311_vm0, %v1655_v45, %v5004_v60  ;;  %v4301_v14 = vld [vmem:[%s5900_s1 + $0x220] sm:$0xff]   ;;  %v4312_v45 = vld [vmem:[%s5900_s1 + $0xa8] sm:$0xff]  }
  0x7d   :  { %v5030_v42 = vrot.slane %v1618_v1, 4  ;;  %v5041_v2 = vrot.slane %v1622_v30, 4  ;;  %4089 = vmatpush3.bf16.msra.mxu1 %v4280_v23  ;;  %3834 = vmatprep.subr.bf16.mxu0 %v4282_v35  ;;  %v3413_v60 = vcombine.high %v1656_v7, %v5062_v61  ;;  %v4302_v23 = vld [vmem:[%s5900_s1 + $0x100] sm:$0xff]  }
  0x7e   :  { %4090 = vmatprep.subr.bf16.mxu1 %v4283_v43  ;;  %1358 = vmatprep.mubr.bf16.mxu0 %v3303_v46  ;;  %v4303_v62 = vld [vmem:[%s5900_s1 + $0x1e0] sm:$0xff]  }
  0x7f   :  { %v3602_v3 = vcombine.low %v5009_v19, %v5030_v42  ;;  %4092 = vmatprep.mubr.msk.bf16.mxu1 %vm311_vm0, %v3414_v51  ;;  %v3417_v32 = vcombine.low %v5030_v42, %v5041_v2  ;;  %v4305_v51 = vld [vmem:[%s5900_s1 + $0xf8] sm:$0xff]  }
  0x80   :  { %v1620_v9 = vpop.permute.xlu1 %1619  ;;  %v1616_v18 = vpop.permute.xlu0 %1615  ;;  %3835 = vmatpush3.bf16.msra.mxu0 %v4284_v4 }
  0x81   :  { %v1645_v31 = vrot.slane %v1620_v9, 4  ;;  %v1643_v5 = vrot.slane %v1616_v18, 4  ;;  %4091 = vmatpush3.bf16.msra.mxu1 %v4283_v43  ;;  %3836 = vmatprep.subr.bf16.mxu0 %v4287_v27  ;;  %v4307_v27 = vld [vmem:[%s5900_s1 + $0xb8] sm:$0xff]  }
  0x82   :  { %3876 = vmatprep.subr.bf16.mxu1 %v4288_v10  ;;  %v4311_v10 = vld [vmem:[%s5900_s1 + $0x130] sm:$0xff]  }
  0x83   :  { %v1661_v46 = vsel %vm1548_vm1, %v1645_v31, %v5041_v2  ;;  %v1659_v29 = vsel %vm1548_vm1, %v1643_v5, %v5030_v42  ;;  %1359 = vmatmul.mubr.bf16.gmra.mxu0 %v3302_v47  ;;  %v3412_v31 = vcombine.low %v1656_v7, %v5062_v61 }
  0x84   :  { %v5076_v15 = vsel %vm311_vm0, %v1659_v29, %v1618_v1  ;;  %v1626_v17 = vpop.permute.xlu1 %1625  ;;  %v1624_v24 = vpop.permute.xlu0 %1623  ;;  %v5094_v39 = vsel %vm311_vm0, %v1661_v46, %v1622_v30  ;;  %3837 = vmatpush3.bf16.msra.mxu0 %v4289_v8  ;;  %4093 = vmatmul.mubr.msk.bf16.vlgmr.msra.gmra.mxu1 %vm311_vm0, %v3417_v32  ;;  %v4304_v1 = vld [vmem:[%s5900_s1 + $0xc0] sm:$0xff]  }
  0x85   :  { %v3600_v40 = vcombine.low %v5062_v61, %v5076_v15  ;;  %v5083_v20 = vrot.slane %v1626_v17, 4  ;;  %v1647_v54 = vrot.slane %v1624_v24, 4  ;;  %3877 = vmatpush3.bf16.msra.mxu1 %v4290_v41  ;;  %3838 = vmatprep.subr.bf16.mxu0 %v4291_v34  ;;  %v3416_v8 = vcombine.high %v5076_v15, %v5094_v39  ;;  %v4309_v41 = vld [vmem:[%s5900_s1 + $0xb0] sm:$0xff]   ;;  %v4315_v24 = vld [vmem:[%s5900_s1 + $0x128] sm:$0xff]  }
  0x86   :  { %3878 = vmatprep.subr.bf16.mxu1 %v4292_v11  ;;  %1366 = vmatprep.mubr.bf16.mxu0 %v3306_v38  ;;  %v4310_v34 = vld [vmem:[%s5900_s1 + $0xe8] sm:$0xff]  }
  0x87   :  { %v3605_v21 = vcombine.low %v5041_v2, %v5083_v20  ;;  %v1663_v53 = vsel %vm1548_vm1, %v1647_v54, %v5083_v20 }
  0x88   :  { %v5109_v48 = vsel %vm311_vm0, %v1663_v53, %v1626_v17  ;;  %v1630_v36 = vpop.permute.xlu1 %1629  ;;  %v1628_v49 = vpop.permute.xlu0 %1627  ;;  %3839 = vmatpush3.bf16.msra.mxu0 %v4293_v37 }
  0x89   :  { %v5114_v47 = vrot.slane %v1630_v36, 4  ;;  %v3604_v55 = vcombine.high %v5094_v39, %v5109_v48  ;;  %v3603_v63 = vcombine.low %v5094_v39, %v5109_v48  ;;  %v1649_v56 = vrot.slane %v1628_v49, 4  ;;  %3879 = vmatpush3.bf16.msra.mxu1 %v4294_v59  ;;  %3840 = vmatprep.subr.bf16.mxu0 %v4297_v44  ;;  %v4313_v44 = vld [vmem:[%s5900_s1 + $0xe0] sm:$0xff]  }
  0x8a   :  { %3880 = vmatprep.subr.bf16.mxu1 %v4298_v50  ;;  %v4320_v49 = vld [vmem:[%s5900_s1 + $0x120] sm:$0xff]  }
  0x8b   :  { %v3420_v58 = vcombine.low %v5083_v20, %v5114_v47  ;;  %v1665_v26 = vsel %vm1548_vm1, %v1649_v56, %v5114_v47  ;;  %1367 = vmatmul.mubr.bf16.gmra.mxu0 %v3305_v25 }
  0x8c   :  { %v1634_v13 = vpop.permute.xlu1 %1633  ;;  %v1632_v12 = vpop.permute.xlu0 %1631  ;;  %3841 = vmatpush3.bf16.msra.mxu0 %v4299_v57  ;;  %1920 = vmatprep.mubr.bf16.mxu0 %v3413_v60  ;;  %v5162_v16 = vsel %vm311_vm0, %v1665_v26, %v1630_v36  ;;  %v3415_v36 = vcombine.low %v5076_v15, %v5094_v39 }
  0x8d   :  { %v5137_v0 = vrot.slane %v1634_v13, 4  ;;  %4096 = vmatprep.mubr.msk.bf16.mxu1 %vm311_vm0, %v3420_v58  ;;  %v1651_v28 = vrot.slane %v1632_v12, 4  ;;  %3881 = vmatpush3.bf16.msra.mxu1 %v4300_v6  ;;  %v3419_v50 = vcombine.high %v5109_v48, %v5162_v16  ;;  %v4316_v12 = vld [vmem:[%s5900_s1 + $0x398] sm:$0xff]  }
  0x8e   :  { %3842 = vmatprep.subr.bf16.mxu0 %v4301_v14  ;;  %3882 = vmatprep.subr.bf16.mxu1 %v4302_v23  ;;  %v4314_v14 = vld [vmem:[%s5900_s1 + $0xa0] sm:$0xff]   ;;  %v5240_v23 = vld [vmem:[%s5900_s1 + $0x3b8] sm:$0xff]  }
  0x8f   :  { %v3608_v30 = vcombine.low %v5114_v47, %v5137_v0  ;;  %v1667_v35 = vsel %vm1548_vm1, %v1651_v28, %v5137_v0 }
  0x90   :  { %v5165_v25 = vsel %vm311_vm0, %v1667_v35, %v1634_v13  ;;  %v1638_v43 = vpop.permute.xlu1 %1637  ;;  %v1636_v4 = vpop.permute.xlu0 %1635  ;;  %3843 = vmatpush3.bf16.msra.mxu0 %v4303_v62 }
  0x91   :  { %v5170_v33 = vrot.slane %v1638_v43, 4  ;;  %v3607_v9 = vcombine.high %v5162_v16, %v5165_v25  ;;  %v3606_v18 = vcombine.low %v5162_v16, %v5165_v25  ;;  %3883 = vmatpush3.bf16.msra.mxu1 %v4304_v1  ;;  %4100 = vmatprep.subr.bf16.mxu0 %v4306_v52  ;;  %v1653_v11 = vrot.slane %v1636_v4, 4 }
  0x92   :  { %3884 = vmatprep.subr.bf16.mxu1 %v4305_v51 }
  0x93   :  { %v3423_v5 = vcombine.low %v5137_v0, %v5170_v33  ;;  %1921 = vmatmul.mubr.bf16.vlgmr.msra.gmra.mxu0 %v3412_v31  ;;  %v1669_v57 = vsel %vm1548_vm1, %v1653_v11, %v5170_v33  ;;  %v4318_v31 = vld [vmem:[%s5900_s1 + $0x390] sm:$0xff]  }
  0x94   :  { %v5190_v32 = vpop.permute.xlu1 %1502  ;;  %1928 = vmatprep.mubr.bf16.mxu0 %v3416_v8  ;;  %4101 = vmatpush3.bf16.msra.mxu0 %v4306_v52  ;;  %v1501_v29 = vpop.permute.xlu0 %1500  ;;  %v5243_v26 = vsel %vm311_vm0, %v1669_v57, %v1638_v43  ;;  %v4317_v43 = vld [vmem:[%s5900_s1 + $0x358] sm:$0xff]  }
  0x95   :  { %4097 = vmatmul.mubr.msk.bf16.gmra.mxu1 %vm311_vm0, %v3423_v5  ;;  %v1533_v46 = vrot.slane %v5190_v32, 4  ;;  %v1532_v17 = vrot.slane %v1501_v29, 4  ;;  %4102 = vmatprep.subr.bf16.mxu0 %v4311_v10  ;;  %v3422_v5 = vcombine.high %v5165_v25, %v5243_v26 }
  0x96   :  { %3885 = vmatpush3.bf16.msra.mxu1 %v4307_v27  ;;  %v3418_v27 = vcombine.low %v5109_v48, %v5162_v16 }
  0x97   :  { %3886 = vmatprep.subr.bf16.mxu1 %v4308_v22  ;;  %v1549_v54 = vsel %vm1548_vm1, %v1532_v17, %v1533_v46 }
  0x98   :  { %v1507_v37 = vpop.permute.xlu1 %1506  ;;  %v1505_v38 = vpop.permute.xlu0 %1504  ;;  %4103 = vmatpush3.bf16.msra.mxu0 %v4311_v10  ;;  %v1551_v7 = vsel %vm311_vm0, %v1549_v54, %v5190_v32  ;;  %v4321_v54 = vld [vmem:[%s5900_s1 + $0x388] sm:$0xff]   ;;  %v4326_v32 = vld [vmem:[%s5900_s1 + $0x378] sm:$0xff]  }
  0x99   :  { %v5209_v53 = vrot.slane %v1507_v37, 4  ;;  %v1534_v59 = vrot.slane %v1505_v38, 4  ;;  %4104 = vmatprep.subr.bf16.mxu0 %v4315_v24 }
  0x9a   :  { %3887 = vmatpush3.bf16.msra.mxu1 %v4309_v41 }
  0x9b   :  { %3888 = vmatprep.subr.bf16.mxu1 %v4310_v34  ;;  %v1552_v56 = vsel %vm1548_vm1, %v1534_v59, %v5209_v53  ;;  %1929 = vmatmul.mubr.bf16.gmra.mxu0 %v3415_v36  ;;  %v4322_v59 = vld [vmem:[%s5900_s1 + $0x348] sm:$0xff]   ;;  %v4323_v36 = vld [vmem:[%s5900_s1 + $0x380] sm:$0xff]  }
  0x9c   :  { %v5228_v58 = vsel %vm311_vm0, %v1552_v56, %v1507_v37  ;;  %v1515_v6 = vpop.permute.xlu1 %1514  ;;  %1936 = vmatprep.mubr.bf16.mxu0 %v3419_v50  ;;  %v1511_v13 = vpop.permute.xlu0 %1510  ;;  %4105 = vmatpush3.bf16.msra.mxu0 %v4315_v24  ;;  %v4319_v24 = vld [vmem:[%s5900_s1 + $0x350] sm:$0xff]  }
  0x9d   :  { %v3449_v60 = vcombine.high %v1551_v7, %v5228_v58  ;;  %4106 = vmatprep.subr.bf16.mxu0 %v4320_v49  ;;  %v5245_v28 = vrot.slane %v1515_v6, 4  ;;  %v5247_v62 = vrot.slane %v1511_v13, 4  ;;  %v3448_v52 = vcombine.low %v1551_v7, %v5228_v58 }
  0x9e   :  { %3889 = vmatpush3.bf16.msra.mxu1 %v4312_v45  ;;  %v3421_v45 = vcombine.low %v5165_v25, %v5243_v26 }
  0x9f   :  { %3890 = vmatprep.subr.bf16.mxu1 %v4313_v44  ;;  %2226 = vmatprep.mubr.bf16.mxu1 %v3449_v60  ;;  %v3450_v44 = vcombine.low %v1533_v46, %v5209_v53 }
  0xa0   :  { %v1513_v1 = vpop.permute.xlu1 %1512  ;;  %v1509_v35 = vpop.permute.xlu0 %1508  ;;  %4107 = vmatpush3.bf16.msra.mxu0 %v4320_v49 }
  0xa1   :  { %v1538_v51 = vrot.slane %v1513_v1, 4  ;;  %v1536_v4 = vrot.slane %v1509_v35, 4  ;;  %4116 = vmatprep.subr.bf16.mxu0 %v5240_v23  ;;  %v3453_v1 = vcombine.low %v5247_v62, %v5245_v28 }
  0xa2   :  { %3891 = vmatpush3.bf16.msra.mxu1 %v4314_v14 }
  0xa3   :  { %3924 = vmatprep.subr.bf16.mxu1 %v4316_v12  ;;  %v1556_v10 = vsel %vm1548_vm1, %v1538_v51, %v5245_v28  ;;  %v1554_v8 = vsel %vm1548_vm1, %v1536_v4, %v5247_v62  ;;  %1937 = vmatmul.mubr.bf16.gmra.mxu0 %v3418_v27 }
  0xa4   :  { %v5266_v22 = vsel %vm311_vm0, %v1556_v10, %v1515_v6  ;;  %v5269_v29 = vsel %vm311_vm0, %v1554_v8, %v1511_v13  ;;  %v1523_v41 = vpop.permute.xlu1 %1522  ;;  %1944 = vmatprep.mubr.bf16.mxu0 %v3422_v5  ;;  %v1519_v17 = vpop.permute.xlu0 %1518  ;;  %v4324_v13 = vld [vmem:[%s5900_s1 + $0x340] sm:$0xff]   ;;  %v4327_v8 = vld [vmem:[%s5900_s1 + $0x338] sm:$0xff]  }
  0xa5   :  { %2227 = vmatmul.mubr.bf16.vlgmr.msra.gmra.mxu1 %v3448_v52  ;;  %v3452_v34 = vcombine.high %v5269_v29, %v5266_v22  ;;  %v3451_v38 = vcombine.low %v5269_v29, %v5266_v22  ;;  %v5292_v49 = vrot.slane %v1523_v41, 4  ;;  %v5295_v56 = vrot.slane %v1519_v17, 4 }
  0xa6   :  { %3925 = vmatpush3.bf16.msra.mxu1 %v4317_v43 }
  0xa7   :  { %3926 = vmatprep.subr.bf16.mxu1 %v4318_v31  ;;  %2234 = vmatprep.mubr.bf16.mxu1 %v3452_v34  ;;  %v3456_v35 = vcombine.low %v5295_v56, %v5292_v49 }
  0xa8   :  { %v1531_v11 = vpop.permute.xlu1 %1530  ;;  %v1527_v37 = vpop.permute.xlu0 %1526 }
  0xa9   :  { %v5303_v46 = vrot.slane %v1531_v11, 4  ;;  %v5305_v14 = vrot.slane %v1527_v37, 4 }
  0xaa   :  { %3927 = vmatpush3.bf16.msra.mxu1 %v4319_v24 }
  0xab   :  { %3928 = vmatprep.subr.bf16.mxu1 %v4321_v54  ;;  %1945 = vmatmul.mubr.bf16.gmra.mxu0 %v3421_v45 }
  0xac   :  { %v1521_v50 = vpop.permute.xlu1 %1520  ;;  %4108 = vmatprep.mubr.msk.bf16.mxu0 %vm311_vm0, %v3450_v44  ;;  %v1517_v7 = vpop.permute.xlu0 %1516 }
  0xad   :  { %2235 = vmatmul.mubr.bf16.gmra.mxu1 %v3451_v38  ;;  %v1542_v57 = vrot.slane %v1521_v50, 4  ;;  %v1540_v6 = vrot.slane %v1517_v7, 4  ;;  %v4334_v50 = vld [vmem:[%s5900_s1 + $0x3a0] sm:$0xff]   ;;  %v3526_v7 = vcombine.low %v5209_v53, %v5247_v62  ;;  %v4337_v53 = vld [vmem:[%s5900_s1 + $0x4d8] sm:$0xff]  }
  0xae   :  { %3929 = vmatpush3.bf16.msra.mxu1 %v4322_v59  ;;  %v4330_v59 = vld [vmem:[%s5900_s1 + $0x330] sm:$0xff]   ;;  %v4345_v62 = vld [vmem:[%s5900_s1 + $0x4f8] sm:$0xff]  }
  0xaf   :  { %3930 = vmatprep.subr.bf16.mxu1 %v4323_v36  ;;  %v1560_v60 = vsel %vm1548_vm1, %v1542_v57, %v5292_v49  ;;  %v1558_v12 = vsel %vm1548_vm1, %v1540_v6, %v5295_v56  ;;  %v4333_v36 = vld [vmem:[%s5900_s1 + $0x328] sm:$0xff]   ;;  %v4335_v57 = vld [vmem:[%s5900_s1 + $0x360] sm:$0xff]   ;;  %v3525_v6 = vcombine.high %v5228_v58, %v5269_v29 }
  0xb0   :  { %v5316_v52 = vsel %vm311_vm0, %v1560_v60, %v1523_v41  ;;  %v5319_v51 = vsel %vm311_vm0, %v1558_v12, %v1519_v17  ;;  %v1529_v4 = vpop.permute.xlu1 %1528  ;;  %v1525_v27 = vpop.permute.xlu0 %1524  ;;  %v4328_v41 = vld [vmem:[%s5900_s1 + $0x3b0] sm:$0xff]   ;;  %v3529_v60 = vcombine.low %v5245_v28, %v5295_v56  ;;  %v3524_v12 = vcombine.low %v5228_v58, %v5269_v29 }
  0xb1   :  { %v1546_v43 = vrot.slane %v1529_v4, 4  ;;  %v1544_v31 = vrot.slane %v1525_v27, 4  ;;  %v3455_v5 = vcombine.high %v5319_v51, %v5316_v52  ;;  %v3454_v10 = vcombine.low %v5319_v51, %v5316_v52  ;;  %v4329_v17 = vld [vmem:[%s5900_s1 + $0x370] sm:$0xff]  }
  0xb2   :  { %3931 = vmatpush3.bf16.msra.mxu1 %v4324_v13  ;;  %v4336_v13 = vld [vmem:[%s5900_s1 + $0x320] sm:$0xff]   ;;  %v3532_v4 = vcombine.low %v5292_v49, %v5305_v14  ;;  %v3528_v27 = vcombine.high %v5266_v22, %v5319_v51  ;;  %v4350_v28 = vld [vmem:[%s5900_s1 + $0x4f0] sm:$0xff]   ;;  %v4341_v49 = vld [vmem:[%s5900_s1 + $0x4c8] sm:$0xff]  }
  0xb3   :  { %3932 = vmatprep.subr.bf16.mxu1 %v4326_v32  ;;  %v1564_v24 = vsel %vm1548_vm1, %v1546_v43, %v5303_v46  ;;  %v1562_v34 = vsel %vm1548_vm1, %v1544_v31, %v5305_v14  ;;  %2242 = vmatprep.mubr.bf16.mxu1 %v3455_v5  ;;  %v4338_v32 = vld [vmem:[%s5900_s1 + $0x498] sm:$0xff]   ;;  %v4340_v58 = vld [vmem:[%s5900_s1 + $0x490] sm:$0xff]   ;;  %v4342_v43 = vld [vmem:[%s5900_s1 + $0x488] sm:$0xff]  }
  0xb4   :  { %4109 = vmatmul.mubr.msk.bf16.vlgmr.msra.gmra.mxu0 %vm311_vm0, %v3453_v1  ;;  %v5340_v54 = vsel %vm311_vm0, %v1562_v34, %v1527_v37  ;;  %v5344_v38 = vsel %vm311_vm0, %v1564_v24, %v1531_v11  ;;  %v4331_v37 = vld [vmem:[%s5900_s1 + $0x3a8] sm:$0xff]   ;;  %v3459_v11 = vcombine.low %v5305_v14, %v5303_v46  ;;  %v2327_v1 = vpop.permute.xlu0 %2326  ;;  %v2325_v56 = vpop.permute.xlu1 %2324  ;;  %v4346_v24 = vld [vmem:[%s5900_s1 + $0x4b8] sm:$0xff]  }
  0xb5   :  { %4117 = vmatpush3.bf16.msra.mxu0 %v5240_v23  ;;  %2243 = vmatmul.mubr.bf16.gmra.mxu1 %v3454_v10  ;;  %v3458_v45 = vcombine.high %v5340_v54, %v5344_v38  ;;  %v4332_v23 = vld [vmem:[%s5900_s1 + $0x368] sm:$0xff]   ;;  %v3457_v44 = vcombine.low %v5340_v54, %v5344_v38  ;;  %v2329_v29 = vrot.slane %v2327_v1, 4  ;;  %v2328_v31 = vrot.slane %v2325_v56, 4 }
  0xb6   :  { %3933 = vmatpush3.bf16.msra.mxu1 %v4327_v8  ;;  %4112 = vmatprep.mubr.msk.bf16.mxu0 %vm311_vm0, %v3456_v35  ;;  %v4339_v35 = vld [vmem:[%s5900_s1 + $0x4d0] sm:$0xff]   ;;  %v4353_v14 = vld [vmem:[%s5900_s1 + $0x4e8] sm:$0xff]   ;;  %v3527_v10 = vcombine.low %v5266_v22, %v5319_v51  ;;  %v4343_v8 = vld [vmem:[%s5900_s1 + $0x4c0] sm:$0xff]  }
  0xb7   :  { %4118 = vmatprep.subr.bf16.mxu0 %v4328_v41  ;;  %3934 = vmatprep.subr.bf16.mxu1 %v4329_v17  ;;  %v3535_v5 = vcombine.low %v5303_v46, %v2329_v29  ;;  %v3531_v17 = vcombine.high %v5316_v52, %v5340_v54  ;;  %v4356_v46 = vld [vmem:[%s5900_s1 + $0x4e0] sm:$0xff]   ;;  %v2330_v51 = vsel %vm1548_vm1, %v2328_v31, %v2329_v29 }
  0xb8   :  { %2250 = vmatprep.mubr.bf16.mxu1 %v3458_v45  ;;  %v4344_v22 = vld [vmem:[%s5900_s1 + $0x480] sm:$0xff]   ;;  %v2331_v34 = vsel %vm311_vm0, %v2330_v51, %v2327_v1  ;;  %v4347_v45 = vld [vmem:[%s5900_s1 + $0x478] sm:$0xff]   ;;  %v2667_v42 = vpop.permute.xlu0 %2666 }
  0xb9   :  { %4119 = vmatpush3.bf16.msra.mxu0 %v4328_v41  ;;  %v3601_v41 = vcombine.high %v5062_v61, %v5076_v15 }
  0xba   :  { %3935 = vmatpush3.bf16.msra.mxu1 %v4330_v59  ;;  %4120 = vmatprep.subr.bf16.mxu0 %v4331_v37  ;;  %v4348_v59 = vld [vmem:[%s5900_s1 + $0x4b0] sm:$0xff]  }
  0xbb   :  { %3936 = vmatprep.subr.bf16.mxu1 %v4332_v23  ;;  %v3534_v23 = vcombine.high %v5344_v38, %v2331_v34 }
  0xbc   :  { %4113 = vmatmul.mubr.msk.bf16.gmra.mxu0 %vm311_vm0, %v3459_v11  ;;  %v4349_v11 = vld [vmem:[%s5900_s1 + $0x470] sm:$0xff]  }
  0xbd   :  { %4121 = vmatpush3.bf16.msra.mxu0 %v4331_v37  ;;  %2251 = vmatmul.mubr.bf16.gmra.mxu1 %v3457_v44  ;;  %v3530_v37 = vcombine.low %v5316_v52, %v5340_v54  ;;  %v4352_v52 = vld [vmem:[%s5900_s1 + $0x468] sm:$0xff]   ;;  %v4354_v54 = vld [vmem:[%s5900_s1 + $0x4a0] sm:$0xff]  }
  0xbe   :  { %4124 = vmatprep.mubr.msk.bf16.mxu0 %vm311_vm0, %v3526_v7  ;;  %3937 = vmatpush3.bf16.msra.mxu1 %v4333_v36  ;;  %v4351_v36 = vld [vmem:[%s5900_s1 + $0x4a8] sm:$0xff]  }
  0xbf   :  { %2560 = vmatprep.mubr.bf16.mxu1 %v3525_v6  ;;  %4122 = vmatprep.subr.bf16.mxu0 %v4334_v50 }
  0xc0   :  { %3938 = vmatprep.subr.bf16.mxu1 %v4335_v57  ;;  %v4355_v57 = vld [vmem:[%s5900_s1 + $0x460] sm:$0xff]  }
  0xc1   :  { %4123 = vmatpush3.bf16.msra.mxu0 %v4334_v50  ;;  %v3533_v50 = vcombine.low %v5344_v38, %v2331_v34  ;;  %v2669_v38 = vpop.permute.xlu1 %2668 }
  0xc2   :  { %3939 = vmatpush3.bf16.msra.mxu1 %v4336_v13  ;;  %3972 = vmatprep.subr.bf16.mxu0 %v4337_v53  ;;  %v2671_v61 = vrot.slane %v2669_v38, 4 }
  0xc3   :  { %4132 = vmatprep.subr.bf16.mxu1 %v4345_v62 }
  0xc4   :  { %4125 = vmatmul.mubr.msk.bf16.vlgmr.msra.gmra.mxu0 %vm311_vm0, %v3529_v60  ;;  %v3611_v2 = vcombine.low %v5170_v33, %v2671_v61 }
  0xc5   :  { %3973 = vmatpush3.bf16.msra.mxu0 %v4338_v32  ;;  %2561 = vmatmul.mubr.bf16.vlgmr.msra.gmra.mxu1 %v3524_v12 }
  0xc6   :  { %4128 = vmatprep.mubr.msk.bf16.mxu0 %vm311_vm0, %v3532_v4  ;;  %2568 = vmatprep.mubr.bf16.mxu1 %v3528_v27 }
  0xc7   :  { %3974 = vmatprep.subr.bf16.mxu0 %v4339_v35  ;;  %4133 = vmatpush3.bf16.msra.mxu1 %v4345_v62 }
  0xc8   :  { %4134 = vmatprep.subr.bf16.mxu1 %v4350_v28 }
  0xc9   :  { %3975 = vmatpush3.bf16.msra.mxu0 %v4340_v58 }
  0xca   :  { %3976 = vmatprep.subr.bf16.mxu0 %v4341_v49 }
  0xcb   :  { %4135 = vmatpush3.bf16.msra.mxu1 %v4350_v28 }
  0xcc   :  { %4129 = vmatmul.mubr.msk.bf16.gmra.mxu0 %vm311_vm0, %v3535_v5  ;;  %4136 = vmatprep.subr.bf16.mxu1 %v4353_v14 }
  0xcd   :  { %3977 = vmatpush3.bf16.msra.mxu0 %v4342_v43  ;;  %2569 = vmatmul.mubr.bf16.gmra.mxu1 %v3527_v10 }
  0xce   :  { %2902 = vmatprep.mubr.bf16.mxu0 %v3601_v41  ;;  %2576 = vmatprep.mubr.bf16.mxu1 %v3531_v17 }
  0xcf   :  { %3978 = vmatprep.subr.bf16.mxu0 %v4343_v8  ;;  %4137 = vmatpush3.bf16.msra.mxu1 %v4353_v14 }
  0xd0   :  { %4138 = vmatprep.subr.bf16.mxu1 %v4356_v46 }
  0xd1   :  { %3979 = vmatpush3.bf16.msra.mxu0 %v4344_v22 }
  0xd2   :  { %3980 = vmatprep.subr.bf16.mxu0 %v4346_v24 }
  0xd3   :  { %4139 = vmatpush3.bf16.msra.mxu1 %v4356_v46 }
  0xd4   :  { %v5454_v44 = vpop.f32.mrf.mxu1 }
  0xd5   :  { %3981 = vmatpush3.bf16.msra.mxu0 %v4347_v45  ;;  %2577 = vmatmul.mubr.bf16.gmra.mxu1 %v3530_v37 }
  0xd6   :  { %2584 = vmatprep.mubr.bf16.mxu1 %v3534_v23  ;;  %3982 = vmatprep.subr.bf16.mxu0 %v4348_v59  ;;  %v5463_v7 = vpop.f32.mrf.mxu1 }
  0xd8   :  { %v5472_v6 = vpop.f32.mrf.mxu1 }
  0xd9   :  { %3983 = vmatpush3.bf16.msra.mxu0 %v4349_v11 }
  0xda   :  { %3984 = vmatprep.subr.bf16.mxu0 %v4351_v36  ;;  %v5474_v13 = vpop.f32.mrf.mxu1 }
  0xdc   :  { %v5488_v19 = vpop.f32.mrf.mxu1 }
  0xdd   :  { %3985 = vmatpush3.bf16.msra.mxu0 %v4352_v52  ;;  %2585 = vmatmul.mubr.bf16.gmra.mxu1 %v3533_v50  ;;  %5903 = vst [vmem:[#allocation2_spill] sm:$0xff] %v5488_v19 }
  0xde   :  { %4140 = vmatprep.mubr.msk.bf16.mxu1 %vm311_vm0, %v3602_v3  ;;  %3986 = vmatprep.subr.bf16.mxu0 %v4354_v54 }
  0xe1   :  { %3987 = vmatpush3.bf16.msra.mxu0 %v4355_v57 }
  0xe3   :  { %v5479_v53 = vpop.f32.mrf.mxu0 }
  0xe4   :  { %2903 = vmatmul.mubr.bf16.vlgmr.msra.gmra.mxu0 %v3600_v40  ;;  %v2670_v40 = vrot.slane %v2667_v42, 4 }
  0xe5   :  { %2910 = vmatprep.mubr.bf16.mxu0 %v3604_v55  ;;  %4141 = vmatmul.mubr.msk.bf16.vlgmr.msra.gmra.mxu1 %vm311_vm0, %v3605_v21  ;;  %v5494_v3 = vpop.f32.mrf.mxu0  ;;  %v5498_v55 = vpop.f32.mrf.mxu1 }
  0xe6   :  { %4144 = vmatprep.mubr.msk.bf16.mxu1 %vm311_vm0, %v3608_v30  ;;  %v2672_v21 = vsel %vm1548_vm1, %v2670_v40, %v2671_v61 }
  0xe7   :  { %v5496_v15 = vpop.f32.mrf.mxu0  ;;  %v5513_v47 = vpop.f32.mrf.mxu1  ;;  %v2673_v33 = vsel %vm311_vm0, %v2672_v21, %v2669_v38 }
  0xe8   :  { %5904 = vst [vmem:[#allocation3_spill] sm:$0xff] %v5513_v47  ;;  %v3609_v27 = vcombine.low %v5243_v26, %v2673_v33 }
  0xe9   :  { %v5500_v62 = vpop.f32.mrf.mxu0  ;;  %v5520_v39 = vpop.f32.mrf.mxu1 }
  0xea   :  { %5905 = vst [vmem:[#allocation4_spill] sm:$0xff] %v5520_v39 }
  0xeb   :  { %v5506_v20 = vpop.f32.mrf.mxu0 }
  0xec   :  { %2911 = vmatmul.mubr.bf16.gmra.mxu0 %v3603_v63  ;;  %v3610_v63 = vcombine.high %v5243_v26, %v2673_v33 }
  0xed   :  { %2918 = vmatprep.mubr.bf16.mxu0 %v3607_v9  ;;  %4145 = vmatmul.mubr.msk.bf16.gmra.mxu1 %vm311_vm0, %v3611_v2  ;;  %v5515_v0 = vpop.f32.mrf.mxu0 }
  0xef   :  { %v5517_v30 = vpop.f32.mrf.mxu0 }
  0xf1   :  { %v5522_v48 = vpop.f32.mrf.mxu0 }
  0xf3   :  { %v5528_v9 = vpop.f32.mrf.mxu0 }
  0xf4   :  { %2919 = vmatmul.mubr.bf16.gmra.mxu0 %v3606_v18  ;;  %v3700_v32 = vpop.f32.mrf.mxu1 }
  0xf5   :  { %2926 = vmatprep.mubr.bf16.mxu0 %v3610_v63  ;;  %v5530_v60 = vpop.f32.mrf.mxu0 }
  0xf6   :  { %v3701_v12 = vpop.f32.mrf.mxu1 }
  0xf7   :  { %v5532_v1 = vpop.f32.mrf.mxu0 }
  0xf8   :  { %v3703_v35 = vpop.f32.mrf.mxu1 }
  0xf9   :  { %v5534_v4 = vpop.f32.mrf.mxu0 }
  0xfa   :  { %v3704_v28 = vpop.f32.mrf.mxu1 }
  0xfb   :  { %v5537_v58 = vpop.f32.mrf.mxu0 }
  0xfc   :  { %2927 = vmatmul.mubr.bf16.gmra.mxu0 %v3609_v27  ;;  %v5539_v16 = vpop.f32.mrf.mxu1 }
  0xfd   :  { %v5541_v25 = vpop.f32.mrf.mxu0 }
  0xfe   :  { %v5543_v18 = vpop.f32.mrf.mxu1 }
  0xff   :  { %v5545_v29 = vpop.f32.mrf.mxu0 }
 0x100   :  { %5906 = vst [vmem:[#allocation5_spill] sm:$0xff] %v5545_v29  ;;  %v5547_v49 = vpop.f32.mrf.mxu1 }
 0x101   :  { %v5549_v56 = vpop.f32.mrf.mxu0 }
 0x102   :  { %5907 = vst [vmem:[#allocation6_spill] sm:$0xff] %v5549_v56  ;;  %v5551_v14 = vpop.f32.mrf.mxu1  ;;  %v3702_v56 = vadd.f32 %v3701_v12, %v3700_v32  ;;  %v3660_v32 = vadd.f32 %v5515_v0, %v5506_v20 }
 0x103   :  { %v5553_v43 = vpop.f32.mrf.mxu0  ;;  %v3711_v0 = vadd.f32 %v5551_v14, %v5547_v49 }
 0x104   :  { %v5555_v26 = vpop.f32.mrf.mxu1  ;;  %v432_v20 = vadd.f32 %v5454_v44, %v3660_v32 }
 0x105   :  { %v745_v31 = vpop.f32.mrf.mxu0 }
 0x106   :  { %v5557_v5 = vpop.f32.mrf.mxu1 }
 0x107   :  { %v5559_v10 = vpop.f32.mrf.mxu0  ;;  %v3714_v14 = vadd.f32 %v5557_v5, %v5555_v26 }
 0x108   :  { %v5561_v8 = vpop.f32.mrf.mxu1 }
 0x109   :  { %v5563_v41 = vpop.f32.mrf.mxu0 }
 0x10a   :  { %v5565_v17 = vpop.f32.mrf.mxu1 }
 0x10b   :  { %v5567_v46 = vpop.f32.mrf.mxu0 }
 0x10c   :  { %5908 = vst [vmem:[#allocation7_spill] sm:$0xff] %v5567_v46  ;;  %v5569_v22 = vpop.f32.mrf.mxu1 }
 0x10d   :  { %5909 = vst [vmem:[#allocation8_spill] sm:$0xff] %v5569_v22  ;;  %v5571_v51 = vpop.f32.mrf.mxu0  ;;  %v3657_v22 = vadd.f32 %v5500_v62, %v5496_v15  ;;  %v3663_v15 = vadd.f32 %v5522_v48, %v5517_v30  ;;  %v3708_v62 = vadd.f32 %v5543_v18, %v5539_v16 }
 0x10e   :  { %5910 = vst [vmem:[#allocation9_spill] sm:$0xff] %v5571_v51  ;;  %v5573_v24 = vpop.f32.mrf.mxu1 }
 0x10f   :  { %5911 = vst [vmem:[#allocation10_spill] sm:$0xff] %v5573_v24  ;;  %v5575_v34 = vpop.f32.mrf.mxu0  ;;  %v689_v18 = vadd.f32 %v3708_v62, %v432_v20  ;;  %v5923_v20 = vld [vmem:[#allocation2_spill] sm:$0xff] }
 0x110   :  { %5912 = vst [vmem:[#allocation11_spill] sm:$0xff] %v5575_v34  ;;  %v5577_v45 = vpop.f32.mrf.mxu1 }
 0x111   :  { %5913 = vst [vmem:[#allocation12_spill] sm:$0xff] %v5577_v45  ;;  %v5581_v37 = vpop.f32.mrf.mxu0 }
 0x112   :  { %v5579_v59 = vpop.f32.mrf.mxu1  ;;  %5915 = vst [vmem:[#allocation14_spill] sm:$0xff] %v5581_v37 }
 0x113   :  { %5914 = vst [vmem:[#allocation13_spill] sm:$0xff] %v5579_v59  ;;  %v4062_v36 = vpop.f32.mrf.mxu0  ;;  %v3654_v59 = vadd.f32 %v5494_v3, %v5479_v53 }
 0x114   :  { %v3748_v23 = vpop.f32.mrf.mxu1 }
 0x115   :  { %v1073_v50 = vpop.f32.mrf.mxu0  ;;  %v424_v24 = vadd.f32 %v3654_v59, %v5463_v7 }
 0x116   :  { %v3749_v11 = vpop.f32.mrf.mxu1 }
 0x117   :  { %v5583_v42 = vpop.f32.mrf.mxu0  ;;  %v3750_v29 = vadd.f32 %v3749_v11, %v3748_v23  ;;  %v681_v39 = vadd.f32 %v3702_v56, %v424_v24  ;;  %v427_v23 = vadd.f32 %v3657_v22, %v5474_v13  ;;  %v3666_v13 = vadd.f32 %v5530_v60, %v5528_v9 }
 0x118   :  { %v3751_v52 = vpop.f32.mrf.mxu1  ;;  %v754_v60 = vadd.f32 %v5553_v43, %v689_v18 }
 0x119   :  { %v1076_v2 = vpop.f32.mrf.mxu0  ;;  %v746_v11 = vadd.f32 %v745_v31, %v681_v39  ;;  %v440_v9 = vadd.f32 %v3666_v13, %v5498_v55 }
 0x11a   :  { %v3752_v54 = vpop.f32.mrf.mxu1 }
 0x11b   :  { %v5587_v33 = vpop.f32.mrf.mxu0  ;;  %v3753_v53 = vadd.f32 %v3752_v54, %v3751_v52 }
 0x11c   :  { %v3754_v57 = vpop.f32.mrf.mxu1  ;;  %5916 = vst [vmem:[#allocation15_spill] sm:$0xff] %v5587_v33 }
 0x11d   :  { %v5593_v34 = vpop.f32.mrf.mxu0  ;;  %v1077_v24 = vadd.f32 %v3753_v53, %v1076_v2 }
 0x11e   :  { %v3755_v38 = vpop.f32.mrf.mxu1 }
 0x11f   :  { %v5599_v37 = vpop.f32.mrf.mxu0 }
 0x120   :  { %v3757_v61 = vpop.f32.mrf.mxu1  ;;  %5919 = vst [vmem:[#allocation18_spill] sm:$0xff] %v5599_v37  ;;  %v3705_v37 = vadd.f32 %v3704_v28, %v3703_v35  ;;  %v3756_v35 = vadd.f32 %v3755_v38, %v3754_v57 }
 0x121   :  { %v5607_v51 = vpop.f32.mrf.mxu0 }
 0x122   :  { %v3758_v40 = vpop.f32.mrf.mxu1  ;;  %v1082_v31 = vadd.f32 %v4062_v36, %v3756_v35 }
 0x124   :  { %v5585_v21 = vpop.f32.mrf.mxu1 }
 0x126   :  { %v5589_v63 = vpop.f32.mrf.mxu1 }
 0x127   :  { %v3762_v55 = vadd.f32 %v5589_v63, %v5585_v21 }
 0x128   :  { %v5591_v27 = vpop.f32.mrf.mxu1 }
 0x12a   :  { %v5595_v46 = vpop.f32.mrf.mxu1 }
 0x12b   :  { %5917 = vst [vmem:[#allocation16_spill] sm:$0xff] %v5595_v46  ;;  %v1074_v46 = vadd.f32 %v3750_v29, %v1073_v50  ;;  %v684_v29 = vadd.f32 %v3705_v37, %v427_v23  ;;  %v435_v37 = vadd.f32 %v5472_v6, %v3663_v15  ;;  %v3672_v23 = vadd.f32 %v5541_v25, %v5537_v58 }
 0x12c   :  { %v5597_v47 = vpop.f32.mrf.mxu1 }
 0x12d   :  { %5918 = vst [vmem:[#allocation17_spill] sm:$0xff] %v5597_v47  ;;  %v1104_v56 = vadd.f32 %v1074_v46, %v746_v11  ;;  %v749_v30 = vadd.f32 %v5563_v41, %v684_v29  ;;  %v3759_v46 = vadd.f32 %v3758_v40, %v3757_v61  ;;  %v692_v41 = vadd.f32 %v3711_v0, %v435_v37  ;;  %v5925_v0 = vld [vmem:[#allocation10_spill] sm:$0xff] }
 0x12e   :  { %v5603_v45 = vpop.f32.mrf.mxu1  ;;  %v1106_v61 = vadd.f32 %v1082_v31, %v754_v60  ;;  %v448_v13 = vadd.f32 %v5923_v20, %v3672_v23 }
 0x12f   :  { %v1105_v54 = vadd.f32 %v1077_v24, %v749_v30  ;;  %v1085_v40 = vadd.f32 %v5583_v42, %v3759_v46  ;;  %v757_v11 = vadd.f32 %v5559_v10, %v692_v41  ;;  %v5922_v24 = vld [vmem:[#allocation4_spill] sm:$0xff] }
 0x130   :  { %v5605_v33 = vpop.f32.mrf.mxu1 }
 0x131   :  { %5920 = vst [vmem:[#allocation19_spill] sm:$0xff] %v5605_v33  ;;  %v1107_v62 = vadd.f32 %v1085_v40, %v757_v11  ;;  %v5932_v40 = vld [vmem:[#allocation14_spill] sm:$0xff] }
 0x132   :  { %v5612_v19 = vpop.f32.mrf.mxu1 }
 0x133   :  { %v3796_v47 = vpop.f32.mrf.mxu0 }
 0x134   :  { %v4078_v3 = vpop.f32.mrf.mxu1  ;;  %v5929_v37 = vld [vmem:[#allocation17_spill] sm:$0xff] }
 0x135   :  { %v3797_v12 = vpop.f32.mrf.mxu0 }
 0x136   :  { %v3798_v33 = vadd.f32 %v3797_v12, %v3796_v47  ;;  %v1409_v7 = vpop.f32.mrf.mxu1  ;;  %v3669_v12 = vadd.f32 %v5534_v4, %v5532_v1  ;;  %v1090_v1 = vadd.f32 %v3762_v55, %v5593_v34  ;;  %v5921_v4 = vld [vmem:[#allocation16_spill] sm:$0xff]  ;;  %v5927_v34 = vld [vmem:[#allocation5_spill] sm:$0xff] }
 0x137   :  { %v3799_v28 = vpop.f32.mrf.mxu0  ;;  %v3765_v58 = vadd.f32 %v5921_v4, %v5591_v27 }
 0x138   :  { %v1410_v59 = vadd.f32 %v3798_v33, %v1409_v7  ;;  %v4079_v52 = vpop.f32.mrf.mxu1  ;;  %v697_v7 = vadd.f32 %v3714_v14, %v440_v9 }
 0x139   :  { %v3800_v47 = vpop.f32.mrf.mxu0 }
 0x13a   :  { %v1440_v39 = vadd.f32 %v1410_v59, %v1104_v56  ;;  %v3801_v48 = vadd.f32 %v3800_v47, %v3799_v28  ;;  %v1412_v16 = vpop.f32.mrf.mxu1  ;;  %v443_v59 = vadd.f32 %v3669_v12, %v5922_v24  ;;  %v5924_v47 = vld [vmem:[#allocation8_spill] sm:$0xff]  ;;  %v5935_v12 = vld [vmem:[#allocation19_spill] sm:$0xff] }
 0x13b   :  { %v3802_v22 = vpop.f32.mrf.mxu0  ;;  %v3720_v30 = vadd.f32 %v5925_v0, %v5924_v47  ;;  %v3771_v23 = vadd.f32 %v5612_v19, %v5935_v12  ;;  %v5937_v19 = vld [vmem:[#allocation18_spill] sm:$0xff]  ;;  %v5938_v47 = vld [vmem:[#allocation11_spill] sm:$0xff] }
 0x13c   :  { %v1448_v44 = vpack.c.bf16 %v1440_v39, %v1440_v39  ;;  %v1413_v50 = vadd.f32 %v3801_v48, %v1412_v16  ;;  %v5628_v57 = vpop.f32.mrf.mxu1  ;;  %v1478_v2 = vmul.f32 %v1440_v39, %v1440_v39  ;;  %v5928_v48 = vld [vmem:[#allocation6_spill] sm:$0xff] }
 0x13d   :  { %v3803_v49 = vpop.f32.mrf.mxu0  ;;  %v3675_v16 = vadd.f32 %v5928_v48, %v5927_v34  ;;  %v705_v41 = vadd.f32 %v3720_v30, %v448_v13 }
 0x13e   :  { %1456 = vst [vmem:[%s5901_s2] sm:$0xf] %v1448_v44  ;;  %v1441_v36 = vadd.f32 %v1413_v50, %v1105_v54  ;;  %v3804_v6 = vadd.f32 %v3803_v49, %v3802_v22  ;;  %v1425_v38 = vpop.f32.mrf.mxu1  ;;  %v1093_v22 = vadd.f32 %v3765_v58, %v5607_v51  ;;  %v3768_v54 = vadd.f32 %v5603_v45, %v5929_v37 }
 0x13f   :  { %v3805_v43 = vpop.f32.mrf.mxu0 }
 0x140   :  { %v1449_v33 = vpack.c.bf16 %v1441_v36, %v1441_v36  ;;  %v1464_v53 = vadd.f32 %v1441_v36, %v1440_v39  ;;  %v1479_v32 = vmul.f32 %v1441_v36, %v1441_v36  ;;  %v1418_v26 = vadd.f32 %v4078_v3, %v3804_v6  ;;  %v5640_v5 = vpop.f32.mrf.mxu1  ;;  %v5930_v36 = vld [vmem:[#allocation12_spill] sm:$0xff]  ;;  %v5931_v6 = vld [vmem:[#allocation13_spill] sm:$0xff] }
 0x141   :  { %v3806_v42 = vpop.f32.mrf.mxu0  ;;  %v3717_v3 = vadd.f32 %v5565_v17, %v5561_v8  ;;  %v5926_v8 = vld [vmem:[#allocation9_spill] sm:$0xff] }
 0x142   :  { %1457 = vst [vmem:[%s5901_s2 + $0x8] sm:$0xf] %v1449_v33  ;;  %v1486_v21 = vadd.f32 %v1479_v32, %v1478_v2  ;;  %v1442_v63 = vadd.f32 %v1418_v26, %v1106_v61  ;;  %v3807_v15 = vadd.f32 %v3806_v42, %v3805_v43  ;;  %v1428_v56 = vpop.f32.mrf.mxu1  ;;  %v762_v17 = vadd.f32 %v5926_v8, %v697_v7  ;;  %v5933_v33 = vld [vmem:[#allocation3_spill] sm:$0xff] }
 0x143   :  { %v3808_v25 = vpop.f32.mrf.mxu0  ;;  %v700_v31 = vadd.f32 %v3717_v3, %v443_v59  ;;  %v3723_v61 = vadd.f32 %v5931_v6, %v5930_v36  ;;  %v5936_v3 = vld [vmem:[#allocation7_spill] sm:$0xff] }
 0x144   :  { %v1450_v10 = vpack.c.bf16 %v1442_v63, %v1442_v63  ;;  %v1465_v35 = vadd.f32 %v1464_v53, %v1442_v63  ;;  %v1480_v28 = vmul.f32 %v1442_v63, %v1442_v63  ;;  %v1421_v29 = vadd.f32 %v4079_v52, %v3807_v15  ;;  %v5668_v14 = vpop.f32.mrf.mxu1 }
 0x145   :  { %v3809_v39 = vpop.f32.mrf.mxu0  ;;  %v1108_v46 = vadd.f32 %v1090_v1, %v762_v17  ;;  %v765_v55 = vadd.f32 %v5932_v40, %v700_v31  ;;  %v451_v53 = vadd.f32 %v5933_v33, %v3675_v16 }
 0x146   :  { %1458 = vst [vmem:[%s5901_s2 + $0x10] sm:$0xf] %v1450_v10  ;;  %v1487_v27 = vadd.f32 %v1486_v21, %v1480_v28  ;;  %v1443_v52 = vadd.f32 %v1421_v29, %v1107_v62  ;;  %v3810_v18 = vadd.f32 %v3809_v39, %v3808_v25  ;;  %v5680_v15 = vpop.f32.mrf.mxu1  ;;  %v770_v62 = vadd.f32 %v5936_v3, %v705_v41 }
 0x147   :  { %v3811_v44 = vpop.f32.mrf.mxu0  ;;  %v1109_v32 = vadd.f32 %v1093_v22, %v765_v55  ;;  %v708_v1 = vadd.f32 %v3723_v61, %v451_v53  ;;  %v1101_v28 = vadd.f32 %v5937_v19, %v3771_v23 }
 0x148   :  { %v1451_v50 = vpack.c.bf16 %v1443_v52, %v1443_v52  ;;  %v1466_v9 = vadd.f32 %v1465_v35, %v1443_v52  ;;  %v1481_v60 = vmul.f32 %v1443_v52, %v1443_v52  ;;  %v1426_v49 = vadd.f32 %v3810_v18, %v1425_v38  ;;  %v5934_v38 = vld [vmem:[#allocation15_spill] sm:$0xff]  ;;  %v5687_v20 = vpop.f32.mrf.mxu1 }
 0x149   :  { %v3812_v2 = vpop.f32.mrf.mxu0  ;;  %v1098_v26 = vadd.f32 %v5934_v38, %v3768_v54  ;;  %v773_v0 = vadd.f32 %v5938_v47, %v708_v1 }
 0x14a   :  { %1459 = vst [vmem:[%s5901_s2 + $0x18] sm:$0xf] %v1451_v50  ;;  %v1488_v51 = vadd.f32 %v1487_v27, %v1481_v60  ;;  %v1444_v45 = vadd.f32 %v1426_v49, %v1108_v46  ;;  %v3813_v43 = vadd.f32 %v3812_v2, %v3811_v44  ;;  %v5696_v18 = vpop.f32.mrf.mxu1 }
 0x14b   :  { %v3814_v11 = vpop.f32.mrf.mxu0  ;;  %v1110_v35 = vadd.f32 %v1098_v26, %v770_v62  ;;  %v1111_v34 = vadd.f32 %v1101_v28, %v773_v0 }
 0x14c   :  { %v1452_v42 = vpack.c.bf16 %v1444_v45, %v1444_v45  ;;  %v1467_v7 = vadd.f32 %v1466_v9, %v1444_v45  ;;  %v1482_v21 = vmul.f32 %v1444_v45, %v1444_v45  ;;  %v1429_v63 = vadd.f32 %v3813_v43, %v1428_v56 }
 0x14d   :  { %v3815_v4 = vpop.f32.mrf.mxu0 }
 0x14e   :  { %1460 = vst [vmem:[%s5901_s2 + $0x20] sm:$0xf] %v1452_v42  ;;  %v1489_v58 = vadd.f32 %v1488_v51, %v1482_v21  ;;  %v1445_v25 = vadd.f32 %v1429_v63, %v1109_v32  ;;  %v3816_v10 = vadd.f32 %v3815_v4, %v3814_v11 }
 0x14f   :  { %v3817_v29 = vpop.f32.mrf.mxu0 }
 0x150   :  { %v1453_v24 = vpack.c.bf16 %v1445_v25, %v1445_v25  ;;  %v1468_v59 = vadd.f32 %v1467_v7, %v1445_v25  ;;  %v1483_v56 = vmul.f32 %v1445_v25, %v1445_v25  ;;  %v1434_v13 = vadd.f32 %v5628_v57, %v3816_v10 }
 0x151   :  { %v3818_v30 = vpop.f32.mrf.mxu0 }
 0x152   :  { %1461 = vst [vmem:[%s5901_s2 + $0x28] sm:$0xf] %v1453_v24  ;;  %v1490_v8 = vadd.f32 %v1489_v58, %v1483_v56  ;;  %v1446_v17 = vadd.f32 %v1434_v13, %v1110_v35  ;;  %v3819_v39 = vadd.f32 %v3818_v30, %v3817_v29 }
 0x153   :  { %v5694_v48 = vpop.f32.mrf.mxu0 }
 0x154   :  { %v1454_v16 = vpack.c.bf16 %v1446_v17, %v1446_v17  ;;  %v1469_v27 = vadd.f32 %v1468_v59, %v1446_v17  ;;  %v1484_v52 = vmul.f32 %v1446_v17, %v1446_v17  ;;  %v1437_v57 = vadd.f32 %v5640_v5, %v3819_v39 }
 0x155   :  { %v5699_v31 = vpop.f32.mrf.mxu0  ;;  %v5704_v37 = vpop.f32.mrf.mxu1 }
 0x156   :  { %1462 = vst [vmem:[%s5901_s2 + $0x30] sm:$0xf] %v1454_v16  ;;  %v1491_v46 = vadd.f32 %v1490_v8, %v1484_v52  ;;  %v1447_v22 = vadd.f32 %v1437_v57, %v1111_v34  ;;  %5939 = vst [vmem:[#allocation16_spill] sm:$0xff] %v5704_v37 }
 0x157   :  { %v5706_v54 = vpop.f32.mrf.mxu0  ;;  %v5713_v41 = vpop.f32.mrf.mxu1 }
 0x158   :  { %v1455_v44 = vpack.c.bf16 %v1447_v22, %v1447_v22  ;;  %v1470_v50 = vadd.f32 %v1469_v27, %v1447_v22  ;;  %v1485_v9 = vmul.f32 %v1447_v22, %v1447_v22 }
 0x159   :  { %v5708_v60 = vpop.f32.mrf.mxu0  ;;  %v5719_v51 = vpop.f32.mrf.mxu1 }
 0x15a   :  { %1463 = vst [vmem:[%s5901_s2 + $0x38] sm:$0xf] %v1455_v44  ;;  %v1471_v5 = vrot.slane %v1470_v50, 4  ;;  %v1492_v49 = vadd.f32 %v1491_v46, %v1485_v9  ;;  %5940 = vst [vmem:[#allocation4_spill] sm:$0xff] %v5719_v51 }
 0x15b   :  { %v5715_v36 = vpop.f32.mrf.mxu0  ;;  %v5725_v26 = vpop.f32.mrf.mxu1 }
 0x15c   :  { %v1472_v6 = vadd.f32 %v1471_v5, %v1470_v50  ;;  %v1493_v61 = vrot.slane %v1492_v49, 4  ;;  %5941 = vst [vmem:[#allocation2_spill] sm:$0xff] %v5725_v26 }
 0x15d   :  { %v5717_v40 = vpop.f32.mrf.mxu0 }
 0x15e   :  { %v1473_v55 = vrot.slane %v1472_v6, 2  ;;  %v1494_v2 = vadd.f32 %v1493_v61, %v1492_v49 }
 0x15f   :  { %v5721_v45 = vpop.f32.mrf.mxu0 }
 0x160   :  { %v1474_v43 = vadd.f32 %v1473_v55, %v1472_v6  ;;  %v1495_v33 = vrot.slane %v1494_v2, 2 }
 0x161   :  { %v5723_v53 = vpop.f32.mrf.mxu0 }
 0x162   :  { %v1475_v32 = vrot.slane %v1474_v43, 1  ;;  %v1496_v38 = vadd.f32 %v1495_v33, %v1494_v2 }
 0x163   :  { %v5727_v12 = vpop.f32.mrf.mxu0 }
 0x164   :  { %v1476_v23 = vadd.f32 %v1475_v32, %v1474_v43  ;;  %v1497_v11 = vrot.slane %v1496_v38, 1 }
 0x165   :  { %v3892_v42 = vpop.f32.mrf.mxu1  ;;  %v5729_v7 = vpop.f32.mrf.mxu0 }
 0x166   :  { %1477 = vst [vmem:[%s5902_s3] sm:$0x1] %v1476_v23  ;;  %v1498_v21 = vadd.f32 %v1497_v11, %v1496_v38 }
 0x167   :  { %v3893_v63 = vpop.f32.mrf.mxu1  ;;  %v5734_v3 = vpop.f32.mrf.mxu0 }
 0x168   :  { %1499 = vst [vmem:[%s5902_s3 + $0x1] sm:$0x1] %v1498_v21 }
 0x169   :  { %v3895_v62 = vpop.f32.mrf.mxu1  ;;  %v5739_v1 = vpop.f32.mrf.mxu0 }
 0x16b   :  { %v3896_v4 = vpop.f32.mrf.mxu1  ;;  %v5741_v58 = vpop.f32.mrf.mxu0 }
 0x16d   :  { %v5743_v25 = vpop.f32.mrf.mxu1  ;;  %v5745_v10 = vpop.f32.mrf.mxu0 }
 0x16f   :  { %v5747_v35 = vpop.f32.mrf.mxu1  ;;  %v5749_v19 = vpop.f32.mrf.mxu0 }
 0x170   :  { %5942 = vst [vmem:[#allocation8_spill] sm:$0xff] %v5749_v19 }
 0x171   :  { %v5751_v28 = vpop.f32.mrf.mxu1  ;;  %v5753_v29 = vpop.f32.mrf.mxu0 }
 0x172   :  { %5943 = vst [vmem:[#allocation10_spill] sm:$0xff] %v5753_v29  ;;  %v3894_v29 = vadd.f32 %v3893_v63, %v3892_v42  ;;  %v3852_v42 = vadd.f32 %v5717_v40, %v5715_v36 }
 0x173   :  { %v5755_v24 = vpop.f32.mrf.mxu1 }
 0x174   :  { %v5757_v59 = vpop.f32.mrf.mxu0  ;;  %v1996_v36 = vadd.f32 %v5668_v14, %v3852_v42  ;;  %v3864_v42 = vadd.f32 %v5745_v10, %v5741_v58 }
 0x175   :  { %v5759_v56 = vpop.f32.mrf.mxu1 }
 0x176   :  { %v2293_v13 = vpop.f32.mrf.mxu0 }
 0x177   :  { %v5761_v47 = vpop.f32.mrf.mxu1 }
 0x178   :  { %v5763_v0 = vpop.f32.mrf.mxu0 }
 0x179   :  { %v5765_v30 = vpop.f32.mrf.mxu1 }
 0x17a   :  { %v5767_v8 = vpop.f32.mrf.mxu0 }
 0x17b   :  { %v5769_v17 = vpop.f32.mrf.mxu1 }
 0x17c   :  { %v5771_v39 = vpop.f32.mrf.mxu0 }
 0x17d   :  { %5944 = vst [vmem:[#allocation9_spill] sm:$0xff] %v5771_v39  ;;  %v5773_v34 = vpop.f32.mrf.mxu1 }
 0x17e   :  { %5945 = vst [vmem:[#allocation5_spill] sm:$0xff] %v5773_v34  ;;  %v5775_v16 = vpop.f32.mrf.mxu0 }
 0x17f   :  { %5946 = vst [vmem:[#allocation6_spill] sm:$0xff] %v5775_v16  ;;  %v5777_v27 = vpop.f32.mrf.mxu1  ;;  %v3849_v16 = vadd.f32 %v5708_v60, %v5706_v54  ;;  %v3855_v54 = vadd.f32 %v5723_v53, %v5721_v45  ;;  %v3900_v60 = vadd.f32 %v5747_v35, %v5743_v25 }
 0x180   :  { %5947 = vst [vmem:[#allocation17_spill] sm:$0xff] %v5777_v27  ;;  %v5779_v52 = vpop.f32.mrf.mxu0 }
 0x181   :  { %5948 = vst [vmem:[#allocation12_spill] sm:$0xff] %v5779_v52  ;;  %v5781_v57 = vpop.f32.mrf.mxu1  ;;  %v2237_v35 = vadd.f32 %v3900_v60, %v1996_v36 }
 0x182   :  { %5949 = vst [vmem:[#allocation13_spill] sm:$0xff] %v5781_v57  ;;  %v5783_v46 = vpop.f32.mrf.mxu0  ;;  %v3846_v57 = vadd.f32 %v5699_v31, %v5694_v48 }
 0x183   :  { %5950 = vst [vmem:[#allocation14_spill] sm:$0xff] %v5783_v46  ;;  %v5785_v22 = vpop.f32.mrf.mxu1 }
 0x184   :  { %5951 = vst [vmem:[#allocation3_spill] sm:$0xff] %v5785_v22  ;;  %v4126_v50 = vpop.f32.mrf.mxu0  ;;  %v1988_v34 = vadd.f32 %v3846_v57, %v5680_v15 }
 0x185   :  { %v3940_v44 = vpop.f32.mrf.mxu1 }
 0x186   :  { %v2627_v49 = vpop.f32.mrf.mxu0  ;;  %v2229_v26 = vadd.f32 %v3894_v29, %v1988_v34  ;;  %v5960_v36 = vld [vmem:[#allocation6_spill] sm:$0xff] }
 0x187   :  { %v3941_v9 = vpop.f32.mrf.mxu1 }
 0x188   :  { %v5787_v55 = vpop.f32.mrf.mxu0  ;;  %v3942_v19 = vadd.f32 %v3941_v9, %v3940_v44  ;;  %v1991_v44 = vadd.f32 %v3849_v16, %v5696_v18  ;;  %v2294_v9 = vadd.f32 %v2293_v13, %v2229_v26  ;;  %v3858_v18 = vadd.f32 %v5729_v7, %v5727_v12 }
 0x189   :  { %v3943_v5 = vpop.f32.mrf.mxu1  ;;  %v2302_v7 = vadd.f32 %v5757_v59, %v2237_v35 }
 0x18a   :  { %v2630_v33 = vpop.f32.mrf.mxu0  ;;  %v2004_v12 = vadd.f32 %v3858_v18, %v5713_v41 }
 0x18b   :  { %v3944_v6 = vpop.f32.mrf.mxu1 }
 0x18c   :  { %v5791_v23 = vpop.f32.mrf.mxu0  ;;  %v3945_v48 = vadd.f32 %v3944_v6, %v3943_v5 }
 0x18d   :  { %v3946_v61 = vpop.f32.mrf.mxu1  ;;  %5952 = vst [vmem:[#allocation15_spill] sm:$0xff] %v5791_v23 }
 0x18e   :  { %v5795_v52 = vpop.f32.mrf.mxu0  ;;  %v2631_v29 = vadd.f32 %v3945_v48, %v2630_v33 }
 0x18f   :  { %v3947_v2 = vpop.f32.mrf.mxu1 }
 0x190   :  { %v5801_v22 = vpop.f32.mrf.mxu0 }
 0x191   :  { %v3949_v43 = vpop.f32.mrf.mxu1  ;;  %5955 = vst [vmem:[#allocation18_spill] sm:$0xff] %v5801_v22  ;;  %v3897_v22 = vadd.f32 %v3896_v4, %v3895_v62  ;;  %v3948_v62 = vadd.f32 %v3947_v2, %v3946_v61 }
 0x192   :  { %v5809_v23 = vpop.f32.mrf.mxu0 }
 0x193   :  { %v3950_v32 = vpop.f32.mrf.mxu1  ;;  %v2636_v13 = vadd.f32 %v4126_v50, %v3948_v62 }
 0x194   :  { %v3951_v16 = vadd.f32 %v3950_v32, %v3949_v43 }
 0x195   :  { %v5789_v38 = vpop.f32.mrf.mxu1  ;;  %v2660_v61 = vadd.f32 %v2636_v13, %v2302_v7 }
 0x197   :  { %v3953_v11 = vpop.f32.mrf.mxu1 }
 0x198   :  { %v3954_v2 = vadd.f32 %v3953_v11, %v5789_v38 }
 0x199   :  { %v5793_v21 = vpop.f32.mrf.mxu1 }
 0x19b   :  { %v5797_v39 = vpop.f32.mrf.mxu1 }
 0x19c   :  { %5953 = vst [vmem:[#allocation19_spill] sm:$0xff] %v5797_v39  ;;  %v2628_v39 = vadd.f32 %v3942_v19, %v2627_v49  ;;  %v2232_v19 = vadd.f32 %v3897_v22, %v1991_v44 }
 0x19d   :  { %v5799_v51 = vpop.f32.mrf.mxu1 }
 0x19e   :  { %5954 = vst [vmem:[#allocation7_spill] sm:$0xff] %v5799_v51  ;;  %v2658_v34 = vadd.f32 %v2628_v39, %v2294_v9  ;;  %v2297_v45 = vadd.f32 %v5767_v8, %v2232_v19  ;;  %v5958_v19 = vld [vmem:[#allocation2_spill] sm:$0xff] }
 0x19f   :  { %v5805_v46 = vpop.f32.mrf.mxu1 }
 0x1a0   :  { %v2659_v14 = vadd.f32 %v2631_v29, %v2297_v45  ;;  %v5964_v45 = vld [vmem:[#allocation10_spill] sm:$0xff] }
 0x1a1   :  { %v5807_v27 = vpop.f32.mrf.mxu1 }
 0x1a2   :  { %5956 = vst [vmem:[#allocation11_spill] sm:$0xff] %v5807_v27 }
 0x1a3   :  { %v5814_v37 = vpop.f32.mrf.mxu1 }
 0x1a4   :  { %v3988_v51 = vpop.f32.mrf.mxu0 }
 0x1a5   :  { %v4142_v31 = vpop.f32.mrf.mxu1 }
 0x1a6   :  { %v3989_v63 = vpop.f32.mrf.mxu0 }
 0x1a7   :  { %v3990_v27 = vadd.f32 %v3989_v63, %v3988_v51  ;;  %v2969_v15 = vpop.f32.mrf.mxu1  ;;  %v3903_v51 = vadd.f32 %v5755_v24, %v5751_v28  ;;  %v3906_v28 = vadd.f32 %v5761_v47, %v5759_v56  ;;  %v3861_v47 = vadd.f32 %v5739_v1, %v5734_v3  ;;  %v5957_v1 = vld [vmem:[#allocation19_spill] sm:$0xff] }
 0x1a8   :  { %v3991_v4 = vpop.f32.mrf.mxu0  ;;  %v2644_v3 = vadd.f32 %v3954_v2, %v5795_v52  ;;  %v3957_v58 = vadd.f32 %v5957_v1, %v5793_v21  ;;  %v5963_v52 = vld [vmem:[#allocation8_spill] sm:$0xff] }
 0x1a9   :  { %v2970_v57 = vadd.f32 %v3990_v27, %v2969_v15  ;;  %v4143_v5 = vpop.f32.mrf.mxu1  ;;  %v1999_v27 = vadd.f32 %v5687_v20, %v3855_v54  ;;  %v2639_v20 = vadd.f32 %v5787_v55, %v3951_v16  ;;  %v2245_v55 = vadd.f32 %v3906_v28, %v2004_v12  ;;  %v5965_v16 = vld [vmem:[#allocation7_spill] sm:$0xff]  ;;  %v5966_v28 = vld [vmem:[#allocation14_spill] sm:$0xff] }
 0x1aa   :  { %v3992_v40 = vpop.f32.mrf.mxu0  ;;  %v2007_v29 = vadd.f32 %v3861_v47, %v5958_v19  ;;  %v2647_v13 = vadd.f32 %v3957_v58, %v5809_v23 }
 0x1ab   :  { %v3000_v53 = vadd.f32 %v2970_v57, %v2658_v34  ;;  %v3993_v26 = vadd.f32 %v3992_v40, %v3991_v4  ;;  %v2972_v25 = vpop.f32.mrf.mxu1  ;;  %v2240_v24 = vadd.f32 %v3903_v51, %v1999_v27  ;;  %v5959_v34 = vld [vmem:[#allocation16_spill] sm:$0xff]  ;;  %v2310_v18 = vadd.f32 %v5960_v36, %v2245_v55  ;;  %v5961_v40 = vld [vmem:[#allocation5_spill] sm:$0xff] }
 0x1ac   :  { %v3994_v39 = vpop.f32.mrf.mxu0  ;;  %v2012_v57 = vadd.f32 %v5959_v34, %v3864_v42  ;;  %v5974_v34 = vld [vmem:[#allocation12_spill] sm:$0xff] }
 0x1ad   :  { %v3008_v22 = vpack.c.bf16 %v3000_v53, %v3000_v53  ;;  %v2973_v49 = vadd.f32 %v3993_v26, %v2972_v25  ;;  %v3038_v43 = vmul.f32 %v3000_v53, %v3000_v53  ;;  %v5839_v41 = vpop.f32.mrf.mxu1  ;;  %v2305_v63 = vadd.f32 %v5763_v0, %v2240_v24 }
 0x1ae   :  { %v3995_v6 = vpop.f32.mrf.mxu0  ;;  %v2662_v35 = vadd.f32 %v2644_v3, %v2310_v18 }
 0x1af   :  { %3016 = vst [vmem:[%s5901_s2 + $0x4] sm:$0xf] %v3008_v22  ;;  %v3001_v8 = vadd.f32 %v2973_v49, %v2659_v14  ;;  %v3996_v50 = vadd.f32 %v3995_v6, %v3994_v39  ;;  %v2661_v15 = vadd.f32 %v2639_v20, %v2305_v63  ;;  %v2985_v10 = vpop.f32.mrf.mxu1  ;;  %v3960_v39 = vadd.f32 %v5805_v46, %v5965_v16 }
 0x1b0   :  { %v3997_v59 = vpop.f32.mrf.mxu0 }
 0x1b1   :  { %v3009_v33 = vpack.c.bf16 %v3001_v8, %v3001_v8  ;;  %v3024_v32 = vadd.f32 %v3001_v8, %v3000_v53  ;;  %v3039_v48 = vmul.f32 %v3001_v8, %v3001_v8  ;;  %v2978_v56 = vadd.f32 %v4142_v31, %v3996_v50  ;;  %v4147_v27 = vpop.f32.mrf.mxu1  ;;  %v5967_v8 = vld [vmem:[#allocation13_spill] sm:$0xff]  ;;  %v5968_v50 = vld [vmem:[#allocation3_spill] sm:$0xff] }
 0x1b2   :  { %v3998_v44 = vpop.f32.mrf.mxu0  ;;  %v3909_v31 = vadd.f32 %v5769_v17, %v5765_v30  ;;  %v5962_v30 = vld [vmem:[#allocation17_spill] sm:$0xff]  ;;  %v3867_v53 = vadd.f32 %v5964_v45, %v5963_v52 }
 0x1b3   :  { %3017 = vst [vmem:[%s5901_s2 + $0xc] sm:$0xf] %v3009_v33  ;;  %v3046_v38 = vadd.f32 %v3039_v48, %v3038_v43  ;;  %v3002_v11 = vadd.f32 %v2978_v56, %v2660_v61  ;;  %v3999_v9 = vadd.f32 %v3998_v44, %v3997_v59  ;;  %v3912_v17 = vadd.f32 %v5962_v30, %v5961_v40  ;;  %v5969_v43 = vld [vmem:[#allocation4_spill] sm:$0xff]  ;;  %v5971_v56 = vld [vmem:[#allocation11_spill] sm:$0xff]  ;;  %v2988_v42 = vpop.f32.mrf.mxu1 }
 0x1b4   :  { %v4000_v0 = vpop.f32.mrf.mxu0  ;;  %v2248_v25 = vadd.f32 %v3909_v31, %v2007_v29  ;;  %v3915_v61 = vadd.f32 %v5968_v50, %v5967_v8  ;;  %v2015_v59 = vadd.f32 %v5969_v43, %v3867_v53  ;;  %v3963_v47 = vadd.f32 %v5814_v37, %v5971_v56 }
 0x1b5   :  { %v3010_v54 = vpack.c.bf16 %v3002_v11, %v3002_v11  ;;  %v3025_v60 = vadd.f32 %v3024_v32, %v3002_v11  ;;  %v3040_v62 = vmul.f32 %v3002_v11, %v3002_v11  ;;  %v2981_v4 = vadd.f32 %v4143_v5, %v3999_v9  ;;  %v5970_v32 = vld [vmem:[#allocation15_spill] sm:$0xff]  ;;  %v5972_v9 = vld [vmem:[#allocation9_spill] sm:$0xff] }
 0x1b6   :  { %v4001_v51 = vpop.f32.mrf.mxu0  ;;  %v2253_v6 = vadd.f32 %v3912_v17, %v2012_v57  ;;  %v2313_v24 = vadd.f32 %v5966_v28, %v2248_v25  ;;  %v2652_v48 = vadd.f32 %v5970_v32, %v3960_v39 }
 0x1b7   :  { %3018 = vst [vmem:[%s5901_s2 + $0x14] sm:$0xf] %v3010_v54  ;;  %v3047_v21 = vadd.f32 %v3046_v38, %v3040_v62  ;;  %v3003_v26 = vadd.f32 %v2981_v4, %v2661_v15  ;;  %v4002_v5 = vadd.f32 %v4001_v51, %v4000_v0  ;;  %v2256_v15 = vadd.f32 %v3915_v61, %v2015_v59  ;;  %v5973_v54 = vld [vmem:[#allocation18_spill] sm:$0xff] }
 0x1b8   :  { %v4003_v22 = vpop.f32.mrf.mxu0  ;;  %v2663_v33 = vadd.f32 %v2647_v13, %v2313_v24  ;;  %v2318_v31 = vadd.f32 %v5972_v9, %v2253_v6  ;;  %v2655_v37 = vadd.f32 %v5973_v54, %v3963_v47 }
 0x1b9   :  { %v3011_v14 = vpack.c.bf16 %v3003_v26, %v3003_v26  ;;  %v3026_v49 = vadd.f32 %v3025_v60, %v3003_v26  ;;  %v3041_v12 = vmul.f32 %v3003_v26, %v3003_v26  ;;  %v2986_v7 = vadd.f32 %v4002_v5, %v2985_v10 }
 0x1ba   :  { %v4004_v20 = vpop.f32.mrf.mxu0  ;;  %v2664_v0 = vadd.f32 %v2652_v48, %v2318_v31  ;;  %v2321_v57 = vadd.f32 %v5974_v34, %v2256_v15 }
 0x1bb   :  { %3019 = vst [vmem:[%s5901_s2 + $0x1c] sm:$0xf] %v3011_v14  ;;  %v3048_v23 = vadd.f32 %v3047_v21, %v3041_v12  ;;  %v3004_v2 = vadd.f32 %v2986_v7, %v2662_v35  ;;  %v4005_v46 = vadd.f32 %v4004_v20, %v4003_v22 }
 0x1bc   :  { %v4006_v63 = vpop.f32.mrf.mxu0  ;;  %v2665_v17 = vadd.f32 %v2655_v37, %v2321_v57 }
 0x1bd   :  { %v3012_v44 = vpack.c.bf16 %v3004_v2, %v3004_v2  ;;  %v3027_v55 = vadd.f32 %v3026_v49, %v3004_v2  ;;  %v3042_v38 = vmul.f32 %v3004_v2, %v3004_v2  ;;  %v2989_v11 = vadd.f32 %v4005_v46, %v2988_v42 }
 0x1be   :  { %v4007_v3 = vpop.f32.mrf.mxu0 }
 0x1bf   :  { %3020 = vst [vmem:[%s5901_s2 + $0x24] sm:$0xf] %v3012_v44  ;;  %v3049_v1 = vadd.f32 %v3048_v23, %v3042_v38  ;;  %v3005_v58 = vadd.f32 %v2989_v11, %v2663_v33  ;;  %v4008_v10 = vadd.f32 %v4007_v3, %v4006_v63 }
 0x1c0   :  { %v4009_v60 = vpop.f32.mrf.mxu0 }
 0x1c1   :  { %v3013_v62 = vpack.c.bf16 %v3005_v58, %v3005_v58  ;;  %v3028_v4 = vadd.f32 %v3027_v55, %v3005_v58  ;;  %v3043_v19 = vmul.f32 %v3005_v58, %v3005_v58  ;;  %v2994_v29 = vadd.f32 %v5839_v41, %v4008_v10 }
 0x1c2   :  { %v4010_v36 = vpop.f32.mrf.mxu0 }
 0x1c3   :  { %3021 = vst [vmem:[%s5901_s2 + $0x2c] sm:$0xf] %v3013_v62  ;;  %v3050_v18 = vadd.f32 %v3049_v1, %v3043_v19  ;;  %v3006_v40 = vadd.f32 %v2994_v29, %v2664_v0  ;;  %v4011_v30 = vadd.f32 %v4010_v36, %v4009_v60 }
 0x1c5   :  { %v3014_v51 = vpack.c.bf16 %v3006_v40, %v3006_v40  ;;  %v3029_v52 = vadd.f32 %v3028_v4, %v3006_v40  ;;  %v3044_v45 = vmul.f32 %v3006_v40, %v3006_v40  ;;  %v2997_v53 = vadd.f32 %v4147_v27, %v4011_v30 }
 0x1c7   :  { %3022 = vst [vmem:[%s5901_s2 + $0x34] sm:$0xf] %v3014_v51  ;;  %v3051_v41 = vadd.f32 %v3050_v18, %v3044_v45  ;;  %v3007_v21 = vadd.f32 %v2997_v53, %v2665_v17 }
 0x1c9   :  { %v3015_v26 = vpack.c.bf16 %v3007_v21, %v3007_v21  ;;  %v3030_v5 = vadd.f32 %v3029_v52, %v3007_v21  ;;  %v3045_v25 = vmul.f32 %v3007_v21, %v3007_v21 }
 0x1cb   :  { %3023 = vst [vmem:[%s5901_s2 + $0x3c] sm:$0xf] %v3015_v26  ;;  %v3031_v35 = vrot.slane %v3030_v5, 4  ;;  %v3052_v13 = vadd.f32 %v3051_v41, %v3045_v25 }
 0x1cd   :  { %v3032_v16 = vadd.f32 %v3031_v35, %v3030_v5  ;;  %v3053_v39 = vrot.slane %v3052_v13, 4 }
 0x1cf   :  { %v3033_v22 = vrot.slane %v3032_v16, 2  ;;  %v3054_v14 = vadd.f32 %v3053_v39, %v3052_v13 }
 0x1d1   :  { %v3034_v27 = vadd.f32 %v3033_v22, %v3032_v16  ;;  %v3055_v49 = vrot.slane %v3054_v14, 2 }
 0x1d3   :  { %v3035_v12 = vrot.slane %v3034_v27, 1  ;;  %v3056_v7 = vadd.f32 %v3055_v49, %v3054_v14 }
 0x1d5   :  { %v3036_v6 = vadd.f32 %v3035_v12, %v3034_v27  ;;  %v3057_v28 = vrot.slane %v3056_v7, 1 }
 0x1d7   :  { %3037 = vst [vmem:[%s5902_s3 + $0x2] sm:$0x1] %v3036_v6  ;;  %v3058_v24 = vadd.f32 %v3057_v28, %v3056_v7 }
 0x1d9   :  { %3059 = vst [vmem:[%s5902_s3 + $0x3] sm:$0x1] %v3058_v24 }

// kernel: tile.53
= control target key start
LH: loop header
LB: loop body
LE: loop exit
PB: predicated region body
PF: predicated region fallthrough
CT: control target
= control target key end

     0   :  { %s22_s0 = inlined_call_operand.vmem [shape: f32[64], index: 0, kind: input, shape index: {}]   ;;  %s23_s1 = inlined_call_operand.vmem [shape: f32[8,64], index: 1, kind: output, shape index: {}]  }
   0x1   :  { %v4_v0 = vld [vmem:[%s22_s0] ss:$0 sm:$0xff] }
   0x2   :  { %5 = vst [vmem:[%s23_s1] sm:$0xff] %v4_v0 }

// kernel: tile.58
= control target key start
LH: loop header
LB: loop body
LE: loop exit
PB: predicated region body
PF: predicated region fallthrough
CT: control target
= control target key end

     0   :  { %vm3_vm0 = vcmask 523264   ;;  %s46_s8 = smov 64   ;;  %vm9_vm1 = vcmask 1048064   ;;  %s75_s0 = inlined_call_operand.vmem [shape: f32[8,64], index: 0, kind: input, shape index: {}]   ;;  %s76_s1 = inlined_call_operand.vmem [shape: f32[1,512], index: 1, kind: output, shape index: {}]  }
   0x1   :  { %v41_v0 = vld [vmem:[%s75_s0 + $0x1] ss:$2 sm:$0xf]   ;;  %v2_v1 = vld [vmem:[%s75_s0] ss:$2 sm:$0xf]  }
   0x2   :  { %7 = vrot.lane.b32.xlu0 %v41_v0, %s46_s8  ;;  %4 = vst.msk [vmem:[#allocation0] ss:$8 sm:$0xf] %vm3_vm0, %v2_v1  }
  0x74   :  { %v8_v2 = vpop.permute.xlu0 %7  }
  0x75   :  { %10 = vst.msk [vmem:[#allocation0] ss:$8 sm:$0xf] %vm9_vm1, %v8_v2  }
  0x7c   :  { %v15_v3 = vld [vmem:[#allocation0] sm:$0x1]  ;;  %v20_v4 = vld [vmem:[#allocation0 + $0x8] sm:$0x1]  ;;  %v26_v5 = vld [vmem:[#allocation0 + $0x10] sm:$0x1] }
  0x7d   :  { %18 = vst [vmem:[%s76_s1] sm:$0x1] %v15_v3  ;;  %42 = vst [vmem:[%s76_s1 + $0x1] sm:$0x1] %v20_v4  ;;  %v33_v6 = vld [vmem:[#allocation0 + $0x18] sm:$0x1] }
  0x7e   :  { %43 = vst [vmem:[%s76_s1 + $0x2] sm:$0x1] %v26_v5  ;;  %44 = vst [vmem:[%s76_s1 + $0x3] sm:$0x1] %v33_v6 }

// kernel: _lambda_.5
= control target key start
LH: loop header
LB: loop body
LE: loop exit
PB: predicated region body
PF: predicated region fallthrough
CT: control target
= control target key end

     0   :  { %v43_v0 = vlaneseq  ;;  %vm343_vm0 = vcmask 523264   ;;  %s2587_s7 = smov 64   ;;  %s3444_s1 = inlined_call_operand.vmem [shape: bf16[3,2,192,256], index: 1, kind: input, shape index: {}]   ;;  %s3445_s0 = inlined_call_operand.vmem [shape: bf16[8,8,256], index: 0, kind: input, shape index: {}]   ;;  %s3446_s2 = inlined_call_operand.vmem [shape: f32[2,256], index: 2, kind: input, shape index: {}]   ;;  %s3447_s3 = inlined_call_operand.vmem [shape: bf16[8,8,512], index: 3, kind: output, shape index: {0}]   ;;  %s3448_s4 = inlined_call_operand.vmem [shape: f32[1,2,512], index: 4, kind: output, shape index: {1}]  }
   0x1   :  { %v2371_v1 = vld [vmem:[%s3444_s1 + $0x1f4] ss:$8 sps:$4 sm:$0xff]   ;;  %v2373_v2 = vld [vmem:[%s3444_s1 + $0x1f0] ss:$8 sps:$4 sm:$0xff]   ;;  %v2374_v4 = vld [vmem:[%s3444_s1 + $0x1e4] ss:$8 sps:$4 sm:$0xff]  }
   0x2   :  { %v2621_v3 = vshrl.u32 %v43_v0, 7  ;;  %356 = vmatprep.subr.bf16.mxu0 %v2371_v1  ;;  %v2376_v5 = vld [vmem:[%s3444_s1 + $0x1e0] ss:$8 sps:$4 sm:$0xff]   ;;  %v2377_v7 = vld [vmem:[%s3444_s1 + $0x1d4] ss:$8 sps:$4 sm:$0xff]   ;;  %vm3380_vm1 = vcmp.lt.s32.totalorder %v43_v0, 256 }
   0x3   :  { %357 = vmatpush1.bf16.msra.mxu0 %v2373_v2  ;;  %v19_v9 = vld [vmem:[%s3445_s0 + $0x10] sm:$0xff]  ;;  %v20_v10 = vld [vmem:[%s3445_s0 + $0x18] sm:$0xff]  ;;  %v41_v11 = vld [vmem:[%s3446_s2] ss:$2 sm:$0x3] }
   0x4   :  { %v45_v6 = vsub.s32 0, %v2621_v3  ;;  %358 = vmatprep.subr.bf16.mxu0 %v2374_v4  ;;  %v49_v8 = vsub.s32 1, %v2621_v3  ;;  %v29_v12 = vunpack.c.l.bf16 %v19_v9  ;;  %v30_v13 = vunpack.c.h.bf16 %v19_v9  ;;  %v2009_v16 = vld [vmem:[%s3446_s2 + $0x1] ss:$2 sm:$0x3]  ;;  %v18_v18 = vld [vmem:[%s3445_s0 + $0x8] sm:$0xff] }
   0x5   :  { %v31_v14 = vunpack.c.l.bf16 %v20_v10  ;;  %v32_v15 = vunpack.c.h.bf16 %v20_v10  ;;  %v17_v17 = vld [vmem:[%s3445_s0] sm:$0xff]  ;;  %v2379_v19 = vld [vmem:[%s3444_s1 + $0x1d0] ss:$8 sps:$4 sm:$0xff]   ;;  %v27_v27 = vunpack.c.l.bf16 %v18_v18  ;;  %v28_v28 = vunpack.c.h.bf16 %v18_v18  ;;  %v2383_v40 = vld [vmem:[%s3444_s1 + $0x1b4] ss:$8 sps:$4 sm:$0xff]  }
   0x6   :  { %v2655_v20 = vrot.slane %v41_v11, %v45_v6  ;;  %v2657_v21 = vrot.slane %v41_v11, %v49_v8  ;;  %v2659_v22 = vrot.slane %v2009_v16, %v45_v6  ;;  %v2661_v23 = vrot.slane %v2009_v16, %v49_v8  ;;  %v2380_v24 = vld [vmem:[%s3444_s1 + $0x1c4] ss:$8 sps:$4 sm:$0xff]   ;;  %v2382_v39 = vld [vmem:[%s3444_s1 + $0x1c0] ss:$8 sps:$4 sm:$0xff]   ;;  %v2385_v53 = vld [vmem:[%s3444_s1 + $0x1b0] ss:$8 sps:$4 sm:$0xff]  }
   0x7   :  { %359 = vmatpush1.bf16.msra.mxu0 %v2376_v5  ;;  %v25_v25 = vunpack.c.l.bf16 %v17_v17  ;;  %v26_v26 = vunpack.c.h.bf16 %v17_v17  ;;  %v21_v47 = vld [vmem:[%s3445_s0 + $0x20] sm:$0xff]  ;;  %v22_v48 = vld [vmem:[%s3445_s0 + $0x28] sm:$0xff]  ;;  %v23_v58 = vld [vmem:[%s3445_s0 + $0x30] sm:$0xff] }
   0x8   :  { %360 = vmatprep.subr.bf16.mxu0 %v2377_v7  ;;  %v57_v29 = vmul.f32 %v2655_v20, %v29_v12  ;;  %v59_v30 = vmul.f32 %v2655_v20, %v31_v14  ;;  %v58_v31 = vmul.f32 %v2657_v21, %v30_v13  ;;  %v60_v32 = vmul.f32 %v2657_v21, %v32_v15  ;;  %v24_v59 = vld [vmem:[%s3445_s0 + $0x38] sm:$0xff]  ;;  %v2386_v62 = vld [vmem:[%s3444_s1 + $0x1a4] ss:$8 sps:$4 sm:$0xff]   ;;  %v2388_v15 = vld [vmem:[%s3444_s1 + $0x1a0] ss:$8 sps:$4 sm:$0xff]  }
   0x9   :  { %v53_v33 = vmul.f32 %v2655_v20, %v25_v25  ;;  %v55_v34 = vmul.f32 %v2655_v20, %v27_v27  ;;  %v54_v35 = vmul.f32 %v2657_v21, %v26_v26  ;;  %v56_v36 = vmul.f32 %v2657_v21, %v28_v28  ;;  %v2394_v2 = vld [vmem:[%s3444_s1 + $0x74] ss:$8 sps:$4 sm:$0xff]   ;;  %v2397_v8 = vld [vmem:[%s3444_s1 + $0x70] ss:$8 sps:$4 sm:$0xff]   ;;  %v2400_v18 = vld [vmem:[%s3444_s1 + $0x64] ss:$8 sps:$4 sm:$0xff]  }
   0xa   :  { %v2675_v37 = vadd.f32 %v2659_v22, %v57_v29  ;;  %v2678_v38 = vadd.f32 %v2659_v22, %v59_v30  ;;  %v2687_v41 = vadd.f32 %v2661_v23, %v58_v31  ;;  %v2690_v42 = vadd.f32 %v2661_v23, %v60_v32  ;;  %573 = vmatprep.subr.bf16.mxu1 %v2394_v2  ;;  %v2389_v26 = vld [vmem:[%s3444_s1 + $0x194] ss:$8 sps:$4 sm:$0xff]  }
   0xb   :  { %361 = vmatpush1.bf16.msra.mxu0 %v2379_v19  ;;  %v2693_v43 = vadd.f32 %v2659_v22, %v53_v33  ;;  %v84_v44 = vadd.f32 %v2659_v22, %v55_v34  ;;  %v2697_v45 = vadd.f32 %v2661_v23, %v54_v35  ;;  %v85_v46 = vadd.f32 %v2661_v23, %v56_v36  ;;  %v2403_v19 = vld [vmem:[%s3444_s1 + $0x60] ss:$8 sps:$4 sm:$0xff]   ;;  %v2406_v33 = vld [vmem:[%s3444_s1 + $0x54] ss:$8 sps:$4 sm:$0xff]  }
   0xc   :  { %362 = vmatprep.subr.bf16.mxu0 %v2380_v24  ;;  %v102_v49 = vmax.f32 %v2675_v37, 0.0  ;;  %v104_v50 = vmax.f32 %v2678_v38, 0.0  ;;  %v103_v51 = vmax.f32 %v2687_v41, 0.0  ;;  %v105_v52 = vmax.f32 %v2690_v42, 0.0  ;;  %574 = vmatpush1.bf16.msra.mxu1 %v2397_v8  ;;  %v2418_v8 = vld [vmem:[%s3444_s1 + $0x34] ss:$8 sps:$4 sm:$0xff]  }
   0xd   :  { %v98_v54 = vmax.f32 %v2693_v43, 0.0  ;;  %v2714_v55 = vmax.f32 %v84_v44, 0.0  ;;  %v99_v56 = vmax.f32 %v2697_v45, 0.0  ;;  %v2717_v57 = vmax.f32 %v85_v46, 0.0  ;;  %575 = vmatprep.subr.bf16.mxu1 %v2400_v18  ;;  %v2398_v45 = vld [vmem:[%s3444_s1 + $0x234] ss:$8 sps:$4 sm:$0xff]  }
   0xe   :  { %v2729_v60 = vpack.c.bf16 %v104_v50, %v102_v49  ;;  %v2735_v61 = vpack.c.bf16 %v105_v52, %v103_v51  ;;  %v34_v63 = vunpack.c.h.bf16 %v21_v47  ;;  %v36_v1 = vunpack.c.h.bf16 %v22_v48  ;;  %v2408_v41 = vld [vmem:[%s3444_s1 + $0x220] ss:$8 sps:$4 sm:$0xff]   ;;  %v2410_v37 = vld [vmem:[%s3444_s1 + $0x214] ss:$8 sps:$4 sm:$0xff]   ;;  %v2434_v42 = vld [vmem:[%s3444_s1 + $0x4] ss:$8 sps:$4 sm:$0xff]  }
   0xf   :  { %363 = vmatpush1.bf16.msra.mxu0 %v2382_v39  ;;  %v2746_v4 = vpack.c.bf16 %v2714_v55, %v98_v54  ;;  %v2336_v5 = vpack.c.bf16 %v2717_v57, %v99_v56  ;;  %v33_v6 = vunpack.c.l.bf16 %v21_v47  ;;  %v35_v7 = vunpack.c.l.bf16 %v22_v48  ;;  %v2426_v18 = vld [vmem:[%s3444_s1 + $0x374] ss:$8 sps:$4 sm:$0xff]  }
  0x10   :  { %364 = vmatprep.subr.bf16.mxu0 %v2383_v40  ;;  %1123 = vrot.lane.b32.xlu1 %v2729_v60, %s2587_s7  ;;  %v62_v9 = vmul.f32 %v2657_v21, %v34_v63  ;;  %v64_v10 = vmul.f32 %v2657_v21, %v36_v1  ;;  %v38_v11 = vunpack.c.h.bf16 %v23_v58  ;;  %v40_v12 = vunpack.c.h.bf16 %v24_v59  ;;  %v2392_v63 = vld [vmem:[%s3444_s1 + $0x184] ss:$8 sps:$4 sm:$0xff]  }
  0x11   :  { %1119 = vrot.lane.b32.xlu0 %v2746_v4, %s2587_s7  ;;  %v61_v13 = vmul.f32 %v2655_v20, %v33_v6  ;;  %v63_v14 = vmul.f32 %v2655_v20, %v35_v7  ;;  %v37_v16 = vunpack.c.l.bf16 %v23_v58  ;;  %v39_v17 = vunpack.c.l.bf16 %v24_v59  ;;  %576 = vmatpush1.bf16.msra.mxu1 %v2403_v19  ;;  %v2415_v6 = vld [vmem:[%s3444_s1 + $0x40] ss:$8 sps:$4 sm:$0xff]  }
  0x12   :  { %v2772_v24 = vadd.f32 %v2661_v23, %v62_v9  ;;  %v2775_v25 = vadd.f32 %v2661_v23, %v64_v10  ;;  %v66_v27 = vmul.f32 %v2657_v21, %v38_v11  ;;  %v68_v28 = vmul.f32 %v2657_v21, %v40_v12  ;;  %577 = vmatprep.subr.bf16.mxu1 %v2406_v33  ;;  %v2396_v7 = vld [vmem:[%s3444_s1 + $0x180] ss:$8 sps:$4 sm:$0xff]   ;;  %v2421_v10 = vld [vmem:[%s3444_s1 + $0x30] ss:$8 sps:$4 sm:$0xff]   ;;  %v2422_v11 = vld [vmem:[%s3444_s1 + $0x24] ss:$8 sps:$4 sm:$0xff]  }
  0x13   :  { %365 = vmatpush1.bf16.msra.mxu0 %v2385_v53  ;;  %v2783_v29 = vadd.f32 %v2659_v22, %v61_v13  ;;  %v2786_v30 = vadd.f32 %v2659_v22, %v63_v14  ;;  %v65_v31 = vmul.f32 %v2655_v20, %v37_v16  ;;  %v67_v32 = vmul.f32 %v2655_v20, %v39_v17  ;;  %v2391_v20 = vld [vmem:[%s3444_s1 + $0x190] ss:$8 sps:$4 sm:$0xff]   ;;  %v2404_v12 = vld [vmem:[%s3444_s1 + $0x224] ss:$8 sps:$4 sm:$0xff]   ;;  %v2427_v13 = vld [vmem:[%s3444_s1 + $0x20] ss:$8 sps:$4 sm:$0xff]  }
  0x14   :  { %366 = vmatprep.subr.bf16.mxu0 %v2386_v62  ;;  %1125 = vrot.lane.b32.xlu1 %v2735_v61, %s2587_s7  ;;  %v107_v21 = vmax.f32 %v2772_v24, 0.0  ;;  %v109_v34 = vmax.f32 %v2775_v25, 0.0  ;;  %v95_v35 = vadd.f32 %v2661_v23, %v66_v27  ;;  %v2799_v36 = vadd.f32 %v2661_v23, %v68_v28  ;;  %v2409_v23 = vld [vmem:[%s3444_s1 + $0x50] ss:$8 sps:$4 sm:$0xff]   ;;  %v2420_v16 = vld [vmem:[%s3444_s1 + $0x200] ss:$8 sps:$4 sm:$0xff]  }
  0x15   :  { %1121 = vrot.lane.b32.xlu0 %v2336_v5, %s2587_s7  ;;  %v106_v39 = vmax.f32 %v2783_v29, 0.0  ;;  %v108_v40 = vmax.f32 %v2786_v30, 0.0  ;;  %v94_v44 = vadd.f32 %v2659_v22, %v65_v31  ;;  %v2809_v46 = vadd.f32 %v2659_v22, %v67_v32  ;;  %v2412_v22 = vld [vmem:[%s3444_s1 + $0x44] ss:$8 sps:$4 sm:$0xff]   ;;  %2066 = vmatprep.mubr.msk.bf16.mxu0 %vm343_vm0, %v2336_v5  ;;  %v2433_v14 = vld [vmem:[%s3444_s1 + $0x10] ss:$8 sps:$4 sm:$0xff]  }
  0x16   :  { %v2818_v47 = vpack.c.bf16 %v109_v34, %v107_v21  ;;  %v2820_v48 = vmax.f32 %v95_v35, 0.0  ;;  %v113_v53 = vmax.f32 %v2799_v36, 0.0  ;;  %v2344_v5 = vpack.c.bf16 %v99_v56, %v2717_v57  ;;  %578 = vmatpush1.bf16.msra.mxu1 %v2409_v23  ;;  %v2402_v56 = vld [vmem:[%s3444_s1 + $0x230] ss:$8 sps:$4 sm:$0xff]   ;;  %v2440_v17 = vld [vmem:[%s3444_s1 + $0xb4] ss:$8 sps:$4 sm:$0xff]  }
  0x17   :  { %367 = vmatpush1.bf16.msra.mxu0 %v2388_v15  ;;  %v2828_v58 = vpack.c.bf16 %v108_v40, %v106_v39  ;;  %v2830_v59 = vmax.f32 %v94_v44, 0.0  ;;  %v112_v62 = vmax.f32 %v2809_v46, 0.0  ;;  %579 = vmatprep.subr.bf16.mxu1 %v2412_v22  ;;  %v2877_v9 = vpack.c.bf16 %v98_v54, %v2714_v55  ;;  %v2439_v15 = vld [vmem:[%s3444_s1] ss:$8 sps:$4 sm:$0xff]   ;;  %v2445_v24 = vld [vmem:[%s3444_s1 + $0xb0] ss:$8 sps:$4 sm:$0xff]  }
  0x18   :  { %368 = vmatprep.subr.bf16.mxu0 %v2389_v26  ;;  %1129 = vrot.lane.b32.xlu1 %v2818_v47, %s2587_s7  ;;  %v2842_v1 = vpack.c.bf16 %v113_v53, %v2820_v48  ;;  %v2892_v43 = vpack.c.bf16 %v103_v51, %v2717_v57  ;;  %v2899_v54 = vpack.c.bf16 %v102_v49, %v2714_v55  ;;  %v2428_v51 = vld [vmem:[%s3444_s1 + $0x14] ss:$8 sps:$4 sm:$0xff]   ;;  %v2414_v49 = vld [vmem:[%s3444_s1 + $0x210] ss:$8 sps:$4 sm:$0xff]   ;;  %v2446_v26 = vld [vmem:[%s3444_s1 + $0xa4] ss:$8 sps:$4 sm:$0xff]  }
  0x19   :  { %1127 = vrot.lane.b32.xlu0 %v2828_v58, %s2587_s7  ;;  %v2849_v2 = vpack.c.bf16 %v112_v62, %v2830_v59  ;;  %2102 = vmatprep.mubr.msk.bf16.mxu1 %vm343_vm0, %v2344_v5  ;;  %v2922_v55 = vpack.c.bf16 %v107_v21, %v105_v52  ;;  %v2928_v57 = vpack.c.bf16 %v106_v39, %v104_v50  ;;  %v2416_v52 = vld [vmem:[%s3444_s1 + $0x204] ss:$8 sps:$4 sm:$0xff]   ;;  %v2424_v25 = vld [vmem:[%s3444_s1 + $0x370] ss:$8 sps:$4 sm:$0xff]   ;;  %v2451_v29 = vld [vmem:[%s3444_s1 + $0xa0] ss:$8 sps:$4 sm:$0xff]  }
  0x1a   :  { %580 = vmatpush1.bf16.msra.mxu1 %v2415_v6  ;;  %v2944_v38 = vpack.c.bf16 %v2820_v48, %v109_v34  ;;  %v2951_v50 = vpack.c.bf16 %v2830_v59, %v108_v40  ;;  %v2970_v19 = vpack.c.bf16 %v2820_v48, %v113_v53  ;;  %v2432_v27 = vld [vmem:[%s3444_s1 + $0x364] ss:$8 sps:$4 sm:$0xff]   ;;  %v2991_v28 = vpack.c.bf16 %v2830_v59, %v112_v62  ;;  %v2430_v30 = vld [vmem:[%s3444_s1 + $0x360] ss:$8 sps:$4 sm:$0xff]   ;;  %v2452_v31 = vld [vmem:[%s3444_s1 + $0x94] ss:$8 sps:$4 sm:$0xff]  }
  0x1b   :  { %369 = vmatpush1.bf16.msra.mxu0 %v2391_v20  ;;  %581 = vmatprep.subr.bf16.mxu1 %v2418_v8  ;;  %v2457_v32 = vld [vmem:[%s3444_s1 + $0x90] ss:$8 sps:$4 sm:$0xff]   ;;  %v2458_v21 = vld [vmem:[%s3444_s1 + $0x84] ss:$8 sps:$4 sm:$0xff]   ;;  %v2463_v34 = vld [vmem:[%s3444_s1 + $0x80] ss:$8 sps:$4 sm:$0xff]  }
  0x1c   :  { %370 = vmatprep.subr.bf16.mxu0 %v2392_v63  ;;  %1133 = vrot.lane.b32.xlu1 %v2842_v1, %s2587_s7  ;;  %v2436_v33 = vld [vmem:[%s3444_s1 + $0x350] ss:$8 sps:$4 sm:$0xff]   ;;  %v2442_v35 = vld [vmem:[%s3444_s1 + $0x340] ss:$8 sps:$4 sm:$0xff]   ;;  %v2472_v36 = vld [vmem:[%s3444_s1 + $0x2b4] ss:$8 sps:$4 sm:$0xff]  }
  0x1d   :  { %1131 = vrot.lane.b32.xlu0 %v2849_v2, %s2587_s7  ;;  %v2450_v20 = vld [vmem:[%s3444_s1 + $0x334] ss:$8 sps:$4 sm:$0xff]   ;;  %v2448_v39 = vld [vmem:[%s3444_s1 + $0x330] ss:$8 sps:$4 sm:$0xff]   ;;  %v2478_v40 = vld [vmem:[%s3444_s1 + $0x2a4] ss:$8 sps:$4 sm:$0xff]  }
  0x1e   :  { %582 = vmatpush1.bf16.msra.mxu1 %v2421_v10  ;;  %v2456_v44 = vld [vmem:[%s3444_s1 + $0x324] ss:$8 sps:$4 sm:$0xff]   ;;  %v2476_v46 = vld [vmem:[%s3444_s1 + $0x2a0] ss:$8 sps:$4 sm:$0xff]   ;;  %v2462_v48 = vld [vmem:[%s3444_s1 + $0x314] ss:$8 sps:$4 sm:$0xff]  }
  0x1f   :  { %371 = vmatpush1.bf16.msra.mxu0 %v2396_v7  ;;  %583 = vmatprep.subr.bf16.mxu1 %v2422_v11  ;;  %v2454_v23 = vld [vmem:[%s3444_s1 + $0x320] ss:$8 sps:$4 sm:$0xff]   ;;  %v2482_v53 = vld [vmem:[%s3444_s1 + $0x290] ss:$8 sps:$4 sm:$0xff]   ;;  %v2490_v59 = vld [vmem:[%s3444_s1 + $0x284] ss:$8 sps:$4 sm:$0xff]  }
  0x20   :  { %380 = vmatprep.subr.bf16.mxu0 %v2398_v45  ;;  %1351 = vrot.lane.b32.xlu1 %v2344_v5, %s2587_s7  ;;  %v2460_v22 = vld [vmem:[%s3444_s1 + $0x310] ss:$8 sps:$4 sm:$0xff]   ;;  %v2488_v62 = vld [vmem:[%s3444_s1 + $0x280] ss:$8 sps:$4 sm:$0xff]   ;;  %v2502_v7 = vld [vmem:[%s3444_s1 + $0x264] ss:$8 sps:$4 sm:$0xff]  }
  0x21   :  { %1349 = vrot.lane.b32.xlu0 %v2877_v9, %s2587_s7  ;;  %v2464_v63 = vld [vmem:[%s3444_s1 + $0x300] ss:$8 sps:$4 sm:$0xff]   ;;  %v2494_v5 = vld [vmem:[%s3444_s1 + $0x270] ss:$8 sps:$4 sm:$0xff]   ;;  %v2475_v8 = vld [vmem:[%s3444_s1 + $0x3a4] ss:$8 sps:$4 sm:$0xff]  }
  0x22   :  { %584 = vmatpush1.bf16.msra.mxu1 %v2427_v13  ;;  %v2467_v6 = vld [vmem:[%s3444_s1 + $0x3b0] ss:$8 sps:$4 sm:$0xff]   ;;  %v2500_v45 = vld [vmem:[%s3444_s1 + $0x260] ss:$8 sps:$4 sm:$0xff]   ;;  %v2481_v10 = vld [vmem:[%s3444_s1 + $0x394] ss:$8 sps:$4 sm:$0xff]  }
  0x23   :  { %381 = vmatpush2.bf16.msra.mxu0 %v2402_v56  ;;  %585 = vmatprep.subr.bf16.mxu1 %v2428_v51  ;;  %v2473_v56 = vld [vmem:[%s3444_s1 + $0x3a0] ss:$8 sps:$4 sm:$0xff]   ;;  %v2506_v11 = vld [vmem:[%s3444_s1 + $0x250] ss:$8 sps:$4 sm:$0xff]   ;;  %v2487_v13 = vld [vmem:[%s3444_s1 + $0x384] ss:$8 sps:$4 sm:$0xff]  }
  0x24   :  { %382 = vmatprep.subr.bf16.mxu0 %v2404_v12  ;;  %1355 = vrot.lane.b32.xlu1 %v2892_v43, %s2587_s7  ;;  %v2479_v12 = vld [vmem:[%s3444_s1 + $0x390] ss:$8 sps:$4 sm:$0xff]   ;;  %v2485_v51 = vld [vmem:[%s3444_s1 + $0x380] ss:$8 sps:$4 sm:$0xff]  }
  0x25   :  { %1353 = vrot.lane.b32.xlu0 %v2899_v54, %s2587_s7 }
  0x26   :  { %586 = vmatpush1.bf16.msra.mxu1 %v2433_v14  ;;  %v2518_v14 = vld [vmem:[%s3444_s1 + $0x2f0] ss:$8 sps:$4 sm:$0xff]  }
  0x27   :  { %383 = vmatpush2.bf16.msra.mxu0 %v2408_v41  ;;  %587 = vmatprep.subr.bf16.mxu1 %v2434_v42  ;;  %v2512_v41 = vld [vmem:[%s3444_s1 + $0x240] ss:$8 sps:$4 sm:$0xff]   ;;  %v2491_v42 = vld [vmem:[%s3444_s1 + $0x130] ss:$8 sps:$4 sm:$0xff]  }
  0x28   :  { %384 = vmatprep.subr.bf16.mxu0 %v2410_v37  ;;  %1359 = vrot.lane.b32.xlu1 %v2922_v55, %s2587_s7  ;;  %v2520_v37 = vld [vmem:[%s3444_s1 + $0x2f4] ss:$8 sps:$4 sm:$0xff]  }
  0x29   :  { %1357 = vrot.lane.b32.xlu0 %v2928_v57, %s2587_s7 }
  0x2a   :  { %588 = vmatpush1.bf16.msra.mxu1 %v2439_v15  ;;  %v2526_v15 = vld [vmem:[%s3444_s1 + $0x2e4] ss:$8 sps:$4 sm:$0xff]  }
  0x2b   :  { %385 = vmatpush2.bf16.msra.mxu0 %v2414_v49  ;;  %597 = vmatprep.subr.bf16.mxu1 %v2440_v17  ;;  %v2493_v49 = vld [vmem:[%s3444_s1 + $0x134] ss:$8 sps:$4 sm:$0xff]   ;;  %v2497_v17 = vld [vmem:[%s3444_s1 + $0x120] ss:$8 sps:$4 sm:$0xff]  }
  0x2c   :  { %386 = vmatprep.subr.bf16.mxu0 %v2416_v52  ;;  %1363 = vrot.lane.b32.xlu1 %v2944_v38, %s2587_s7  ;;  %v2499_v52 = vld [vmem:[%s3444_s1 + $0x124] ss:$8 sps:$4 sm:$0xff]  }
  0x2d   :  { %1361 = vrot.lane.b32.xlu0 %v2951_v50, %s2587_s7 }
  0x2e   :  { %598 = vmatpush2.bf16.msra.mxu1 %v2445_v24  ;;  %v2530_v24 = vld [vmem:[%s3444_s1 + $0x2d0] ss:$8 sps:$4 sm:$0xff]  }
  0x2f   :  { %387 = vmatpush2.bf16.msra.mxu0 %v2420_v16  ;;  %599 = vmatprep.subr.bf16.mxu1 %v2446_v26  ;;  %v2524_v16 = vld [vmem:[%s3444_s1 + $0x2e0] ss:$8 sps:$4 sm:$0xff]   ;;  %v2538_v26 = vld [vmem:[%s3444_s1 + $0x2c4] ss:$8 sps:$4 sm:$0xff]  }
  0x30   :  { %797 = vmatprep.subr.bf16.mxu0 %v2426_v18  ;;  %1605 = vrot.lane.b32.xlu1 %v2970_v19, %s2587_s7  ;;  %v2532_v18 = vld [vmem:[%s3444_s1 + $0x2d4] ss:$8 sps:$4 sm:$0xff]  }
  0x31   :  { %1603 = vrot.lane.b32.xlu0 %v2991_v28, %s2587_s7 }
  0x32   :  { %389 = vmatmul.mubr.bf16.vlgmr.msra.gmra.mxu0 %v2746_v4  ;;  %v2438_v4 = vld [vmem:[%s3444_s1 + $0x354] ss:$8 sps:$4 sm:$0xff]   ;;  %600 = vmatpush2.bf16.msra.mxu1 %v2451_v29  ;;  %v2509_v29 = vld [vmem:[%s3444_s1 + $0x100] ss:$8 sps:$4 sm:$0xff]  }
  0x33   :  { %798 = vmatpush1.bf16.msra.mxu0 %v2424_v25  ;;  %2067 = vmatprep.mubr.msk.bf16.mxu0 %vm343_vm0, %v2735_v61  ;;  %v2444_v61 = vld [vmem:[%s3444_s1 + $0x344] ss:$8 sps:$4 sm:$0xff]  }
  0x34   :  { %799 = vmatprep.subr.bf16.mxu0 %v2432_v27  ;;  %601 = vmatprep.subr.bf16.mxu1 %v2452_v31  ;;  %v2511_v25 = vld [vmem:[%s3444_s1 + $0x104] ss:$8 sps:$4 sm:$0xff]   ;;  %v2536_v27 = vld [vmem:[%s3444_s1 + $0x2c0] ss:$8 sps:$4 sm:$0xff]   ;;  %v2515_v31 = vld [vmem:[%s3444_s1 + $0xf0] ss:$8 sps:$4 sm:$0xff]  }
  0x36   :  { %602 = vmatpush2.bf16.msra.mxu1 %v2457_v32  ;;  %v2529_v32 = vld [vmem:[%s3444_s1 + $0xd4] ss:$8 sps:$4 sm:$0xff]  }
  0x37   :  { %800 = vmatpush1.bf16.msra.mxu0 %v2430_v30  ;;  %603 = vmatprep.subr.bf16.mxu1 %v2458_v21  ;;  %v2544_v30 = vld [vmem:[%s3444_s1 + $0x434] ss:$8 sps:$4 sm:$0xff]  }
  0x38   :  { %801 = vmatprep.subr.bf16.mxu0 %v2438_v4  ;;  %v2521_v4 = vld [vmem:[%s3444_s1 + $0xe0] ss:$8 sps:$4 sm:$0xff]   ;;  %v2541_v21 = vld [vmem:[%s3444_s1 + $0x174] ss:$8 sps:$4 sm:$0xff]  }
  0x3a   :  { %399 = vmatmul.mubr.bf16.gmra.mxu0 %v2729_v60  ;;  %604 = vmatpush2.bf16.msra.mxu1 %v2463_v34  ;;  %v2470_v60 = vld [vmem:[%s3444_s1 + $0x2b0] ss:$8 sps:$4 sm:$0xff]  }
  0x3b   :  { %802 = vmatpush1.bf16.msra.mxu0 %v2436_v33  ;;  %2068 = vmatprep.mubr.msk.bf16.mxu0 %vm343_vm0, %v2818_v47  ;;  %v2484_v47 = vld [vmem:[%s3444_s1 + $0x294] ss:$8 sps:$4 sm:$0xff]   ;;  %v2527_v33 = vld [vmem:[%s3444_s1 + $0xd0] ss:$8 sps:$4 sm:$0xff]  }
  0x3c   :  { %803 = vmatprep.subr.bf16.mxu0 %v2444_v61  ;;  %1276 = vmatprep.subr.bf16.mxu1 %v2472_v36  ;;  %v2539_v61 = vld [vmem:[%s3444_s1 + $0x170] ss:$8 sps:$4 sm:$0xff]  }
  0x3d   :  { %606 = vmatmul.mubr.bf16.vlgmr.msra.gmra.mxu1 %v2877_v9  ;;  %v2508_v9 = vld [vmem:[%s3444_s1 + $0x254] ss:$8 sps:$4 sm:$0xff]  }
  0x3e   :  { %1277 = vmatpush1.bf16.msra.mxu1 %v2470_v60  ;;  %2103 = vmatprep.mubr.msk.bf16.mxu1 %vm343_vm0, %v2892_v43 }
  0x3f   :  { %804 = vmatpush1.bf16.msra.mxu0 %v2442_v35  ;;  %1278 = vmatprep.subr.bf16.mxu1 %v2478_v40  ;;  %v2545_v35 = vld [vmem:[%s3444_s1 + $0x160] ss:$8 sps:$4 sm:$0xff]   ;;  %v2551_v40 = vld [vmem:[%s3444_s1 + $0x150] ss:$8 sps:$4 sm:$0xff]  }
  0x40   :  { %805 = vmatprep.subr.bf16.mxu0 %v2450_v20  ;;  %v2553_v20 = vld [vmem:[%s3444_s1 + $0x154] ss:$8 sps:$4 sm:$0xff]  }
  0x42   :  { %409 = vmatmul.mubr.bf16.gmra.mxu0 %v2828_v58  ;;  %1279 = vmatpush1.bf16.msra.mxu1 %v2476_v46  ;;  %v2466_v58 = vld [vmem:[%s3444_s1 + $0x304] ss:$8 sps:$4 sm:$0xff]  }
  0x43   :  { %806 = vmatpush1.bf16.msra.mxu0 %v2448_v39  ;;  %2069 = vmatprep.mubr.msk.bf16.mxu0 %vm343_vm0, %v2842_v1  ;;  %v2496_v1 = vld [vmem:[%s3444_s1 + $0x274] ss:$8 sps:$4 sm:$0xff]   ;;  %v2542_v39 = vld [vmem:[%s3444_s1 + $0x430] ss:$8 sps:$4 sm:$0xff]   ;;  %v2550_v46 = vld [vmem:[%s3444_s1 + $0x424] ss:$8 sps:$4 sm:$0xff]  }
  0x44   :  { %807 = vmatprep.subr.bf16.mxu0 %v2456_v44  ;;  %1280 = vmatprep.subr.bf16.mxu1 %v2484_v47 }
  0x45   :  { %616 = vmatmul.mubr.bf16.gmra.mxu1 %v2899_v54 }
  0x46   :  { %1281 = vmatpush1.bf16.msra.mxu1 %v2482_v53  ;;  %2104 = vmatprep.mubr.msk.bf16.mxu1 %vm343_vm0, %v2922_v55  ;;  %v2548_v53 = vld [vmem:[%s3444_s1 + $0x420] ss:$8 sps:$4 sm:$0xff]  }
  0x47   :  { %808 = vmatpush1.bf16.msra.mxu0 %v2454_v23  ;;  %1282 = vmatprep.subr.bf16.mxu1 %v2490_v59  ;;  %v2559_v23 = vld [vmem:[%s3444_s1 + $0x144] ss:$8 sps:$4 sm:$0xff]   ;;  %v2556_v59 = vld [vmem:[%s3444_s1 + $0x414] ss:$8 sps:$4 sm:$0xff]  }
  0x48   :  { %809 = vmatprep.subr.bf16.mxu0 %v2462_v48 }
  0x4a   :  { %419 = vmatmul.mubr.bf16.gmra.mxu0 %v2849_v2  ;;  %v2469_v2 = vld [vmem:[%s3444_s1 + $0x3b4] ss:$8 sps:$4 sm:$0xff]   ;;  %1283 = vmatpush1.bf16.msra.mxu1 %v2488_v62 }
  0x4b   :  { %810 = vmatpush1.bf16.msra.mxu0 %v2460_v22  ;;  %2156 = vmatprep.mubr.msk.bf16.mxu0 %vm343_vm0, %v2892_v43  ;;  %v2514_v43 = vld [vmem:[%s3444_s1 + $0x244] ss:$8 sps:$4 sm:$0xff]   ;;  %v2557_v22 = vld [vmem:[%s3444_s1 + $0x140] ss:$8 sps:$4 sm:$0xff]  }
  0x4c   :  { %811 = vmatprep.subr.bf16.mxu0 %v2466_v58  ;;  %1284 = vmatprep.subr.bf16.mxu1 %v2496_v1 }
  0x4d   :  { %626 = vmatmul.mubr.bf16.gmra.mxu1 %v2928_v57 }
  0x4e   :  { %1285 = vmatpush1.bf16.msra.mxu1 %v2494_v5  ;;  %2105 = vmatprep.mubr.msk.bf16.mxu1 %vm343_vm0, %v2944_v38  ;;  %v2562_v5 = vld [vmem:[%s3444_s1 + $0x404] ss:$8 sps:$4 sm:$0xff]  }
  0x4f   :  { %812 = vmatpush1.bf16.msra.mxu0 %v2464_v63  ;;  %1286 = vmatprep.subr.bf16.mxu1 %v2502_v7  ;;  %v2554_v63 = vld [vmem:[%s3444_s1 + $0x410] ss:$8 sps:$4 sm:$0xff]   ;;  %v2560_v7 = vld [vmem:[%s3444_s1 + $0x400] ss:$8 sps:$4 sm:$0xff]  }
  0x50   :  { %821 = vmatprep.subr.bf16.mxu0 %v2469_v2 }
  0x52   :  { %1287 = vmatpush1.bf16.msra.mxu1 %v2500_v45  ;;  %v2565_v45 = vld [vmem:[%s3444_s1 + $0x3f4] ss:$8 sps:$4 sm:$0xff]  }
  0x53   :  { %822 = vmatpush2.bf16.msra.mxu0 %v2467_v6  ;;  %1288 = vmatprep.subr.bf16.mxu1 %v2508_v9  ;;  %v2563_v9 = vld [vmem:[%s3444_s1 + $0x3f0] ss:$8 sps:$4 sm:$0xff]  }
  0x54   :  { %823 = vmatprep.subr.bf16.mxu0 %v2475_v8 }
  0x55   :  { %636 = vmatmul.mubr.bf16.gmra.mxu1 %v2951_v50 }
  0x56   :  { %1289 = vmatpush1.bf16.msra.mxu1 %v2506_v11 }
  0x57   :  { %824 = vmatpush2.bf16.msra.mxu0 %v2473_v56  ;;  %1290 = vmatprep.subr.bf16.mxu1 %v2514_v43  ;;  %v2568_v43 = vld [vmem:[%s3444_s1 + $0x3e4] ss:$8 sps:$4 sm:$0xff]  }
  0x58   :  { %825 = vmatprep.subr.bf16.mxu0 %v2481_v10 }
  0x5a   :  { %1291 = vmatpush1.bf16.msra.mxu1 %v2512_v41 }
  0x5b   :  { %826 = vmatpush2.bf16.msra.mxu0 %v2479_v12  ;;  %1300 = vmatprep.subr.bf16.mxu1 %v2520_v37 }
  0x5c   :  { %827 = vmatprep.subr.bf16.mxu0 %v2487_v13  ;;  %v2566_v13 = vld [vmem:[%s3444_s1 + $0x3e0] ss:$8 sps:$4 sm:$0xff]  }
  0x5e   :  { %1301 = vmatpush2.bf16.msra.mxu1 %v2518_v14 }
  0x5f   :  { %828 = vmatpush2.bf16.msra.mxu0 %v2485_v51  ;;  %1302 = vmatprep.subr.bf16.mxu1 %v2526_v15  ;;  %v2571_v51 = vld [vmem:[%s3444_s1 + $0x3d4] ss:$8 sps:$4 sm:$0xff]   ;;  %v2572_v15 = vld [vmem:[%s3444_s1 + $0x3c0] ss:$8 sps:$4 sm:$0xff]  }
  0x60   :  { %1505 = vmatprep.subr.bf16.mxu0 %v2493_v49  ;;  %v2569_v49 = vld [vmem:[%s3444_s1 + $0x3d0] ss:$8 sps:$4 sm:$0xff]  }
  0x62   :  { %830 = vmatmul.mubr.bf16.vlgmr.msra.gmra.mxu0 %v2899_v54  ;;  %v2505_v54 = vld [vmem:[%s3444_s1 + $0x114] ss:$8 sps:$4 sm:$0xff]   ;;  %1303 = vmatpush2.bf16.msra.mxu1 %v2524_v16 }
  0x63   :  { %1506 = vmatpush1.bf16.msra.mxu0 %v2491_v42  ;;  %2157 = vmatprep.mubr.msk.bf16.mxu0 %vm343_vm0, %v2922_v55  ;;  %v2503_v55 = vld [vmem:[%s3444_s1 + $0x110] ss:$8 sps:$4 sm:$0xff]  }
  0x64   :  { %1507 = vmatprep.subr.bf16.mxu0 %v2499_v52  ;;  %1304 = vmatprep.subr.bf16.mxu1 %v2532_v18  ;;  %v2574_v52 = vld [vmem:[%s3444_s1 + $0x3c4] ss:$8 sps:$4 sm:$0xff]  }
  0x66   :  { %1305 = vmatpush2.bf16.msra.mxu1 %v2530_v24 }
  0x67   :  { %1508 = vmatpush1.bf16.msra.mxu0 %v2497_v17  ;;  %1306 = vmatprep.subr.bf16.mxu1 %v2538_v26  ;;  %v2577_v17 = vld [vmem:[%s3444_s1 + $0x474] ss:$8 sps:$4 sm:$0xff]  }
  0x68   :  { %1509 = vmatprep.subr.bf16.mxu0 %v2505_v54  ;;  %v2575_v54 = vld [vmem:[%s3444_s1 + $0x470] ss:$8 sps:$4 sm:$0xff]  }
  0x6a   :  { %840 = vmatmul.mubr.bf16.gmra.mxu0 %v2928_v57  ;;  %v2517_v57 = vld [vmem:[%s3444_s1 + $0xf4] ss:$8 sps:$4 sm:$0xff]   ;;  %1307 = vmatpush2.bf16.msra.mxu1 %v2536_v27 }
  0x6b   :  { %1510 = vmatpush1.bf16.msra.mxu0 %v2503_v55  ;;  %2158 = vmatprep.mubr.msk.bf16.mxu0 %vm343_vm0, %v2944_v38  ;;  %v2523_v38 = vld [vmem:[%s3444_s1 + $0xe4] ss:$8 sps:$4 sm:$0xff]   ;;  %v2583_v27 = vld [vmem:[%s3444_s1 + $0x454] ss:$8 sps:$4 sm:$0xff]  }
  0x6c   :  { %1511 = vmatprep.subr.bf16.mxu0 %v2511_v25  ;;  %1732 = vmatprep.subr.bf16.mxu1 %v2544_v30  ;;  %v2580_v55 = vld [vmem:[%s3444_s1 + $0x464] ss:$8 sps:$4 sm:$0xff]   ;;  %v2578_v25 = vld [vmem:[%s3444_s1 + $0x460] ss:$8 sps:$4 sm:$0xff]  }
  0x6d   :  { %v2586_v30 = vld [vmem:[%s3444_s1 + $0x444] ss:$8 sps:$4 sm:$0xff]  }
  0x6f   :  { %1512 = vmatpush1.bf16.msra.mxu0 %v2509_v29  ;;  %v2581_v29 = vld [vmem:[%s3444_s1 + $0x450] ss:$8 sps:$4 sm:$0xff]  }
  0x70   :  { %1513 = vmatprep.subr.bf16.mxu0 %v2517_v57  ;;  %v2584_v57 = vld [vmem:[%s3444_s1 + $0x440] ss:$8 sps:$4 sm:$0xff]  }
  0x72   :  { %850 = vmatmul.mubr.bf16.gmra.mxu0 %v2951_v50  ;;  %v2535_v50 = vld [vmem:[%s3444_s1 + $0xc4] ss:$8 sps:$4 sm:$0xff]  }
  0x73   :  { %1514 = vmatpush1.bf16.msra.mxu0 %v2515_v31  ;;  %2159 = vmatprep.mubr.msk.bf16.mxu0 %vm343_vm0, %v2970_v19  ;;  %v2533_v19 = vld [vmem:[%s3444_s1 + $0xc0] ss:$8 sps:$4 sm:$0xff]  }
  0x74   :  { %1515 = vmatprep.subr.bf16.mxu0 %v2523_v38 }
  0x77   :  { %1516 = vmatpush1.bf16.msra.mxu0 %v2521_v4 }
  0x78   :  { %1517 = vmatprep.subr.bf16.mxu0 %v2529_v32 }
  0x7a   :  { %860 = vmatmul.mubr.bf16.gmra.mxu0 %v2991_v28  ;;  %v2547_v28 = vld [vmem:[%s3444_s1 + $0x164] ss:$8 sps:$4 sm:$0xff]  }
  0x7b   :  { %1518 = vmatpush1.bf16.msra.mxu0 %v2527_v33 }
  0x7c   :  { %1519 = vmatprep.subr.bf16.mxu0 %v2535_v50 }
  0x7f   :  { %1520 = vmatpush1.bf16.msra.mxu0 %v2533_v19 }
  0x80   :  { %1529 = vmatprep.subr.bf16.mxu0 %v2541_v21 }
  0x82   :  { %v1124_v34 = vpop.permute.xlu1 %1123 }
  0x83   :  { %1530 = vmatpush2.bf16.msra.mxu0 %v2539_v61  ;;  %v1120_v36 = vpop.permute.xlu0 %1119 }
  0x84   :  { %1531 = vmatprep.subr.bf16.mxu0 %v2547_v28 }
  0x86   :  { %v1126_v60 = vpop.permute.xlu1 %1125 }
  0x87   :  { %1532 = vmatpush2.bf16.msra.mxu0 %v2545_v35  ;;  %v1122_v44 = vpop.permute.xlu0 %1121  ;;  %v1137_v1 = vsel %vm343_vm0, %v1124_v34, %v1126_v60 }
  0x88   :  { %1533 = vmatprep.subr.bf16.mxu0 %v2553_v20  ;;  %v1136_v47 = vsel %vm343_vm0, %v1120_v36, %v1122_v44  ;;  %2241 = vmatprep.mubr.msk.bf16.mxu1 %vm343_vm0, %v1122_v44 }
  0x89   :  { %1309 = vmatmul.mubr.bf16.vlgmr.msra.gmra.mxu1 %v1136_v47 }
  0x8a   :  { %1733 = vmatpush1.bf16.msra.mxu1 %v2542_v39  ;;  %v1130_v48 = vpop.permute.xlu1 %1129  ;;  %2242 = vmatprep.mubr.msk.bf16.mxu1 %vm343_vm0, %v1126_v60 }
  0x8b   :  { %1534 = vmatpush2.bf16.msra.mxu0 %v2551_v40  ;;  %v1128_v58 = vpop.permute.xlu0 %1127  ;;  %1734 = vmatprep.subr.bf16.mxu1 %v2550_v46 }
  0x8c   :  { %1535 = vmatprep.subr.bf16.mxu0 %v2559_v23  ;;  %v1138_v11 = vsel %vm343_vm0, %v1128_v58, %v1130_v48 }
  0x8e   :  { %1735 = vmatpush1.bf16.msra.mxu1 %v2548_v53  ;;  %v1134_v62 = vpop.permute.xlu1 %1133 }
  0x8f   :  { %1536 = vmatpush2.bf16.msra.mxu0 %v2557_v22  ;;  %v1132_v2 = vpop.permute.xlu0 %1131  ;;  %1736 = vmatprep.subr.bf16.mxu1 %v2556_v59 }
  0x90   :  { %v1139_v14 = vsel %vm343_vm0, %v1132_v2, %v1134_v62 }
  0x91   :  { %1319 = vmatmul.mubr.bf16.gmra.mxu1 %v1137_v1 }
  0x92   :  { %1737 = vmatpush1.bf16.msra.mxu1 %v2554_v63  ;;  %v1352_v6 = vpop.permute.xlu1 %1351  ;;  %2243 = vmatprep.mubr.msk.bf16.mxu1 %vm343_vm0, %v1130_v48 }
  0x93   :  { %v1350_v8 = vpop.permute.xlu0 %1349  ;;  %2269 = vmatprep.mubr.msk.bf16.mxu0 %vm343_vm0, %v1352_v6  ;;  %1738 = vmatprep.subr.bf16.mxu1 %v2562_v5 }
  0x94   :  { %v1365_v56 = vsel %vm343_vm0, %v1350_v8, %v1352_v6 }
  0x95   :  { %1538 = vmatmul.mubr.bf16.vlgmr.msra.gmra.mxu0 %v1365_v56 }
  0x96   :  { %1739 = vmatpush1.bf16.msra.mxu1 %v2560_v7  ;;  %v1356_v10 = vpop.permute.xlu1 %1355 }
  0x97   :  { %1740 = vmatprep.subr.bf16.mxu1 %v2565_v45  ;;  %v1354_v12 = vpop.permute.xlu0 %1353  ;;  %2270 = vmatprep.mubr.msk.bf16.mxu0 %vm343_vm0, %v1356_v10 }
  0x98   :  { %v1366_v41 = vsel %vm343_vm0, %v1354_v12, %v1356_v10 }
  0x99   :  { %1329 = vmatmul.mubr.bf16.gmra.mxu1 %v1138_v11 }
  0x9a   :  { %1741 = vmatpush1.bf16.msra.mxu1 %v2563_v9  ;;  %2244 = vmatprep.mubr.msk.bf16.mxu1 %vm343_vm0, %v1134_v62  ;;  %v1360_v37 = vpop.permute.xlu1 %1359 }
  0x9b   :  { %1742 = vmatprep.subr.bf16.mxu1 %v2568_v43  ;;  %v1358_v42 = vpop.permute.xlu0 %1357 }
  0x9c   :  { %v1367_v16 = vsel %vm343_vm0, %v1358_v42, %v1360_v37 }
  0x9d   :  { %1548 = vmatmul.mubr.bf16.gmra.mxu0 %v1366_v41 }
  0x9e   :  { %1743 = vmatpush1.bf16.msra.mxu1 %v2566_v13  ;;  %2271 = vmatprep.mubr.msk.bf16.mxu0 %vm343_vm0, %v1360_v37  ;;  %v1364_v18 = vpop.permute.xlu1 %1363 }
  0x9f   :  { %1744 = vmatprep.subr.bf16.mxu1 %v2571_v51  ;;  %v1362_v24 = vpop.permute.xlu0 %1361 }
  0xa0   :  { %v1368_v26 = vsel %vm343_vm0, %v1362_v24, %v1364_v18 }
  0xa1   :  { %1339 = vmatmul.mubr.bf16.gmra.mxu1 %v1139_v14 }
  0xa2   :  { %1745 = vmatpush1.bf16.msra.mxu1 %v2569_v49  ;;  %2321 = vmatprep.mubr.msk.bf16.mxu1 %vm343_vm0, %v1356_v10  ;;  %v1606_v31 = vpop.permute.xlu1 %1605 }
  0xa3   :  { %1746 = vmatprep.subr.bf16.mxu1 %v2574_v52  ;;  %v1604_v38 = vpop.permute.xlu0 %1603 }
  0xa4   :  { %v1607_v4 = vsel %vm343_vm0, %v1604_v38, %v1606_v31 }
  0xa5   :  { %1558 = vmatmul.mubr.bf16.gmra.mxu0 %v1367_v16 }
  0xa6   :  { %1747 = vmatpush1.bf16.msra.mxu1 %v2572_v15  ;;  %2272 = vmatprep.mubr.msk.bf16.mxu0 %vm343_vm0, %v1364_v18 }
  0xa7   :  { %1756 = vmatprep.subr.bf16.mxu1 %v2577_v17 }
  0xaa   :  { %1757 = vmatpush2.bf16.msra.mxu1 %v2575_v54 }
  0xab   :  { %1758 = vmatprep.subr.bf16.mxu1 %v2580_v55 }
  0xad   :  { %1568 = vmatmul.mubr.bf16.gmra.mxu0 %v1368_v26 }
  0xae   :  { %1759 = vmatpush2.bf16.msra.mxu1 %v2578_v25 }
  0xaf   :  { %1760 = vmatprep.subr.bf16.mxu1 %v2583_v27 }
  0xb2   :  { %1761 = vmatpush2.bf16.msra.mxu1 %v2581_v29 }
  0xb3   :  { %1762 = vmatprep.subr.bf16.mxu1 %v2586_v30 }
  0xb6   :  { %1763 = vmatpush2.bf16.msra.mxu1 %v2584_v57 }
  0xb9   :  { %1765 = vmatmul.mubr.bf16.vlgmr.msra.gmra.mxu1 %v1366_v41 }
  0xba   :  { %2322 = vmatprep.mubr.msk.bf16.mxu1 %vm343_vm0, %v1360_v37 }
  0xc1   :  { %1775 = vmatmul.mubr.bf16.gmra.mxu1 %v1367_v16 }
  0xc2   :  { %2323 = vmatprep.mubr.msk.bf16.mxu1 %vm343_vm0, %v1364_v18 }
  0xc9   :  { %1785 = vmatmul.mubr.bf16.gmra.mxu1 %v1368_v26 }
  0xca   :  { %2324 = vmatprep.mubr.msk.bf16.mxu1 %vm343_vm0, %v1606_v31 }
  0xd1   :  { %1795 = vmatmul.mubr.bf16.gmra.mxu1 %v1607_v4 }
  0xf2   :  { %v390_v32 = vpop.f32.mrf.mxu0 }
  0xf4   :  { %v392_v33 = vpop.f32.mrf.mxu0 }
  0xf6   :  { %v394_v50 = vpop.f32.mrf.mxu0 }
  0xf8   :  { %v396_v19 = vpop.f32.mrf.mxu0 }
  0xfa   :  { %v400_v21 = vpop.f32.mrf.mxu0 }
  0xfc   :  { %v402_v61 = vpop.f32.mrf.mxu0 }
  0xfd   :  { %v607_v35 = vpop.f32.mrf.mxu1 }
  0xfe   :  { %v404_v28 = vpop.f32.mrf.mxu0  ;;  %v608_v5 = vadd.f32 %v607_v35, %v390_v32 }
  0xff   :  { %v609_v20 = vpop.f32.mrf.mxu1 }
 0x100   :  { %v406_v34 = vpop.f32.mrf.mxu0  ;;  %v610_v6 = vadd.f32 %v609_v20, %v392_v33 }
 0x101   :  { %v611_v39 = vpop.f32.mrf.mxu1 }
 0x102   :  { %v410_v36 = vpop.f32.mrf.mxu0  ;;  %v612_v10 = vadd.f32 %v611_v39, %v394_v50 }
 0x103   :  { %v613_v44 = vpop.f32.mrf.mxu1 }
 0x104   :  { %v412_v60 = vpop.f32.mrf.mxu0  ;;  %v614_v11 = vadd.f32 %v613_v44, %v396_v19 }
 0x105   :  { %v617_v23 = vpop.f32.mrf.mxu1 }
 0x106   :  { %v414_v40 = vpop.f32.mrf.mxu0  ;;  %v618_v13 = vadd.f32 %v617_v23, %v400_v21 }
 0x107   :  { %v619_v48 = vpop.f32.mrf.mxu1 }
 0x108   :  { %v416_v46 = vpop.f32.mrf.mxu0  ;;  %v620_v51 = vadd.f32 %v619_v48, %v402_v61 }
 0x109   :  { %v621_v22 = vpop.f32.mrf.mxu1 }
 0x10a   :  { %v420_v47 = vpop.f32.mrf.mxu0  ;;  %v622_v15 = vadd.f32 %v621_v22, %v404_v28 }
 0x10b   :  { %v623_v59 = vpop.f32.mrf.mxu1 }
 0x10c   :  { %v3342_v53 = vpop.f32.mrf.mxu0  ;;  %v624_v17 = vadd.f32 %v623_v59, %v406_v34 }
 0x10d   :  { %v627_v63 = vpop.f32.mrf.mxu1 }
 0x10e   :  { %v3344_v58 = vpop.f32.mrf.mxu0  ;;  %v628_v26 = vadd.f32 %v627_v63, %v410_v36 }
 0x10f   :  { %v629_v2 = vpop.f32.mrf.mxu1 }
 0x110   :  { %v3346_v62 = vpop.f32.mrf.mxu0  ;;  %v630_v29 = vadd.f32 %v629_v2, %v412_v60 }
 0x111   :  { %v631_v9 = vpop.f32.mrf.mxu1 }
 0x112   :  { %v632_v32 = vadd.f32 %v631_v9, %v414_v40 }
 0x113   :  { %v633_v14 = vpop.f32.mrf.mxu1 }
 0x114   :  { %v634_v50 = vadd.f32 %v633_v14, %v416_v46 }
 0x115   :  { %v637_v24 = vpop.f32.mrf.mxu1 }
 0x116   :  { %v638_v60 = vadd.f32 %v637_v24, %v420_v47 }
 0x117   :  { %v639_v38 = vpop.f32.mrf.mxu1 }
 0x119   :  { %v641_v44 = vpop.f32.mrf.mxu1 }
 0x122   :  { %v831_v1 = vpop.f32.mrf.mxu0 }
 0x123   :  { %v870_v8 = vadd.f32 %v831_v1, %v608_v5  ;;  %v640_v1 = vadd.f32 %v639_v38, %v3342_v53 }
 0x124   :  { %v833_v7 = vpop.f32.mrf.mxu0 }
 0x125   :  { %v871_v45 = vadd.f32 %v833_v7, %v610_v6  ;;  %v1007_v33 = vmul.f32 %v870_v8, %v870_v8 }
 0x126   :  { %v835_v56 = vpop.f32.mrf.mxu0 }
 0x127   :  { %v2353_v12 = vpack.c.bf16 %v871_v45, %v870_v8  ;;  %v872_v41 = vadd.f32 %v835_v56, %v612_v10  ;;  %v1008_v46 = vmul.f32 %v871_v45, %v871_v45  ;;  %v642_v10 = vadd.f32 %v641_v44, %v3344_v58 }
 0x128   :  { %v837_v43 = vpop.f32.mrf.mxu0 }
 0x129   :  { %950 = vst [vmem:[%s3447_s3] sm:$0xff] %v2353_v12  ;;  %v873_v37 = vadd.f32 %v837_v43, %v614_v11  ;;  %v1009_v57 = vmul.f32 %v872_v41, %v872_v41  ;;  %v958_v21 = vadd.f32 %v872_v41, %v870_v8 }
 0x12a   :  { %v841_v49 = vpop.f32.mrf.mxu0 }
 0x12b   :  { %v2354_v42 = vpack.c.bf16 %v873_v37, %v872_v41  ;;  %v874_v16 = vadd.f32 %v841_v49, %v618_v13  ;;  %v1023_v35 = vadd.f32 %v1009_v57, %v1007_v33  ;;  %v971_v36 = vadd.f32 %v873_v37, %v871_v45  ;;  %v643_v45 = vpop.f32.mrf.mxu1 }
 0x12c   :  { %v843_v52 = vpop.f32.mrf.mxu0  ;;  %v1010_v20 = vmul.f32 %v873_v37, %v873_v37 }
 0x12d   :  { %951 = vst [vmem:[%s3447_s3 + $0x10] sm:$0xff] %v2354_v42  ;;  %v875_v18 = vadd.f32 %v843_v52, %v620_v51  ;;  %v1011_v61 = vmul.f32 %v874_v16, %v874_v16  ;;  %v959_v23 = vadd.f32 %v958_v21, %v874_v16 }
 0x12e   :  { %v845_v54 = vpop.f32.mrf.mxu0  ;;  %v1036_v8 = vadd.f32 %v1010_v20, %v1008_v46 }
 0x12f   :  { %v2355_v55 = vpack.c.bf16 %v875_v18, %v874_v16  ;;  %v876_v27 = vadd.f32 %v845_v54, %v622_v15  ;;  %v972_v59 = vadd.f32 %v971_v36, %v875_v18  ;;  %v1012_v63 = vmul.f32 %v875_v18, %v875_v18 }
 0x130   :  { %v847_v25 = vpop.f32.mrf.mxu0  ;;  %v1024_v5 = vadd.f32 %v1023_v35, %v1011_v61  ;;  %v644_v15 = vadd.f32 %v643_v45, %v3346_v62 }
 0x131   :  { %952 = vst [vmem:[%s3447_s3 + $0x20] sm:$0xff] %v2355_v55  ;;  %v877_v30 = vadd.f32 %v847_v25, %v624_v17  ;;  %v1013_v48 = vmul.f32 %v876_v27, %v876_v27  ;;  %v960_v6 = vadd.f32 %v959_v23, %v876_v27  ;;  %v1037_v41 = vadd.f32 %v1036_v8, %v1012_v63 }
 0x132   :  { %v851_v31 = vpop.f32.mrf.mxu0 }
 0x133   :  { %v2356_v4 = vpack.c.bf16 %v877_v30, %v876_v27  ;;  %v878_v28 = vadd.f32 %v851_v31, %v628_v26  ;;  %v973_v56 = vadd.f32 %v972_v59, %v877_v30  ;;  %v1014_v9 = vmul.f32 %v877_v30, %v877_v30 }
 0x134   :  { %v853_v19 = vpop.f32.mrf.mxu0  ;;  %v1025_v12 = vadd.f32 %v1024_v5, %v1013_v48  ;;  %v2588_v48 = vmov 1966171168  }
 0x135   :  { %953 = vst [vmem:[%s3447_s3 + $0x30] sm:$0xff] %v2356_v4  ;;  %v879_v34 = vadd.f32 %v853_v19, %v630_v29  ;;  %v1015_v7 = vmul.f32 %v878_v28, %v878_v28  ;;  %v961_v43 = vadd.f32 %v960_v6, %v878_v28  ;;  %v1038_v16 = vadd.f32 %v1037_v41, %v1014_v9 }
 0x136   :  { %v855_v39 = vpop.f32.mrf.mxu0 }
 0x137   :  { %v2357_v40 = vpack.c.bf16 %v879_v34, %v878_v28  ;;  %v880_v22 = vadd.f32 %v855_v39, %v632_v32  ;;  %v974_v51 = vadd.f32 %v973_v56, %v879_v34  ;;  %v1016_v37 = vmul.f32 %v879_v34, %v879_v34 }
 0x138   :  { %v857_v2 = vpop.f32.mrf.mxu0  ;;  %v1026_v42 = vadd.f32 %v1025_v12, %v1015_v7 }
 0x139   :  { %954 = vst [vmem:[%s3447_s3 + $0x40] sm:$0xff] %v2357_v40  ;;  %v881_v47 = vadd.f32 %v857_v2, %v634_v50  ;;  %v1017_v13 = vmul.f32 %v880_v22, %v880_v22  ;;  %v962_v52 = vadd.f32 %v961_v43, %v880_v22  ;;  %v1039_v29 = vadd.f32 %v1038_v16, %v1016_v37 }
 0x13a   :  { %v861_v11 = vpop.f32.mrf.mxu0  ;;  %v988_v40 = vunpack.c.l.s4 %v2588_v48 }
 0x13b   :  { %v2358_v53 = vpack.c.bf16 %v881_v47, %v880_v22  ;;  %v882_v49 = vadd.f32 %v861_v11, %v638_v60  ;;  %v975_v17 = vadd.f32 %v974_v51, %v881_v47  ;;  %v1018_v18 = vmul.f32 %v881_v47, %v881_v47 }
 0x13c   :  { %v863_v14 = vpop.f32.mrf.mxu0  ;;  %v1027_v55 = vadd.f32 %v1026_v42, %v1017_v13  ;;  %v989_v47 = vunpack.c.0.s8 %v988_v40 }
 0x13d   :  { %955 = vst [vmem:[%s3447_s3 + $0x50] sm:$0xff] %v2358_v53  ;;  %v883_v58 = vadd.f32 %v863_v14, %v640_v1  ;;  %v1019_v54 = vmul.f32 %v882_v49, %v882_v49  ;;  %v963_v25 = vadd.f32 %v962_v52, %v882_v49  ;;  %v1040_v33 = vadd.f32 %v1039_v29, %v1018_v18 }
 0x13e   :  { %v865_v24 = vpop.f32.mrf.mxu0  ;;  %v3376_v13 = vsub.s32 %v989_v47, %v2621_v3 }
 0x13f   :  { %v2359_v26 = vpack.c.bf16 %v883_v58, %v882_v49  ;;  %v884_v27 = vadd.f32 %v865_v24, %v642_v10  ;;  %v976_v30 = vadd.f32 %v975_v17, %v883_v58  ;;  %v1020_v57 = vmul.f32 %v883_v58, %v883_v58 }
 0x140   :  { %v867_v31 = vpop.f32.mrf.mxu0  ;;  %v1028_v38 = vadd.f32 %v1027_v55, %v1019_v54 }
 0x141   :  { %956 = vst [vmem:[%s3447_s3 + $0x60] sm:$0xff] %v2359_v26  ;;  %v964_v62 = vadd.f32 %v963_v25, %v884_v27  ;;  %v1021_v4 = vmul.f32 %v884_v27, %v884_v27  ;;  %v885_v32 = vadd.f32 %v867_v31, %v644_v15  ;;  %v1041_v28 = vadd.f32 %v1040_v33, %v1020_v57 }
 0x143   :  { %v965_v50 = vrot.slane %v964_v62, 4  ;;  %v1029_v19 = vadd.f32 %v1028_v38, %v1021_v4  ;;  %v2360_v21 = vpack.c.bf16 %v885_v32, %v884_v27  ;;  %v977_v61 = vadd.f32 %v976_v30, %v885_v32 }
 0x144   :  { %v1022_v34 = vmul.f32 %v885_v32, %v885_v32 }
 0x145   :  { %v966_v35 = vadd.f32 %v965_v50, %v964_v62  ;;  %v1030_v36 = vrot.slane %v1029_v19, 4  ;;  %957 = vst [vmem:[%s3447_s3 + $0x70] sm:$0xff] %v2360_v21  ;;  %v978_v20 = vrot.slane %v977_v61, 4 }
 0x146   :  { %v1042_v60 = vadd.f32 %v1041_v28, %v1022_v34 }
 0x147   :  { %v967_v39 = vrot.slane %v966_v35, 2  ;;  %v1031_v44 = vadd.f32 %v1030_v36, %v1029_v19  ;;  %v979_v23 = vadd.f32 %v978_v20, %v977_v61 }
 0x148   :  { %v1043_v22 = vrot.slane %v1042_v60, 4 }
 0x149   :  { %v968_v46 = vadd.f32 %v967_v39, %v966_v35  ;;  %v1032_v59 = vrot.slane %v1031_v44, 2  ;;  %v980_v63 = vrot.slane %v979_v23, 2  ;;  %v1310_v2 = vpop.f32.mrf.mxu1 }
 0x14a   :  { %v1044_v1 = vadd.f32 %v1043_v22, %v1042_v60 }
 0x14b   :  { %v969_v5 = vrot.slane %v968_v46, 1  ;;  %v1033_v6 = vadd.f32 %v1032_v59, %v1031_v44  ;;  %v981_v7 = vadd.f32 %v980_v63, %v979_v23  ;;  %v1312_v56 = vpop.f32.mrf.mxu1 }
 0x14c   :  { %v1045_v8 = vrot.slane %v1044_v1, 2 }
 0x14d   :  { %v982_v9 = vrot.slane %v981_v7, 1  ;;  %v1034_v10 = vrot.slane %v1033_v6, 1  ;;  %v1314_v45 = vpop.f32.mrf.mxu1  ;;  %v970_v12 = vadd.f32 %v969_v5, %v968_v46 }
 0x14e   :  { %v1046_v11 = vadd.f32 %v1045_v8, %v1044_v1 }
 0x14f   :  { %v983_v43 = vadd.f32 %v982_v9, %v981_v7  ;;  %v1316_v41 = vpop.f32.mrf.mxu1  ;;  %v1035_v37 = vadd.f32 %v1034_v10, %v1033_v6 }
 0x150   :  { %v1047_v53 = vrot.slane %v1046_v11, 1 }
 0x151   :  { %v986_v51 = vcombine.low %v970_v12, %v983_v43  ;;  %v1320_v14 = vpop.f32.mrf.mxu1 }
 0x152   :  { %v1048_v49 = vadd.f32 %v1047_v53, %v1046_v11 }
 0x153   :  { %v993_v42 = vrot.slane %v986_v51, %v3376_v13  ;;  %v1322_v58 = vpop.f32.mrf.mxu1 }
 0x154   :  { %v1051_v15 = vcombine.low %v1035_v37, %v1048_v49 }
 0x155   :  { %v1000_v16 = vrot.slane %v993_v42, %v3376_v13  ;;  %v1539_v17 = vpop.f32.mrf.mxu0  ;;  %v1324_v18 = vpop.f32.mrf.mxu1 }
 0x156   :  { %v1058_v3 = vrot.slane %v1051_v15, %v3376_v13  ;;  %v1540_v28 = vadd.f32 %v1539_v17, %v1310_v2 }
 0x157   :  { %1006 = vst.msk [vmem:[%s3448_s4] ss:$2 sm:$0x3] %vm3380_vm1, %v1000_v16  ;;  %v1541_v0 = vpop.f32.mrf.mxu0  ;;  %v1326_v24 = vpop.f32.mrf.mxu1 }
 0x158   :  { %v1065_v54 = vrot.slane %v1058_v3, %v3376_v13  ;;  %v1542_v34 = vadd.f32 %v1541_v0, %v1312_v56 }
 0x159   :  { %v1330_v55 = vpop.f32.mrf.mxu1  ;;  %v1543_v25 = vpop.f32.mrf.mxu0 }
 0x15a   :  { %2168 = vst.msk [vmem:[%s3448_s4 + $0x1] ss:$2 sm:$0x3] %vm3380_vm1, %v1065_v54  ;;  %v1544_v44 = vadd.f32 %v1543_v25, %v1314_v45 }
 0x15b   :  { %v1332_v26 = vpop.f32.mrf.mxu1  ;;  %v1545_v27 = vpop.f32.mrf.mxu0 }
 0x15c   :  { %v1546_v23 = vadd.f32 %v1545_v27, %v1316_v41 }
 0x15d   :  { %v1334_v29 = vpop.f32.mrf.mxu1  ;;  %v1549_v30 = vpop.f32.mrf.mxu0 }
 0x15e   :  { %v1550_v1 = vadd.f32 %v1549_v30, %v1320_v14 }
 0x15f   :  { %v1336_v57 = vpop.f32.mrf.mxu1  ;;  %v1551_v31 = vpop.f32.mrf.mxu0 }
 0x160   :  { %v1552_v2 = vadd.f32 %v1551_v31, %v1322_v58 }
 0x161   :  { %v1340_v38 = vpop.f32.mrf.mxu1  ;;  %v1553_v62 = vpop.f32.mrf.mxu0 }
 0x162   :  { %v1554_v9 = vadd.f32 %v1553_v62, %v1324_v18 }
 0x163   :  { %v3397_v4 = vpop.f32.mrf.mxu1  ;;  %v1555_v32 = vpop.f32.mrf.mxu0 }
 0x164   :  { %v1556_v10 = vadd.f32 %v1555_v32, %v1326_v24 }
 0x165   :  { %v3399_v33 = vpop.f32.mrf.mxu1  ;;  %v1559_v50 = vpop.f32.mrf.mxu0 }
 0x166   :  { %v1560_v37 = vadd.f32 %v1559_v50, %v1330_v55 }
 0x167   :  { %v3401_v19 = vpop.f32.mrf.mxu1  ;;  %v1561_v21 = vpop.f32.mrf.mxu0 }
 0x168   :  { %v1562_v49 = vadd.f32 %v1561_v21, %v1332_v26 }
 0x169   :  { %v1563_v60 = vpop.f32.mrf.mxu0 }
 0x16a   :  { %v1564_v42 = vadd.f32 %v1563_v60, %v1334_v29 }
 0x16b   :  { %v1565_v59 = vpop.f32.mrf.mxu0 }
 0x16c   :  { %v1566_v15 = vadd.f32 %v1565_v59, %v1336_v57 }
 0x16d   :  { %v1569_v8 = vpop.f32.mrf.mxu0 }
 0x16e   :  { %v1570_v0 = vadd.f32 %v1569_v8, %v1340_v38 }
 0x16f   :  { %v1571_v53 = vpop.f32.mrf.mxu0 }
 0x170   :  { %v1572_v62 = vadd.f32 %v1571_v53, %v3397_v4 }
 0x171   :  { %v1573_v24 = vpop.f32.mrf.mxu0 }
 0x173   :  { %v1575_v60 = vpop.f32.mrf.mxu0 }
 0x179   :  { %v1766_v61 = vpop.f32.mrf.mxu1 }
 0x17a   :  { %v1805_v36 = vadd.f32 %v1766_v61, %v1540_v28 }
 0x17b   :  { %v1768_v35 = vpop.f32.mrf.mxu1 }
 0x17c   :  { %v1806_v20 = vadd.f32 %v1768_v35, %v1542_v34  ;;  %v1939_v58 = vmul.f32 %v1805_v36, %v1805_v36 }
 0x17d   :  { %v1770_v39 = vpop.f32.mrf.mxu1 }
 0x17e   :  { %v2361_v48 = vpack.c.bf16 %v1806_v20, %v1805_v36  ;;  %v1807_v22 = vadd.f32 %v1770_v39, %v1544_v44  ;;  %v1940_v32 = vmul.f32 %v1806_v20, %v1806_v20 }
 0x17f   :  { %v1772_v40 = vpop.f32.mrf.mxu1 }
 0x180   :  { %1885 = vst [vmem:[%s3447_s3 + $0x8] sm:$0xff] %v2361_v48  ;;  %v1808_v46 = vadd.f32 %v1772_v40, %v1546_v23  ;;  %v1941_v41 = vmul.f32 %v1807_v22, %v1807_v22  ;;  %v1893_v3 = vadd.f32 %v1807_v22, %v1805_v36  ;;  %v1574_v36 = vadd.f32 %v1573_v24, %v3399_v33 }
 0x181   :  { %v1776_v63 = vpop.f32.mrf.mxu1 }
 0x182   :  { %v2362_v5 = vpack.c.bf16 %v1808_v46, %v1807_v22  ;;  %v1809_v7 = vadd.f32 %v1776_v63, %v1550_v1  ;;  %v1955_v25 = vadd.f32 %v1941_v41, %v1939_v58  ;;  %v1906_v27 = vadd.f32 %v1808_v46, %v1806_v20 }
 0x183   :  { %v1778_v6 = vpop.f32.mrf.mxu1  ;;  %v1942_v30 = vmul.f32 %v1808_v46, %v1808_v46 }
 0x184   :  { %1886 = vst [vmem:[%s3447_s3 + $0x18] sm:$0xff] %v2362_v5  ;;  %v1810_v47 = vadd.f32 %v1778_v6, %v1552_v2  ;;  %v1943_v17 = vmul.f32 %v1809_v7, %v1809_v7  ;;  %v1894_v26 = vadd.f32 %v1893_v3, %v1809_v7  ;;  %v1576_v5 = vadd.f32 %v1575_v60, %v3401_v19 }
 0x185   :  { %v1780_v56 = vpop.f32.mrf.mxu1  ;;  %v1968_v39 = vadd.f32 %v1942_v30, %v1940_v32 }
 0x186   :  { %v2363_v11 = vpack.c.bf16 %v1810_v47, %v1809_v7  ;;  %v1811_v12 = vadd.f32 %v1780_v56, %v1554_v9  ;;  %v1907_v50 = vadd.f32 %v1906_v27, %v1810_v47  ;;  %v1944_v21 = vmul.f32 %v1810_v47, %v1810_v47 }
 0x187   :  { %v1782_v45 = vpop.f32.mrf.mxu1  ;;  %v1956_v28 = vadd.f32 %v1955_v25, %v1943_v17 }
 0x188   :  { %1887 = vst [vmem:[%s3447_s3 + $0x28] sm:$0xff] %v2363_v11  ;;  %v1812_v43 = vadd.f32 %v1782_v45, %v1556_v10  ;;  %v1945_v31 = vmul.f32 %v1811_v12, %v1811_v12  ;;  %v1895_v34 = vadd.f32 %v1894_v26, %v1811_v12  ;;  %v1969_v46 = vadd.f32 %v1968_v39, %v1944_v21 }
 0x189   :  { %v1786_v51 = vpop.f32.mrf.mxu1 }
 0x18a   :  { %v2364_v14 = vpack.c.bf16 %v1812_v43, %v1811_v12  ;;  %v1813_v18 = vadd.f32 %v1786_v51, %v1560_v37  ;;  %v1908_v44 = vadd.f32 %v1907_v50, %v1812_v43  ;;  %v1946_v23 = vmul.f32 %v1812_v43, %v1812_v43 }
 0x18b   :  { %v1788_v16 = vpop.f32.mrf.mxu1  ;;  %v1957_v4 = vadd.f32 %v1956_v28, %v1945_v31 }
 0x18c   :  { %1888 = vst [vmem:[%s3447_s3 + $0x38] sm:$0xff] %v2364_v14  ;;  %v1814_v54 = vadd.f32 %v1788_v16, %v1562_v49  ;;  %v1947_v35 = vmul.f32 %v1813_v18, %v1813_v18  ;;  %v1896_v20 = vadd.f32 %v1895_v34, %v1813_v18  ;;  %v1970_v47 = vadd.f32 %v1969_v46, %v1946_v23 }
 0x18d   :  { %v1790_v55 = vpop.f32.mrf.mxu1 }
 0x18e   :  { %v2365_v29 = vpack.c.bf16 %v1814_v54, %v1813_v18  ;;  %v1815_v57 = vadd.f32 %v1790_v55, %v1564_v42  ;;  %v1909_v59 = vadd.f32 %v1908_v44, %v1814_v54  ;;  %v1948_v63 = vmul.f32 %v1814_v54, %v1814_v54 }
 0x18f   :  { %v1792_v61 = vpop.f32.mrf.mxu1  ;;  %v1958_v6 = vadd.f32 %v1957_v4, %v1947_v35 }
 0x190   :  { %1889 = vst [vmem:[%s3447_s3 + $0x48] sm:$0xff] %v2365_v29  ;;  %v1816_v38 = vadd.f32 %v1792_v61, %v1566_v15  ;;  %v1949_v40 = vmul.f32 %v1815_v57, %v1815_v57  ;;  %v1897_v7 = vadd.f32 %v1896_v20, %v1815_v57  ;;  %v1971_v53 = vadd.f32 %v1970_v47, %v1948_v63 }
 0x191   :  { %v1796_v48 = vpop.f32.mrf.mxu1 }
 0x192   :  { %v2366_v22 = vpack.c.bf16 %v1816_v38, %v1815_v57  ;;  %v1817_v1 = vadd.f32 %v1796_v48, %v1570_v0  ;;  %v1910_v8 = vadd.f32 %v1909_v59, %v1816_v38  ;;  %v1950_v56 = vmul.f32 %v1816_v38, %v1816_v38 }
 0x193   :  { %v1798_v2 = vpop.f32.mrf.mxu1  ;;  %v1959_v11 = vadd.f32 %v1958_v6, %v1949_v40 }
 0x194   :  { %1890 = vst [vmem:[%s3447_s3 + $0x58] sm:$0xff] %v2366_v22  ;;  %v1818_v33 = vadd.f32 %v1798_v2, %v1572_v62  ;;  %v1951_v9 = vmul.f32 %v1817_v1, %v1817_v1  ;;  %v1898_v45 = vadd.f32 %v1897_v7, %v1817_v1  ;;  %v1972_v15 = vadd.f32 %v1971_v53, %v1950_v56 }
 0x195   :  { %v1800_v10 = vpop.f32.mrf.mxu1 }
 0x196   :  { %v2367_v12 = vpack.c.bf16 %v1818_v33, %v1817_v1  ;;  %v1819_v43 = vadd.f32 %v1800_v10, %v1574_v36  ;;  %v1911_v41 = vadd.f32 %v1910_v8, %v1818_v33  ;;  %v1952_v51 = vmul.f32 %v1818_v33, %v1818_v33 }
 0x197   :  { %v1802_v19 = vpop.f32.mrf.mxu1  ;;  %v1960_v37 = vadd.f32 %v1959_v11, %v1951_v9 }
 0x198   :  { %1891 = vst [vmem:[%s3447_s3 + $0x68] sm:$0xff] %v2367_v12  ;;  %v1899_v49 = vadd.f32 %v1898_v45, %v1819_v43  ;;  %v1953_v14 = vmul.f32 %v1819_v43, %v1819_v43  ;;  %v1820_v42 = vadd.f32 %v1802_v19, %v1576_v5  ;;  %v1973_v18 = vadd.f32 %v1972_v15, %v1952_v51 }
 0x19a   :  { %v1900_v58 = vrot.slane %v1899_v49, 4  ;;  %v1961_v16 = vadd.f32 %v1960_v37, %v1953_v14  ;;  %v2368_v3 = vpack.c.bf16 %v1820_v42, %v1819_v43  ;;  %v1912_v17 = vadd.f32 %v1911_v41, %v1820_v42 }
 0x19b   :  { %v1954_v54 = vmul.f32 %v1820_v42, %v1820_v42 }
 0x19c   :  { %v1901_v0 = vadd.f32 %v1900_v58, %v1899_v49  ;;  %v1962_v24 = vrot.slane %v1961_v16, 4  ;;  %1892 = vst [vmem:[%s3447_s3 + $0x78] sm:$0xff] %v2368_v3  ;;  %v1913_v25 = vrot.slane %v1912_v17, 4 }
 0x19d   :  { %v1974_v27 = vadd.f32 %v1973_v18, %v1954_v54 }
 0x19e   :  { %v1902_v30 = vrot.slane %v1901_v0, 2  ;;  %v1963_v55 = vadd.f32 %v1962_v24, %v1961_v16  ;;  %v1914_v26 = vadd.f32 %v1913_v25, %v1912_v17 }
 0x19f   :  { %v1975_v31 = vrot.slane %v1974_v27, 4 }
 0x1a0   :  { %v1903_v29 = vadd.f32 %v1902_v30, %v1901_v0  ;;  %v1964_v57 = vrot.slane %v1963_v55, 2  ;;  %v1915_v62 = vrot.slane %v1914_v26, 2 }
 0x1a1   :  { %v1976_v32 = vadd.f32 %v1975_v31, %v1974_v27 }
 0x1a2   :  { %v1904_v50 = vrot.slane %v1903_v29, 1  ;;  %v1965_v21 = vadd.f32 %v1964_v57, %v1963_v55  ;;  %v1916_v61 = vadd.f32 %v1915_v62, %v1914_v26 }
 0x1a3   :  { %v1977_v28 = vrot.slane %v1976_v32, 2 }
 0x1a4   :  { %v1917_v34 = vrot.slane %v1916_v61, 1  ;;  %v1966_v35 = vrot.slane %v1965_v21, 1  ;;  %v1905_v36 = vadd.f32 %v1904_v50, %v1903_v29 }
 0x1a5   :  { %v1978_v38 = vadd.f32 %v1977_v28, %v1976_v32 }
 0x1a6   :  { %v1918_v60 = vadd.f32 %v1917_v34, %v1916_v61  ;;  %v1967_v23 = vadd.f32 %v1966_v35, %v1965_v21 }
 0x1a7   :  { %v1979_v39 = vrot.slane %v1978_v38, 1 }
 0x1a8   :  { %v1921_v44 = vcombine.low %v1905_v36, %v1918_v60 }
 0x1a9   :  { %v1980_v48 = vadd.f32 %v1979_v39, %v1978_v38 }
 0x1aa   :  { %v1928_v4 = vrot.slane %v1921_v44, %v3376_v13 }
 0x1ab   :  { %v1983_v20 = vcombine.low %v1967_v23, %v1980_v48 }
 0x1ac   :  { %v1935_v40 = vrot.slane %v1928_v4, %v3376_v13 }
 0x1ad   :  { %v1990_v22 = vrot.slane %v1983_v20, %v3376_v13 }
 0x1ae   :  { %2333 = vst.msk [vmem:[%s3448_s4 + $0x4] ss:$2 sm:$0x3] %vm3380_vm1, %v1935_v40 }
 0x1af   :  { %v1997_v46 = vrot.slane %v1990_v22, %v3376_v13 }
 0x1b1   :  { %2334 = vst.msk [vmem:[%s3448_s4 + $0x5] ss:$2 sm:$0x3] %vm3380_vm1, %v1997_v46 }

// kernel: _lambda_.7
= control target key start
LH: loop header
LB: loop body
LE: loop exit
PB: predicated region body
PF: predicated region fallthrough
CT: control target
= control target key end

     0   :  { %v67_v0 = vlaneseq  ;;  %s950_s0 = inlined_call_operand.vmem [shape: bf16[8,8,512], index: 0, kind: input, shape index: {}]   ;;  %s951_s1 = inlined_call_operand.vmem [shape: bf16[8,8,512], index: 1, kind: input, shape index: {}]   ;;  %s952_s2 = inlined_call_operand.vmem [shape: f32[2,512], index: 2, kind: input, shape index: {}]   ;;  %s953_s3 = inlined_call_operand.vmem [shape: f32[2,512], index: 3, kind: input, shape index: {}]   ;;  %s954_s4 = inlined_call_operand.vmem [shape: bf16[8,8,512], index: 4, kind: output, shape index: {}]  }
   0x1   :  { %v17_v1 = vld [vmem:[%s950_s0] sm:$0xff]  ;;  %v18_v9 = vld [vmem:[%s950_s0 + $0x8] sm:$0xff]  ;;  %v19_v21 = vld [vmem:[%s950_s0 + $0x10] sm:$0xff] }
   0x2   :  { %v65_v2 = vld [vmem:[%s952_s2] ss:$2 sm:$0xf]  ;;  %v33_v4 = vunpack.c.l.bf16 %v17_v1  ;;  %v34_v5 = vunpack.c.h.bf16 %v17_v1  ;;  %v68_v6 = vshrl.u32 %v67_v0, 7  ;;  %v207_v10 = vld [vmem:[%s951_s1 + $0x8] sm:$0xff]  ;;  %v35_v14 = vunpack.c.l.bf16 %v18_v9  ;;  %v208_v22 = vld [vmem:[%s951_s1 + $0x10] sm:$0xff] }
   0x3   :  { %v206_v3 = vld [vmem:[%s951_s1] sm:$0xff]  ;;  %v36_v15 = vunpack.c.h.bf16 %v18_v9  ;;  %v224_v16 = vunpack.c.l.bf16 %v207_v10  ;;  %v225_v23 = vunpack.c.h.bf16 %v207_v10  ;;  %v37_v24 = vunpack.c.l.bf16 %v19_v21  ;;  %v20_v63 = vld [vmem:[%s950_s0 + $0x18] sm:$0xff] }
   0x4   :  { %v575_v7 = vld [vmem:[%s952_s2 + $0x1] ss:$2 sm:$0xf]  ;;  %v222_v8 = vunpack.c.l.bf16 %v206_v3  ;;  %v223_v11 = vunpack.c.h.bf16 %v206_v3  ;;  %v254_v12 = vld [vmem:[%s953_s3] ss:$2 sm:$0xf]  ;;  %v38_v25 = vunpack.c.h.bf16 %v19_v21  ;;  %v226_v26 = vunpack.c.l.bf16 %v208_v22 }
   0x5   :  { %v576_v13 = vld [vmem:[%s953_s3 + $0x1] ss:$2 sm:$0xf]  ;;  %v69_v17 = vsub.s32 0, %v68_v6  ;;  %v73_v18 = vsub.s32 1, %v68_v6  ;;  %v77_v19 = vsub.s32 2, %v68_v6 }
   0x6   :  { %v81_v20 = vsub.s32 3, %v68_v6  ;;  %v227_v6 = vunpack.c.h.bf16 %v208_v22  ;;  %v21_v21 = vld [vmem:[%s950_s0 + $0x20] sm:$0xff] }
   0x7   :  { %v664_v27 = vrot.slane %v65_v2, %v69_v17  ;;  %v666_v28 = vrot.slane %v65_v2, %v73_v18  ;;  %v668_v29 = vrot.slane %v575_v7, %v69_v17  ;;  %v670_v30 = vrot.slane %v575_v7, %v73_v18 }
   0x8   :  { %v672_v31 = vrot.slane %v254_v12, %v69_v17  ;;  %v674_v32 = vrot.slane %v254_v12, %v73_v18  ;;  %v676_v33 = vrot.slane %v576_v13, %v69_v17  ;;  %v678_v34 = vrot.slane %v576_v13, %v73_v18 }
   0x9   :  { %v87_v35 = vmul.f32 %v664_v27, %v33_v4  ;;  %v88_v36 = vmul.f32 %v666_v28, %v34_v5  ;;  %v682_v37 = vrot.slane %v65_v2, %v77_v19  ;;  %v684_v38 = vrot.slane %v65_v2, %v81_v20 }
   0xa   :  { %v276_v39 = vmul.f32 %v672_v31, %v222_v8  ;;  %v277_v40 = vmul.f32 %v674_v32, %v223_v11  ;;  %v688_v41 = vrot.slane %v575_v7, %v77_v19  ;;  %v690_v42 = vrot.slane %v575_v7, %v81_v20 }
   0xb   :  { %v142_v43 = vadd.f32 %v668_v29, %v87_v35  ;;  %v143_v44 = vadd.f32 %v670_v30, %v88_v36  ;;  %v89_v45 = vmul.f32 %v682_v37, %v35_v14  ;;  %v90_v46 = vmul.f32 %v684_v38, %v36_v15 }
   0xc   :  { %v331_v47 = vadd.f32 %v676_v33, %v276_v39  ;;  %v332_v48 = vadd.f32 %v678_v34, %v277_v40  ;;  %v698_v49 = vrot.slane %v254_v12, %v77_v19  ;;  %v700_v50 = vrot.slane %v254_v12, %v81_v20  ;;  %v210_v40 = vld [vmem:[%s951_s1 + $0x20] sm:$0xff] }
   0xd   :  { %v174_v51 = vmax.f32 %v142_v43, 0.0  ;;  %v175_v52 = vmax.f32 %v143_v44, 0.0  ;;  %v144_v53 = vadd.f32 %v688_v41, %v89_v45  ;;  %v145_v54 = vadd.f32 %v690_v42, %v90_v46 }
   0xe   :  { %v363_v55 = vmax.f32 %v331_v47, 0.0  ;;  %v364_v56 = vmax.f32 %v332_v48, 0.0  ;;  %v278_v57 = vmul.f32 %v698_v49, %v224_v16  ;;  %v279_v58 = vmul.f32 %v700_v50, %v225_v23  ;;  %v209_v16 = vld [vmem:[%s951_s1 + $0x18] sm:$0xff] }
   0xf   :  { %v176_v59 = vmax.f32 %v144_v53, 0.0  ;;  %v177_v60 = vmax.f32 %v145_v54, 0.0  ;;  %v706_v61 = vrot.slane %v576_v13, %v77_v19  ;;  %v708_v62 = vrot.slane %v576_v13, %v81_v20 }
  0x10   :  { %v395_v0 = vadd.f32 %v363_v55, %v174_v51  ;;  %v396_v1 = vadd.f32 %v364_v56, %v175_v52  ;;  %v91_v2 = vmul.f32 %v664_v27, %v37_v24  ;;  %v92_v3 = vmul.f32 %v666_v28, %v38_v25 }
  0x11   :  { %v333_v4 = vadd.f32 %v706_v61, %v278_v57  ;;  %v334_v5 = vadd.f32 %v708_v62, %v279_v58  ;;  %v280_v7 = vmul.f32 %v672_v31, %v226_v26  ;;  %v39_v11 = vunpack.c.l.bf16 %v20_v63  ;;  %v22_v57 = vld [vmem:[%s950_s0 + $0x28] sm:$0xff] }
  0x12   :  { %v593_v8 = vpack.c.bf16 %v396_v1, %v395_v0  ;;  %v146_v9 = vadd.f32 %v668_v29, %v91_v2  ;;  %v147_v10 = vadd.f32 %v670_v30, %v92_v3  ;;  %v281_v14 = vmul.f32 %v674_v32, %v227_v6 }
  0x13   :  { %v365_v12 = vmax.f32 %v333_v4, 0.0  ;;  %v366_v13 = vmax.f32 %v334_v5, 0.0  ;;  %v335_v15 = vadd.f32 %v676_v33, %v280_v7  ;;  %v40_v19 = vunpack.c.h.bf16 %v20_v63 }
  0x14   :  { %555 = vst [vmem:[%s954_s4] sm:$0xff] %v593_v8  ;;  %v178_v17 = vmax.f32 %v146_v9, 0.0  ;;  %v179_v18 = vmax.f32 %v147_v10, 0.0  ;;  %v93_v20 = vmul.f32 %v682_v37, %v39_v11  ;;  %v336_v24 = vadd.f32 %v678_v34, %v281_v14  ;;  %v211_v8 = vld [vmem:[%s951_s1 + $0x28] sm:$0xff] }
  0x15   :  { %v397_v22 = vadd.f32 %v365_v12, %v176_v59  ;;  %v398_v23 = vadd.f32 %v366_v13, %v177_v60  ;;  %v367_v25 = vmax.f32 %v335_v15, 0.0  ;;  %v94_v26 = vmul.f32 %v684_v38, %v40_v19 }
  0x16   :  { %v148_v35 = vadd.f32 %v688_v41, %v93_v20  ;;  %v228_v36 = vunpack.c.l.bf16 %v209_v16  ;;  %v229_v39 = vunpack.c.h.bf16 %v209_v16  ;;  %v368_v44 = vmax.f32 %v336_v24, 0.0 }
  0x17   :  { %v594_v43 = vpack.c.bf16 %v398_v23, %v397_v22  ;;  %v399_v45 = vadd.f32 %v367_v25, %v178_v17  ;;  %v41_v46 = vunpack.c.l.bf16 %v21_v21  ;;  %v149_v47 = vadd.f32 %v690_v42, %v94_v26  ;;  %v23_v17 = vld [vmem:[%s950_s0 + $0x30] sm:$0xff] }
  0x18   :  { %v180_v48 = vmax.f32 %v148_v35, 0.0  ;;  %v282_v51 = vmul.f32 %v698_v49, %v228_v36  ;;  %v283_v52 = vmul.f32 %v700_v50, %v229_v39  ;;  %v400_v53 = vadd.f32 %v368_v44, %v179_v18  ;;  %v212_v26 = vld [vmem:[%s951_s1 + $0x30] sm:$0xff] }
  0x19   :  { %556 = vst [vmem:[%s954_s4 + $0x8] sm:$0xff] %v594_v43  ;;  %v42_v54 = vunpack.c.h.bf16 %v21_v21  ;;  %v95_v55 = vmul.f32 %v664_v27, %v41_v46  ;;  %v230_v56 = vunpack.c.l.bf16 %v210_v40  ;;  %v181_v58 = vmax.f32 %v149_v47, 0.0  ;;  %v24_v47 = vld [vmem:[%s950_s0 + $0x38] sm:$0xff] }
  0x1a   :  { %v337_v59 = vadd.f32 %v706_v61, %v282_v51  ;;  %v338_v60 = vadd.f32 %v708_v62, %v283_v52  ;;  %v231_v63 = vunpack.c.h.bf16 %v210_v40  ;;  %v595_v0 = vpack.c.bf16 %v400_v53, %v399_v45 }
  0x1b   :  { %v96_v1 = vmul.f32 %v666_v28, %v42_v54  ;;  %v150_v2 = vadd.f32 %v668_v29, %v95_v55  ;;  %v284_v3 = vmul.f32 %v672_v31, %v230_v56  ;;  %v43_v7 = vunpack.c.l.bf16 %v22_v57 }
  0x1c   :  { %v369_v4 = vmax.f32 %v337_v59, 0.0  ;;  %v370_v5 = vmax.f32 %v338_v60, 0.0  ;;  %v285_v6 = vmul.f32 %v674_v32, %v231_v63  ;;  %557 = vst [vmem:[%s954_s4 + $0x10] sm:$0xff] %v595_v0  ;;  %v44_v12 = vunpack.c.h.bf16 %v22_v57 }
  0x1d   :  { %v151_v9 = vadd.f32 %v670_v30, %v96_v1  ;;  %v182_v10 = vmax.f32 %v150_v2, 0.0  ;;  %v339_v11 = vadd.f32 %v676_v33, %v284_v3  ;;  %v97_v16 = vmul.f32 %v682_v37, %v43_v7 }
  0x1e   :  { %v401_v13 = vadd.f32 %v369_v4, %v180_v48  ;;  %v402_v14 = vadd.f32 %v370_v5, %v181_v58  ;;  %v340_v15 = vadd.f32 %v678_v34, %v285_v6  ;;  %v98_v20 = vmul.f32 %v684_v38, %v44_v12  ;;  %v213_v4 = vld [vmem:[%s951_s1 + $0x38] sm:$0xff] }
  0x1f   :  { %v183_v18 = vmax.f32 %v151_v9, 0.0  ;;  %v371_v19 = vmax.f32 %v339_v11, 0.0  ;;  %v232_v21 = vunpack.c.l.bf16 %v211_v8  ;;  %v152_v24 = vadd.f32 %v688_v41, %v97_v16  ;;  %v25_v9 = vld [vmem:[%s950_s0 + $0x40] sm:$0xff] }
  0x20   :  { %v596_v22 = vpack.c.bf16 %v402_v14, %v401_v13  ;;  %v372_v23 = vmax.f32 %v340_v15, 0.0  ;;  %v233_v25 = vunpack.c.h.bf16 %v211_v8  ;;  %v153_v36 = vadd.f32 %v690_v42, %v98_v20 }
  0x21   :  { %v403_v35 = vadd.f32 %v371_v19, %v182_v10  ;;  %v286_v39 = vmul.f32 %v698_v49, %v232_v21  ;;  %v45_v40 = vunpack.c.l.bf16 %v23_v17  ;;  %v184_v44 = vmax.f32 %v152_v24, 0.0 }
  0x22   :  { %558 = vst [vmem:[%s954_s4 + $0x18] sm:$0xff] %v596_v22  ;;  %v404_v43 = vadd.f32 %v372_v23, %v183_v18  ;;  %v287_v45 = vmul.f32 %v700_v50, %v233_v25  ;;  %v46_v46 = vunpack.c.h.bf16 %v23_v17  ;;  %v185_v48 = vmax.f32 %v153_v36, 0.0  ;;  %v214_v22 = vld [vmem:[%s951_s1 + $0x40] sm:$0xff] }
  0x23   :  { %v341_v51 = vadd.f32 %v706_v61, %v286_v39  ;;  %v99_v52 = vmul.f32 %v664_v27, %v45_v40  ;;  %v234_v53 = vunpack.c.l.bf16 %v212_v26  ;;  %v235_v57 = vunpack.c.h.bf16 %v212_v26 }
  0x24   :  { %v597_v54 = vpack.c.bf16 %v404_v43, %v403_v35  ;;  %v342_v55 = vadd.f32 %v708_v62, %v287_v45  ;;  %v100_v56 = vmul.f32 %v666_v28, %v46_v46  ;;  %v47_v63 = vunpack.c.l.bf16 %v24_v47  ;;  %v26_v35 = vld [vmem:[%s950_s0 + $0x48] sm:$0xff] }
  0x25   :  { %v373_v58 = vmax.f32 %v341_v51, 0.0  ;;  %v154_v59 = vadd.f32 %v668_v29, %v99_v52  ;;  %v288_v60 = vmul.f32 %v672_v31, %v234_v53  ;;  %v289_v2 = vmul.f32 %v674_v32, %v235_v57 }
  0x26   :  { %559 = vst [vmem:[%s954_s4 + $0x20] sm:$0xff] %v597_v54  ;;  %v374_v0 = vmax.f32 %v342_v55, 0.0  ;;  %v155_v1 = vadd.f32 %v670_v30, %v100_v56  ;;  %v48_v3 = vunpack.c.h.bf16 %v24_v47  ;;  %v101_v8 = vmul.f32 %v682_v37, %v47_v63 }
  0x27   :  { %v405_v5 = vadd.f32 %v373_v58, %v184_v44  ;;  %v186_v6 = vmax.f32 %v154_v59, 0.0  ;;  %v343_v7 = vadd.f32 %v676_v33, %v288_v60  ;;  %v344_v12 = vadd.f32 %v678_v34, %v289_v2  ;;  %v215_v58 = vld [vmem:[%s951_s1 + $0x48] sm:$0xff] }
  0x28   :  { %v406_v10 = vadd.f32 %v374_v0, %v185_v48  ;;  %v187_v11 = vmax.f32 %v155_v1, 0.0  ;;  %v102_v13 = vmul.f32 %v684_v38, %v48_v3  ;;  %v156_v15 = vadd.f32 %v688_v41, %v101_v8 }
  0x29   :  { %v375_v14 = vmax.f32 %v343_v7, 0.0  ;;  %v236_v16 = vunpack.c.l.bf16 %v213_v4  ;;  %v237_v17 = vunpack.c.h.bf16 %v213_v4  ;;  %v376_v19 = vmax.f32 %v344_v12, 0.0 }
  0x2a   :  { %v598_v18 = vpack.c.bf16 %v406_v10, %v405_v5  ;;  %v157_v20 = vadd.f32 %v690_v42, %v102_v13  ;;  %v49_v21 = vunpack.c.l.bf16 %v25_v9  ;;  %v188_v24 = vmax.f32 %v156_v15, 0.0  ;;  %v27_v5 = vld [vmem:[%s950_s0 + $0x50] sm:$0xff] }
  0x2b   :  { %v407_v23 = vadd.f32 %v375_v14, %v186_v6  ;;  %v290_v25 = vmul.f32 %v698_v49, %v236_v16  ;;  %v291_v26 = vmul.f32 %v700_v50, %v237_v17  ;;  %v408_v36 = vadd.f32 %v376_v19, %v187_v11  ;;  %v216_v14 = vld [vmem:[%s951_s1 + $0x50] sm:$0xff] }
  0x2c   :  { %560 = vst [vmem:[%s954_s4 + $0x28] sm:$0xff] %v598_v18  ;;  %v189_v39 = vmax.f32 %v157_v20, 0.0  ;;  %v50_v40 = vunpack.c.h.bf16 %v25_v9  ;;  %v103_v43 = vmul.f32 %v664_v27, %v49_v21  ;;  %v238_v46 = vunpack.c.l.bf16 %v214_v22 }
  0x2d   :  { %v345_v44 = vadd.f32 %v706_v61, %v290_v25  ;;  %v346_v45 = vadd.f32 %v708_v62, %v291_v26  ;;  %v239_v47 = vunpack.c.h.bf16 %v214_v22  ;;  %v599_v48 = vpack.c.bf16 %v408_v36, %v407_v23  ;;  %v28_v23 = vld [vmem:[%s950_s0 + $0x58] sm:$0xff] }
  0x2e   :  { %v104_v51 = vmul.f32 %v666_v28, %v50_v40  ;;  %v158_v52 = vadd.f32 %v668_v29, %v103_v43  ;;  %v51_v53 = vunpack.c.l.bf16 %v26_v35  ;;  %v292_v56 = vmul.f32 %v672_v31, %v238_v46 }
  0x2f   :  { %v377_v54 = vmax.f32 %v345_v44, 0.0  ;;  %v378_v55 = vmax.f32 %v346_v45, 0.0  ;;  %v293_v57 = vmul.f32 %v674_v32, %v239_v47  ;;  %561 = vst [vmem:[%s954_s4 + $0x30] sm:$0xff] %v599_v48  ;;  %v52_v63 = vunpack.c.h.bf16 %v26_v35 }
  0x30   :  { %v159_v59 = vadd.f32 %v670_v30, %v104_v51  ;;  %v190_v60 = vmax.f32 %v158_v52, 0.0  ;;  %v105_v0 = vmul.f32 %v682_v37, %v51_v53  ;;  %v347_v3 = vadd.f32 %v676_v33, %v292_v56 }
  0x31   :  { %v409_v1 = vadd.f32 %v377_v54, %v188_v24  ;;  %v410_v2 = vadd.f32 %v378_v55, %v189_v39  ;;  %v348_v4 = vadd.f32 %v678_v34, %v293_v57  ;;  %v106_v7 = vmul.f32 %v684_v38, %v52_v63  ;;  %v217_v54 = vld [vmem:[%s951_s1 + $0x58] sm:$0xff] }
  0x32   :  { %v191_v6 = vmax.f32 %v159_v59, 0.0  ;;  %v160_v8 = vadd.f32 %v688_v41, %v105_v0  ;;  %v240_v9 = vunpack.c.l.bf16 %v215_v58  ;;  %v379_v11 = vmax.f32 %v347_v3, 0.0  ;;  %v29_v59 = vld [vmem:[%s950_s0 + $0x60] sm:$0xff] }
  0x33   :  { %v600_v10 = vpack.c.bf16 %v410_v2, %v409_v1  ;;  %v380_v12 = vmax.f32 %v348_v4, 0.0  ;;  %v241_v13 = vunpack.c.h.bf16 %v215_v58  ;;  %v161_v15 = vadd.f32 %v690_v42, %v106_v7 }
  0x34   :  { %v192_v16 = vmax.f32 %v160_v8, 0.0  ;;  %v294_v17 = vmul.f32 %v698_v49, %v240_v9  ;;  %v53_v18 = vunpack.c.l.bf16 %v27_v5  ;;  %v411_v19 = vadd.f32 %v379_v11, %v190_v60 }
  0x35   :  { %562 = vst [vmem:[%s954_s4 + $0x38] sm:$0xff] %v600_v10  ;;  %v412_v20 = vadd.f32 %v380_v12, %v191_v6  ;;  %v295_v21 = vmul.f32 %v700_v50, %v241_v13  ;;  %v54_v22 = vunpack.c.h.bf16 %v27_v5  ;;  %v193_v24 = vmax.f32 %v161_v15, 0.0  ;;  %v218_v10 = vld [vmem:[%s951_s1 + $0x60] sm:$0xff]  ;;  %v30_v15 = vld [vmem:[%s950_s0 + $0x68] sm:$0xff] }
  0x36   :  { %v349_v25 = vadd.f32 %v706_v61, %v294_v17  ;;  %v107_v26 = vmul.f32 %v664_v27, %v53_v18  ;;  %v242_v35 = vunpack.c.l.bf16 %v216_v14  ;;  %v243_v43 = vunpack.c.h.bf16 %v216_v14 }
  0x37   :  { %v601_v36 = vpack.c.bf16 %v412_v20, %v411_v19  ;;  %v350_v39 = vadd.f32 %v708_v62, %v295_v21  ;;  %v108_v40 = vmul.f32 %v666_v28, %v54_v22  ;;  %v55_v47 = vunpack.c.l.bf16 %v28_v23 }
  0x38   :  { %v381_v44 = vmax.f32 %v349_v25, 0.0  ;;  %v162_v45 = vadd.f32 %v668_v29, %v107_v26  ;;  %v296_v46 = vmul.f32 %v672_v31, %v242_v35  ;;  %v297_v52 = vmul.f32 %v674_v32, %v243_v43 }
  0x39   :  { %563 = vst [vmem:[%s954_s4 + $0x40] sm:$0xff] %v601_v36  ;;  %v382_v48 = vmax.f32 %v350_v39, 0.0  ;;  %v163_v51 = vadd.f32 %v670_v30, %v108_v40  ;;  %v56_v53 = vunpack.c.h.bf16 %v28_v23  ;;  %v109_v58 = vmul.f32 %v682_v37, %v55_v47 }
  0x3a   :  { %v413_v55 = vadd.f32 %v381_v44, %v192_v16  ;;  %v194_v56 = vmax.f32 %v162_v45, 0.0  ;;  %v351_v57 = vadd.f32 %v676_v33, %v296_v46  ;;  %v352_v0 = vadd.f32 %v678_v34, %v297_v52  ;;  %v219_v44 = vld [vmem:[%s951_s1 + $0x68] sm:$0xff] }
  0x3b   :  { %v414_v60 = vadd.f32 %v382_v48, %v193_v24  ;;  %v195_v63 = vmax.f32 %v163_v51, 0.0  ;;  %v110_v1 = vmul.f32 %v684_v38, %v56_v53  ;;  %v164_v3 = vadd.f32 %v688_v41, %v109_v58 }
  0x3c   :  { %v383_v2 = vmax.f32 %v351_v57, 0.0  ;;  %v244_v4 = vunpack.c.l.bf16 %v217_v54  ;;  %v245_v5 = vunpack.c.h.bf16 %v217_v54  ;;  %v384_v7 = vmax.f32 %v352_v0, 0.0 }
  0x3d   :  { %v602_v6 = vpack.c.bf16 %v414_v60, %v413_v55  ;;  %v165_v8 = vadd.f32 %v690_v42, %v110_v1  ;;  %v57_v9 = vunpack.c.l.bf16 %v29_v59  ;;  %v196_v12 = vmax.f32 %v164_v3, 0.0  ;;  %v31_v55 = vld [vmem:[%s950_s0 + $0x70] sm:$0xff] }
  0x3e   :  { %v415_v11 = vadd.f32 %v383_v2, %v194_v56  ;;  %v298_v13 = vmul.f32 %v698_v49, %v244_v4  ;;  %v299_v14 = vmul.f32 %v700_v50, %v245_v5  ;;  %v416_v16 = vadd.f32 %v384_v7, %v195_v63  ;;  %v220_v2 = vld [vmem:[%s951_s1 + $0x70] sm:$0xff] }
  0x3f   :  { %564 = vst [vmem:[%s954_s4 + $0x48] sm:$0xff] %v602_v6  ;;  %v197_v17 = vmax.f32 %v165_v8, 0.0  ;;  %v58_v18 = vunpack.c.h.bf16 %v29_v59  ;;  %v111_v19 = vmul.f32 %v664_v27, %v57_v9  ;;  %v246_v22 = vunpack.c.l.bf16 %v218_v10 }
  0x40   :  { %v353_v20 = vadd.f32 %v706_v61, %v298_v13  ;;  %v354_v21 = vadd.f32 %v708_v62, %v299_v14  ;;  %v247_v23 = vunpack.c.h.bf16 %v218_v10  ;;  %v603_v24 = vpack.c.bf16 %v416_v16, %v415_v11  ;;  %v32_v11 = vld [vmem:[%s950_s0 + $0x78] sm:$0xff] }
  0x41   :  { %v112_v25 = vmul.f32 %v666_v28, %v58_v18  ;;  %v166_v26 = vadd.f32 %v668_v29, %v111_v19  ;;  %v59_v35 = vunpack.c.l.bf16 %v30_v15  ;;  %v300_v40 = vmul.f32 %v672_v31, %v246_v22 }
  0x42   :  { %v385_v36 = vmax.f32 %v353_v20, 0.0  ;;  %v386_v39 = vmax.f32 %v354_v21, 0.0  ;;  %v301_v43 = vmul.f32 %v674_v32, %v247_v23  ;;  %565 = vst [vmem:[%s954_s4 + $0x50] sm:$0xff] %v603_v24  ;;  %v60_v47 = vunpack.c.h.bf16 %v30_v15 }
  0x43   :  { %v167_v45 = vadd.f32 %v670_v30, %v112_v25  ;;  %v198_v46 = vmax.f32 %v166_v26, 0.0  ;;  %v113_v48 = vmul.f32 %v682_v37, %v59_v35  ;;  %v355_v53 = vadd.f32 %v676_v33, %v300_v40 }
  0x44   :  { %v417_v51 = vadd.f32 %v385_v36, %v196_v12  ;;  %v418_v52 = vadd.f32 %v386_v39, %v197_v17  ;;  %v356_v54 = vadd.f32 %v678_v34, %v301_v43  ;;  %v114_v57 = vmul.f32 %v684_v38, %v60_v47 }
  0x45   :  { %v199_v56 = vmax.f32 %v167_v45, 0.0  ;;  %v168_v58 = vadd.f32 %v688_v41, %v113_v48  ;;  %v248_v59 = vunpack.c.l.bf16 %v219_v44  ;;  %v387_v63 = vmax.f32 %v355_v53, 0.0 }
  0x46   :  { %v604_v60 = vpack.c.bf16 %v418_v52, %v417_v51  ;;  %v388_v0 = vmax.f32 %v356_v54, 0.0  ;;  %v249_v1 = vunpack.c.h.bf16 %v219_v44  ;;  %v169_v3 = vadd.f32 %v690_v42, %v114_v57 }
  0x47   :  { %v200_v4 = vmax.f32 %v168_v58, 0.0  ;;  %v302_v5 = vmul.f32 %v698_v49, %v248_v59  ;;  %v61_v6 = vunpack.c.l.bf16 %v31_v55  ;;  %v419_v7 = vadd.f32 %v387_v63, %v198_v46 }
  0x48   :  { %566 = vst [vmem:[%s954_s4 + $0x58] sm:$0xff] %v604_v60  ;;  %v420_v8 = vadd.f32 %v388_v0, %v199_v56  ;;  %v303_v9 = vmul.f32 %v700_v50, %v249_v1  ;;  %v62_v10 = vunpack.c.h.bf16 %v31_v55  ;;  %v201_v12 = vmax.f32 %v169_v3, 0.0 }
  0x49   :  { %v357_v13 = vadd.f32 %v706_v61, %v302_v5  ;;  %v115_v14 = vmul.f32 %v664_v27, %v61_v6  ;;  %v250_v15 = vunpack.c.l.bf16 %v220_v2  ;;  %v251_v19 = vunpack.c.h.bf16 %v220_v2 }
  0x4a   :  { %v605_v16 = vpack.c.bf16 %v420_v8, %v419_v7  ;;  %v358_v17 = vadd.f32 %v708_v62, %v303_v9  ;;  %v116_v18 = vmul.f32 %v666_v28, %v62_v10  ;;  %v63_v23 = vunpack.c.l.bf16 %v32_v11  ;;  %v221_v28 = vld [vmem:[%s951_s1 + $0x78] sm:$0xff] }
  0x4b   :  { %v389_v20 = vmax.f32 %v357_v13, 0.0  ;;  %v170_v21 = vadd.f32 %v668_v29, %v115_v14  ;;  %v304_v22 = vmul.f32 %v672_v31, %v250_v15  ;;  %v305_v25 = vmul.f32 %v674_v32, %v251_v19 }
  0x4c   :  { %567 = vst [vmem:[%s954_s4 + $0x60] sm:$0xff] %v605_v16  ;;  %v390_v24 = vmax.f32 %v358_v17, 0.0  ;;  %v171_v27 = vadd.f32 %v670_v30, %v116_v18  ;;  %v64_v26 = vunpack.c.h.bf16 %v32_v11  ;;  %v117_v31 = vmul.f32 %v682_v37, %v63_v23 }
  0x4d   :  { %v421_v35 = vadd.f32 %v389_v20, %v200_v4  ;;  %v202_v36 = vmax.f32 %v170_v21, 0.0  ;;  %v359_v29 = vadd.f32 %v676_v33, %v304_v22  ;;  %v360_v43 = vadd.f32 %v678_v34, %v305_v25 }
  0x4e   :  { %v422_v39 = vadd.f32 %v390_v24, %v201_v12  ;;  %v203_v40 = vmax.f32 %v171_v27, 0.0  ;;  %v118_v44 = vmul.f32 %v684_v38, %v64_v26  ;;  %v172_v32 = vadd.f32 %v688_v41, %v117_v31 }
  0x4f   :  { %v391_v30 = vmax.f32 %v359_v29, 0.0  ;;  %v252_v45 = vunpack.c.l.bf16 %v221_v28  ;;  %v253_v46 = vunpack.c.h.bf16 %v221_v28  ;;  %v392_v48 = vmax.f32 %v360_v43, 0.0 }
  0x50   :  { %v606_v47 = vpack.c.bf16 %v422_v39, %v421_v35  ;;  %v173_v51 = vadd.f32 %v690_v42, %v118_v44  ;;  %v204_v38 = vmax.f32 %v172_v32, 0.0 }
  0x51   :  { %v423_v52 = vadd.f32 %v391_v30, %v202_v36  ;;  %v306_v33 = vmul.f32 %v698_v49, %v252_v45  ;;  %v307_v37 = vmul.f32 %v700_v50, %v253_v46  ;;  %v424_v34 = vadd.f32 %v392_v48, %v203_v40 }
  0x52   :  { %568 = vst [vmem:[%s954_s4 + $0x68] sm:$0xff] %v606_v47  ;;  %v205_v53 = vmax.f32 %v173_v51, 0.0 }
  0x53   :  { %v361_v41 = vadd.f32 %v706_v61, %v306_v33  ;;  %v362_v54 = vadd.f32 %v708_v62, %v307_v37  ;;  %v607_v55 = vpack.c.bf16 %v424_v34, %v423_v52 }
  0x55   :  { %v393_v56 = vmax.f32 %v361_v41, 0.0  ;;  %v394_v57 = vmax.f32 %v362_v54, 0.0  ;;  %569 = vst [vmem:[%s954_s4 + $0x70] sm:$0xff] %v607_v55 }
  0x57   :  { %v425_v42 = vadd.f32 %v393_v56, %v204_v38  ;;  %v426_v49 = vadd.f32 %v394_v57, %v205_v53 }
  0x59   :  { %v608_v50 = vpack.c.bf16 %v426_v49, %v425_v42 }
  0x5b   :  { %570 = vst [vmem:[%s954_s4 + $0x78] sm:$0xff] %v608_v50 }

// kernel: _lambda_.6
= control target key start
LH: loop header
LB: loop body
LE: loop exit
PB: predicated region body
PF: predicated region fallthrough
CT: control target
= control target key end

     0   :  { %v4456_v1 = vmov 0   ;;  %v6316_v16 = vlaneseq  ;;  %s6311_s1 = inlined_call_operand.vmem [shape: bf16[3,2,384,256], index: 1, kind: input, shape index: {}]   ;;  %s6312_s0 = inlined_call_operand.vmem [shape: bf16[8,8,512], index: 0, kind: input, shape index: {}]   ;;  %s6313_s2 = inlined_call_operand.vmem [shape: f32[2,512], index: 2, kind: input, shape index: {}]   ;;  %s6314_s3 = inlined_call_operand.vmem [shape: bf16[8,8,512], index: 3, kind: output, shape index: {0}]   ;;  %s6315_s4 = inlined_call_operand.vmem [shape: f32[1,2,512], index: 4, kind: output, shape index: {1}]  }
   0x1   :  { %v4024_v0 = vld [vmem:[%s6311_s1 + $0x374] ss:$8 sps:$4 sm:$0xff]   ;;  %752 = vmatprep.mubr.bf16.mxu1 %v4456_v1  ;;  %v4028_v3 = vld [vmem:[%s6311_s1 + $0x370] ss:$8 sps:$4 sm:$0xff]   ;;  %v4030_v5 = vld [vmem:[%s6311_s1 + $0x364] ss:$8 sps:$4 sm:$0xff]  }
   0x2   :  { %v4026_v2 = vld [vmem:[%s6311_s1 + $0x474] ss:$8 sps:$4 sm:$0xff]   ;;  %647 = vmatprep.subr.bf16.mxu0 %v4024_v0  ;;  %v4029_v4 = vld [vmem:[%s6311_s1 + $0x470] ss:$8 sps:$4 sm:$0xff]   ;;  %v4032_v6 = vld [vmem:[%s6311_s1 + $0x464] ss:$8 sps:$4 sm:$0xff]  }
   0x3   :  { %720 = vmatprep.subr.bf16.mxu1 %v4026_v2  ;;  %648 = vmatpush1.bf16.msra.mxu0 %v4028_v3  ;;  %v4034_v7 = vld [vmem:[%s6311_s1 + $0x360] ss:$8 sps:$4 sm:$0xff]   ;;  %v4036_v9 = vld [vmem:[%s6311_s1 + $0x354] ss:$8 sps:$4 sm:$0xff]   ;;  %v4040_v11 = vld [vmem:[%s6311_s1 + $0x350] ss:$8 sps:$4 sm:$0xff]  }
   0x4   :  { %721 = vmatpush1.bf16.msra.mxu1 %v4029_v4  ;;  %649 = vmatprep.subr.bf16.mxu0 %v4030_v5  ;;  %v4035_v8 = vld [vmem:[%s6311_s1 + $0x460] ss:$8 sps:$4 sm:$0xff]   ;;  %v4038_v10 = vld [vmem:[%s6311_s1 + $0x454] ss:$8 sps:$4 sm:$0xff]   ;;  %v4041_v12 = vld [vmem:[%s6311_s1 + $0x450] ss:$8 sps:$4 sm:$0xff]  }
   0x5   :  { %722 = vmatprep.subr.bf16.mxu1 %v4032_v6  ;;  %v4042_v13 = vld [vmem:[%s6311_s1 + $0x344] ss:$8 sps:$4 sm:$0xff]   ;;  %v4046_v15 = vld [vmem:[%s6311_s1 + $0x340] ss:$8 sps:$4 sm:$0xff]   ;;  %v4048_v18 = vld [vmem:[%s6311_s1 + $0x334] ss:$8 sps:$4 sm:$0xff]  }
   0x6   :  { %v4044_v14 = vld [vmem:[%s6311_s1 + $0x444] ss:$8 sps:$4 sm:$0xff]   ;;  %v4047_v17 = vld [vmem:[%s6311_s1 + $0x440] ss:$8 sps:$4 sm:$0xff]   ;;  %v4050_v19 = vld [vmem:[%s6311_s1 + $0x434] ss:$8 sps:$4 sm:$0xff]  }
   0x7   :  { %650 = vmatpush1.bf16.msra.mxu0 %v4034_v7  ;;  %v4052_v20 = vld [vmem:[%s6311_s1 + $0x330] ss:$8 sps:$4 sm:$0xff]   ;;  %v4545_v22 = vshrl.u32 %v6316_v16, 7  ;;  %v4054_v23 = vld [vmem:[%s6311_s1 + $0x324] ss:$8 sps:$4 sm:$0xff]  }
   0x8   :  { %723 = vmatpush1.bf16.msra.mxu1 %v4035_v8  ;;  %651 = vmatprep.subr.bf16.mxu0 %v4036_v9  ;;  %v4053_v21 = vld [vmem:[%s6311_s1 + $0x430] ss:$8 sps:$4 sm:$0xff]   ;;  %v4056_v24 = vld [vmem:[%s6311_s1 + $0x424] ss:$8 sps:$4 sm:$0xff]   ;;  %v4058_v25 = vld [vmem:[%s6311_s1 + $0x320] ss:$8 sps:$4 sm:$0xff]  }
   0x9   :  { %724 = vmatprep.subr.bf16.mxu1 %v4038_v10  ;;  %6335 = vst [vmem:[#allocation2_spill] sm:$0xff] %v4545_v22  ;;  %v77_v26 = vsub.s32 2, %v4545_v22  ;;  %v4059_v27 = vld [vmem:[%s6311_s1 + $0x420] ss:$8 sps:$4 sm:$0xff]   ;;  %v4060_v28 = vld [vmem:[%s6311_s1 + $0x314] ss:$8 sps:$4 sm:$0xff]  }
   0xa   :  { %v6324_v29 = vsub.s32 3, %v4545_v22  ;;  %v4062_v30 = vld [vmem:[%s6311_s1 + $0x414] ss:$8 sps:$4 sm:$0xff]   ;;  %v4064_v31 = vld [vmem:[%s6311_s1 + $0x310] ss:$8 sps:$4 sm:$0xff]   ;;  %v18_v32 = vld [vmem:[%s6312_s0 + $0x8] sm:$0xff] }
   0xb   :  { %652 = vmatpush1.bf16.msra.mxu0 %v4040_v11  ;;  %v20_v33 = vld [vmem:[%s6312_s0 + $0x18] sm:$0xff]  ;;  %v35_v34 = vunpack.c.l.bf16 %v18_v32  ;;  %v36_v35 = vunpack.c.h.bf16 %v18_v32  ;;  %v4579_v38 = vld [vmem:[%s6313_s2] ss:$2 sm:$0xf]  ;;  %v73_v6 = vsub.s32 1, %v4545_v22  ;;  %v69_v11 = vsub.s32 0, %v4545_v22 }
   0xc   :  { %725 = vmatpush1.bf16.msra.mxu1 %v4041_v12  ;;  %653 = vmatprep.subr.bf16.mxu0 %v4042_v13  ;;  %v39_v36 = vunpack.c.l.bf16 %v20_v33  ;;  %v40_v37 = vunpack.c.h.bf16 %v20_v33  ;;  %v4584_v39 = vld [vmem:[%s6313_s2 + $0x1] ss:$2 sm:$0xf]  ;;  %v4065_v40 = vld [vmem:[%s6311_s1 + $0x410] ss:$8 sps:$4 sm:$0xff]   ;;  %v4590_v41 = vrot.slane %v4579_v38, %v77_v26  ;;  %v4595_v42 = vrot.slane %v4579_v38, %v6324_v29 }
   0xd   :  { %726 = vmatprep.subr.bf16.mxu1 %v4044_v14  ;;  %v4598_v43 = vrot.slane %v4584_v39, %v77_v26  ;;  %v4066_v44 = vld [vmem:[%s6311_s1 + $0x304] ss:$8 sps:$4 sm:$0xff]   ;;  %v4070_v50 = vld [vmem:[%s6311_s1 + $0x300] ss:$8 sps:$4 sm:$0xff]   ;;  %v4072_v52 = vld [vmem:[%s6311_s1 + $0x3f4] ss:$8 sps:$4 sm:$0xff]   ;;  %v4683_v13 = vrot.slane %v4579_v38, %v73_v6 }
   0xe   :  { %v4068_v45 = vld [vmem:[%s6311_s1 + $0x404] ss:$8 sps:$4 sm:$0xff]   ;;  %v89_v46 = vmul.f32 %v4590_v41, %v35_v34  ;;  %v4608_v47 = vmul.f32 %v4595_v42, %v36_v35  ;;  %v93_v48 = vmul.f32 %v4590_v41, %v39_v36  ;;  %v4612_v49 = vmul.f32 %v4595_v42, %v40_v37  ;;  %v4071_v51 = vld [vmem:[%s6311_s1 + $0x400] ss:$8 sps:$4 sm:$0xff]   ;;  %v4076_v55 = vld [vmem:[%s6311_s1 + $0x74] ss:$8 sps:$4 sm:$0xff]  }
   0xf   :  { %654 = vmatpush1.bf16.msra.mxu0 %v4046_v15  ;;  %v4074_v58 = vld [vmem:[%s6311_s1 + $0x70] ss:$8 sps:$4 sm:$0xff]   ;;  %v4078_v62 = vld [vmem:[%s6311_s1 + $0x3e4] ss:$8 sps:$4 sm:$0xff]   ;;  %v4080_v0 = vld [vmem:[%s6311_s1 + $0x60] ss:$8 sps:$4 sm:$0xff]  }
  0x10   :  { %727 = vmatpush1.bf16.msra.mxu1 %v4047_v17  ;;  %655 = vmatprep.subr.bf16.mxu0 %v4048_v18  ;;  %v144_v53 = vadd.f32 %v4598_v43, %v89_v46  ;;  %v148_v54 = vadd.f32 %v4598_v43, %v93_v48  ;;  %v4077_v61 = vld [vmem:[%s6311_s1 + $0x3f0] ss:$8 sps:$4 sm:$0xff]   ;;  %v4082_v63 = vld [vmem:[%s6311_s1 + $0x64] ss:$8 sps:$4 sm:$0xff]   ;;  %v4083_v2 = vld [vmem:[%s6311_s1 + $0x3e0] ss:$8 sps:$4 sm:$0xff]  }
  0x11   :  { %728 = vmatprep.subr.bf16.mxu1 %v4050_v19  ;;  %v4084_v3 = vld [vmem:[%s6311_s1 + $0x3d4] ss:$8 sps:$4 sm:$0xff]   ;;  %v4086_v5 = vld [vmem:[%s6311_s1 + $0x50] ss:$8 sps:$4 sm:$0xff]   ;;  %v4090_v8 = vld [vmem:[%s6311_s1 + $0x3c4] ss:$8 sps:$4 sm:$0xff]  }
  0x12   :  { %v176_v56 = vmax.f32 %v144_v53, 0.0  ;;  %v4628_v57 = vmax.f32 %v148_v54, 0.0  ;;  %v4088_v4 = vld [vmem:[%s6311_s1 + $0x54] ss:$8 sps:$4 sm:$0xff]   ;;  %v4089_v7 = vld [vmem:[%s6311_s1 + $0x3d0] ss:$8 sps:$4 sm:$0xff]  }
  0x13   :  { %656 = vmatpush1.bf16.msra.mxu0 %v4052_v20  ;;  %v4094_v9 = vld [vmem:[%s6311_s1 + $0x44] ss:$8 sps:$4 sm:$0xff]   ;;  %v4092_v10 = vld [vmem:[%s6311_s1 + $0x40] ss:$8 sps:$4 sm:$0xff]   ;;  %v4096_v14 = vld [vmem:[%s6311_s1 + $0x3b4] ss:$8 sps:$4 sm:$0xff]   ;;  %v4698_v20 = vrot.slane %v4584_v39, %v73_v6 }
  0x14   :  { %729 = vmatpush1.bf16.msra.mxu1 %v4053_v21  ;;  %657 = vmatprep.subr.bf16.mxu0 %v4054_v23  ;;  %v4634_v59 = vpack.c.bf16 %v4628_v57, %v176_v56  ;;  %v4637_v60 = vpack.c.bf16 %v176_v56, %v4628_v57  ;;  %v4095_v12 = vld [vmem:[%s6311_s1 + $0x3c0] ss:$8 sps:$4 sm:$0xff]   ;;  %v4100_v15 = vld [vmem:[%s6311_s1 + $0x34] ss:$8 sps:$4 sm:$0xff]   ;;  %v4101_v26 = vld [vmem:[%s6311_s1 + $0x3b0] ss:$8 sps:$4 sm:$0xff]  }
  0x15   :  { %730 = vmatprep.subr.bf16.mxu1 %v4056_v24  ;;  %v17_v17 = vld [vmem:[%s6312_s0] sm:$0xff]  ;;  %v19_v18 = vld [vmem:[%s6312_s0 + $0x10] sm:$0xff]  ;;  %v4701_v24 = vrot.slane %v4579_v38, %v69_v11  ;;  %v4719_v32 = vld [vmem:[%s6312_s0 + $0x38] sm:$0xff] }
  0x16   :  { %v34_v19 = vunpack.c.h.bf16 %v17_v17  ;;  %v33_v21 = vunpack.c.l.bf16 %v17_v17  ;;  %v38_v23 = vunpack.c.h.bf16 %v19_v18  ;;  %v4102_v33 = vld [vmem:[%s6311_s1 + $0x3a4] ss:$8 sps:$4 sm:$0xff]   ;;  %v47_v37 = vunpack.c.l.bf16 %v4719_v32  ;;  %v4104_v38 = vld [vmem:[%s6311_s1 + $0x20] ss:$8 sps:$4 sm:$0xff]   ;;  %v23_v54 = vld [vmem:[%s6312_s0 + $0x30] sm:$0xff] }
  0x17   :  { %658 = vmatpush1.bf16.msra.mxu0 %v4058_v25  ;;  %v4098_v25 = vld [vmem:[%s6311_s1 + $0x30] ss:$8 sps:$4 sm:$0xff]   ;;  %v4106_v34 = vld [vmem:[%s6311_s1 + $0x24] ss:$8 sps:$4 sm:$0xff]   ;;  %v4107_v46 = vld [vmem:[%s6311_s1 + $0x3a0] ss:$8 sps:$4 sm:$0xff]  }
  0x18   :  { %731 = vmatpush1.bf16.msra.mxu1 %v4059_v27  ;;  %659 = vmatprep.subr.bf16.mxu0 %v4060_v28  ;;  %v37_v27 = vunpack.c.l.bf16 %v19_v18  ;;  %v88_v28 = vmul.f32 %v4683_v13, %v34_v19  ;;  %v21_v53 = vld [vmem:[%s6312_s0 + $0x20] sm:$0xff] }
  0x19   :  { %732 = vmatprep.subr.bf16.mxu1 %v4062_v30  ;;  %v92_v30 = vmul.f32 %v4683_v13, %v38_v23  ;;  %v4118_v23 = vld [vmem:[%s6311_s1 + $0x4] ss:$8 sps:$4 sm:$0xff]  }
  0x1a   :  { %v4728_v35 = vadd.f32 %v4698_v20, %v88_v28 }
  0x1b   :  { %660 = vmatpush1.bf16.msra.mxu0 %v4064_v31  ;;  %v4714_v31 = vld [vmem:[%s6312_s0 + $0x28] sm:$0xff] }
  0x1c   :  { %733 = vmatpush1.bf16.msra.mxu1 %v4065_v40  ;;  %661 = vmatprep.subr.bf16.mxu0 %v4066_v44  ;;  %v43_v36 = vunpack.c.l.bf16 %v4714_v31  ;;  %v147_v40 = vadd.f32 %v4698_v20, %v92_v30  ;;  %v87_v44 = vmul.f32 %v4701_v24, %v33_v21  ;;  %v6325_v48 = vmax.f32 %v4728_v35, 0.0  ;;  %v4114_v21 = vld [vmem:[%s6311_s1 + $0x384] ss:$8 sps:$4 sm:$0xff]  }
  0x1d   :  { %734 = vmatprep.subr.bf16.mxu1 %v4068_v45  ;;  %v4738_v45 = vrot.slane %v4584_v39, %v69_v11 }
  0x1e   :  { %v4756_v56 = vmax.f32 %v147_v40, 0.0 }
  0x1f   :  { %662 = vmatpush1.bf16.msra.mxu0 %v4070_v50  ;;  %v91_v50 = vmul.f32 %v4701_v24, %v37_v27 }
  0x20   :  { %735 = vmatpush1.bf16.msra.mxu1 %v4071_v51  ;;  %663 = vmatprep.subr.bf16.mxu0 %v4072_v52  ;;  %v97_v51 = vmul.f32 %v4590_v41, %v43_v36  ;;  %v101_v52 = vmul.f32 %v4590_v41, %v47_v37  ;;  %v27_v36 = vld [vmem:[%s6312_s0 + $0x50] sm:$0xff]  ;;  %v4116_v37 = vld [vmem:[%s6311_s1] ss:$8 sps:$4 sm:$0xff]  }
  0x21   :  { %1057 = vmatprep.subr.bf16.mxu1 %v4076_v55  ;;  %v4108_v55 = vld [vmem:[%s6311_s1 + $0x394] ss:$8 sps:$4 sm:$0xff]  }
  0x23   :  { %753 = vmatmul.mubr.bf16.vlgmr.msra.gmra.mxu1 %v4634_v59  ;;  %664 = vmatpush2.bf16.msra.mxu0 %v4077_v61  ;;  %v46_v61 = vunpack.c.h.bf16 %v23_v54 }
  0x24   :  { %1058 = vmatpush1.bf16.msra.mxu1 %v4074_v58  ;;  %665 = vmatprep.subr.bf16.mxu0 %v4078_v62  ;;  %v42_v58 = vunpack.c.h.bf16 %v21_v53  ;;  %v4112_v62 = vld [vmem:[%s6311_s1 + $0x14] ss:$8 sps:$4 sm:$0xff]  }
  0x25   :  { %1059 = vmatprep.subr.bf16.mxu1 %v4082_v63  ;;  %762 = vmatprep.mubr.bf16.mxu1 %v4456_v1  ;;  %v4762_v63 = vadd.f32 %v4598_v43, %v97_v51  ;;  %v100_v11 = vmul.f32 %v4683_v13, %v46_v61  ;;  %v4122_v51 = vld [vmem:[%s6311_s1 + $0xf4] ss:$8 sps:$4 sm:$0xff]  }
  0x26   :  { %v96_v6 = vmul.f32 %v4683_v13, %v42_v58  ;;  %v4125_v58 = vld [vmem:[%s6311_s1 + $0x174] ss:$8 sps:$4 sm:$0xff]  }
  0x27   :  { %666 = vmatpush2.bf16.msra.mxu0 %v4083_v2  ;;  %v41_v2 = vunpack.c.l.bf16 %v21_v53  ;;  %v4817_v28 = vadd.f32 %v4698_v20, %v100_v11 }
  0x28   :  { %1060 = vmatpush1.bf16.msra.mxu1 %v4080_v0  ;;  %667 = vmatprep.subr.bf16.mxu0 %v4084_v3  ;;  %v4765_v0 = vadd.f32 %v4598_v43, %v101_v52  ;;  %v45_v3 = vunpack.c.l.bf16 %v23_v54  ;;  %v4814_v27 = vadd.f32 %v4698_v20, %v96_v6  ;;  %v4865_v6 = vld [vmem:[%s6312_s0 + $0x78] sm:$0xff] }
  0x29   :  { %1061 = vmatprep.subr.bf16.mxu1 %v4088_v4  ;;  %v4770_v4 = vpack.c.bf16 %v4756_v56, %v6325_v48  ;;  %v95_v17 = vmul.f32 %v4701_v24, %v41_v2 }
  0x2a   :  { %v6322_v11 = vmax.f32 %v4814_v27, 0.0 }
  0x2b   :  { %668 = vmatpush2.bf16.msra.mxu0 %v4089_v7  ;;  %v4779_v7 = vld [vmem:[%s6312_s0 + $0x48] sm:$0xff]  ;;  %679 = vmatprep.mubr.bf16.mxu0 %v4770_v4  ;;  %v4841_v52 = vadd.f32 %v4738_v45, %v95_v17 }
  0x2c   :  { %1062 = vmatpush1.bf16.msra.mxu1 %v4086_v5  ;;  %669 = vmatprep.subr.bf16.mxu0 %v4090_v8  ;;  %v4773_v5 = vadd.f32 %v4738_v45, %v87_v44  ;;  %v146_v8 = vadd.f32 %v4738_v45, %v91_v50  ;;  %v51_v18 = vunpack.c.l.bf16 %v4779_v7  ;;  %v4119_v50 = vld [vmem:[%s6311_s1 + $0x380] ss:$8 sps:$4 sm:$0xff]  }
  0x2d   :  { %1063 = vmatprep.subr.bf16.mxu1 %v4094_v9  ;;  %v6320_v9 = vmax.f32 %v4762_v63, 0.0 }
  0x2e   :  { %v105_v30 = vmul.f32 %v4590_v41, %v51_v18  ;;  %v4831_v40 = vmax.f32 %v146_v8, 0.0  ;;  %v4120_v8 = vld [vmem:[%s6311_s1 + $0xf0] ss:$8 sps:$4 sm:$0xff]  }
  0x2f   :  { %670 = vmatpush2.bf16.msra.mxu0 %v4095_v12  ;;  %v4788_v12 = vld [vmem:[%s6312_s0 + $0x58] sm:$0xff] }
  0x30   :  { %1064 = vmatpush1.bf16.msra.mxu1 %v4092_v10  ;;  %671 = vmatprep.subr.bf16.mxu0 %v4096_v14  ;;  %v6319_v10 = vmax.f32 %v4765_v0, 0.0  ;;  %v4110_v14 = vld [vmem:[%s6311_s1 + $0x10] ss:$8 sps:$4 sm:$0xff]   ;;  %v55_v19 = vunpack.c.l.bf16 %v4788_v12  ;;  %v4844_v53 = vadd.f32 %v4598_v43, %v105_v30  ;;  %v4128_v30 = vld [vmem:[%s6311_s1 + $0xe4] ss:$8 sps:$4 sm:$0xff]  }
  0x31   :  { %1065 = vmatprep.subr.bf16.mxu1 %v4100_v15  ;;  %v4113_v15 = vld [vmem:[%s6311_s1 + $0x390] ss:$8 sps:$4 sm:$0xff]  }
  0x33   :  { %672 = vmatpush2.bf16.msra.mxu0 %v4101_v26  ;;  %v99_v26 = vmul.f32 %v4701_v24, %v45_v3  ;;  %v4860_v3 = vld [vmem:[%s6312_s0 + $0x68] sm:$0xff] }
  0x34   :  { %1066 = vmatpush1.bf16.msra.mxu1 %v4098_v25  ;;  %673 = vmatprep.subr.bf16.mxu0 %v4102_v33  ;;  %v4809_v25 = vpack.c.bf16 %v6319_v10, %v6320_v9  ;;  %v109_v33 = vmul.f32 %v4590_v41, %v55_v19  ;;  %v4123_v19 = vld [vmem:[%s6311_s1 + $0x170] ss:$8 sps:$4 sm:$0xff]   ;;  %v4134_v10 = vld [vmem:[%s6311_s1 + $0xd4] ss:$8 sps:$4 sm:$0xff]  }
  0x35   :  { %1067 = vmatprep.subr.bf16.mxu1 %v4106_v34  ;;  %v25_v34 = vld [vmem:[%s6312_s0 + $0x40] sm:$0xff]  ;;  %v4853_v61 = vadd.f32 %v4738_v45, %v99_v26  ;;  %v59_v26 = vunpack.c.l.bf16 %v4860_v3 }
  0x36   :  { %763 = vmatmul.mubr.bf16.gmra.mxu1 %v4809_v25  ;;  %v50_v44 = vunpack.c.h.bf16 %v25_v34  ;;  %v4847_v54 = vadd.f32 %v4598_v43, %v109_v33  ;;  %v4131_v33 = vld [vmem:[%s6311_s1 + $0x164] ss:$8 sps:$4 sm:$0xff]  }
  0x37   :  { %674 = vmatpush2.bf16.msra.mxu0 %v4107_v46  ;;  %v54_v46 = vunpack.c.h.bf16 %v27_v36  ;;  %772 = vmatprep.mubr.bf16.mxu1 %v4456_v1  ;;  %v113_v16 = vmul.f32 %v4590_v41, %v59_v26  ;;  %v4129_v26 = vld [vmem:[%s6311_s1 + $0x160] ss:$8 sps:$4 sm:$0xff]  }
  0x38   :  { %1068 = vmatpush1.bf16.msra.mxu1 %v4104_v38  ;;  %675 = vmatprep.subr.bf16.mxu0 %v4108_v55  ;;  %v6323_v38 = vmax.f32 %v4773_v5, 0.0  ;;  %v49_v55 = vunpack.c.l.bf16 %v25_v34  ;;  %v6317_v17 = vmax.f32 %v4847_v54, 0.0  ;;  %v182_v34 = vmax.f32 %v4841_v52, 0.0  ;;  %v4191_v52 = vld [vmem:[%s6311_s1 + $0x744] ss:$8 sps:$4 sm:$0xff]  }
  0x39   :  { %1069 = vmatprep.subr.bf16.mxu1 %v4112_v62  ;;  %v104_v62 = vmul.f32 %v4683_v13, %v50_v44  ;;  %v108_v2 = vmul.f32 %v4683_v13, %v54_v46  ;;  %v63_v44 = vunpack.c.l.bf16 %v4865_v6  ;;  %v6329_v46 = vmax.f32 %v4853_v61, 0.0 }
  0x3a   :  { %v3970_v18 = vpack.c.bf16 %v4831_v40, %v6323_v38 }
  0x3b   :  { %676 = vmatpush2.bf16.msra.mxu0 %v4113_v15  ;;  %v6318_v15 = vmax.f32 %v4844_v53, 0.0 }
  0x3c   :  { %1070 = vmatpush1.bf16.msra.mxu1 %v4110_v14  ;;  %677 = vmatprep.subr.bf16.mxu0 %v4114_v21  ;;  %v6321_v14 = vmax.f32 %v4817_v28, 0.0  ;;  %v53_v21 = vunpack.c.l.bf16 %v27_v36 }
  0x3d   :  { %1071 = vmatprep.subr.bf16.mxu1 %v4118_v23  ;;  %v103_v23 = vmul.f32 %v4701_v24, %v49_v55  ;;  %v4894_v36 = vpack.c.bf16 %v6317_v17, %v6318_v15  ;;  %v4905_v55 = vadd.f32 %v4698_v20, %v108_v2  ;;  %v31_v17 = vld [vmem:[%s6312_s0 + $0x70] sm:$0xff]  ;;  %v4126_v15 = vld [vmem:[%s6311_s1 + $0xe0] ss:$8 sps:$4 sm:$0xff]  }
  0x3e   :  { %v62_v2 = vunpack.c.h.bf16 %v31_v17  ;;  %v107_v9 = vmul.f32 %v4701_v24, %v53_v21  ;;  %v61_v48 = vunpack.c.l.bf16 %v31_v17 }
  0x3f   :  { %678 = vmatpush2.bf16.msra.mxu0 %v4119_v50  ;;  %v4902_v50 = vadd.f32 %v4698_v20, %v104_v62  ;;  %773 = vmatmul.mubr.bf16.gmra.mxu1 %v4894_v36 }
  0x40   :  { %1072 = vmatpush1.bf16.msra.mxu1 %v4116_v37  ;;  %v29_v37 = vld [vmem:[%s6312_s0 + $0x60] sm:$0xff]  ;;  %1130 = vmatprep.subr.bf16.mxu0 %v4125_v58  ;;  %v117_v58 = vmul.f32 %v4590_v41, %v63_v44  ;;  %v168_v41 = vadd.f32 %v4598_v43, %v113_v16  ;;  %v116_v29 = vmul.f32 %v4683_v13, %v62_v2  ;;  %v6327_v16 = vmax.f32 %v4905_v55, 0.0 }
  0x41   :  { %1073 = vmatprep.subr.bf16.mxu1 %v4122_v51  ;;  %v4918_v51 = vpack.c.bf16 %v6321_v14, %v6322_v11  ;;  %v58_v62 = vunpack.c.h.bf16 %v29_v37  ;;  %v4930_v14 = vadd.f32 %v4738_v45, %v103_v23  ;;  %v57_v44 = vunpack.c.l.bf16 %v29_v37  ;;  %782 = vmatprep.mubr.bf16.mxu1 %v4456_v1  ;;  %v4135_v37 = vld [vmem:[%s6311_s1 + $0x150] ss:$8 sps:$4 sm:$0xff]  }
  0x42   :  { %680 = vmatmul.mubr.bf16.vlgmr.msra.gmra.mxu0 %v3970_v18  ;;  %v4137_v18 = vld [vmem:[%s6311_s1 + $0x154] ss:$8 sps:$4 sm:$0xff]   ;;  %v172_v11 = vadd.f32 %v4598_v43, %v117_v58  ;;  %v191_v21 = vmax.f32 %v4902_v50, 0.0  ;;  %v4941_v23 = vmax.f32 %v168_v41, 0.0  ;;  %v4132_v43 = vld [vmem:[%s6311_s1 + $0xd0] ss:$8 sps:$4 sm:$0xff]  }
  0x43   :  { %1131 = vmatpush1.bf16.msra.mxu0 %v4123_v19  ;;  %v112_v38 = vmul.f32 %v4683_v13, %v58_v62  ;;  %689 = vmatprep.mubr.bf16.mxu0 %v4918_v51  ;;  %v4951_v19 = vadd.f32 %v4698_v20, %v116_v29  ;;  %v6328_v58 = vmax.f32 %v4930_v14, 0.0  ;;  %v4197_v50 = vld [vmem:[%s6311_s1 + $0x734] ss:$8 sps:$4 sm:$0xff]  }
  0x44   :  { %1074 = vmatpush2.bf16.msra.mxu1 %v4120_v8  ;;  %1132 = vmatprep.subr.bf16.mxu0 %v4131_v33  ;;  %v111_v8 = vmul.f32 %v4701_v24, %v57_v44  ;;  %v204_v13 = vmax.f32 %v172_v11, 0.0  ;;  %v3973_v33 = vpack.c.bf16 %v6329_v46, %v182_v34  ;;  %v4140_v11 = vld [vmem:[%s6311_s1 + $0xc4] ss:$8 sps:$4 sm:$0xff]   ;;  %v4141_v44 = vld [vmem:[%s6311_s1 + $0x140] ss:$8 sps:$4 sm:$0xff]  }
  0x45   :  { %1075 = vmatprep.subr.bf16.mxu1 %v4128_v30  ;;  %v167_v17 = vadd.f32 %v4698_v20, %v112_v38  ;;  %v115_v30 = vmul.f32 %v4701_v24, %v61_v48  ;;  %v4965_v38 = vadd.f32 %v4738_v45, %v107_v9  ;;  %v4143_v20 = vld [vmem:[%s6311_s1 + $0x144] ss:$8 sps:$4 sm:$0xff]   ;;  %v203_v62 = vmax.f32 %v4951_v19, 0.0 }
  0x46   :  { %v166_v29 = vadd.f32 %v4738_v45, %v111_v8  ;;  %v4972_v24 = vpack.c.bf16 %v204_v13, %v4941_v23  ;;  %v4996_v41 = vpack.c.bf16 %v4941_v23, %v204_v13  ;;  %v44_v19 = vunpack.c.h.bf16 %v4714_v31 }
  0x47   :  { %1133 = vmatpush1.bf16.msra.mxu0 %v4129_v26  ;;  %v4975_v48 = vadd.f32 %v4738_v45, %v115_v30  ;;  %v4978_v9 = vmax.f32 %v167_v17, 0.0  ;;  %v4990_v26 = vpack.c.bf16 %v6327_v16, %v191_v21  ;;  %v6337_v17 = vsub.s32 3, %v4545_v22  ;;  %v4146_v30 = vld [vmem:[%s6311_s1 + $0xb4] ss:$8 sps:$4 sm:$0xff]  }
  0x48   :  { %1076 = vmatpush2.bf16.msra.mxu1 %v4126_v15  ;;  %1134 = vmatprep.subr.bf16.mxu0 %v4137_v18  ;;  %v6336_v15 = vmax.f32 %v4728_v35, 0.0  ;;  %v4992_v45 = vmax.f32 %v166_v29, 0.0  ;;  %v4138_v35 = vld [vmem:[%s6311_s1 + $0xc0] ss:$8 sps:$4 sm:$0xff]   ;;  %v6326_v18 = vmax.f32 %v4965_v38, 0.0  ;;  %v48_v29 = vunpack.c.h.bf16 %v4719_v32 }
  0x49   :  { %1077 = vmatprep.subr.bf16.mxu1 %v4134_v10  ;;  %v202_v10 = vmax.f32 %v4975_v48, 0.0  ;;  %783 = vmatmul.mubr.bf16.gmra.mxu1 %v4972_v24  ;;  %v5007_v8 = vpack.c.bf16 %v4978_v9, %v203_v62  ;;  %v137_v13 = vrot.slane %v4584_v39, %v6337_v17  ;;  %v4149_v39 = vld [vmem:[%s6311_s1 + $0x134] ss:$8 sps:$4 sm:$0xff]   ;;  %v56_v17 = vunpack.c.h.bf16 %v4788_v12  ;;  %v4147_v12 = vld [vmem:[%s6311_s1 + $0x130] ss:$8 sps:$4 sm:$0xff]  }
  0x4a   :  { %v4984_v2 = vpack.c.bf16 %v6336_v15, %v4756_v56  ;;  %690 = vmatmul.mubr.bf16.gmra.mxu0 %v3973_v33  ;;  %v52_v15 = vunpack.c.h.bf16 %v4779_v7  ;;  %v102_v32 = vmul.f32 %v4595_v42, %v48_v29  ;;  %v4152_v29 = vld [vmem:[%s6311_s1 + $0xa4] ss:$8 sps:$4 sm:$0xff]  }
  0x4b   :  { %1135 = vmatpush1.bf16.msra.mxu0 %v4135_v37  ;;  %v5019_v33 = vpack.c.bf16 %v4992_v45, %v202_v10  ;;  %v5027_v31 = vadd.f32 %v137_v13, %v4608_v47  ;;  %v98_v37 = vmul.f32 %v4595_v42, %v44_v19  ;;  %699 = vmatprep.mubr.bf16.mxu0 %v4990_v26  ;;  %v4167_v48 = vld [vmem:[%s6311_s1 + $0x104] ss:$8 sps:$4 sm:$0xff]  }
  0x4c   :  { %1078 = vmatpush2.bf16.msra.mxu1 %v4132_v43  ;;  %1136 = vmatprep.subr.bf16.mxu0 %v4143_v20  ;;  %v149_v43 = vadd.f32 %v137_v13, %v4612_v49  ;;  %v106_v7 = vmul.f32 %v4595_v42, %v52_v15  ;;  %v3976_v47 = vpack.c.bf16 %v6326_v18, %v6328_v58  ;;  %v4144_v49 = vld [vmem:[%s6311_s1 + $0xb0] ss:$8 sps:$4 sm:$0xff]   ;;  %v64_v58 = vunpack.c.h.bf16 %v4865_v6 }
  0x4d   :  { %1079 = vmatprep.subr.bf16.mxu1 %v4140_v11  ;;  %1089 = vmatprep.mubr.bf16.mxu1 %v4984_v2  ;;  %v177_v11 = vmax.f32 %v5027_v31, 0.0  ;;  %v5047_v20 = vadd.f32 %v137_v13, %v98_v37  ;;  %v110_v19 = vmul.f32 %v4595_v42, %v56_v17  ;;  %v5055_v18 = vadd.f32 %v137_v13, %v102_v32  ;;  %v4155_v37 = vld [vmem:[%s6311_s1 + $0x124] ss:$8 sps:$4 sm:$0xff]   ;;  %v4150_v32 = vld [vmem:[%s6311_s1 + $0xa0] ss:$8 sps:$4 sm:$0xff]  }
  0x4e   :  { %v5053_v15 = vmax.f32 %v149_v43, 0.0  ;;  %v5057_v16 = vadd.f32 %v137_v13, %v106_v7  ;;  %v5068_v43 = vpack.c.bf16 %v203_v62, %v4978_v9  ;;  %v118_v7 = vmul.f32 %v4595_v42, %v64_v58  ;;  %v4182_v31 = vld [vmem:[%s6311_s1 + $0x654] ss:$8 sps:$4 sm:$0xff]  }
  0x4f   :  { %1137 = vmatpush1.bf16.msra.mxu0 %v4141_v44  ;;  %v185_v17 = vmax.f32 %v5047_v20, 0.0  ;;  %v60_v44 = vunpack.c.h.bf16 %v4860_v3  ;;  %v4153_v3 = vld [vmem:[%s6311_s1 + $0x120] ss:$8 sps:$4 sm:$0xff]   ;;  %v4228_v20 = vld [vmem:[%s6311_s1 + $0x6d0] ss:$8 sps:$4 sm:$0xff]  }
  0x50   :  { %1080 = vmatpush2.bf16.msra.mxu1 %v4138_v35  ;;  %1138 = vmatprep.subr.bf16.mxu0 %v4149_v39  ;;  %v5063_v35 = vadd.f32 %v137_v13, %v110_v19  ;;  %v189_v39 = vmax.f32 %v5055_v18, 0.0  ;;  %v193_v6 = vmax.f32 %v5057_v16, 0.0  ;;  %v4240_v16 = vld [vmem:[%s6311_s1 + $0x6b0] ss:$8 sps:$4 sm:$0xff]  }
  0x51   :  { %1081 = vmatprep.subr.bf16.mxu1 %v4146_v30  ;;  %v5073_v30 = vpack.c.bf16 %v5053_v15, %v177_v11  ;;  %v114_v62 = vmul.f32 %v4595_v42, %v60_v44  ;;  %v4161_v42 = vld [vmem:[%s6311_s1 + $0x114] ss:$8 sps:$4 sm:$0xff]   ;;  %v4164_v44 = vld [vmem:[%s6311_s1 + $0x84] ss:$8 sps:$4 sm:$0xff]   ;;  %v4243_v18 = vld [vmem:[%s6311_s1 + $0x4b0] ss:$8 sps:$4 sm:$0xff]  }
  0x52   :  { %700 = vmatmul.mubr.bf16.gmra.mxu0 %v3976_v47  ;;  %v4158_v47 = vld [vmem:[%s6311_s1 + $0x94] ss:$8 sps:$4 sm:$0xff]   ;;  %v5092_v19 = vpack.c.bf16 %v189_v39, %v185_v17  ;;  %v197_v46 = vmax.f32 %v5063_v35, 0.0  ;;  %v4404_v35 = vld [vmem:[%s6311_s1 + $0x204] ss:$8 sps:$4 sm:$0xff]  }
  0x53   :  { %1139 = vmatpush1.bf16.msra.mxu0 %v4147_v12  ;;  %v5098_v58 = vadd.f32 %v137_v13, %v114_v62  ;;  %709 = vmatprep.mubr.bf16.mxu0 %v5068_v43  ;;  %v4173_v62 = vld [vmem:[%s6311_s1 + $0x774] ss:$8 sps:$4 sm:$0xff]  }
  0x54   :  { %1082 = vmatpush2.bf16.msra.mxu1 %v4144_v49  ;;  %1140 = vmatprep.subr.bf16.mxu0 %v4155_v37  ;;  %v5100_v49 = vadd.f32 %v137_v13, %v118_v7  ;;  %v5107_v12 = vpack.c.bf16 %v197_v46, %v193_v6  ;;  %v4156_v37 = vld [vmem:[%s6311_s1 + $0x90] ss:$8 sps:$4 sm:$0xff]   ;;  %v6338_v7 = vmax.f32 %v4773_v5, 0.0  ;;  %v4179_v5 = vld [vmem:[%s6311_s1 + $0x764] ss:$8 sps:$4 sm:$0xff]  }
  0x55   :  { %1083 = vmatprep.subr.bf16.mxu1 %v4152_v29  ;;  %v3979_v29 = vpack.c.bf16 %v202_v10, %v4992_v45  ;;  %v4159_v13 = vld [vmem:[%s6311_s1 + $0x110] ss:$8 sps:$4 sm:$0xff]   ;;  %v4162_v10 = vld [vmem:[%s6311_s1 + $0x80] ss:$8 sps:$4 sm:$0xff]  }
  0x57   :  { %1141 = vmatpush1.bf16.msra.mxu0 %v4153_v3  ;;  %v4170_v3 = vld [vmem:[%s6311_s1 + $0x674] ss:$8 sps:$4 sm:$0xff]  }
  0x58   :  { %1084 = vmatpush2.bf16.msra.mxu1 %v4150_v32  ;;  %1142 = vmatprep.subr.bf16.mxu0 %v4161_v42  ;;  %v4165_v32 = vld [vmem:[%s6311_s1 + $0x100] ss:$8 sps:$4 sm:$0xff]   ;;  %v4168_v42 = vld [vmem:[%s6311_s1 + $0x670] ss:$8 sps:$4 sm:$0xff]  }
  0x59   :  { %1085 = vmatprep.subr.bf16.mxu1 %v4158_v47  ;;  %v3982_v47 = vpack.c.bf16 %v6338_v7, %v4831_v40 }
  0x5a   :  { %710 = vmatmul.mubr.bf16.gmra.mxu0 %v3979_v29  ;;  %v4171_v29 = vld [vmem:[%s6311_s1 + $0x770] ss:$8 sps:$4 sm:$0xff]  }
  0x5b   :  { %1143 = vmatpush1.bf16.msra.mxu0 %v4159_v13  ;;  %1162 = vmatprep.mubr.bf16.mxu0 %v4456_v1  ;;  %v5155_v13 = vpack.c.bf16 %v177_v11, %v5053_v15  ;;  %v4180_v11 = vld [vmem:[%s6311_s1 + $0x650] ss:$8 sps:$4 sm:$0xff]  }
  0x5c   :  { %1086 = vmatpush2.bf16.msra.mxu1 %v4156_v37  ;;  %1144 = vmatprep.subr.bf16.mxu0 %v4167_v48  ;;  %v4176_v37 = vld [vmem:[%s6311_s1 + $0x664] ss:$8 sps:$4 sm:$0xff]  }
  0x5d   :  { %1087 = vmatprep.subr.bf16.mxu1 %v4164_v44  ;;  %v6339_v44 = vmax.f32 %v4814_v27, 0.0  ;;  %v5180_v27 = vpack.c.bf16 %v182_v34, %v4831_v40  ;;  %v4188_v40 = vld [vmem:[%s6311_s1 + $0x644] ss:$8 sps:$4 sm:$0xff]   ;;  %v6341_v34 = vmax.f32 %v4817_v28, 0.0  ;;  %v4194_v28 = vld [vmem:[%s6311_s1 + $0x634] ss:$8 sps:$4 sm:$0xff]  }
  0x5f   :  { %1145 = vmatpush1.bf16.msra.mxu0 %v4165_v32  ;;  %v5160_v48 = vpack.c.bf16 %v6339_v44, %v4756_v56  ;;  %v4177_v32 = vld [vmem:[%s6311_s1 + $0x760] ss:$8 sps:$4 sm:$0xff]   ;;  %v4185_v56 = vld [vmem:[%s6311_s1 + $0x754] ss:$8 sps:$4 sm:$0xff]   ;;  %v6344_v44 = vmax.f32 %v4765_v0, 0.0 }
  0x60   :  { %1088 = vmatpush2.bf16.msra.mxu1 %v4162_v10  ;;  %1498 = vmatprep.subr.bf16.mxu0 %v4170_v3  ;;  %v4174_v10 = vld [vmem:[%s6311_s1 + $0x660] ss:$8 sps:$4 sm:$0xff]   ;;  %v4183_v3 = vld [vmem:[%s6311_s1 + $0x750] ss:$8 sps:$4 sm:$0xff]  }
  0x61   :  { %1571 = vmatprep.subr.bf16.mxu1 %v4173_v62  ;;  %v6340_v62 = vmax.f32 %v4762_v63, 0.0  ;;  %v4189_v63 = vld [vmem:[%s6311_s1 + $0x740] ss:$8 sps:$4 sm:$0xff]  }
  0x62   :  { %1163 = vmatmul.mubr.bf16.vlgmr.msra.gmra.mxu0 %v4637_v60 }
  0x63   :  { %1090 = vmatmul.mubr.bf16.vlgmr.msra.gmra.mxu1 %v3982_v47  ;;  %1499 = vmatpush1.bf16.msra.mxu0 %v4168_v42  ;;  %v5191_v7 = vpack.c.bf16 %v6340_v62, %v4628_v57  ;;  %v5203_v47 = vpack.c.bf16 %v191_v21, %v6341_v34  ;;  %v4186_v57 = vld [vmem:[%s6311_s1 + $0x640] ss:$8 sps:$4 sm:$0xff]   ;;  %v6342_v21 = vmax.f32 %v4853_v61, 0.0  ;;  %v6343_v42 = vmax.f32 %v4930_v14, 0.0  ;;  %v4200_v61 = vld [vmem:[%s6311_s1 + $0x624] ss:$8 sps:$4 sm:$0xff]  }
  0x64   :  { %1572 = vmatpush1.bf16.msra.mxu1 %v4171_v29  ;;  %1500 = vmatprep.subr.bf16.mxu0 %v4176_v37  ;;  %v4192_v37 = vld [vmem:[%s6311_s1 + $0x630] ss:$8 sps:$4 sm:$0xff]   ;;  %v4203_v14 = vld [vmem:[%s6311_s1 + $0x724] ss:$8 sps:$4 sm:$0xff]  }
  0x65   :  { %1573 = vmatprep.subr.bf16.mxu1 %v4179_v5  ;;  %1099 = vmatprep.mubr.bf16.mxu1 %v5160_v48  ;;  %v5225_v29 = vpack.c.bf16 %v6343_v42, %v6342_v21  ;;  %v4195_v5 = vld [vmem:[%s6311_s1 + $0x730] ss:$8 sps:$4 sm:$0xff]   ;;  %v4224_v21 = vld [vmem:[%s6311_s1 + $0x6e4] ss:$8 sps:$4 sm:$0xff]  }
  0x66   :  { %1172 = vmatprep.mubr.bf16.mxu0 %v4456_v1  ;;  %v4204_v62 = vld [vmem:[%s6311_s1 + $0x610] ss:$8 sps:$4 sm:$0xff]   ;;  %v4227_v42 = vld [vmem:[%s6311_s1 + $0x4e4] ss:$8 sps:$4 sm:$0xff]  }
  0x67   :  { %1501 = vmatpush1.bf16.msra.mxu0 %v4174_v10  ;;  %v6345_v10 = vmax.f32 %v4844_v53, 0.0  ;;  %v4198_v53 = vld [vmem:[%s6311_s1 + $0x620] ss:$8 sps:$4 sm:$0xff]  }
  0x68   :  { %1574 = vmatpush1.bf16.msra.mxu1 %v4177_v32  ;;  %1502 = vmatprep.subr.bf16.mxu0 %v4182_v31  ;;  %v6346_v31 = vmax.f32 %v4905_v55, 0.0  ;;  %v4206_v55 = vld [vmem:[%s6311_s1 + $0x614] ss:$8 sps:$4 sm:$0xff]  }
  0x69   :  { %1575 = vmatprep.subr.bf16.mxu1 %v4185_v56  ;;  %v5237_v32 = vpack.c.bf16 %v6345_v10, %v6344_v44  ;;  %v4201_v56 = vld [vmem:[%s6311_s1 + $0x720] ss:$8 sps:$4 sm:$0xff]   ;;  %v5326_v44 = vpack.c.bf16 %v185_v17, %v5053_v15  ;;  %v4230_v10 = vld [vmem:[%s6311_s1 + $0x6d4] ss:$8 sps:$4 sm:$0xff]   ;;  %v4231_v15 = vld [vmem:[%s6311_s1 + $0x4d0] ss:$8 sps:$4 sm:$0xff]  }
  0x6a   :  { %1173 = vmatmul.mubr.bf16.gmra.mxu0 %v5191_v7  ;;  %v5248_v0 = vpack.c.bf16 %v4978_v9, %v6346_v31  ;;  %v4209_v9 = vld [vmem:[%s6311_s1 + $0x714] ss:$8 sps:$4 sm:$0xff]   ;;  %v4236_v17 = vld [vmem:[%s6311_s1 + $0x6c4] ss:$8 sps:$4 sm:$0xff]   ;;  %v4234_v31 = vld [vmem:[%s6311_s1 + $0x6c0] ss:$8 sps:$4 sm:$0xff]  }
  0x6b   :  { %1100 = vmatmul.mubr.bf16.gmra.mxu1 %v5180_v27  ;;  %1503 = vmatpush1.bf16.msra.mxu0 %v4180_v11  ;;  %v6347_v11 = vmax.f32 %v4965_v38, 0.0  ;;  %v4212_v38 = vld [vmem:[%s6311_s1 + $0x604] ss:$8 sps:$4 sm:$0xff]  }
  0x6c   :  { %1576 = vmatpush1.bf16.msra.mxu1 %v4183_v3  ;;  %1504 = vmatprep.subr.bf16.mxu0 %v4188_v40  ;;  %v4207_v40 = vld [vmem:[%s6311_s1 + $0x710] ss:$8 sps:$4 sm:$0xff]  }
  0x6d   :  { %1577 = vmatprep.subr.bf16.mxu1 %v4191_v52  ;;  %1109 = vmatprep.mubr.bf16.mxu1 %v5203_v47  ;;  %v5269_v3 = vpack.c.bf16 %v4992_v45, %v6347_v11  ;;  %v6348_v52 = vmax.f32 %v4847_v54, 0.0  ;;  %v4215_v45 = vld [vmem:[%s6311_s1 + $0x704] ss:$8 sps:$4 sm:$0xff]   ;;  %v4210_v54 = vld [vmem:[%s6311_s1 + $0x600] ss:$8 sps:$4 sm:$0xff]  }
  0x6e   :  { %1182 = vmatprep.mubr.bf16.mxu0 %v4456_v1  ;;  %v4246_v11 = vld [vmem:[%s6311_s1 + $0x6a0] ss:$8 sps:$4 sm:$0xff]  }
  0x6f   :  { %1505 = vmatpush1.bf16.msra.mxu0 %v4186_v57  ;;  %v5280_v34 = vpack.c.bf16 %v4941_v23, %v6348_v52  ;;  %v4213_v23 = vld [vmem:[%s6311_s1 + $0x700] ss:$8 sps:$4 sm:$0xff]   ;;  %v4218_v57 = vld [vmem:[%s6311_s1 + $0x6f4] ss:$8 sps:$4 sm:$0xff]  }
  0x70   :  { %1578 = vmatpush1.bf16.msra.mxu1 %v4189_v63  ;;  %1506 = vmatprep.subr.bf16.mxu0 %v4194_v28  ;;  %v4221_v63 = vld [vmem:[%s6311_s1 + $0x4f4] ss:$8 sps:$4 sm:$0xff]   ;;  %v4216_v28 = vld [vmem:[%s6311_s1 + $0x6f0] ss:$8 sps:$4 sm:$0xff]  }
  0x71   :  { %1579 = vmatprep.subr.bf16.mxu1 %v4197_v50  ;;  %v4219_v50 = vld [vmem:[%s6311_s1 + $0x4f0] ss:$8 sps:$4 sm:$0xff]   ;;  %v4257_v52 = vld [vmem:[%s6311_s1 + $0x494] ss:$8 sps:$4 sm:$0xff]  }
  0x72   :  { %1183 = vmatmul.mubr.bf16.gmra.mxu0 %v5237_v32 }
  0x73   :  { %1110 = vmatmul.mubr.bf16.gmra.mxu1 %v5225_v29  ;;  %1507 = vmatpush1.bf16.msra.mxu0 %v4192_v37  ;;  %v4222_v37 = vld [vmem:[%s6311_s1 + $0x6e0] ss:$8 sps:$4 sm:$0xff]  }
  0x74   :  { %1580 = vmatpush1.bf16.msra.mxu1 %v4195_v5  ;;  %1508 = vmatprep.subr.bf16.mxu0 %v4200_v61  ;;  %v4225_v5 = vld [vmem:[%s6311_s1 + $0x4e0] ss:$8 sps:$4 sm:$0xff]   ;;  %v4233_v61 = vld [vmem:[%s6311_s1 + $0x4d4] ss:$8 sps:$4 sm:$0xff]  }
  0x75   :  { %1581 = vmatprep.subr.bf16.mxu1 %v4203_v14  ;;  %1119 = vmatprep.mubr.bf16.mxu1 %v5248_v0  ;;  %v4239_v14 = vld [vmem:[%s6311_s1 + $0x4c4] ss:$8 sps:$4 sm:$0xff]  }
  0x76   :  { %1192 = vmatprep.mubr.bf16.mxu0 %v4456_v1 }
  0x77   :  { %1509 = vmatpush1.bf16.msra.mxu0 %v4198_v53  ;;  %v4237_v53 = vld [vmem:[%s6311_s1 + $0x4c0] ss:$8 sps:$4 sm:$0xff]  }
  0x78   :  { %1582 = vmatpush1.bf16.msra.mxu1 %v4201_v56  ;;  %1510 = vmatprep.subr.bf16.mxu0 %v4206_v55  ;;  %v5358_v56 = vpack.c.bf16 %v193_v6, %v189_v39  ;;  %v4242_v55 = vld [vmem:[%s6311_s1 + $0x6b4] ss:$8 sps:$4 sm:$0xff]   ;;  %v4248_v39 = vld [vmem:[%s6311_s1 + $0x6a4] ss:$8 sps:$4 sm:$0xff]  }
  0x79   :  { %1583 = vmatprep.subr.bf16.mxu1 %v4209_v9  ;;  %v4245_v9 = vld [vmem:[%s6311_s1 + $0x4b4] ss:$8 sps:$4 sm:$0xff]   ;;  %v4251_v6 = vld [vmem:[%s6311_s1 + $0x4a4] ss:$8 sps:$4 sm:$0xff]  }
  0x7a   :  { %1193 = vmatmul.mubr.bf16.gmra.mxu0 %v5280_v34 }
  0x7b   :  { %1120 = vmatmul.mubr.bf16.gmra.mxu1 %v5269_v3  ;;  %1511 = vmatpush1.bf16.msra.mxu0 %v4204_v62  ;;  %v4249_v62 = vld [vmem:[%s6311_s1 + $0x4a0] ss:$8 sps:$4 sm:$0xff]  }
  0x7c   :  { %1584 = vmatpush1.bf16.msra.mxu1 %v4207_v40  ;;  %1512 = vmatprep.subr.bf16.mxu0 %v4212_v38  ;;  %v4254_v40 = vld [vmem:[%s6311_s1 + $0x694] ss:$8 sps:$4 sm:$0xff]   ;;  %v4252_v38 = vld [vmem:[%s6311_s1 + $0x690] ss:$8 sps:$4 sm:$0xff]  }
  0x7d   :  { %1585 = vmatprep.subr.bf16.mxu1 %v4215_v45  ;;  %1603 = vmatprep.mubr.bf16.mxu1 %v4456_v1  ;;  %v4255_v45 = vld [vmem:[%s6311_s1 + $0x490] ss:$8 sps:$4 sm:$0xff]  }
  0x7e   :  { %1530 = vmatprep.mubr.bf16.mxu0 %v5160_v48 }
  0x7f   :  { %1513 = vmatpush1.bf16.msra.mxu0 %v4210_v54  ;;  %v4260_v54 = vld [vmem:[%s6311_s1 + $0x684] ss:$8 sps:$4 sm:$0xff]  }
  0x80   :  { %1586 = vmatpush1.bf16.msra.mxu1 %v4213_v23  ;;  %1514 = vmatprep.subr.bf16.mxu0 %v4218_v57  ;;  %v4263_v23 = vld [vmem:[%s6311_s1 + $0x484] ss:$8 sps:$4 sm:$0xff]   ;;  %v4258_v57 = vld [vmem:[%s6311_s1 + $0x680] ss:$8 sps:$4 sm:$0xff]  }
  0x81   :  { %2205 = vmatprep.subr.bf16.mxu1 %v4221_v63  ;;  %v4261_v63 = vld [vmem:[%s6311_s1 + $0x480] ss:$8 sps:$4 sm:$0xff]  }
  0x83   :  { %1604 = vmatmul.mubr.bf16.vlgmr.msra.gmra.mxu1 %v5191_v7  ;;  %1515 = vmatpush2.bf16.msra.mxu0 %v4216_v28  ;;  %v4266_v28 = vld [vmem:[%s6311_s1 + $0x574] ss:$8 sps:$4 sm:$0xff]  }
  0x84   :  { %2206 = vmatpush1.bf16.msra.mxu1 %v4219_v50  ;;  %1516 = vmatprep.subr.bf16.mxu0 %v4224_v21  ;;  %v4269_v50 = vld [vmem:[%s6311_s1 + $0x5f4] ss:$8 sps:$4 sm:$0xff]   ;;  %v4264_v21 = vld [vmem:[%s6311_s1 + $0x570] ss:$8 sps:$4 sm:$0xff]  }
  0x85   :  { %2207 = vmatprep.subr.bf16.mxu1 %v4227_v42  ;;  %1613 = vmatprep.mubr.bf16.mxu1 %v4456_v1  ;;  %v4267_v42 = vld [vmem:[%s6311_s1 + $0x5f0] ss:$8 sps:$4 sm:$0xff]  }
  0x87   :  { %1517 = vmatpush2.bf16.msra.mxu0 %v4222_v37  ;;  %v4272_v37 = vld [vmem:[%s6311_s1 + $0x564] ss:$8 sps:$4 sm:$0xff]  }
  0x88   :  { %2208 = vmatpush1.bf16.msra.mxu1 %v4225_v5  ;;  %1518 = vmatprep.subr.bf16.mxu0 %v4230_v10  ;;  %v4270_v5 = vld [vmem:[%s6311_s1 + $0x560] ss:$8 sps:$4 sm:$0xff]  }
  0x89   :  { %2209 = vmatprep.subr.bf16.mxu1 %v4233_v61  ;;  %v4273_v10 = vld [vmem:[%s6311_s1 + $0x5e0] ss:$8 sps:$4 sm:$0xff]   ;;  %v4278_v61 = vld [vmem:[%s6311_s1 + $0x554] ss:$8 sps:$4 sm:$0xff]  }
  0x8b   :  { %1614 = vmatmul.mubr.bf16.gmra.mxu1 %v5237_v32  ;;  %1519 = vmatpush2.bf16.msra.mxu0 %v4228_v20  ;;  %v4276_v20 = vld [vmem:[%s6311_s1 + $0x550] ss:$8 sps:$4 sm:$0xff]  }
  0x8c   :  { %2210 = vmatpush1.bf16.msra.mxu1 %v4231_v15  ;;  %1520 = vmatprep.subr.bf16.mxu0 %v4236_v17  ;;  %v4279_v15 = vld [vmem:[%s6311_s1 + $0x5d0] ss:$8 sps:$4 sm:$0xff]   ;;  %v4284_v17 = vld [vmem:[%s6311_s1 + $0x544] ss:$8 sps:$4 sm:$0xff]  }
  0x8d   :  { %2211 = vmatprep.subr.bf16.mxu1 %v4239_v14  ;;  %1623 = vmatprep.mubr.bf16.mxu1 %v4456_v1  ;;  %v4287_v14 = vld [vmem:[%s6311_s1 + $0x5c4] ss:$8 sps:$4 sm:$0xff]  }
  0x8f   :  { %1521 = vmatpush2.bf16.msra.mxu0 %v4234_v31  ;;  %v4282_v31 = vld [vmem:[%s6311_s1 + $0x540] ss:$8 sps:$4 sm:$0xff]  }
  0x90   :  { %2212 = vmatpush1.bf16.msra.mxu1 %v4237_v53  ;;  %1522 = vmatprep.subr.bf16.mxu0 %v4242_v55  ;;  %v4285_v53 = vld [vmem:[%s6311_s1 + $0x5c0] ss:$8 sps:$4 sm:$0xff]   ;;  %v4290_v55 = vld [vmem:[%s6311_s1 + $0x534] ss:$8 sps:$4 sm:$0xff]  }
  0x91   :  { %2213 = vmatprep.subr.bf16.mxu1 %v4245_v9  ;;  %v4288_v9 = vld [vmem:[%s6311_s1 + $0x530] ss:$8 sps:$4 sm:$0xff]  }
  0x93   :  { %1624 = vmatmul.mubr.bf16.gmra.mxu1 %v5280_v34  ;;  %1523 = vmatpush2.bf16.msra.mxu0 %v4240_v16  ;;  %v4291_v16 = vld [vmem:[%s6311_s1 + $0x5b0] ss:$8 sps:$4 sm:$0xff]  }
  0x94   :  { %2214 = vmatpush1.bf16.msra.mxu1 %v4243_v18  ;;  %1524 = vmatprep.subr.bf16.mxu0 %v4248_v39  ;;  %v4296_v18 = vld [vmem:[%s6311_s1 + $0x524] ss:$8 sps:$4 sm:$0xff]  }
  0x95   :  { %2215 = vmatprep.subr.bf16.mxu1 %v4251_v6  ;;  %1633 = vmatprep.mubr.bf16.mxu1 %v4456_v1  ;;  %v4299_v39 = vld [vmem:[%s6311_s1 + $0x5a4] ss:$8 sps:$4 sm:$0xff]   ;;  %v4294_v6 = vld [vmem:[%s6311_s1 + $0x520] ss:$8 sps:$4 sm:$0xff]  }
  0x97   :  { %1525 = vmatpush2.bf16.msra.mxu0 %v4246_v11  ;;  %v4297_v11 = vld [vmem:[%s6311_s1 + $0x5a0] ss:$8 sps:$4 sm:$0xff]  }
  0x98   :  { %2216 = vmatpush1.bf16.msra.mxu1 %v4249_v62  ;;  %1526 = vmatprep.subr.bf16.mxu0 %v4254_v40  ;;  %v4302_v62 = vld [vmem:[%s6311_s1 + $0x514] ss:$8 sps:$4 sm:$0xff]   ;;  %v4300_v40 = vld [vmem:[%s6311_s1 + $0x510] ss:$8 sps:$4 sm:$0xff]  }
  0x99   :  { %2217 = vmatprep.subr.bf16.mxu1 %v4257_v52  ;;  %v4303_v52 = vld [vmem:[%s6311_s1 + $0x590] ss:$8 sps:$4 sm:$0xff]  }
  0x9b   :  { %1634 = vmatmul.mubr.bf16.gmra.mxu1 %v4996_v41  ;;  %1527 = vmatpush2.bf16.msra.mxu0 %v4252_v38  ;;  %v4308_v38 = vld [vmem:[%s6311_s1 + $0x504] ss:$8 sps:$4 sm:$0xff]  }
  0x9c   :  { %2218 = vmatpush1.bf16.msra.mxu1 %v4255_v45  ;;  %1528 = vmatprep.subr.bf16.mxu0 %v4260_v54  ;;  %v4311_v45 = vld [vmem:[%s6311_s1 + $0x584] ss:$8 sps:$4 sm:$0xff]   ;;  %v4306_v54 = vld [vmem:[%s6311_s1 + $0x500] ss:$8 sps:$4 sm:$0xff]  }
  0x9d   :  { %2219 = vmatprep.subr.bf16.mxu1 %v4263_v23  ;;  %2237 = vmatprep.mubr.bf16.mxu1 %v4634_v59  ;;  %v4275_v59 = vld [vmem:[%s6311_s1 + $0x5e4] ss:$8 sps:$4 sm:$0xff]   ;;  %v4309_v23 = vld [vmem:[%s6311_s1 + $0x580] ss:$8 sps:$4 sm:$0xff]  }
  0x9f   :  { %1529 = vmatpush2.bf16.msra.mxu0 %v4258_v57  ;;  %v4314_v57 = vld [vmem:[%s6311_s1 + $0x1f4] ss:$8 sps:$4 sm:$0xff]  }
  0xa0   :  { %2220 = vmatpush1.bf16.msra.mxu1 %v4261_v63  ;;  %2278 = vmatprep.subr.bf16.mxu0 %v4269_v50  ;;  %v4312_v63 = vld [vmem:[%s6311_s1 + $0x1f0] ss:$8 sps:$4 sm:$0xff]   ;;  %v4320_v50 = vld [vmem:[%s6311_s1 + $0x1e4] ss:$8 sps:$4 sm:$0xff]  }
  0xa1   :  { %2221 = vmatprep.subr.bf16.mxu1 %v4266_v28  ;;  %v4315_v28 = vld [vmem:[%s6311_s1 + $0x2f0] ss:$8 sps:$4 sm:$0xff]  }
  0xa2   :  { %1531 = vmatmul.mubr.bf16.vlgmr.msra.gmra.mxu0 %v5180_v27  ;;  %v4281_v27 = vld [vmem:[%s6311_s1 + $0x5d4] ss:$8 sps:$4 sm:$0xff]  }
  0xa3   :  { %2279 = vmatpush1.bf16.msra.mxu0 %v4267_v42  ;;  %1540 = vmatprep.mubr.bf16.mxu0 %v5203_v47  ;;  %v4318_v42 = vld [vmem:[%s6311_s1 + $0x1e0] ss:$8 sps:$4 sm:$0xff]  }
  0xa4   :  { %2222 = vmatpush2.bf16.msra.mxu1 %v4264_v21  ;;  %2280 = vmatprep.subr.bf16.mxu0 %v4275_v59  ;;  %v4323_v21 = vld [vmem:[%s6311_s1 + $0x2e4] ss:$8 sps:$4 sm:$0xff]   ;;  %v4326_v59 = vld [vmem:[%s6311_s1 + $0x1d4] ss:$8 sps:$4 sm:$0xff]  }
  0xa5   :  { %2223 = vmatprep.subr.bf16.mxu1 %v4272_v37  ;;  %v4321_v37 = vld [vmem:[%s6311_s1 + $0x2e0] ss:$8 sps:$4 sm:$0xff]  }
  0xa7   :  { %2281 = vmatpush1.bf16.msra.mxu0 %v4273_v10  ;;  %v4332_v10 = vld [vmem:[%s6311_s1 + $0x1c4] ss:$8 sps:$4 sm:$0xff]  }
  0xa8   :  { %2224 = vmatpush2.bf16.msra.mxu1 %v4270_v5  ;;  %2282 = vmatprep.subr.bf16.mxu0 %v4281_v27  ;;  %v4327_v5 = vld [vmem:[%s6311_s1 + $0x2d0] ss:$8 sps:$4 sm:$0xff]   ;;  %v4333_v27 = vld [vmem:[%s6311_s1 + $0x2c0] ss:$8 sps:$4 sm:$0xff]  }
  0xa9   :  { %2225 = vmatprep.subr.bf16.mxu1 %v4278_v61  ;;  %v4330_v61 = vld [vmem:[%s6311_s1 + $0x1c0] ss:$8 sps:$4 sm:$0xff]  }
  0xaa   :  { %1541 = vmatmul.mubr.bf16.gmra.mxu0 %v5225_v29  ;;  %v4293_v29 = vld [vmem:[%s6311_s1 + $0x5b4] ss:$8 sps:$4 sm:$0xff]  }
  0xab   :  { %2283 = vmatpush1.bf16.msra.mxu0 %v4279_v15  ;;  %1550 = vmatprep.mubr.bf16.mxu0 %v5248_v0  ;;  %v4339_v15 = vld [vmem:[%s6311_s1 + $0x2b0] ss:$8 sps:$4 sm:$0xff]  }
  0xac   :  { %2226 = vmatpush2.bf16.msra.mxu1 %v4276_v20  ;;  %2284 = vmatprep.subr.bf16.mxu0 %v4287_v14  ;;  %v4338_v20 = vld [vmem:[%s6311_s1 + $0x1b4] ss:$8 sps:$4 sm:$0xff]   ;;  %v5594_v14 = vmax.f32 %v5098_v58, 0.0 }
  0xad   :  { %2227 = vmatprep.subr.bf16.mxu1 %v4284_v17  ;;  %v4344_v17 = vld [vmem:[%s6311_s1 + $0x1a4] ss:$8 sps:$4 sm:$0xff]   ;;  %v4353_v58 = vld [vmem:[%s6311_s1 + $0x294] ss:$8 sps:$4 sm:$0xff]  }
  0xaf   :  { %2285 = vmatpush1.bf16.msra.mxu0 %v4285_v53  ;;  %v4342_v53 = vld [vmem:[%s6311_s1 + $0x1a0] ss:$8 sps:$4 sm:$0xff]  }
  0xb0   :  { %2228 = vmatpush2.bf16.msra.mxu1 %v4282_v31  ;;  %2286 = vmatprep.subr.bf16.mxu0 %v4293_v29  ;;  %v205_v31 = vmax.f32 %v5100_v49, 0.0  ;;  %v4348_v29 = vld [vmem:[%s6311_s1 + $0x190] ss:$8 sps:$4 sm:$0xff]  }
  0xb1   :  { %2229 = vmatprep.subr.bf16.mxu1 %v4290_v55  ;;  %v4345_v55 = vld [vmem:[%s6311_s1 + $0x2a0] ss:$8 sps:$4 sm:$0xff]  }
  0xb2   :  { %1551 = vmatmul.mubr.bf16.gmra.mxu0 %v5269_v3  ;;  %v4305_v3 = vld [vmem:[%s6311_s1 + $0x594] ss:$8 sps:$4 sm:$0xff]  }
  0xb3   :  { %2287 = vmatpush1.bf16.msra.mxu0 %v4291_v16  ;;  %1560 = vmatprep.mubr.bf16.mxu0 %v5007_v8  ;;  %v4359_v16 = vld [vmem:[%s6311_s1 + $0x284] ss:$8 sps:$4 sm:$0xff]  }
  0xb4   :  { %2230 = vmatpush2.bf16.msra.mxu1 %v4288_v9  ;;  %2288 = vmatprep.subr.bf16.mxu0 %v4299_v39  ;;  %v4351_v9 = vld [vmem:[%s6311_s1 + $0x290] ss:$8 sps:$4 sm:$0xff]   ;;  %v4357_v39 = vld [vmem:[%s6311_s1 + $0x280] ss:$8 sps:$4 sm:$0xff]  }
  0xb5   :  { %2231 = vmatprep.subr.bf16.mxu1 %v4296_v18  ;;  %v4354_v18 = vld [vmem:[%s6311_s1 + $0x180] ss:$8 sps:$4 sm:$0xff]  }
  0xb7   :  { %2289 = vmatpush1.bf16.msra.mxu0 %v4297_v11  ;;  %v4360_v11 = vld [vmem:[%s6311_s1 + $0x270] ss:$8 sps:$4 sm:$0xff]  }
  0xb8   :  { %2232 = vmatpush2.bf16.msra.mxu1 %v4294_v6  ;;  %2290 = vmatprep.subr.bf16.mxu0 %v4305_v3  ;;  %v4362_v6 = vld [vmem:[%s6311_s1 + $0x274] ss:$8 sps:$4 sm:$0xff]   ;;  %v4368_v3 = vld [vmem:[%s6311_s1 + $0x264] ss:$8 sps:$4 sm:$0xff]  }
  0xb9   :  { %2233 = vmatprep.subr.bf16.mxu1 %v4302_v62  ;;  %v4363_v62 = vld [vmem:[%s6311_s1 + $0x7f0] ss:$8 sps:$4 sm:$0xff]  }
  0xba   :  { %1561 = vmatmul.mubr.bf16.gmra.mxu0 %v5019_v33  ;;  %v4317_v33 = vld [vmem:[%s6311_s1 + $0x2f4] ss:$8 sps:$4 sm:$0xff]  }
  0xbb   :  { %2291 = vmatpush1.bf16.msra.mxu0 %v4303_v52  ;;  %2310 = vmatprep.mubr.bf16.mxu0 %v4456_v1  ;;  %v4369_v52 = vld [vmem:[%s6311_s1 + $0x7e0] ss:$8 sps:$4 sm:$0xff]  }
  0xbc   :  { %2234 = vmatpush2.bf16.msra.mxu1 %v4300_v40  ;;  %2292 = vmatprep.subr.bf16.mxu0 %v4311_v45  ;;  %v4366_v40 = vld [vmem:[%s6311_s1 + $0x260] ss:$8 sps:$4 sm:$0xff]   ;;  %v4372_v45 = vld [vmem:[%s6311_s1 + $0x250] ss:$8 sps:$4 sm:$0xff]  }
  0xbd   :  { %2235 = vmatprep.subr.bf16.mxu1 %v4308_v38  ;;  %v4374_v38 = vld [vmem:[%s6311_s1 + $0x254] ss:$8 sps:$4 sm:$0xff]  }
  0xbf   :  { %2293 = vmatpush1.bf16.msra.mxu0 %v4309_v23  ;;  %v4380_v23 = vld [vmem:[%s6311_s1 + $0x244] ss:$8 sps:$4 sm:$0xff]  }
  0xc0   :  { %2236 = vmatpush2.bf16.msra.mxu1 %v4306_v54  ;;  %2599 = vmatprep.subr.bf16.mxu0 %v4314_v57  ;;  %v4375_v54 = vld [vmem:[%s6311_s1 + $0x7d0] ss:$8 sps:$4 sm:$0xff]   ;;  %v4383_v57 = vld [vmem:[%s6311_s1 + $0x7c4] ss:$8 sps:$4 sm:$0xff]  }
  0xc1   :  { %2672 = vmatprep.subr.bf16.mxu1 %v4317_v33  ;;  %v4378_v33 = vld [vmem:[%s6311_s1 + $0x240] ss:$8 sps:$4 sm:$0xff]  }
  0xc2   :  { %2311 = vmatmul.mubr.bf16.vlgmr.msra.gmra.mxu0 %v5073_v30  ;;  %v4324_v30 = vld [vmem:[%s6311_s1 + $0x1d0] ss:$8 sps:$4 sm:$0xff]  }
  0xc3   :  { %2238 = vmatmul.mubr.bf16.vlgmr.msra.gmra.mxu1 %v4770_v4  ;;  %2600 = vmatpush1.bf16.msra.mxu0 %v4312_v63  ;;  %v4329_v4 = vld [vmem:[%s6311_s1 + $0x2d4] ss:$8 sps:$4 sm:$0xff]   ;;  %v4381_v63 = vld [vmem:[%s6311_s1 + $0x7c0] ss:$8 sps:$4 sm:$0xff]  }
  0xc4   :  { %2673 = vmatpush1.bf16.msra.mxu1 %v4315_v28  ;;  %2601 = vmatprep.subr.bf16.mxu0 %v4320_v50  ;;  %v4386_v50 = vld [vmem:[%s6311_s1 + $0x234] ss:$8 sps:$4 sm:$0xff]  }
  0xc5   :  { %2674 = vmatprep.subr.bf16.mxu1 %v4323_v21  ;;  %2247 = vmatprep.mubr.bf16.mxu1 %v4809_v25  ;;  %v4335_v25 = vld [vmem:[%s6311_s1 + $0x2c4] ss:$8 sps:$4 sm:$0xff]   ;;  %v4389_v21 = vld [vmem:[%s6311_s1 + $0x7b4] ss:$8 sps:$4 sm:$0xff]  }
  0xc6   :  { %2320 = vmatprep.mubr.bf16.mxu0 %v4456_v1 }
  0xc7   :  { %2602 = vmatpush1.bf16.msra.mxu0 %v4318_v42  ;;  %v4384_v42 = vld [vmem:[%s6311_s1 + $0x230] ss:$8 sps:$4 sm:$0xff]  }
  0xc8   :  { %2675 = vmatpush1.bf16.msra.mxu1 %v4321_v37  ;;  %2603 = vmatprep.subr.bf16.mxu0 %v4326_v59  ;;  %v4387_v37 = vld [vmem:[%s6311_s1 + $0x7b0] ss:$8 sps:$4 sm:$0xff]  }
  0xc9   :  { %2676 = vmatprep.subr.bf16.mxu1 %v4329_v4  ;;  %v4392_v4 = vld [vmem:[%s6311_s1 + $0x224] ss:$8 sps:$4 sm:$0xff]  }
  0xca   :  { %2321 = vmatmul.mubr.bf16.gmra.mxu0 %v5092_v19  ;;  %v4336_v19 = vld [vmem:[%s6311_s1 + $0x1b0] ss:$8 sps:$4 sm:$0xff]  }
  0xcb   :  { %2248 = vmatmul.mubr.bf16.gmra.mxu1 %v4918_v51  ;;  %2604 = vmatpush1.bf16.msra.mxu0 %v4324_v30  ;;  %v4341_v51 = vld [vmem:[%s6311_s1 + $0x2b4] ss:$8 sps:$4 sm:$0xff]   ;;  %v4395_v30 = vld [vmem:[%s6311_s1 + $0x7a4] ss:$8 sps:$4 sm:$0xff]  }
  0xcc   :  { %2677 = vmatpush1.bf16.msra.mxu1 %v4327_v5  ;;  %2605 = vmatprep.subr.bf16.mxu0 %v4332_v10  ;;  %v4390_v5 = vld [vmem:[%s6311_s1 + $0x220] ss:$8 sps:$4 sm:$0xff]  }
  0xcd   :  { %2678 = vmatprep.subr.bf16.mxu1 %v4335_v25  ;;  %2257 = vmatprep.mubr.bf16.mxu1 %v4894_v36  ;;  %v4347_v36 = vld [vmem:[%s6311_s1 + $0x2a4] ss:$8 sps:$4 sm:$0xff]   ;;  %v4393_v10 = vld [vmem:[%s6311_s1 + $0x7a0] ss:$8 sps:$4 sm:$0xff]  }
  0xce   :  { %2330 = vmatprep.mubr.bf16.mxu0 %v4456_v1 }
  0xcf   :  { %2606 = vmatpush1.bf16.msra.mxu0 %v4330_v61  ;;  %v4398_v61 = vld [vmem:[%s6311_s1 + $0x214] ss:$8 sps:$4 sm:$0xff]  }
  0xd0   :  { %2679 = vmatpush1.bf16.msra.mxu1 %v4333_v27  ;;  %2607 = vmatprep.subr.bf16.mxu0 %v4338_v20  ;;  %v4401_v27 = vld [vmem:[%s6311_s1 + $0x794] ss:$8 sps:$4 sm:$0xff]   ;;  %v5728_v20 = vpack.c.bf16 %v5594_v14, %v197_v46  ;;  %v4407_v46 = vld [vmem:[%s6311_s1 + $0x784] ss:$8 sps:$4 sm:$0xff]  }
  0xd1   :  { %2680 = vmatprep.subr.bf16.mxu1 %v4341_v51  ;;  %v4396_v51 = vld [vmem:[%s6311_s1 + $0x210] ss:$8 sps:$4 sm:$0xff]  }
  0xd2   :  { %2331 = vmatmul.mubr.bf16.gmra.mxu0 %v5107_v12  ;;  %v4008_v12 = vpack.c.bf16 %v205_v31, %v5594_v14 }
  0xd3   :  { %2258 = vmatmul.mubr.bf16.gmra.mxu1 %v4990_v26  ;;  %2608 = vmatpush1.bf16.msra.mxu0 %v4336_v19  ;;  %v4350_v26 = vld [vmem:[%s6311_s1 + $0x194] ss:$8 sps:$4 sm:$0xff]   ;;  %v4399_v19 = vld [vmem:[%s6311_s1 + $0x790] ss:$8 sps:$4 sm:$0xff]  }
  0xd4   :  { %2681 = vmatpush1.bf16.msra.mxu1 %v4339_v15  ;;  %2609 = vmatprep.subr.bf16.mxu0 %v4344_v17 }
  0xd5   :  { %2682 = vmatprep.subr.bf16.mxu1 %v4347_v36  ;;  %2267 = vmatprep.mubr.bf16.mxu1 %v4972_v24  ;;  %v4356_v24 = vld [vmem:[%s6311_s1 + $0x184] ss:$8 sps:$4 sm:$0xff]   ;;  %v4402_v36 = vld [vmem:[%s6311_s1 + $0x200] ss:$8 sps:$4 sm:$0xff]  }
  0xd6   :  { %2340 = vmatprep.mubr.bf16.mxu0 %v4456_v1 }
  0xd7   :  { %2610 = vmatpush1.bf16.msra.mxu0 %v4342_v53  ;;  %v4405_v53 = vld [vmem:[%s6311_s1 + $0x780] ss:$8 sps:$4 sm:$0xff]  }
  0xd8   :  { %2683 = vmatpush1.bf16.msra.mxu1 %v4345_v55  ;;  %2611 = vmatprep.subr.bf16.mxu0 %v4350_v26  ;;  %v4410_v55 = vld [vmem:[%s6311_s1 + $0x874] ss:$8 sps:$4 sm:$0xff]  }
  0xd9   :  { %2684 = vmatprep.subr.bf16.mxu1 %v4353_v58  ;;  %v4413_v26 = vld [vmem:[%s6311_s1 + $0x8f4] ss:$8 sps:$4 sm:$0xff]  }
  0xda   :  { %2341 = vmatmul.mubr.bf16.gmra.mxu0 %v4008_v12 }
  0xdb   :  { %2268 = vmatmul.mubr.bf16.gmra.mxu1 %v5068_v43  ;;  %2612 = vmatpush1.bf16.msra.mxu0 %v4348_v29  ;;  %v4365_v43 = vld [vmem:[%s6311_s1 + $0x7f4] ss:$8 sps:$4 sm:$0xff]   ;;  %v4408_v29 = vld [vmem:[%s6311_s1 + $0x870] ss:$8 sps:$4 sm:$0xff]  }
  0xdc   :  { %2685 = vmatpush1.bf16.msra.mxu1 %v4351_v9  ;;  %2613 = vmatprep.subr.bf16.mxu0 %v4356_v24  ;;  %v4411_v9 = vld [vmem:[%s6311_s1 + $0x8f0] ss:$8 sps:$4 sm:$0xff]   ;;  %v4416_v24 = vld [vmem:[%s6311_s1 + $0x864] ss:$8 sps:$4 sm:$0xff]  }
  0xdd   :  { %2686 = vmatprep.subr.bf16.mxu1 %v4359_v16  ;;  %2704 = vmatprep.mubr.bf16.mxu1 %v4456_v1  ;;  %v4419_v16 = vld [vmem:[%s6311_s1 + $0x8e4] ss:$8 sps:$4 sm:$0xff]  }
  0xde   :  { %2631 = vmatprep.mubr.bf16.mxu0 %v4637_v60  ;;  %v4371_v60 = vld [vmem:[%s6311_s1 + $0x7e4] ss:$8 sps:$4 sm:$0xff]  }
  0xdf   :  { %2614 = vmatpush1.bf16.msra.mxu0 %v4354_v18 }
  0xe0   :  { %2687 = vmatpush1.bf16.msra.mxu1 %v4357_v39  ;;  %2615 = vmatprep.subr.bf16.mxu0 %v4362_v6  ;;  %v4414_v6 = vld [vmem:[%s6311_s1 + $0x860] ss:$8 sps:$4 sm:$0xff]  }
  0xe1   :  { %3036 = vmatprep.subr.bf16.mxu1 %v4365_v43  ;;  %v4417_v43 = vld [vmem:[%s6311_s1 + $0x8e0] ss:$8 sps:$4 sm:$0xff]  }
  0xe3   :  { %2705 = vmatmul.mubr.bf16.vlgmr.msra.gmra.mxu1 %v5155_v13  ;;  %2616 = vmatpush2.bf16.msra.mxu0 %v4360_v11  ;;  %v4377_v13 = vld [vmem:[%s6311_s1 + $0x7d4] ss:$8 sps:$4 sm:$0xff]   ;;  %v5686_v28 = vpop.f32.mrf.mxu1 }
  0xe4   :  { %3037 = vmatpush1.bf16.msra.mxu1 %v4363_v62  ;;  %2617 = vmatprep.subr.bf16.mxu0 %v4368_v3  ;;  %v4422_v62 = vld [vmem:[%s6311_s1 + $0x854] ss:$8 sps:$4 sm:$0xff]  }
  0xe5   :  { %3038 = vmatprep.subr.bf16.mxu1 %v4371_v60  ;;  %2714 = vmatprep.mubr.bf16.mxu1 %v4456_v1  ;;  %v5701_v59 = vpop.f32.mrf.mxu1 }
  0xe7   :  { %2618 = vmatpush2.bf16.msra.mxu0 %v4366_v40  ;;  %v5716_v25 = vpop.f32.mrf.mxu1  ;;  %v4420_v40 = vld [vmem:[%s6311_s1 + $0x850] ss:$8 sps:$4 sm:$0xff]  }
  0xe8   :  { %3039 = vmatpush1.bf16.msra.mxu1 %v4369_v52  ;;  %2619 = vmatprep.subr.bf16.mxu0 %v4374_v38  ;;  %v4423_v52 = vld [vmem:[%s6311_s1 + $0x8d0] ss:$8 sps:$4 sm:$0xff]  }
  0xe9   :  { %3040 = vmatprep.subr.bf16.mxu1 %v4377_v13  ;;  %v5736_v15 = vpop.f32.mrf.mxu1  ;;  %v4431_v13 = vld [vmem:[%s6311_s1 + $0x8c4] ss:$8 sps:$4 sm:$0xff]  }
  0xeb   :  { %2715 = vmatmul.mubr.bf16.gmra.mxu1 %v5326_v44  ;;  %2620 = vmatpush2.bf16.msra.mxu0 %v4372_v45 }
  0xec   :  { %3041 = vmatpush1.bf16.msra.mxu1 %v4375_v54  ;;  %2621 = vmatprep.subr.bf16.mxu0 %v4380_v23  ;;  %v4426_v23 = vld [vmem:[%s6311_s1 + $0x840] ss:$8 sps:$4 sm:$0xff]  }
  0xed   :  { %3042 = vmatprep.subr.bf16.mxu1 %v4383_v57  ;;  %2724 = vmatprep.mubr.bf16.mxu1 %v4456_v1  ;;  %v4429_v57 = vld [vmem:[%s6311_s1 + $0x8c0] ss:$8 sps:$4 sm:$0xff]  }
  0xef   :  { %2622 = vmatpush2.bf16.msra.mxu0 %v4378_v33 }
  0xf0   :  { %3043 = vmatpush1.bf16.msra.mxu1 %v4381_v63  ;;  %2623 = vmatprep.subr.bf16.mxu0 %v4386_v50  ;;  %v4434_v50 = vld [vmem:[%s6311_s1 + $0x834] ss:$8 sps:$4 sm:$0xff]  }
  0xf1   :  { %3044 = vmatprep.subr.bf16.mxu1 %v4389_v21  ;;  %v4437_v21 = vld [vmem:[%s6311_s1 + $0x8b4] ss:$8 sps:$4 sm:$0xff]  }
  0xf3   :  { %2725 = vmatmul.mubr.bf16.gmra.mxu1 %v5358_v56  ;;  %2624 = vmatpush2.bf16.msra.mxu0 %v4384_v42 }
  0xf4   :  { %3045 = vmatpush1.bf16.msra.mxu1 %v4387_v37  ;;  %2625 = vmatprep.subr.bf16.mxu0 %v4392_v4  ;;  %v4432_v37 = vld [vmem:[%s6311_s1 + $0x830] ss:$8 sps:$4 sm:$0xff]  }
  0xf5   :  { %3046 = vmatprep.subr.bf16.mxu1 %v4395_v30  ;;  %2734 = vmatprep.mubr.bf16.mxu1 %v4456_v1  ;;  %v4435_v4 = vld [vmem:[%s6311_s1 + $0x8b0] ss:$8 sps:$4 sm:$0xff]  }
  0xf6   :  { %v5744_v17 = vpop.f32.mrf.mxu1 }
  0xf7   :  { %2626 = vmatpush2.bf16.msra.mxu0 %v4390_v5 }
  0xf8   :  { %3047 = vmatpush1.bf16.msra.mxu1 %v4393_v10  ;;  %2627 = vmatprep.subr.bf16.mxu0 %v4398_v61  ;;  %v5759_v58 = vpop.f32.mrf.mxu1  ;;  %v4440_v10 = vld [vmem:[%s6311_s1 + $0x824] ss:$8 sps:$4 sm:$0xff]  }
  0xf9   :  { %3048 = vmatprep.subr.bf16.mxu1 %v4401_v27  ;;  %v4443_v61 = vld [vmem:[%s6311_s1 + $0x8a4] ss:$8 sps:$4 sm:$0xff]  }
  0xfa   :  { %v5762_v12 = vpop.f32.mrf.mxu1 }
  0xfb   :  { %2735 = vmatmul.mubr.bf16.gmra.mxu1 %v5728_v20  ;;  %2628 = vmatpush2.bf16.msra.mxu0 %v4396_v51  ;;  %v4438_v51 = vld [vmem:[%s6311_s1 + $0x820] ss:$8 sps:$4 sm:$0xff]  }
  0xfc   :  { %3049 = vmatpush1.bf16.msra.mxu1 %v4399_v19  ;;  %2629 = vmatprep.subr.bf16.mxu0 %v4404_v35  ;;  %v5776_v18 = vpop.f32.mrf.mxu1  ;;  %v4441_v19 = vld [vmem:[%s6311_s1 + $0x8a0] ss:$8 sps:$4 sm:$0xff]  }
  0xfd   :  { %3050 = vmatprep.subr.bf16.mxu1 %v4407_v46  ;;  %3068 = vmatprep.mubr.bf16.mxu1 %v5191_v7 }
  0xff   :  { %2630 = vmatpush2.bf16.msra.mxu0 %v4402_v36  ;;  %v5795_v3 = vpop.f32.mrf.mxu1  ;;  %v4446_v36 = vld [vmem:[%s6311_s1 + $0x814] ss:$8 sps:$4 sm:$0xff]  }
 0x100   :  { %3051 = vmatpush1.bf16.msra.mxu1 %v4405_v53  ;;  %3109 = vmatprep.subr.bf16.mxu0 %v4413_v26  ;;  %v4449_v53 = vld [vmem:[%s6311_s1 + $0x894] ss:$8 sps:$4 sm:$0xff]   ;;  %v4444_v26 = vld [vmem:[%s6311_s1 + $0x810] ss:$8 sps:$4 sm:$0xff]  }
 0x101   :  { %3052 = vmatprep.subr.bf16.mxu1 %v4410_v55  ;;  %v5814_v45 = vpop.f32.mrf.mxu1 }
 0x102   :  { %v5778_v39 = vpop.f32.mrf.mxu0  ;;  %2632 = vmatmul.mubr.bf16.vlgmr.msra.gmra.mxu0 %v4984_v2  ;;  %v4425_v2 = vld [vmem:[%s6311_s1 + $0x8d4] ss:$8 sps:$4 sm:$0xff]  }
 0x103   :  { %3110 = vmatpush1.bf16.msra.mxu0 %v4411_v9  ;;  %2641 = vmatprep.mubr.bf16.mxu0 %v5191_v7  ;;  %v4428_v7 = vld [vmem:[%s6311_s1 + $0x844] ss:$8 sps:$4 sm:$0xff]   ;;  %v5827_v63 = vpop.f32.mrf.mxu1 }
 0x104   :  { %3053 = vmatpush2.bf16.msra.mxu1 %v4408_v29  ;;  %v5787_v11 = vpop.f32.mrf.mxu0  ;;  %3111 = vmatprep.subr.bf16.mxu0 %v4419_v16  ;;  %v4447_v29 = vld [vmem:[%s6311_s1 + $0x890] ss:$8 sps:$4 sm:$0xff]   ;;  %v4452_v16 = vld [vmem:[%s6311_s1 + $0x804] ss:$8 sps:$4 sm:$0xff]  }
 0x105   :  { %3054 = vmatprep.subr.bf16.mxu1 %v4416_v24  ;;  %v5846_v5 = vpop.f32.mrf.mxu1 }
 0x106   :  { %v5798_v60 = vpop.f32.mrf.mxu0 }
 0x107   :  { %3112 = vmatpush1.bf16.msra.mxu0 %v4417_v43 }
 0x108   :  { %3055 = vmatpush2.bf16.msra.mxu1 %v4414_v6  ;;  %v5806_v38 = vpop.f32.mrf.mxu0  ;;  %3113 = vmatprep.subr.bf16.mxu0 %v4425_v2  ;;  %v4455_v6 = vld [vmem:[%s6311_s1 + $0x884] ss:$8 sps:$4 sm:$0xff]   ;;  %v4453_v2 = vld [vmem:[%s6311_s1 + $0x880] ss:$8 sps:$4 sm:$0xff]  }
 0x109   :  { %3056 = vmatprep.subr.bf16.mxu1 %v4422_v62  ;;  %v5865_v46 = vpop.f32.mrf.mxu1  ;;  %v4450_v62 = vld [vmem:[%s6311_s1 + $0x800] ss:$8 sps:$4 sm:$0xff]  }
 0x10a   :  { %v5816_v54 = vpop.f32.mrf.mxu0  ;;  %2642 = vmatmul.mubr.bf16.gmra.mxu0 %v5160_v48 }
 0x10b   :  { %3114 = vmatpush1.bf16.msra.mxu0 %v4423_v52  ;;  %2651 = vmatprep.mubr.bf16.mxu0 %v5237_v32  ;;  %v5884_v24 = vpop.f32.mrf.mxu1 }
 0x10c   :  { %3057 = vmatpush2.bf16.msra.mxu1 %v4420_v40  ;;  %v5825_v33 = vpop.f32.mrf.mxu0  ;;  %3115 = vmatprep.subr.bf16.mxu0 %v4431_v13 }
 0x10d   :  { %3058 = vmatprep.subr.bf16.mxu1 %v4428_v7  ;;  %v5901_v40 = vpop.f32.mrf.mxu1 }
 0x10e   :  { %v5836_v42 = vpop.f32.mrf.mxu0  ;;  %6349 = vst [vmem:[#allocation3_spill] sm:$0xff] %v5901_v40 }
 0x10f   :  { %3116 = vmatpush1.bf16.msra.mxu0 %v4429_v57  ;;  %v5908_v13 = vpop.f32.mrf.mxu1 }
 0x110   :  { %3059 = vmatpush2.bf16.msra.mxu1 %v4426_v23  ;;  %v5844_v30 = vpop.f32.mrf.mxu0  ;;  %3117 = vmatprep.subr.bf16.mxu0 %v4437_v21  ;;  %6351 = vst [vmem:[#allocation5_spill] sm:$0xff] %v5908_v13 }
 0x111   :  { %3060 = vmatprep.subr.bf16.mxu1 %v4434_v50 }
 0x112   :  { %v5854_v27 = vpop.f32.mrf.mxu0  ;;  %2652 = vmatmul.mubr.bf16.gmra.mxu0 %v5203_v47 }
 0x113   :  { %3118 = vmatpush1.bf16.msra.mxu0 %v4435_v4  ;;  %2661 = vmatprep.mubr.bf16.mxu0 %v5280_v34 }
 0x114   :  { %3061 = vmatpush2.bf16.msra.mxu1 %v4432_v37  ;;  %v5863_v35 = vpop.f32.mrf.mxu0  ;;  %3119 = vmatprep.subr.bf16.mxu0 %v4443_v61 }
 0x115   :  { %3062 = vmatprep.subr.bf16.mxu1 %v4440_v10 }
 0x116   :  { %v5874_v55 = vpop.f32.mrf.mxu0 }
 0x117   :  { %3120 = vmatpush1.bf16.msra.mxu0 %v4441_v19 }
 0x118   :  { %3063 = vmatpush2.bf16.msra.mxu1 %v4438_v51  ;;  %v5882_v9 = vpop.f32.mrf.mxu0  ;;  %3121 = vmatprep.subr.bf16.mxu0 %v4449_v53  ;;  %v4013_v53 = vpack.c.bf16 %v5594_v14, %v205_v31 }
 0x119   :  { %3064 = vmatprep.subr.bf16.mxu1 %v4446_v36 }
 0x11a   :  { %v5892_v43 = vpop.f32.mrf.mxu0  ;;  %2662 = vmatmul.mubr.bf16.gmra.mxu0 %v5248_v0 }
 0x11b   :  { %3122 = vmatpush1.bf16.msra.mxu0 %v4447_v29  ;;  %3141 = vmatprep.mubr.bf16.mxu0 %v4456_v1 }
 0x11c   :  { %3065 = vmatpush2.bf16.msra.mxu1 %v4444_v26  ;;  %v5903_v52 = vpop.f32.mrf.mxu0  ;;  %3123 = vmatprep.subr.bf16.mxu0 %v4455_v6 }
 0x11d   :  { %3066 = vmatprep.subr.bf16.mxu1 %v4452_v16 }
 0x11e   :  { %v5906_v7 = vpop.f32.mrf.mxu0 }
 0x11f   :  { %6350 = vst [vmem:[#allocation4_spill] sm:$0xff] %v5906_v7  ;;  %3124 = vmatpush1.bf16.msra.mxu0 %v4453_v2 }
 0x120   :  { %3067 = vmatpush2.bf16.msra.mxu1 %v4450_v62  ;;  %v5910_v23 = vpop.f32.mrf.mxu0 }
 0x121   :  { %6352 = vst [vmem:[#allocation6_spill] sm:$0xff] %v5910_v23 }
 0x122   :  { %3142 = vmatmul.mubr.bf16.vlgmr.msra.gmra.mxu0 %v5326_v44  ;;  %v1164_v21 = vpop.f32.mrf.mxu0 }
 0x123   :  { %v1091_v57 = vpop.f32.mrf.mxu1  ;;  %3069 = vmatmul.mubr.bf16.vlgmr.msra.gmra.mxu1 %v5160_v48  ;;  %3151 = vmatprep.mubr.bf16.mxu0 %v4456_v1 }
 0x124   :  { %3078 = vmatprep.mubr.bf16.mxu1 %v5237_v32  ;;  %v1166_v10 = vpop.f32.mrf.mxu0 }
 0x125   :  { %v1093_v50 = vpop.f32.mrf.mxu1 }
 0x126   :  { %v1168_v32 = vpop.f32.mrf.mxu0 }
 0x127   :  { %v1095_v37 = vpop.f32.mrf.mxu1 }
 0x128   :  { %v1170_v19 = vpop.f32.mrf.mxu0 }
 0x129   :  { %v1097_v4 = vpop.f32.mrf.mxu1 }
 0x12a   :  { %3152 = vmatmul.mubr.bf16.gmra.mxu0 %v5358_v56 }
 0x12b   :  { %v5916_v61 = vpop.f32.mrf.mxu1  ;;  %3079 = vmatmul.mubr.bf16.gmra.mxu1 %v5203_v47  ;;  %3161 = vmatprep.mubr.bf16.mxu0 %v4456_v1  ;;  %v5934_v47 = vpop.f32.mrf.mxu0 }
 0x12c   :  { %3088 = vmatprep.mubr.bf16.mxu1 %v5280_v34 }
 0x12d   :  { %v5922_v48 = vpop.f32.mrf.mxu1  ;;  %v5943_v26 = vpop.f32.mrf.mxu0 }
 0x12f   :  { %v5924_v44 = vpop.f32.mrf.mxu1 }
 0x131   :  { %v5926_v51 = vpop.f32.mrf.mxu1 }
 0x132   :  { %3162 = vmatmul.mubr.bf16.gmra.mxu0 %v5728_v20 }
 0x133   :  { %v5928_v36 = vpop.f32.mrf.mxu1  ;;  %3089 = vmatmul.mubr.bf16.gmra.mxu1 %v5248_v0  ;;  %3171 = vmatprep.mubr.bf16.mxu0 %v4456_v1  ;;  %v5950_v1 = vpop.f32.mrf.mxu0 }
 0x134   :  { %3098 = vmatprep.mubr.bf16.mxu1 %v4996_v41  ;;  %6356 = vst [vmem:[#allocation10_spill] sm:$0xff] %v5950_v1 }
 0x135   :  { %v5936_v34 = vpop.f32.mrf.mxu1  ;;  %v5956_v16 = vpop.f32.mrf.mxu0 }
 0x136   :  { %6359 = vst [vmem:[#allocation13_spill] sm:$0xff] %v5956_v16 }
 0x137   :  { %v5938_v56 = vpop.f32.mrf.mxu1  ;;  %v5960_v14 = vpop.f32.mrf.mxu0 }
 0x138   :  { %6353 = vst [vmem:[#allocation7_spill] sm:$0xff] %v5938_v56  ;;  %6361 = vst [vmem:[#allocation15_spill] sm:$0xff] %v5960_v14  ;;  %v755_v14 = vadd.f32 %v5686_v28, %v5778_v39 }
 0x139   :  { %v5945_v29 = vpop.f32.mrf.mxu1  ;;  %v5962_v6 = vpop.f32.mrf.mxu0 }
 0x13a   :  { %6354 = vst [vmem:[#allocation8_spill] sm:$0xff] %v5945_v29  ;;  %3172 = vmatmul.mubr.bf16.gmra.mxu0 %v4013_v53  ;;  %6362 = vst [vmem:[#allocation16_spill] sm:$0xff] %v5962_v6  ;;  %v757_v6 = vadd.f32 %v5701_v59, %v5787_v11 }
 0x13b   :  { %v5947_v0 = vpop.f32.mrf.mxu1  ;;  %3099 = vmatmul.mubr.bf16.gmra.mxu1 %v5007_v8  ;;  %v5964_v2 = vpop.f32.mrf.mxu0 }
 0x13c   :  { %6355 = vst [vmem:[#allocation9_spill] sm:$0xff] %v5947_v0  ;;  %6363 = vst [vmem:[#allocation17_spill] sm:$0xff] %v5964_v2  ;;  %v1094_v0 = vadd.f32 %v1093_v50, %v757_v6 }
 0x13d   :  { %v5952_v41 = vpop.f32.mrf.mxu1  ;;  %v5966_v53 = vpop.f32.mrf.mxu0 }
 0x13e   :  { %6357 = vst [vmem:[#allocation11_spill] sm:$0xff] %v5952_v41  ;;  %6364 = vst [vmem:[#allocation18_spill] sm:$0xff] %v5966_v53  ;;  %v1092_v53 = vadd.f32 %v1091_v57, %v755_v14  ;;  %v1167_v59 = vadd.f32 %v1166_v10, %v1094_v0  ;;  %v765_v57 = vadd.f32 %v5744_v17, %v5816_v54 }
 0x13f   :  { %v5954_v20 = vpop.f32.mrf.mxu1  ;;  %v5968_v13 = vpop.f32.mrf.mxu0  ;;  %v769_v17 = vadd.f32 %v5762_v12, %v5836_v42  ;;  %v771_v54 = vadd.f32 %v5776_v18, %v5844_v30  ;;  %v779_v12 = vadd.f32 %v5827_v63, %v5874_v55  ;;  %v781_v18 = vadd.f32 %v5846_v5, %v5882_v9 }
 0x140   :  { %6358 = vst [vmem:[#allocation12_spill] sm:$0xff] %v5954_v20  ;;  %6365 = vst [vmem:[#allocation19_spill] sm:$0xff] %v5968_v13  ;;  %v759_v13 = vadd.f32 %v5716_v25, %v5798_v60  ;;  %v1165_v39 = vadd.f32 %v1164_v21, %v1092_v53  ;;  %v785_v42 = vadd.f32 %v5865_v46, %v5892_v43  ;;  %v6369_v43 = vld [vmem:[#allocation4_spill] sm:$0xff]  ;;  %v6377_v53 = vld [vmem:[#allocation6_spill] sm:$0xff] }
 0x141   :  { %v5958_v49 = vpop.f32.mrf.mxu1  ;;  %v5970_v20 = vpop.f32.mrf.mxu0  ;;  %v787_v46 = vadd.f32 %v5884_v24, %v5903_v52  ;;  %v6375_v52 = vld [vmem:[#allocation13_spill] sm:$0xff] }
 0x142   :  { %6360 = vst [vmem:[#allocation14_spill] sm:$0xff] %v5958_v49  ;;  %6366 = vst [vmem:[#allocation20_spill] sm:$0xff] %v5970_v20  ;;  %v1096_v56 = vadd.f32 %v1095_v37, %v759_v13 }
 0x143   :  { %v1605_v31 = vpop.f32.mrf.mxu1  ;;  %v5972_v16 = vpop.f32.mrf.mxu0 }
 0x144   :  { %6367 = vst [vmem:[#allocation21_spill] sm:$0xff] %v5972_v16  ;;  %v761_v16 = vadd.f32 %v5736_v15, %v5806_v38  ;;  %v767_v15 = vadd.f32 %v5759_v58, %v5825_v33  ;;  %v1169_v38 = vadd.f32 %v1168_v32, %v1096_v56  ;;  %v775_v33 = vadd.f32 %v5795_v3, %v5854_v27 }
 0x145   :  { %v1607_v62 = vpop.f32.mrf.mxu1  ;;  %v5978_v2 = vpop.f32.mrf.mxu0  ;;  %v777_v32 = vadd.f32 %v5814_v45, %v5863_v35  ;;  %v1106_v35 = vadd.f32 %v5924_v44, %v769_v17 }
 0x146   :  { %6368 = vst [vmem:[#allocation22_spill] sm:$0xff] %v5978_v2  ;;  %v1098_v11 = vadd.f32 %v1097_v4, %v761_v16  ;;  %v1102_v4 = vadd.f32 %v5916_v61, %v765_v57  ;;  %v1112_v63 = vadd.f32 %v5928_v36, %v775_v33  ;;  %v6373_v36 = vld [vmem:[#allocation9_spill] sm:$0xff]  ;;  %v6380_v57 = vld [vmem:[#allocation16_spill] sm:$0xff] }
 0x147   :  { %v1609_v8 = vpop.f32.mrf.mxu1  ;;  %v1114_v55 = vadd.f32 %v5936_v34, %v777_v32 }
 0x148   :  { %v1171_v21 = vadd.f32 %v1170_v19, %v1098_v11  ;;  %v1175_v45 = vadd.f32 %v5934_v47, %v1102_v4  ;;  %v6371_v47 = vld [vmem:[#allocation7_spill] sm:$0xff] }
 0x149   :  { %v1611_v22 = vpop.f32.mrf.mxu1  ;;  %v1116_v0 = vadd.f32 %v6371_v47, %v779_v12 }
 0x14b   :  { %v1615_v23 = vpop.f32.mrf.mxu1 }
 0x14d   :  { %v1617_v41 = vpop.f32.mrf.mxu1 }
 0x14f   :  { %v1619_v49 = vpop.f32.mrf.mxu1 }
 0x151   :  { %v5980_v1 = vpop.f32.mrf.mxu1 }
 0x153   :  { %v5986_v28 = vpop.f32.mrf.mxu1 }
 0x155   :  { %v5996_v37 = vpop.f32.mrf.mxu1 }
 0x157   :  { %v1629_v27 = vpop.f32.mrf.mxu1 }
 0x159   :  { %v1631_v14 = vpop.f32.mrf.mxu1 }
 0x15b   :  { %v1635_v12 = vpop.f32.mrf.mxu1 }
 0x162   :  { %v1532_v20 = vpop.f32.mrf.mxu0 }
 0x163   :  { %v1606_v29 = vadd.f32 %v1605_v31, %v1532_v20  ;;  %v1122_v20 = vadd.f32 %v6373_v36, %v785_v42  ;;  %v6374_v31 = vld [vmem:[#allocation10_spill] sm:$0xff] }
 0x164   :  { %v1534_v40 = vpop.f32.mrf.mxu0  ;;  %v1179_v24 = vadd.f32 %v6374_v31, %v1106_v35 }
 0x165   :  { %v1608_v2 = vadd.f32 %v1607_v62, %v1534_v40  ;;  %v5990_v50 = vadd.f32 %v1606_v29, %v1165_v39  ;;  %v6376_v62 = vld [vmem:[#allocation11_spill] sm:$0xff]  ;;  %v6378_v39 = vld [vmem:[#allocation5_spill] sm:$0xff] }
 0x166   :  { %v1536_v7 = vpop.f32.mrf.mxu0 }
 0x167   :  { %v5992_v25 = vadd.f32 %v1608_v2, %v1167_v59  ;;  %v1610_v60 = vadd.f32 %v1609_v8, %v1536_v7  ;;  %v1104_v7 = vadd.f32 %v5922_v48, %v767_v15  ;;  %v1108_v48 = vadd.f32 %v5926_v51, %v771_v54  ;;  %v6372_v51 = vld [vmem:[#allocation8_spill] sm:$0xff]  ;;  %v6382_v54 = vld [vmem:[#allocation18_spill] sm:$0xff] }
 0x168   :  { %v1538_v13 = vpop.f32.mrf.mxu0  ;;  %v1124_v2 = vadd.f32 %v6376_v62, %v787_v46  ;;  %v791_v59 = vadd.f32 %v6378_v39, %v6377_v53 }
 0x169   :  { %v3997_v40 = vpack.c.bf16 %v5992_v25, %v5990_v50  ;;  %v1612_v10 = vadd.f32 %v1611_v22, %v1538_v13  ;;  %v1646_v22 = vadd.f32 %v1610_v60, %v1169_v38  ;;  %v1177_v56 = vadd.f32 %v5943_v26, %v1104_v7 }
 0x16a   :  { %v1542_v58 = vpop.f32.mrf.mxu0  ;;  %v1118_v26 = vadd.f32 %v6372_v51, %v781_v18  ;;  %v1181_v6 = vadd.f32 %v6375_v52, %v1108_v48  ;;  %v1187_v60 = vadd.f32 %v6380_v57, %v1114_v55  ;;  %v6384_v18 = vld [vmem:[#allocation12_spill] sm:$0xff]  ;;  %v1782_v35 = vmul.f32 %v5992_v25, %v5992_v25  ;;  %v6386_v55 = vld [vmem:[#allocation14_spill] sm:$0xff]  ;;  %v1637_v51 = vpop.f32.mrf.mxu1 }
 0x16b   :  { %1724 = vst [vmem:[%s6314_s3] sm:$0xff] %v3997_v40  ;;  %v1647_v61 = vadd.f32 %v1612_v10, %v1171_v21  ;;  %v1616_v30 = vadd.f32 %v1615_v23, %v1542_v58  ;;  %v6370_v23 = vld [vmem:[#allocation3_spill] sm:$0xff]  ;;  %v1783_v13 = vmul.f32 %v1646_v22, %v1646_v22  ;;  %v6381_v10 = vld [vmem:[#allocation17_spill] sm:$0xff] }
 0x16c   :  { %v1544_v3 = vpop.f32.mrf.mxu0  ;;  %v789_v29 = vadd.f32 %v6370_v23, %v6369_v43  ;;  %v1189_v17 = vadd.f32 %v6381_v10, %v1116_v0  ;;  %v1191_v7 = vadd.f32 %v6382_v54, %v1118_v26  ;;  %v6383_v58 = vld [vmem:[#allocation19_spill] sm:$0xff] }
 0x16d   :  { %v3998_v19 = vpack.c.bf16 %v1647_v61, %v1646_v22  ;;  %v1618_v5 = vadd.f32 %v1617_v41, %v1544_v3  ;;  %v1648_v34 = vadd.f32 %v1616_v30, %v1175_v45  ;;  %v1784_v33 = vmul.f32 %v1647_v61, %v1647_v61  ;;  %v6385_v30 = vld [vmem:[#allocation20_spill] sm:$0xff] }
 0x16e   :  { %v1546_v9 = vpop.f32.mrf.mxu0  ;;  %v1126_v42 = vadd.f32 %v6384_v18, %v789_v29  ;;  %v1197_v3 = vadd.f32 %v6385_v30, %v1124_v2  ;;  %v1745_v23 = vadd.f32 %v1647_v61, %v5992_v25  ;;  %v6387_v2 = vld [vmem:[#allocation21_spill] sm:$0xff]  ;;  %v6388_v61 = vld [vmem:[#allocation22_spill] sm:$0xff] }
 0x16f   :  { %1725 = vst [vmem:[%s6314_s3 + $0x10] sm:$0xff] %v3998_v19  ;;  %v1620_v44 = vadd.f32 %v1619_v49, %v1546_v9  ;;  %v1649_v41 = vadd.f32 %v1618_v5, %v1177_v56  ;;  %v6379_v49 = vld [vmem:[#allocation15_spill] sm:$0xff]  ;;  %v1785_v48 = vmul.f32 %v1648_v34, %v1648_v34  ;;  %v1128_v5 = vadd.f32 %v6386_v55, %v791_v59 }
 0x170   :  { %v1548_v16 = vpop.f32.mrf.mxu0  ;;  %v1185_v11 = vadd.f32 %v6379_v49, %v1112_v63  ;;  %v1732_v9 = vadd.f32 %v1646_v22, %v5990_v50  ;;  %v1810_v29 = vadd.f32 %v1784_v33, %v1782_v35  ;;  %v1199_v25 = vadd.f32 %v6387_v2, %v1126_v42 }
 0x171   :  { %v1622_v8 = vadd.f32 %v5980_v1, %v1548_v16  ;;  %v3999_v15 = vpack.c.bf16 %v1649_v41, %v1648_v34  ;;  %v1650_v21 = vadd.f32 %v1620_v44, %v1179_v24  ;;  %v1195_v1 = vadd.f32 %v6383_v58, %v1122_v20 }
 0x172   :  { %v1552_v38 = vpop.f32.mrf.mxu0  ;;  %v1733_v26 = vadd.f32 %v1732_v9, %v1648_v34  ;;  %v1746_v31 = vadd.f32 %v1745_v23, %v1649_v41 }
 0x173   :  { %v1651_v4 = vadd.f32 %v1622_v8, %v1181_v6  ;;  %v1626_v40 = vadd.f32 %v5986_v28, %v1552_v38  ;;  %1726 = vst [vmem:[%s6314_s3 + $0x20] sm:$0xff] %v3999_v15  ;;  %v1781_v28 = vmul.f32 %v5990_v50, %v5990_v50  ;;  %v1787_v47 = vmul.f32 %v1650_v21, %v1650_v21 }
 0x174   :  { %v1554_v32 = vpop.f32.mrf.mxu0  ;;  %v1734_v52 = vadd.f32 %v1733_v26, %v1650_v21  ;;  %v1201_v8 = vadd.f32 %v6388_v61, %v1128_v5 }
 0x175   :  { %v4000_v45 = vpack.c.bf16 %v1651_v4, %v1650_v21  ;;  %v1652_v19 = vadd.f32 %v1626_v40, %v1185_v11  ;;  %v1628_v56 = vadd.f32 %v5996_v37, %v1554_v32  ;;  %v1797_v46 = vadd.f32 %v1783_v13, %v1781_v28 }
 0x176   :  { %v1556_v63 = vpop.f32.mrf.mxu0  ;;  %v1786_v37 = vmul.f32 %v1649_v41, %v1649_v41  ;;  %v1788_v6 = vmul.f32 %v1651_v4, %v1651_v4  ;;  %v1747_v59 = vadd.f32 %v1746_v31, %v1651_v4 }
 0x177   :  { %1727 = vst [vmem:[%s6314_s3 + $0x30] sm:$0xff] %v4000_v45  ;;  %v1630_v43 = vadd.f32 %v1629_v27, %v1556_v63  ;;  %v1653_v0 = vadd.f32 %v1628_v56, %v1187_v60  ;;  %v1798_v16 = vadd.f32 %v1797_v46, %v1785_v48  ;;  %v1789_v50 = vmul.f32 %v1652_v19, %v1652_v19 }
 0x178   :  { %v1558_v44 = vpop.f32.mrf.mxu0  ;;  %v1811_v41 = vadd.f32 %v1810_v29, %v1786_v37  ;;  %v1735_v49 = vadd.f32 %v1734_v52, %v1652_v19 }
 0x179   :  { %v1654_v36 = vadd.f32 %v1630_v43, %v1189_v17  ;;  %v1632_v20 = vadd.f32 %v1631_v14, %v1558_v44  ;;  %v4001_v22 = vpack.c.bf16 %v1653_v0, %v1652_v19  ;;  %v1799_v53 = vadd.f32 %v1798_v16, %v1787_v47  ;;  %v1639_v14 = vpop.f32.mrf.mxu1 }
 0x17a   :  { %v1562_v24 = vpop.f32.mrf.mxu0  ;;  %v1790_v60 = vmul.f32 %v1653_v0, %v1653_v0  ;;  %v1812_v21 = vadd.f32 %v1811_v41, %v1788_v6  ;;  %v1748_v40 = vadd.f32 %v1747_v59, %v1653_v0 }
 0x17b   :  { %v1655_v62 = vadd.f32 %v1632_v20, %v1191_v7  ;;  %v1636_v27 = vadd.f32 %v1635_v12, %v1562_v24  ;;  %1728 = vst [vmem:[%s6314_s3 + $0x40] sm:$0xff] %v4001_v22  ;;  %v1791_v34 = vmul.f32 %v1654_v36, %v1654_v36  ;;  %v1800_v57 = vadd.f32 %v1799_v53, %v1789_v50  ;;  %v1641_v4 = vpop.f32.mrf.mxu1 }
 0x17c   :  { %v1564_v39 = vpop.f32.mrf.mxu0  ;;  %v1736_v10 = vadd.f32 %v1735_v49, %v1654_v36  ;;  %v1813_v30 = vadd.f32 %v1812_v21, %v1790_v60  ;;  %v4457_v24 = vmov 1966171168  }
 0x17d   :  { %v4002_v11 = vpack.c.bf16 %v1655_v62, %v1654_v36  ;;  %v1656_v15 = vadd.f32 %v1636_v27, %v1195_v1  ;;  %v1638_v38 = vadd.f32 %v1637_v51, %v1564_v39  ;;  %v1801_v54 = vadd.f32 %v1800_v57, %v1791_v34 }
 0x17e   :  { %v1566_v13 = vpop.f32.mrf.mxu0  ;;  %v1792_v7 = vmul.f32 %v1655_v62, %v1655_v62  ;;  %v1749_v12 = vadd.f32 %v1748_v40, %v1655_v62  ;;  %v1762_v52 = vunpack.c.l.s4 %v4457_v24  ;;  %v6389_v40 = vld [vmem:[#allocation2_spill] sm:$0xff] }
 0x17f   :  { %1729 = vst [vmem:[%s6314_s3 + $0x50] sm:$0xff] %v4002_v11  ;;  %v1640_v17 = vadd.f32 %v1639_v14, %v1566_v13  ;;  %v1793_v58 = vmul.f32 %v1656_v15, %v1656_v15  ;;  %v1657_v33 = vadd.f32 %v1638_v38, %v1197_v3  ;;  %v1737_v18 = vadd.f32 %v1736_v10, %v1656_v15 }
 0x180   :  { %v1568_v32 = vpop.f32.mrf.mxu0  ;;  %v1814_v5 = vadd.f32 %v1813_v30, %v1792_v7  ;;  %v1763_v41 = vunpack.c.0.s8 %v1762_v52 }
 0x181   :  { %v1658_v42 = vadd.f32 %v1640_v17, %v1199_v25  ;;  %v1642_v1 = vadd.f32 %v1641_v4, %v1568_v32  ;;  %v1802_v28 = vadd.f32 %v1801_v54, %v1793_v58  ;;  %v4003_v45 = vpack.c.bf16 %v1657_v33, %v1656_v15 }
 0x182   :  { %v1794_v35 = vmul.f32 %v1657_v33, %v1657_v33  ;;  %v1750_v19 = vadd.f32 %v1749_v12, %v1657_v33  ;;  %v6076_v3 = vpop.f32.mrf.mxu0  ;;  %v6102_v10 = vsub.s32 %v1763_v41, %v6389_v40 }
 0x183   :  { %v6071_v48 = vpop.f32.mrf.mxu1  ;;  %v1738_v56 = vadd.f32 %v1737_v18, %v1658_v42  ;;  %v1795_v63 = vmul.f32 %v1658_v42, %v1658_v42  ;;  %v1659_v55 = vadd.f32 %v1642_v1, %v1201_v8  ;;  %1730 = vst [vmem:[%s6314_s3 + $0x60] sm:$0xff] %v4003_v45  ;;  %v6391_v18 = vlaneseq }
 0x184   :  { %v1815_v47 = vadd.f32 %v1814_v5, %v1794_v35  ;;  %v6085_v20 = vpop.f32.mrf.mxu0  ;;  %6390 = vst [vmem:[#allocation4_spill] sm:$0xff] %v6102_v10 }
 0x185   :  { %v6078_v9 = vpop.f32.mrf.mxu1  ;;  %v1739_v46 = vrot.slane %v1738_v56, 4  ;;  %v1803_v43 = vadd.f32 %v1802_v28, %v1795_v63  ;;  %v4004_v23 = vpack.c.bf16 %v1659_v55, %v1658_v42  ;;  %v1751_v29 = vadd.f32 %v1750_v19, %v1659_v55 }
 0x186   :  { %v1796_v0 = vmul.f32 %v1659_v55, %v1659_v55  ;;  %v6091_v8 = vpop.f32.mrf.mxu0  ;;  %vm6112_vm0 = vcmp.lt.s32.totalorder %v6391_v18, 256  ;;  %v6392_v42 = vmov 0 }
 0x187   :  { %v6080_v44 = vpop.f32.mrf.mxu1  ;;  %v1740_v51 = vadd.f32 %v1739_v46, %v1738_v56  ;;  %v1804_v26 = vrot.slane %v1803_v43, 4  ;;  %1731 = vst [vmem:[%s6314_s3 + $0x70] sm:$0xff] %v4004_v23  ;;  %v1752_v37 = vrot.slane %v1751_v29, 4  ;;  %v6393_v42 = vsel %vm6112_vm0, 4294967295, %v6392_v42 }
 0x188   :  { %v1816_v36 = vadd.f32 %v1815_v47, %v1796_v0  ;;  %v6097_v15 = vpop.f32.mrf.mxu0  ;;  %6394 = vst [vmem:[#allocation3_spill] sm:$0xff] %v6393_v42  ;;  %v2313_v42 = vadd.f32 %v6076_v3, %v6071_v48 }
 0x189   :  { %v6087_v16 = vpop.f32.mrf.mxu1  ;;  %v1741_v31 = vrot.slane %v1740_v51, 2  ;;  %v1805_v50 = vadd.f32 %v1804_v26, %v1803_v43  ;;  %v1753_v22 = vadd.f32 %v1752_v37, %v1751_v29 }
 0x18a   :  { %v1817_v6 = vrot.slane %v1816_v36, 4  ;;  %v6106_v4 = vpop.f32.mrf.mxu0 }
 0x18b   :  { %v6089_v62 = vpop.f32.mrf.mxu1  ;;  %v1742_v27 = vadd.f32 %v1741_v31, %v1740_v51  ;;  %v1806_v2 = vrot.slane %v1805_v50, 2  ;;  %v1754_v25 = vrot.slane %v1753_v22, 2 }
 0x18c   :  { %v1818_v61 = vadd.f32 %v1817_v6, %v1816_v36  ;;  %v6120_v35 = vpop.f32.mrf.mxu0 }
 0x18d   :  { %v6093_v53 = vpop.f32.mrf.mxu1  ;;  %v1743_v34 = vrot.slane %v1742_v27, 1  ;;  %v1807_v14 = vadd.f32 %v1806_v2, %v1805_v50  ;;  %v1755_v39 = vadd.f32 %v1754_v25, %v1753_v22 }
 0x18e   :  { %v1819_v59 = vrot.slane %v1818_v61, 2  ;;  %v6137_v55 = vpop.f32.mrf.mxu0 }
 0x18f   :  { %v6095_v49 = vpop.f32.mrf.mxu1  ;;  %v1756_v11 = vrot.slane %v1755_v39, 1  ;;  %v1808_v57 = vrot.slane %v1807_v14, 1  ;;  %v1744_v13 = vadd.f32 %v1743_v34, %v1742_v27 }
 0x190   :  { %v1820_v60 = vadd.f32 %v1819_v59, %v1818_v61  ;;  %v6143_v43 = vpop.f32.mrf.mxu0 }
 0x191   :  { %v6099_v38 = vpop.f32.mrf.mxu1  ;;  %v1757_v21 = vadd.f32 %v1756_v11, %v1755_v39  ;;  %v1809_v58 = vadd.f32 %v1808_v57, %v1807_v14 }
 0x192   :  { %v1821_v17 = vrot.slane %v1820_v60, 1  ;;  %v6147_v29 = vpop.f32.mrf.mxu0 }
 0x193   :  { %v6104_v54 = vpop.f32.mrf.mxu1  ;;  %v1760_v7 = vcombine.low %v1744_v13, %v1757_v21 }
 0x194   :  { %v1822_v33 = vadd.f32 %v1821_v17, %v1820_v60  ;;  %v6149_v0 = vpop.f32.mrf.mxu0 }
 0x195   :  { %v6108_v32 = vpop.f32.mrf.mxu1  ;;  %v1767_v12 = vrot.slane %v1760_v7, %v6102_v10 }
 0x196   :  { %v1825_v1 = vcombine.low %v1809_v58, %v1822_v33  ;;  %v6151_v26 = vpop.f32.mrf.mxu0 }
 0x197   :  { %v6116_v30 = vpop.f32.mrf.mxu1  ;;  %v1774_v28 = vrot.slane %v1767_v12, %v6102_v10 }
 0x198   :  { %v1832_v45 = vrot.slane %v1825_v1, %v6102_v10  ;;  %v6153_v36 = vpop.f32.mrf.mxu0 }
 0x199   :  { %v6122_v19 = vpop.f32.mrf.mxu1  ;;  %1780 = vst.msk [vmem:[%s6315_s4] ss:$2 sm:$0x3] %vm6112_vm0, %v1774_v28 }
 0x19a   :  { %v1839_v56 = vrot.slane %v1832_v45, %v6102_v10  ;;  %v6155_v50 = vpop.f32.mrf.mxu0  ;;  %v2315_v10 = vadd.f32 %v6085_v20, %v6078_v9 }
 0x19b   :  { %v6130_v63 = vpop.f32.mrf.mxu1 }
 0x19c   :  { %3662 = vst.msk [vmem:[%s6315_s4 + $0x1] ss:$2 sm:$0x3] %vm6112_vm0, %v1839_v56  ;;  %v6159_v24 = vpop.f32.mrf.mxu0 }
 0x19d   :  { %v6139_v5 = vpop.f32.mrf.mxu1 }
 0x19e   :  { %v6163_v6 = vpop.f32.mrf.mxu0 }
 0x19f   :  { %v6141_v46 = vpop.f32.mrf.mxu1 }
 0x1a0   :  { %v6167_v2 = vpop.f32.mrf.mxu0 }
 0x1a1   :  { %v6145_v23 = vpop.f32.mrf.mxu1  ;;  %6396 = vst [vmem:[#allocation8_spill] sm:$0xff] %v6167_v2 }
 0x1a2   :  { %6395 = vst [vmem:[#allocation7_spill] sm:$0xff] %v6145_v23 }
 0x1a3   :  { %v2706_v47 = vpop.f32.mrf.mxu1 }
 0x1a5   :  { %v2708_v51 = vpop.f32.mrf.mxu1 }
 0x1a7   :  { %v2710_v37 = vpop.f32.mrf.mxu1 }
 0x1a9   :  { %v2712_v31 = vpop.f32.mrf.mxu1 }
 0x1ab   :  { %v6157_v22 = vpop.f32.mrf.mxu1 }
 0x1ad   :  { %v6161_v52 = vpop.f32.mrf.mxu1 }
 0x1af   :  { %v6165_v27 = vpop.f32.mrf.mxu1 }
 0x1b1   :  { %v6169_v25 = vpop.f32.mrf.mxu1 }
 0x1b2   :  { %6397 = vst [vmem:[#allocation9_spill] sm:$0xff] %v6169_v25 }
 0x1b3   :  { %v6171_v14 = vpop.f32.mrf.mxu1 }
 0x1b4   :  { %6398 = vst [vmem:[#allocation10_spill] sm:$0xff] %v6171_v14 }
 0x1b5   :  { %v6173_v59 = vpop.f32.mrf.mxu1 }
 0x1b6   :  { %6399 = vst [vmem:[#allocation13_spill] sm:$0xff] %v6173_v59  ;;  %v2317_v59 = vadd.f32 %v6091_v8, %v6080_v44 }
 0x1b7   :  { %v6175_v60 = vpop.f32.mrf.mxu1 }
 0x1b8   :  { %6400 = vst [vmem:[#allocation11_spill] sm:$0xff] %v6175_v60 }
 0x1b9   :  { %v6177_v40 = vpop.f32.mrf.mxu1 }
 0x1ba   :  { %6401 = vst [vmem:[#allocation6_spill] sm:$0xff] %v6177_v40 }
 0x1bb   :  { %v6183_v58 = vpop.f32.mrf.mxu1 }
 0x1bc   :  { %6402 = vst [vmem:[#allocation5_spill] sm:$0xff] %v6183_v58 }
 0x1bd   :  { %v6187_v12 = vpop.f32.mrf.mxu1 }
 0x1be   :  { %6403 = vst [vmem:[#allocation15_spill] sm:$0xff] %v6187_v12 }
 0x1bf   :  { %v6193_v28 = vpop.f32.mrf.mxu1 }
 0x1c0   :  { %6404 = vst [vmem:[#allocation16_spill] sm:$0xff] %v6193_v28 }
 0x1c1   :  { %v6203_v58 = vpop.f32.mrf.mxu1 }
 0x1c2   :  { %v2633_v61 = vpop.f32.mrf.mxu0  ;;  %6407 = vst [vmem:[#allocation19_spill] sm:$0xff] %v6203_v58 }
 0x1c3   :  { %v2634_v12 = vadd.f32 %v2633_v61, %v2313_v42 }
 0x1c4   :  { %v2635_v34 = vpop.f32.mrf.mxu0 }
 0x1c5   :  { %v2636_v60 = vadd.f32 %v2635_v34, %v2315_v10  ;;  %v2323_v10 = vadd.f32 %v6106_v4, %v6089_v62  ;;  %v2327_v62 = vadd.f32 %v6137_v55, %v6095_v49  ;;  %v2329_v4 = vadd.f32 %v6143_v43, %v6099_v38 }
 0x1c6   :  { %v2637_v39 = vpop.f32.mrf.mxu0  ;;  %v2337_v49 = vadd.f32 %v6151_v26, %v6116_v30  ;;  %v2339_v38 = vadd.f32 %v6153_v36, %v6122_v19  ;;  %v2343_v55 = vadd.f32 %v6155_v50, %v6130_v63  ;;  %v2345_v63 = vadd.f32 %v6159_v24, %v6139_v5  ;;  %v6409_v24 = vld [vmem:[#allocation9_spill] sm:$0xff] }
 0x1c7   :  { %v2638_v23 = vadd.f32 %v2637_v39, %v2317_v59  ;;  %v2709_v9 = vadd.f32 %v2708_v51, %v2636_v60  ;;  %v2347_v50 = vadd.f32 %v6163_v6, %v6141_v46 }
 0x1c8   :  { %v2639_v41 = vpop.f32.mrf.mxu0 }
 0x1ca   :  { %v2643_v11 = vpop.f32.mrf.mxu0 }
 0x1cb   :  { %v2644_v51 = vadd.f32 %v2643_v11, %v2323_v10 }
 0x1cc   :  { %v2645_v57 = vpop.f32.mrf.mxu0 }
 0x1ce   :  { %v2647_v13 = vpop.f32.mrf.mxu0 }
 0x1d0   :  { %v2649_v21 = vpop.f32.mrf.mxu0 }
 0x1d2   :  { %v6179_v17 = vpop.f32.mrf.mxu0 }
 0x1d4   :  { %v6181_v7 = vpop.f32.mrf.mxu0 }
 0x1d6   :  { %v6185_v33 = vpop.f32.mrf.mxu0 }
 0x1d8   :  { %v6189_v18 = vpop.f32.mrf.mxu0 }
 0x1d9   :  { %v2660_v60 = vadd.f32 %v6189_v18, %v2339_v38 }
 0x1da   :  { %v6191_v1 = vpop.f32.mrf.mxu0 }
 0x1dc   :  { %v6195_v45 = vpop.f32.mrf.mxu0 }
 0x1dd   :  { %6405 = vst [vmem:[#allocation17_spill] sm:$0xff] %v6195_v45  ;;  %v2707_v45 = vadd.f32 %v2706_v47, %v2634_v12  ;;  %v6411_v12 = vld [vmem:[#allocation7_spill] sm:$0xff] }
 0x1de   :  { %v6197_v56 = vpop.f32.mrf.mxu0 }
 0x1df   :  { %6406 = vst [vmem:[#allocation18_spill] sm:$0xff] %v6197_v56  ;;  %v2319_v56 = vadd.f32 %v6097_v15, %v6087_v16  ;;  %v2325_v16 = vadd.f32 %v6120_v35, %v6093_v53  ;;  %v2711_v15 = vadd.f32 %v2710_v37, %v2638_v23  ;;  %v2333_v53 = vadd.f32 %v6147_v29, %v6104_v54 }
 0x1e0   :  { %v6205_v40 = vpop.f32.mrf.mxu0  ;;  %v2335_v35 = vadd.f32 %v6149_v0, %v6108_v32  ;;  %v2717_v32 = vadd.f32 %v6157_v22, %v2644_v51  ;;  %v2648_v0 = vadd.f32 %v2647_v13, %v2327_v62  ;;  %v2658_v22 = vadd.f32 %v6185_v33, %v2337_v49  ;;  %v6417_v51 = vld [vmem:[#allocation5_spill] sm:$0xff] }
 0x1e1   :  { %6408 = vst [vmem:[#allocation12_spill] sm:$0xff] %v6205_v40  ;;  %v2640_v20 = vadd.f32 %v2639_v41, %v2319_v56  ;;  %v2664_v13 = vadd.f32 %v6191_v1, %v2343_v55  ;;  %v6413_v56 = vld [vmem:[#allocation10_spill] sm:$0xff] }
 0x1e2   :  { %v3143_v14 = vpop.f32.mrf.mxu0  ;;  %v2656_v30 = vadd.f32 %v6181_v7, %v2335_v35  ;;  %v2721_v5 = vadd.f32 %v6165_v27, %v2648_v0  ;;  %v6415_v27 = vld [vmem:[#allocation11_spill] sm:$0xff] }
 0x1e3   :  { %v3070_v28 = vpop.f32.mrf.mxu1  ;;  %v2713_v47 = vadd.f32 %v2712_v31, %v2640_v20  ;;  %v2650_v31 = vadd.f32 %v2649_v21, %v2329_v4 }
 0x1e4   :  { %v3144_v2 = vadd.f32 %v3143_v14, %v3070_v28  ;;  %v3145_v3 = vpop.f32.mrf.mxu0  ;;  %v6410_v46 = vld [vmem:[#allocation17_spill] sm:$0xff]  ;;  %v6412_v28 = vld [vmem:[#allocation8_spill] sm:$0xff] }
 0x1e5   :  { %v3072_v48 = vpop.f32.mrf.mxu1  ;;  %v2666_v6 = vadd.f32 %v6410_v46, %v2345_v63 }
 0x1e6   :  { %v3146_v58 = vadd.f32 %v3145_v3, %v3072_v48  ;;  %v3147_v40 = vpop.f32.mrf.mxu0  ;;  %v6213_v42 = vadd.f32 %v3144_v2, %v2707_v45  ;;  %v2646_v2 = vadd.f32 %v2645_v57, %v2325_v16  ;;  %v2654_v57 = vadd.f32 %v6179_v17, %v2333_v53  ;;  %v6414_v3 = vld [vmem:[#allocation13_spill] sm:$0xff] }
 0x1e7   :  { %v3074_v25 = vpop.f32.mrf.mxu1  ;;  %v2349_v45 = vadd.f32 %v6412_v28, %v6411_v12  ;;  %v2729_v18 = vadd.f32 %v6414_v3, %v2656_v30  ;;  %v6422_v12 = vld [vmem:[#allocation19_spill] sm:$0xff] }
 0x1e8   :  { %v6215_v44 = vadd.f32 %v3146_v58, %v2709_v9  ;;  %v3148_v8 = vadd.f32 %v3147_v40, %v3074_v25  ;;  %v3149_v34 = vpop.f32.mrf.mxu0  ;;  %v2719_v11 = vadd.f32 %v6161_v52, %v2646_v2  ;;  %v2723_v58 = vadd.f32 %v6409_v24, %v2650_v31  ;;  %v6418_v2 = vld [vmem:[#allocation15_spill] sm:$0xff]  ;;  %v6420_v0 = vld [vmem:[#allocation12_spill] sm:$0xff] }
 0x1e9   :  { %v3076_v61 = vpop.f32.mrf.mxu1  ;;  %v2727_v48 = vadd.f32 %v6413_v56, %v2654_v57  ;;  %v3316_v35 = vmul.f32 %v6213_v42, %v6213_v42  ;;  %v2670_v31 = vadd.f32 %v6420_v0, %v2349_v45 }
 0x1ea   :  { %v4014_v14 = vpack.c.bf16 %v6215_v44, %v6213_v42  ;;  %v3150_v39 = vadd.f32 %v3149_v34, %v3076_v61  ;;  %v3153_v41 = vpop.f32.mrf.mxu0  ;;  %v3184_v23 = vadd.f32 %v3148_v8, %v2711_v15  ;;  %v2731_v61 = vadd.f32 %v6415_v27, %v2658_v22  ;;  %v6416_v34 = vld [vmem:[#allocation6_spill] sm:$0xff] }
 0x1eb   :  { %v3080_v25 = vpop.f32.mrf.mxu1  ;;  %v3317_v38 = vmul.f32 %v6215_v44, %v6215_v44  ;;  %v2743_v28 = vadd.f32 %v6422_v12, %v2670_v31 }
 0x1ec   :  { %3262 = vst [vmem:[%s6314_s3 + $0x8] sm:$0xff] %v4014_v14  ;;  %v6232_v37 = vadd.f32 %v3150_v39, %v2713_v47  ;;  %v3154_v54 = vadd.f32 %v3153_v41, %v3080_v25  ;;  %v3155_v29 = vpop.f32.mrf.mxu0  ;;  %v3318_v10 = vmul.f32 %v3184_v23, %v3184_v23  ;;  %v2733_v47 = vadd.f32 %v6416_v34, %v2660_v60  ;;  %v6419_v41 = vld [vmem:[#allocation18_spill] sm:$0xff] }
 0x1ed   :  { %v3082_v43 = vpop.f32.mrf.mxu1  ;;  %v2737_v14 = vadd.f32 %v6417_v51, %v2664_v13  ;;  %v2739_v25 = vadd.f32 %v6418_v2, %v2666_v6  ;;  %v2668_v53 = vadd.f32 %v6419_v41, %v2347_v50 }
 0x1ee   :  { %v4015_v59 = vpack.c.bf16 %v6232_v37, %v3184_v23  ;;  %v3156_v26 = vadd.f32 %v3155_v29, %v3082_v43  ;;  %v3157_v36 = vpop.f32.mrf.mxu0  ;;  %v3186_v21 = vadd.f32 %v3154_v54, %v2717_v32  ;;  %v3319_v39 = vmul.f32 %v6232_v37, %v6232_v37 }
 0x1ef   :  { %v3084_v19 = vpop.f32.mrf.mxu1  ;;  %v3283_v30 = vadd.f32 %v6232_v37, %v6215_v44  ;;  %v6421_v44 = vld [vmem:[#allocation16_spill] sm:$0xff] }
 0x1f0   :  { %3263 = vst [vmem:[%s6314_s3 + $0x18] sm:$0xff] %v4015_v59  ;;  %v3158_v52 = vadd.f32 %v3157_v36, %v3084_v19  ;;  %v3187_v40 = vadd.f32 %v3156_v26, %v2719_v11  ;;  %v3159_v7 = vpop.f32.mrf.mxu0  ;;  %v3320_v55 = vmul.f32 %v3186_v21, %v3186_v21  ;;  %v3270_v59 = vadd.f32 %v3184_v23, %v6213_v42 }
 0x1f1   :  { %v3086_v17 = vpop.f32.mrf.mxu1  ;;  %v3332_v11 = vadd.f32 %v3318_v10, %v3316_v35  ;;  %v3345_v26 = vadd.f32 %v3319_v39, %v3317_v38  ;;  %v2741_v37 = vadd.f32 %v6421_v44, %v2668_v53 }
 0x1f2   :  { %v3160_v33 = vadd.f32 %v3159_v7, %v3086_v17  ;;  %v4016_v9 = vpack.c.bf16 %v3187_v40, %v3186_v21  ;;  %v3163_v20 = vpop.f32.mrf.mxu0  ;;  %v3188_v8 = vadd.f32 %v3158_v52, %v2721_v5  ;;  %v3271_v22 = vadd.f32 %v3270_v59, %v3186_v21 }
 0x1f3   :  { %v3090_v1 = vpop.f32.mrf.mxu1  ;;  %v3321_v52 = vmul.f32 %v3187_v40, %v3187_v40  ;;  %v3333_v17 = vadd.f32 %v3332_v11, %v3320_v55  ;;  %v3284_v42 = vadd.f32 %v3283_v30, %v3187_v40 }
 0x1f4   :  { %v3189_v16 = vadd.f32 %v3160_v33, %v2723_v58  ;;  %v3164_v15 = vadd.f32 %v3163_v20, %v3090_v1  ;;  %3264 = vst [vmem:[%s6314_s3 + $0x28] sm:$0xff] %v4016_v9  ;;  %v3165_v4 = vpop.f32.mrf.mxu0  ;;  %v3322_v19 = vmul.f32 %v3188_v8, %v3188_v8  ;;  %v3272_v58 = vadd.f32 %v3271_v22, %v3188_v8 }
 0x1f5   :  { %v3092_v62 = vpop.f32.mrf.mxu1 }
 0x1f6   :  { %v4017_v49 = vpack.c.bf16 %v3189_v16, %v3188_v8  ;;  %v3190_v54 = vadd.f32 %v3164_v15, %v2727_v48  ;;  %v3166_v43 = vadd.f32 %v3165_v4, %v3092_v62  ;;  %v3167_v32 = vpop.f32.mrf.mxu0  ;;  %v3323_v46 = vmul.f32 %v3189_v16, %v3189_v16 }
 0x1f7   :  { %v3094_v29 = vpop.f32.mrf.mxu1  ;;  %v3334_v45 = vadd.f32 %v3333_v17, %v3322_v19  ;;  %v3346_v48 = vadd.f32 %v3345_v26, %v3321_v52  ;;  %v3285_v3 = vadd.f32 %v3284_v42, %v3189_v16 }
 0x1f8   :  { %3265 = vst [vmem:[%s6314_s3 + $0x38] sm:$0xff] %v4017_v49  ;;  %v3168_v57 = vadd.f32 %v3167_v32, %v3094_v29  ;;  %v3191_v36 = vadd.f32 %v3166_v43, %v2729_v18  ;;  %v3169_v50 = vpop.f32.mrf.mxu0  ;;  %v3324_v23 = vmul.f32 %v3190_v54, %v3190_v54  ;;  %v3273_v18 = vadd.f32 %v3272_v58, %v3190_v54 }
 0x1f9   :  { %v3096_v63 = vpop.f32.mrf.mxu1 }
 0x1fa   :  { %v3192_v60 = vadd.f32 %v3168_v57, %v2731_v61  ;;  %v3170_v13 = vadd.f32 %v3169_v50, %v3096_v63  ;;  %v4018_v7 = vpack.c.bf16 %v3191_v36, %v3190_v54  ;;  %v3173_v24 = vpop.f32.mrf.mxu0  ;;  %v3335_v1 = vadd.f32 %v3334_v45, %v3324_v23 }
 0x1fb   :  { %v3100_v5 = vpop.f32.mrf.mxu1  ;;  %v3325_v20 = vmul.f32 %v3191_v36, %v3191_v36  ;;  %v3347_v61 = vadd.f32 %v3346_v48, %v3323_v46  ;;  %v3286_v34 = vadd.f32 %v3285_v3, %v3191_v36  ;;  %v6423_v48 = vld [vmem:[#allocation4_spill] sm:$0xff] }
 0x1fc   :  { %v3193_v6 = vadd.f32 %v3170_v13, %v2733_v47  ;;  %v3174_v33 = vadd.f32 %v3173_v24, %v3100_v5  ;;  %3266 = vst [vmem:[%s6314_s3 + $0x48] sm:$0xff] %v4018_v7  ;;  %v3326_v21 = vmul.f32 %v3192_v60, %v3192_v60  ;;  %v3175_v40 = vpop.f32.mrf.mxu0  ;;  %v3274_v47 = vadd.f32 %v3273_v18, %v3192_v60 }
 0x1fd   :  { %v3102_v56 = vpop.f32.mrf.mxu1  ;;  %v3348_v38 = vadd.f32 %v3347_v61, %v3325_v20 }
 0x1fe   :  { %v4019_v9 = vpack.c.bf16 %v3193_v6, %v3192_v60  ;;  %v3194_v10 = vadd.f32 %v3174_v33, %v2737_v14  ;;  %v3176_v8 = vadd.f32 %v3175_v40, %v3102_v56  ;;  %v3177_v27 = vpop.f32.mrf.mxu0  ;;  %v3336_v39 = vadd.f32 %v3335_v1, %v3326_v21 }
 0x1ff   :  { %v3104_v15 = vpop.f32.mrf.mxu1  ;;  %v3327_v62 = vmul.f32 %v3193_v6, %v3193_v6  ;;  %v3287_v53 = vadd.f32 %v3286_v34, %v3193_v6 }
 0x200   :  { %3267 = vst [vmem:[%s6314_s3 + $0x58] sm:$0xff] %v4019_v9  ;;  %v3178_v51 = vadd.f32 %v3177_v27, %v3104_v15  ;;  %v3328_v4 = vmul.f32 %v3194_v10, %v3194_v10  ;;  %v3195_v16 = vadd.f32 %v3176_v8, %v2739_v25  ;;  %v3179_v41 = vpop.f32.mrf.mxu0  ;;  %v3275_v35 = vadd.f32 %v3274_v47, %v3194_v10 }
 0x201   :  { %v3106_v2 = vpop.f32.mrf.mxu1  ;;  %v3349_v59 = vadd.f32 %v3348_v38, %v3327_v62 }
 0x202   :  { %v3196_v14 = vadd.f32 %v3178_v51, %v2741_v37  ;;  %v3180_v49 = vadd.f32 %v3179_v41, %v3106_v2  ;;  %v3337_v55 = vadd.f32 %v3336_v39, %v3328_v4  ;;  %v4020_v54 = vpack.c.bf16 %v3195_v16, %v3194_v10 }
 0x203   :  { %v3329_v43 = vmul.f32 %v3195_v16, %v3195_v16  ;;  %v3288_v29 = vadd.f32 %v3287_v53, %v3195_v16 }
 0x204   :  { %v3276_v32 = vadd.f32 %v3275_v35, %v3196_v14  ;;  %v3330_v0 = vmul.f32 %v3196_v14, %v3196_v14  ;;  %v3197_v31 = vadd.f32 %v3180_v49, %v2743_v28  ;;  %3268 = vst [vmem:[%s6314_s3 + $0x68] sm:$0xff] %v4020_v54 }
 0x205   :  { %v3350_v26 = vadd.f32 %v3349_v59, %v3329_v43 }
 0x206   :  { %v3277_v25 = vrot.slane %v3276_v32, 4  ;;  %v3338_v11 = vadd.f32 %v3337_v55, %v3330_v0  ;;  %v4021_v57 = vpack.c.bf16 %v3197_v31, %v3196_v14  ;;  %v3289_v30 = vadd.f32 %v3288_v29, %v3197_v31 }
 0x207   :  { %v3331_v19 = vmul.f32 %v3197_v31, %v3197_v31 }
 0x208   :  { %v3278_v36 = vadd.f32 %v3277_v25, %v3276_v32  ;;  %v3339_v63 = vrot.slane %v3338_v11, 4  ;;  %3269 = vst [vmem:[%s6314_s3 + $0x78] sm:$0xff] %v4021_v57  ;;  %v3290_v50 = vrot.slane %v3289_v30, 4 }
 0x209   :  { %v3351_v22 = vadd.f32 %v3350_v26, %v3331_v19 }
 0x20a   :  { %v3279_v52 = vrot.slane %v3278_v36, 2  ;;  %v3340_v60 = vadd.f32 %v3339_v63, %v3338_v11  ;;  %v3291_v13 = vadd.f32 %v3290_v50, %v3289_v30 }
 0x20b   :  { %v3352_v17 = vrot.slane %v3351_v22, 4 }
 0x20c   :  { %v3280_v42 = vadd.f32 %v3279_v52, %v3278_v36  ;;  %v3341_v23 = vrot.slane %v3340_v60, 2  ;;  %v3292_v7 = vrot.slane %v3291_v13, 2 }
 0x20d   :  { %v3353_v5 = vadd.f32 %v3352_v17, %v3351_v22 }
 0x20e   :  { %v3281_v24 = vrot.slane %v3280_v42, 1  ;;  %v3342_v58 = vadd.f32 %v3341_v23, %v3340_v60  ;;  %v3293_v46 = vadd.f32 %v3292_v7, %v3291_v13 }
 0x20f   :  { %v3354_v6 = vrot.slane %v3353_v5, 2 }
 0x210   :  { %v3294_v33 = vrot.slane %v3293_v46, 1  ;;  %v3343_v44 = vrot.slane %v3342_v58, 1  ;;  %v3282_v12 = vadd.f32 %v3281_v24, %v3280_v42 }
 0x211   :  { %v3355_v37 = vadd.f32 %v3354_v6, %v3353_v5 }
 0x212   :  { %v3295_v28 = vadd.f32 %v3294_v33, %v3293_v46  ;;  %v3344_v56 = vadd.f32 %v3343_v44, %v3342_v58 }
 0x213   :  { %v3356_v45 = vrot.slane %v3355_v37, 1 }
 0x214   :  { %v3298_v21 = vcombine.low %v3282_v12, %v3295_v28 }
 0x215   :  { %v3357_v40 = vadd.f32 %v3356_v45, %v3355_v37 }
 0x216   :  { %v3305_v3 = vrot.slane %v3298_v21, %v6423_v48 }
 0x217   :  { %v3360_v18 = vcombine.low %v3344_v56, %v3357_v40 }
 0x218   :  { %v3312_v9 = vrot.slane %v3305_v3, %v6423_v48 }
 0x219   :  { %v3367_v1 = vrot.slane %v3360_v18, %v6423_v48 }
 0x21a   :  { %3968 = vst.msk [vmem:[%s6315_s4 + $0x4] ss:$2 sm:$0x3] %vm6112_vm0, %v3312_v9 }
 0x21b   :  { %v3374_v10 = vrot.slane %v3367_v1, %v6423_v48 }
 0x21d   :  { %3969 = vst.msk [vmem:[%s6315_s4 + $0x5] ss:$2 sm:$0x3] %vm6112_vm0, %v3374_v10 }

</bundles_post_ra>
